<compile_context>
chip_gen: v7x
topology: tpu7x:2x2x1
jax: 0.10.0
libtpu: 0.0.40
codegen_flags: <defaults>
</compile_context>

<pallas_src>
import functools

import jax
import jax.numpy as jnp
from jax.experimental import pallas as pl
from jax.experimental.pallas import tpu as pltpu


def _round_up(x, m):
    return (x + m - 1) // m * m


# ----------------------------------------------------------------------------
# Pallas kernels
# ----------------------------------------------------------------------------
def _matmul_epilogue_kernel(*refs, relu, has_scale):
    """o = maybe_relu((x @ w) [* scale] + shift); whole arrays as single blocks."""
    if has_scale:
        x_ref, w_ref, s_ref, b_ref, o_ref = refs
    else:
        x_ref, w_ref, b_ref, o_ref = refs
        s_ref = None
    y = jnp.dot(x_ref[...], w_ref[...], preferred_element_type=jnp.float32)
    if s_ref is not None:
        y = y * s_ref[...]
    y = y + b_ref[...]
    if relu:
        y = jnp.maximum(y, 0.0)
    o_ref[...] = y.astype(o_ref.dtype)


def matmul_scale_shift(x, w, shift, scale, *, relu, out_dtype):
    """x:(M,K) @ w:(K,N) with fused per-column scale/shift (+ReLU)."""
    M = x.shape[0]
    N = w.shape[1]
    kernel = functools.partial(_matmul_epilogue_kernel, relu=relu,
                               has_scale=scale is not None)
    args = (x, w) + ((scale,) if scale is not None else ()) + (shift,)
    return pl.pallas_call(
        kernel,
        out_shape=jax.ShapeDtypeStruct((M, N), out_dtype),
    )(*args)


def _maxpool_kernel(x_ref, o_ref, *, c):
    """x_ref: (N*Ho, 2, Wo, 2*C) -> o_ref: (N*Ho, Wo, C), max over the 2x2 window."""
    x = x_ref[...]
    a = jnp.maximum(x[:, 0], x[:, 1])            # max over h-parity  -> (NHo, Wo, 2C)
    o_ref[...] = jnp.maximum(a[..., :c], a[..., c:])   # max over w-parity


def maxpool2x2(y_mat, n, h, w, c):
    """2x2/stride-2 max pool on a conv output stored as (N*H*W, C) rows in
    (n, h, w) order.  The (N*Ho, 2, Wo, 2*C) regrouping is a free HBM reshape."""
    ho, wo = h // 2, w // 2
    x = y_mat.reshape(n * ho, 2, wo, 2 * c)
    out = pl.pallas_call(
        functools.partial(_maxpool_kernel, c=c),
        out_shape=jax.ShapeDtypeStruct((n * ho, wo, c), y_mat.dtype),
    )(x)
    return out.reshape(n, ho, wo, c)


def _fc_fused_kernel(x_ref, w1_ref, b1_ref, w2_ref, b2_ref, w3_ref, b3_ref,
                     o_ref, acc_ref):
    """fc1 (K-grid accumulation) -> relu -> fc2 -> relu -> fc3, all in one call."""
    k = pl.program_id(0)

    @pl.when(k == 0)
    def _():
        acc_ref[...] = jnp.zeros_like(acc_ref)

    acc_ref[...] += jnp.dot(x_ref[...], w1_ref[...],
                            preferred_element_type=jnp.float32)

    @pl.when(k == pl.num_programs(0) - 1)
    def _():
        h1 = jnp.maximum(acc_ref[...] + b1_ref[...], 0.0).astype(jnp.bfloat16)
        h2 = jnp.dot(h1, w2_ref[...], preferred_element_type=jnp.float32)
        h2 = jnp.maximum(h2 + b2_ref[...], 0.0).astype(jnp.bfloat16)
        y = jnp.dot(h2, w3_ref[...], preferred_element_type=jnp.float32)
        o_ref[...] = (y + b3_ref[...]).astype(o_ref.dtype)


def fc_head(x2, w1, b1, w2, b2, w3, b3, *, tk=1024):
    """Fused fc1->relu->fc2->relu->fc3.  x2:(M,K) bf16, weights (K,N) bf16."""
    M, K = x2.shape
    N1, N2, N3 = w1.shape[1], w2.shape[1], w3.shape[1]
    assert K % tk == 0
    return pl.pallas_call(
        _fc_fused_kernel,
        out_shape=jax.ShapeDtypeStruct((M, N3), jnp.float32),
        grid_spec=pltpu.PrefetchScalarGridSpec(
            num_scalar_prefetch=0,
            grid=(K // tk,),
            in_specs=[
                pl.BlockSpec((M, tk), lambda k: (0, k)),      # x   (streamed over K)
                pl.BlockSpec((tk, N1), lambda k: (k, 0)),     # w1  (streamed over K)
                pl.BlockSpec((1, N1), lambda k: (0, 0)),      # b1
                pl.BlockSpec((N1, N2), lambda k: (0, 0)),     # w2  (resident)
                pl.BlockSpec((1, N2), lambda k: (0, 0)),      # b2
                pl.BlockSpec((N2, N3), lambda k: (0, 0)),     # w3  (resident)
                pl.BlockSpec((1, N3), lambda k: (0, 0)),      # b3
            ],
            out_specs=pl.BlockSpec((M, N3), lambda k: (0, 0)),
            scratch_shapes=[pltpu.VMEM((M, N1), jnp.float32)],
        ),
        compiler_params=pltpu.CompilerParams(
            dimension_semantics=("arbitrary",)),
    )(x2, w1, b1, w2, b2, w3, b3)


# ----------------------------------------------------------------------------
# Glue: im2col, conv block, parameter packing, full forward
# ----------------------------------------------------------------------------
def im2col_3x3(x_nhwc, k_pad):
    """3x3 same-padding patch extraction (bf16); column order = (kh, kw, cin),
    zero-padded along K to k_pad (multiple of 128)."""
    N, H, W, C = x_nhwc.shape
    xp = jnp.pad(x_nhwc, ((0, 0), (1, 1), (1, 1), (0, 0)))
    patches = [xp[:, di:di + H, dj:dj + W, :]
               for di in range(3) for dj in range(3)]
    cols = jnp.concatenate(patches, axis=-1).reshape(N * H * W, 9 * C)
    if k_pad > 9 * C:
        cols = jnp.pad(cols, ((0, 0), (0, k_pad - 9 * C)))
    return cols.astype(jnp.bfloat16)


def conv3x3_bn_relu(x_nhwc, w_packed, shift, scale, *, pool):
    """Conv3x3 (+ folded BN) + ReLU; optionally followed by the Pallas 2x2 pool.
    Returns NHWC if pooled, else the (N*H*W, Cout) matrix (rows in n,h,w order)."""
    N, H, W, _ = x_nhwc.shape
    Cout = w_packed.shape[1]
    cols = im2col_3x3(x_nhwc, w_packed.shape[0])
    y = matmul_scale_shift(cols, w_packed, shift, scale,
                           relu=True, out_dtype=jnp.bfloat16)
    if pool:
        return maxpool2x2(y, N, H, W, Cout)
    return y


def pack_conv_w(w_oihw):
    """PyTorch (Cout, Cin, 3, 3) -> (K_pad, Cout) bf16 with K rows = (kh, kw, cin)."""
    Cout, Cin = w_oihw.shape[0], w_oihw.shape[1]
    wm = jnp.transpose(w_oihw, (2, 3, 1, 0)).reshape(9 * Cin, Cout)
    k_pad = _round_up(9 * Cin, 128)
    wm = jnp.pad(wm, ((0, k_pad - 9 * Cin), (0, 0)))
    return wm.astype(jnp.bfloat16)


def pack_params(p, eps=1e-5):
    """One-time packing: bf16 weights, folded BN scale/shift, fc weights in (K,N)
    with fc1 rows permuted to NHWC flatten order."""
    def fold(bias, bn):
        scale = bn["gamma"] / jnp.sqrt(bn["var"] + eps)
        shift = (bias - bn["mean"]) * scale + bn["beta"]
        return (scale.reshape(1, -1).astype(jnp.float32),
                shift.reshape(1, -1).astype(jnp.float32))

    q = {}
    q["conv1_w"] = pack_conv_w(p["conv1_w"])
    q["conv1_scale"], q["conv1_shift"] = fold(p["conv1_b"], p["bn1"])
    q["conv2_w"] = pack_conv_w(p["conv2_w"])
    q["conv2_scale"] = None
    q["conv2_shift"] = p["conv2_b"].reshape(1, -1).astype(jnp.float32)
    q["conv3_w"] = pack_conv_w(p["conv3_w"])
    q["conv3_scale"], q["conv3_shift"] = fold(p["conv3_b"], p["bn2"])
    q["conv4_w"] = pack_conv_w(p["conv4_w"])
    q["conv4_scale"], q["conv4_shift"] = fold(p["conv4_b"], p["bn3"])

    # fc1: PyTorch weight (1024, 4096) expects NCHW flatten (c, h, w).
    # Repack rows to NHWC flatten order (h, w, c) and transpose to (K, N).
    w1 = p["fc1_w"].reshape(1024, 256, 4, 4)                     # (out, c, h, w)
    w1 = jnp.transpose(w1, (2, 3, 1, 0)).reshape(4096, 1024)     # (h, w, c) x out
    q["fc1_w"] = w1.astype(jnp.bfloat16)
    q["fc1_b"] = p["fc1_b"].reshape(1, -1).astype(jnp.float32)
    q["fc2_w"] = p["fc2_w"].T.astype(jnp.bfloat16)
    q["fc2_b"] = p["fc2_b"].reshape(1, -1).astype(jnp.float32)
    q["fc3_w"] = p["fc3_w"].T.astype(jnp.bfloat16)
    q["fc3_b"] = p["fc3_b"].reshape(1, -1).astype(jnp.float32)
    return q


def init_params(key):
    def nrm(k, shape, s=0.05):
        return s * jax.random.normal(k, shape, dtype=jnp.float32)

    ks = jax.random.split(key, 14)
    p = {}
    p["conv1_w"] = nrm(ks[0], (32, 3, 3, 3));    p["conv1_b"] = nrm(ks[1], (32,))
    p["conv2_w"] = nrm(ks[2], (64, 32, 3, 3));   p["conv2_b"] = nrm(ks[3], (64,))
    p["conv3_w"] = nrm(ks[4], (128, 64, 3, 3));  p["conv3_b"] = nrm(ks[5], (128,))
    p["conv4_w"] = nrm(ks[6], (256, 128, 3, 3)); p["conv4_b"] = nrm(ks[7], (256,))
    # conv5 is defined in __init__ but never used in forward -> not materialized.
    for name, c in (("bn1", 32), ("bn2", 128), ("bn3", 256)):
        p[name] = dict(gamma=jnp.ones((c,), jnp.float32),
                       beta=jnp.zeros((c,), jnp.float32),
                       mean=jnp.zeros((c,), jnp.float32),
                       var=jnp.ones((c,), jnp.float32))
    p["fc1_w"] = nrm(ks[8], (1024, 4096));  p["fc1_b"] = nrm(ks[9], (1024,))
    p["fc2_w"] = nrm(ks[10], (512, 1024));  p["fc2_b"] = nrm(ks[11], (512,))
    p["fc3_w"] = nrm(ks[12], (10, 512));    p["fc3_b"] = nrm(ks[13], (10,))
    return p


def forward(packed, x_nchw):
    # NCHW (PyTorch) -> NHWC bf16 for the conv kernels.
    x = jnp.transpose(x_nchw, (0, 2, 3, 1)).astype(jnp.bfloat16)
    N = x.shape[0]

    x = conv3x3_bn_relu(x, packed["conv1_w"], packed["conv1_shift"],
                        packed["conv1_scale"], pool=True)        # (N,16,16,32)
    x = conv3x3_bn_relu(x, packed["conv2_w"], packed["conv2_shift"],
                        packed["conv2_scale"], pool=True)        # (N,8,8,64)
    x = conv3x3_bn_relu(x, packed["conv3_w"], packed["conv3_shift"],
                        packed["conv3_scale"], pool=True)        # (N,4,4,128)
    # TODO(synk): dropout1 (p=0.05) is identity in eval mode, so it is omitted.

    y = conv3x3_bn_relu(x, packed["conv4_w"], packed["conv4_shift"],
                        packed["conv4_scale"], pool=False)       # (N*4*4, 256)

    # NHWC flatten (fc1 weight rows were permuted to match PyTorch's NCHW view).
    x2 = y.reshape(N, 4 * 4 * 256)
    # TODO(synk): dropout2 (p=0.1) is identity in eval mode, so it is omitted.

    return fc_head(x2,
                   packed["fc1_w"], packed["fc1_b"],
                   packed["fc2_w"], packed["fc2_b"],
                   packed["fc3_w"], packed["fc3_b"])             # (N, 10) f32


if __name__ == "__main__":
    key = jax.random.PRNGKey(0)
    pkey, xkey = jax.random.split(key)
    params = init_params(pkey)
    packed = pack_params(params)           # one-time weight packing (outside forward)
    # Forward implies 32x32 spatial input (flatten expects 256*4*4 = 4096).
    x = jax.random.normal(xkey, (2, 3, 32, 32), dtype=jnp.float32)
    fwd = jax.jit(forward)
    out = fwd(packed, x)
    out = jax.block_until_ready(out)
    assert out.shape == (2, 10) and out.dtype == jnp.float32
    print("KERNEL_OK")
</pallas_src>

<mosaic_0001>
module attributes {stable_mosaic.version = 11 : i64} {
  func.func @_matmul_epilogue_kernel(%arg0: memref<2048x128xbf16, #tpu.memory_space<vmem>>, %arg1: memref<128x32xbf16, #tpu.memory_space<vmem>>, %arg2: memref<1x32xf32, #tpu.memory_space<vmem>>, %arg3: memref<1x32xf32, #tpu.memory_space<vmem>>, %arg4: memref<2048x32xbf16, #tpu.memory_space<vmem>>) attributes {dimension_semantics = [], scalar_prefetch = 0 : i64, scratch_operands = 0 : i64, tpu.core_type = #tpu.core_type<tc>} {
    %c0 = arith.constant 0 : index
    %c0_0 = arith.constant 0 : index
    %0 = vector.load %arg0[%c0, %c0_0] : memref<2048x128xbf16, #tpu.memory_space<vmem>>, vector<2048x128xbf16>
    %c0_1 = arith.constant 0 : index
    %c0_2 = arith.constant 0 : index
    %1 = vector.load %arg1[%c0_1, %c0_2] : memref<128x32xbf16, #tpu.memory_space<vmem>>, vector<128x32xbf16>
    %cst = arith.constant dense<0.000000e+00> : vector<2048x32xf32>
    %2 = tpu.matmul %0, %1, %cst {dimension_numbers = #tpu.dot_dimension_numbers<[1], [0], [0], [1], [0, 0, 1, 1], [], []>} : vector<2048x128xbf16>, vector<128x32xbf16>, vector<2048x32xf32> -> vector<2048x32xf32>
    %c0_3 = arith.constant 0 : index
    %c0_4 = arith.constant 0 : index
    %3 = vector.load %arg2[%c0_3, %c0_4] : memref<1x32xf32, #tpu.memory_space<vmem>>, vector<1x32xf32>
    %4 = vector.broadcast %3 : vector<1x32xf32> to vector<2048x32xf32>
    %5 = arith.mulf %2, %4 : vector<2048x32xf32>
    %c0_5 = arith.constant 0 : index
    %c0_6 = arith.constant 0 : index
    %6 = vector.load %arg3[%c0_5, %c0_6] : memref<1x32xf32, #tpu.memory_space<vmem>>, vector<1x32xf32>
    %7 = vector.broadcast %6 : vector<1x32xf32> to vector<2048x32xf32>
    %8 = arith.addf %5, %7 : vector<2048x32xf32>
    %cst_7 = arith.constant 0.000000e+00 : f32
    %9 = vector.broadcast %cst_7 : f32 to vector<2048x32xf32>
    %10 = arith.maximumf %8, %9 : vector<2048x32xf32>
    %11 = arith.truncf %10 : vector<2048x32xf32> to vector<2048x32xbf16>
    %c0_8 = arith.constant 0 : index
    %c0_9 = arith.constant 0 : index
    %12 = vector.load %arg4[%c0_8, %c0_9] : memref<2048x32xbf16, #tpu.memory_space<vmem>>, vector<2048x32xbf16>
    tpu.vector_store %arg4[%c0_8, %c0_9], %11 {strides = array<i32>} : memref<2048x32xbf16, #tpu.memory_space<vmem>>, vector<2048x32xbf16>,
    return
  }
}

module attributes {stable_mosaic.version = 11 : i64} {
  func.func @_maxpool_kernel(%arg0: memref<32x2x16x64xbf16, #tpu.memory_space<vmem>>, %arg1: memref<32x16x32xbf16, #tpu.memory_space<vmem>>) attributes {dimension_semantics = [], scalar_prefetch = 0 : i64, scratch_operands = 0 : i64, tpu.core_type = #tpu.core_type<tc>} {
    %c0 = arith.constant 0 : index
    %c0_0 = arith.constant 0 : index
    %c0_1 = arith.constant 0 : index
    %c0_2 = arith.constant 0 : index
    %0 = vector.load %arg0[%c0, %c0_0, %c0_1, %c0_2] : memref<32x2x16x64xbf16, #tpu.memory_space<vmem>>, vector<32x2x16x64xbf16>
    %1 = vector.extract_strided_slice %0 {offsets = [0, 0, 0, 0], sizes = [32, 1, 16, 64], strides = [1, 1, 1, 1]} : vector<32x2x16x64xbf16> to vector<32x1x16x64xbf16>
    %2 = vector.shape_cast %1 : vector<32x1x16x64xbf16> to vector<32x16x64xbf16>
    %3 = vector.extract_strided_slice %0 {offsets = [0, 1, 0, 0], sizes = [32, 1, 16, 64], strides = [1, 1, 1, 1]} : vector<32x2x16x64xbf16> to vector<32x1x16x64xbf16>
    %4 = vector.shape_cast %3 : vector<32x1x16x64xbf16> to vector<32x16x64xbf16>
    %5 = arith.maximumf %2, %4 : vector<32x16x64xbf16>
    %6 = vector.extract_strided_slice %5 {offsets = [0, 0, 0], sizes = [32, 16, 32], strides = [1, 1, 1]} : vector<32x16x64xbf16> to vector<32x16x32xbf16>
    %7 = vector.extract_strided_slice %5 {offsets = [0, 0, 32], sizes = [32, 16, 32], strides = [1, 1, 1]} : vector<32x16x64xbf16> to vector<32x16x32xbf16>
    %8 = arith.maximumf %6, %7 : vector<32x16x32xbf16>
    %c0_3 = arith.constant 0 : index
    %c0_4 = arith.constant 0 : index
    %c0_5 = arith.constant 0 : index
    %9 = vector.load %arg1[%c0_3, %c0_4, %c0_5] : memref<32x16x32xbf16, #tpu.memory_space<vmem>>, vector<32x16x32xbf16>
    tpu.vector_store %arg1[%c0_3, %c0_4, %c0_5], %8 {strides = array<i32>} : memref<32x16x32xbf16, #tpu.memory_space<vmem>>, vector<32x16x32xbf16>,
    return
  }
}

module attributes {stable_mosaic.version = 11 : i64} {
  func.func @_matmul_epilogue_kernel(%arg0: memref<512x384xbf16, #tpu.memory_space<vmem>>, %arg1: memref<384x64xbf16, #tpu.memory_space<vmem>>, %arg2: memref<1x64xf32, #tpu.memory_space<vmem>>, %arg3: memref<512x64xbf16, #tpu.memory_space<vmem>>) attributes {dimension_semantics = [], scalar_prefetch = 0 : i64, scratch_operands = 0 : i64, tpu.core_type = #tpu.core_type<tc>} {
    %c0 = arith.constant 0 : index
    %c0_0 = arith.constant 0 : index
    %0 = vector.load %arg0[%c0, %c0_0] : memref<512x384xbf16, #tpu.memory_space<vmem>>, vector<512x384xbf16>
    %c0_1 = arith.constant 0 : index
    %c0_2 = arith.constant 0 : index
    %1 = vector.load %arg1[%c0_1, %c0_2] : memref<384x64xbf16, #tpu.memory_space<vmem>>, vector<384x64xbf16>
    %cst = arith.constant dense<0.000000e+00> : vector<512x64xf32>
    %2 = tpu.matmul %0, %1, %cst {dimension_numbers = #tpu.dot_dimension_numbers<[1], [0], [0], [1], [0, 0, 1, 1], [], []>} : vector<512x384xbf16>, vector<384x64xbf16>, vector<512x64xf32> -> vector<512x64xf32>
    %c0_3 = arith.constant 0 : index
    %c0_4 = arith.constant 0 : index
    %3 = vector.load %arg2[%c0_3, %c0_4] : memref<1x64xf32, #tpu.memory_space<vmem>>, vector<1x64xf32>
    %4 = vector.broadcast %3 : vector<1x64xf32> to vector<512x64xf32>
    %5 = arith.addf %2, %4 : vector<512x64xf32>
    %cst_5 = arith.constant 0.000000e+00 : f32
    %6 = vector.broadcast %cst_5 : f32 to vector<512x64xf32>
    %7 = arith.maximumf %5, %6 : vector<512x64xf32>
    %8 = arith.truncf %7 : vector<512x64xf32> to vector<512x64xbf16>
    %c0_6 = arith.constant 0 : index
    %c0_7 = arith.constant 0 : index
    %9 = vector.load %arg3[%c0_6, %c0_7] : memref<512x64xbf16, #tpu.memory_space<vmem>>, vector<512x64xbf16>
    tpu.vector_store %arg3[%c0_6, %c0_7], %8 {strides = array<i32>} : memref<512x64xbf16, #tpu.memory_space<vmem>>, vector<512x64xbf16>,
    return
  }
}

module attributes {stable_mosaic.version = 11 : i64} {
  func.func @_maxpool_kernel(%arg0: memref<16x2x8x128xbf16, #tpu.memory_space<vmem>>, %arg1: memref<16x8x64xbf16, #tpu.memory_space<vmem>>) attributes {dimension_semantics = [], scalar_prefetch = 0 : i64, scratch_operands = 0 : i64, tpu.core_type = #tpu.core_type<tc>} {
    %c0 = arith.constant 0 : index
    %c0_0 = arith.constant 0 : index
    %c0_1 = arith.constant 0 : index
    %c0_2 = arith.constant 0 : index
    %0 = vector.load %arg0[%c0, %c0_0, %c0_1, %c0_2] : memref<16x2x8x128xbf16, #tpu.memory_space<vmem>>, vector<16x2x8x128xbf16>
    %1 = vector.extract_strided_slice %0 {offsets = [0, 0, 0, 0], sizes = [16, 1, 8, 128], strides = [1, 1, 1, 1]} : vector<16x2x8x128xbf16> to vector<16x1x8x128xbf16>
    %2 = vector.shape_cast %1 : vector<16x1x8x128xbf16> to vector<16x8x128xbf16>
    %3 = vector.extract_strided_slice %0 {offsets = [0, 1, 0, 0], sizes = [16, 1, 8, 128], strides = [1, 1, 1, 1]} : vector<16x2x8x128xbf16> to vector<16x1x8x128xbf16>
    %4 = vector.shape_cast %3 : vector<16x1x8x128xbf16> to vector<16x8x128xbf16>
    %5 = arith.maximumf %2, %4 : vector<16x8x128xbf16>
    %6 = vector.extract_strided_slice %5 {offsets = [0, 0, 0], sizes = [16, 8, 64], strides = [1, 1, 1]} : vector<16x8x128xbf16> to vector<16x8x64xbf16>
    %7 = vector.extract_strided_slice %5 {offsets = [0, 0, 64], sizes = [16, 8, 64], strides = [1, 1, 1]} : vector<16x8x128xbf16> to vector<16x8x64xbf16>
    %8 = arith.maximumf %6, %7 : vector<16x8x64xbf16>
    %c0_3 = arith.constant 0 : index
    %c0_4 = arith.constant 0 : index
    %c0_5 = arith.constant 0 : index
    %9 = vector.load %arg1[%c0_3, %c0_4, %c0_5] : memref<16x8x64xbf16, #tpu.memory_space<vmem>>, vector<16x8x64xbf16>
    tpu.vector_store %arg1[%c0_3, %c0_4, %c0_5], %8 {strides = array<i32>} : memref<16x8x64xbf16, #tpu.memory_space<vmem>>, vector<16x8x64xbf16>,
    return
  }
}

module attributes {stable_mosaic.version = 11 : i64} {
  func.func @_matmul_epilogue_kernel(%arg0: memref<128x640xbf16, #tpu.memory_space<vmem>>, %arg1: memref<640x128xbf16, #tpu.memory_space<vmem>>, %arg2: memref<1x128xf32, #tpu.memory_space<vmem>>, %arg3: memref<1x128xf32, #tpu.memory_space<vmem>>, %arg4: memref<128x128xbf16, #tpu.memory_space<vmem>>) attributes {dimension_semantics = [], scalar_prefetch = 0 : i64, scratch_operands = 0 : i64, tpu.core_type = #tpu.core_type<tc>} {
    %c0 = arith.constant 0 : index
    %c0_0 = arith.constant 0 : index
    %0 = vector.load %arg0[%c0, %c0_0] : memref<128x640xbf16, #tpu.memory_space<vmem>>, vector<128x640xbf16>
    %c0_1 = arith.constant 0 : index
    %c0_2 = arith.constant 0 : index
    %1 = vector.load %arg1[%c0_1, %c0_2] : memref<640x128xbf16, #tpu.memory_space<vmem>>, vector<640x128xbf16>
    %cst = arith.constant dense<0.000000e+00> : vector<128x128xf32>
    %2 = tpu.matmul %0, %1, %cst {dimension_numbers = #tpu.dot_dimension_numbers<[1], [0], [0], [1], [0, 0, 1, 1], [], []>} : vector<128x640xbf16>, vector<640x128xbf16>, vector<128x128xf32> -> vector<128x128xf32>
    %c0_3 = arith.constant 0 : index
    %c0_4 = arith.constant 0 : index
    %3 = vector.load %arg2[%c0_3, %c0_4] : memref<1x128xf32, #tpu.memory_space<vmem>>, vector<1x128xf32>
    %4 = vector.broadcast %3 : vector<1x128xf32> to vector<128x128xf32>
    %5 = arith.mulf %2, %4 : vector<128x128xf32>
    %c0_5 = arith.constant 0 : index
    %c0_6 = arith.constant 0 : index
    %6 = vector.load %arg3[%c0_5, %c0_6] : memref<1x128xf32, #tpu.memory_space<vmem>>, vector<1x128xf32>
    %7 = vector.broadcast %6 : vector<1x128xf32> to vector<128x128xf32>
    %8 = arith.addf %5, %7 : vector<128x128xf32>
    %cst_7 = arith.constant 0.000000e+00 : f32
    %9 = vector.broadcast %cst_7 : f32 to vector<128x128xf32>
    %10 = arith.maximumf %8, %9 : vector<128x128xf32>
    %11 = arith.truncf %10 : vector<128x128xf32> to vector<128x128xbf16>
    %c0_8 = arith.constant 0 : index
    %c0_9 = arith.constant 0 : index
    %12 = vector.load %arg4[%c0_8, %c0_9] : memref<128x128xbf16, #tpu.memory_space<vmem>>, vector<128x128xbf16>
    tpu.vector_store %arg4[%c0_8, %c0_9], %11 {strides = array<i32>} : memref<128x128xbf16, #tpu.memory_space<vmem>>, vector<128x128xbf16>,
    return
  }
}

module attributes {stable_mosaic.version = 11 : i64} {
  func.func @_maxpool_kernel(%arg0: memref<8x2x4x256xbf16, #tpu.memory_space<vmem>>, %arg1: memref<8x4x128xbf16, #tpu.memory_space<vmem>>) attributes {dimension_semantics = [], scalar_prefetch = 0 : i64, scratch_operands = 0 : i64, tpu.core_type = #tpu.core_type<tc>} {
    %c0 = arith.constant 0 : index
    %c0_0 = arith.constant 0 : index
    %c0_1 = arith.constant 0 : index
    %c0_2 = arith.constant 0 : index
    %0 = vector.load %arg0[%c0, %c0_0, %c0_1, %c0_2] : memref<8x2x4x256xbf16, #tpu.memory_space<vmem>>, vector<8x2x4x256xbf16>
    %1 = vector.extract_strided_slice %0 {offsets = [0, 0, 0, 0], sizes = [8, 1, 4, 256], strides = [1, 1, 1, 1]} : vector<8x2x4x256xbf16> to vector<8x1x4x256xbf16>
    %2 = vector.shape_cast %1 : vector<8x1x4x256xbf16> to vector<8x4x256xbf16>
    %3 = vector.extract_strided_slice %0 {offsets = [0, 1, 0, 0], sizes = [8, 1, 4, 256], strides = [1, 1, 1, 1]} : vector<8x2x4x256xbf16> to vector<8x1x4x256xbf16>
    %4 = vector.shape_cast %3 : vector<8x1x4x256xbf16> to vector<8x4x256xbf16>
    %5 = arith.maximumf %2, %4 : vector<8x4x256xbf16>
    %6 = vector.extract_strided_slice %5 {offsets = [0, 0, 0], sizes = [8, 4, 128], strides = [1, 1, 1]} : vector<8x4x256xbf16> to vector<8x4x128xbf16>
    %7 = vector.extract_strided_slice %5 {offsets = [0, 0, 128], sizes = [8, 4, 128], strides = [1, 1, 1]} : vector<8x4x256xbf16> to vector<8x4x128xbf16>
    %8 = arith.maximumf %6, %7 : vector<8x4x128xbf16>
    %c0_3 = arith.constant 0 : index
    %c0_4 = arith.constant 0 : index
    %c0_5 = arith.constant 0 : index
    %9 = vector.load %arg1[%c0_3, %c0_4, %c0_5] : memref<8x4x128xbf16, #tpu.memory_space<vmem>>, vector<8x4x128xbf16>
    tpu.vector_store %arg1[%c0_3, %c0_4, %c0_5], %8 {strides = array<i32>} : memref<8x4x128xbf16, #tpu.memory_space<vmem>>, vector<8x4x128xbf16>,
    return
  }
}

module attributes {stable_mosaic.version = 11 : i64} {
  func.func @_matmul_epilogue_kernel(%arg0: memref<32x1152xbf16, #tpu.memory_space<vmem>>, %arg1: memref<1152x256xbf16, #tpu.memory_space<vmem>>, %arg2: memref<1x256xf32, #tpu.memory_space<vmem>>, %arg3: memref<1x256xf32, #tpu.memory_space<vmem>>, %arg4: memref<32x256xbf16, #tpu.memory_space<vmem>>) attributes {dimension_semantics = [], scalar_prefetch = 0 : i64, scratch_operands = 0 : i64, tpu.core_type = #tpu.core_type<tc>} {
    %c0 = arith.constant 0 : index
    %c0_0 = arith.constant 0 : index
    %0 = vector.load %arg0[%c0, %c0_0] : memref<32x1152xbf16, #tpu.memory_space<vmem>>, vector<32x1152xbf16>
    %c0_1 = arith.constant 0 : index
    %c0_2 = arith.constant 0 : index
    %1 = vector.load %arg1[%c0_1, %c0_2] : memref<1152x256xbf16, #tpu.memory_space<vmem>>, vector<1152x256xbf16>
    %cst = arith.constant dense<0.000000e+00> : vector<32x256xf32>
    %2 = tpu.matmul %0, %1, %cst {dimension_numbers = #tpu.dot_dimension_numbers<[1], [0], [0], [1], [0, 0, 1, 1], [], []>} : vector<32x1152xbf16>, vector<1152x256xbf16>, vector<32x256xf32> -> vector<32x256xf32>
    %c0_3 = arith.constant 0 : index
    %c0_4 = arith.constant 0 : index
    %3 = vector.load %arg2[%c0_3, %c0_4] : memref<1x256xf32, #tpu.memory_space<vmem>>, vector<1x256xf32>
    %4 = vector.broadcast %3 : vector<1x256xf32> to vector<32x256xf32>
    %5 = arith.mulf %2, %4 : vector<32x256xf32>
    %c0_5 = arith.constant 0 : index
    %c0_6 = arith.constant 0 : index
    %6 = vector.load %arg3[%c0_5, %c0_6] : memref<1x256xf32, #tpu.memory_space<vmem>>, vector<1x256xf32>
    %7 = vector.broadcast %6 : vector<1x256xf32> to vector<32x256xf32>
    %8 = arith.addf %5, %7 : vector<32x256xf32>
    %cst_7 = arith.constant 0.000000e+00 : f32
    %9 = vector.broadcast %cst_7 : f32 to vector<32x256xf32>
    %10 = arith.maximumf %8, %9 : vector<32x256xf32>
    %11 = arith.truncf %10 : vector<32x256xf32> to vector<32x256xbf16>
    %c0_8 = arith.constant 0 : index
    %c0_9 = arith.constant 0 : index
    %12 = vector.load %arg4[%c0_8, %c0_9] : memref<32x256xbf16, #tpu.memory_space<vmem>>, vector<32x256xbf16>
    tpu.vector_store %arg4[%c0_8, %c0_9], %11 {strides = array<i32>} : memref<32x256xbf16, #tpu.memory_space<vmem>>, vector<32x256xbf16>,
    return
  }
}

module attributes {stable_mosaic.version = 11 : i64} {
  func.func @_fc_fused_kernel(%arg0: i32, %arg1: memref<2x1024xbf16, #tpu.memory_space<vmem>>, %arg2: memref<1024x1024xbf16, #tpu.memory_space<vmem>>, %arg3: memref<1x1024xf32, #tpu.memory_space<vmem>>, %arg4: memref<1024x512xbf16, #tpu.memory_space<vmem>>, %arg5: memref<1x512xf32, #tpu.memory_space<vmem>>, %arg6: memref<512x10xbf16, #tpu.memory_space<vmem>>, %arg7: memref<1x10xf32, #tpu.memory_space<vmem>>, %arg8: memref<2x10xf32, #tpu.memory_space<vmem>>, %arg9: memref<2x1024xf32, #tpu.memory_space<vmem>>) attributes {dimension_semantics = [#tpu.dimension_semantics<arbitrary>], iteration_bounds = array<i64: 4>, scalar_prefetch = 0 : i64, scratch_operands = 1 : i64, tpu.core_type = #tpu.core_type<tc>, window_params = [{transform_indices = @transform_0, window_bounds = array<i64: 2, 1024>}, {transform_indices = @transform_1, window_bounds = array<i64: 1024, 1024>}, {pipeline_mode = #tpu.pipeline_mode<synchronous>, transform_indices = @transform_2, window_bounds = array<i64: 1, 1024>}, {pipeline_mode = #tpu.pipeline_mode<synchronous>, transform_indices = @transform_3, window_bounds = array<i64: 1024, 512>}, {pipeline_mode = #tpu.pipeline_mode<synchronous>, transform_indices = @transform_4, window_bounds = array<i64: 1, 512>}, {pipeline_mode = #tpu.pipeline_mode<synchronous>, transform_indices = @transform_5, window_bounds = array<i64: 512, 10>}, {pipeline_mode = #tpu.pipeline_mode<synchronous>, transform_indices = @transform_6, window_bounds = array<i64: 1, 10>}, {pipeline_mode = #tpu.pipeline_mode<synchronous>, transform_indices = @transform_7, window_bounds = array<i64: 2, 10>}]} {
    %c0_i32 = arith.constant 0 : i32
    %0 = arith.cmpi eq, %arg0, %c0_i32 : i32
    %1 = arith.extui %0 : i1 to i32
    %c0_i32_0 = arith.constant 0 : i32
    %2 = arith.cmpi ne, %1, %c0_i32_0 : i32
    scf.if %2 {
      %cst_9 = arith.constant 0.000000e+00 : f32
      %12 = vector.broadcast %cst_9 : f32 to vector<2x1024xf32>
      %c0_10 = arith.constant 0 : index
      %c0_11 = arith.constant 0 : index
      %13 = vector.load %arg9[%c0_10, %c0_11] : memref<2x1024xf32, #tpu.memory_space<vmem>>, vector<2x1024xf32>
      tpu.vector_store %arg9[%c0_10, %c0_11], %12 {strides = array<i32>} : memref<2x1024xf32, #tpu.memory_space<vmem>>, vector<2x1024xf32>,
    } else {
    }
    %c0 = arith.constant 0 : index
    %c0_1 = arith.constant 0 : index
    %3 = vector.load %arg9[%c0, %c0_1] : memref<2x1024xf32, #tpu.memory_space<vmem>>, vector<2x1024xf32>
    %c0_2 = arith.constant 0 : index
    %c0_3 = arith.constant 0 : index
    %4 = vector.load %arg1[%c0_2, %c0_3] : memref<2x1024xbf16, #tpu.memory_space<vmem>>, vector<2x1024xbf16>
    %c0_4 = arith.constant 0 : index
    %c0_5 = arith.constant 0 : index
    %5 = vector.load %arg2[%c0_4, %c0_5] : memref<1024x1024xbf16, #tpu.memory_space<vmem>>, vector<1024x1024xbf16>
    %cst = arith.constant dense<0.000000e+00> : vector<2x1024xf32>
    %6 = tpu.matmul %4, %5, %cst {dimension_numbers = #tpu.dot_dimension_numbers<[1], [0], [0], [1], [0, 0, 1, 1], [], []>} : vector<2x1024xbf16>, vector<1024x1024xbf16>, vector<2x1024xf32> -> vector<2x1024xf32>
    %7 = arith.addf %3, %6 : vector<2x1024xf32>
    %c0_6 = arith.constant 0 : index
    %c0_7 = arith.constant 0 : index
    %8 = vector.load %arg9[%c0_6, %c0_7] : memref<2x1024xf32, #tpu.memory_space<vmem>>, vector<2x1024xf32>
    tpu.vector_store %arg9[%c0_6, %c0_7], %7 {strides = array<i32>} : memref<2x1024xf32, #tpu.memory_space<vmem>>, vector<2x1024xf32>,
    %c3_i32 = arith.constant 3 : i32
    %9 = arith.cmpi eq, %arg0, %c3_i32 : i32
    %10 = arith.extui %9 : i1 to i32
    %c0_i32_8 = arith.constant 0 : i32
    %11 = arith.cmpi ne, %10, %c0_i32_8 : i32
    scf.if %11 {
      %c0_9 = arith.constant 0 : index
      %c0_10 = arith.constant 0 : index
      %12 = vector.load %arg9[%c0_9, %c0_10] : memref<2x1024xf32, #tpu.memory_space<vmem>>, vector<2x1024xf32>
      %c0_11 = arith.constant 0 : index
      %c0_12 = arith.constant 0 : index
      %13 = vector.load %arg3[%c0_11, %c0_12] : memref<1x1024xf32, #tpu.memory_space<vmem>>, vector<1x1024xf32>
      %14 = vector.broadcast %13 : vector<1x1024xf32> to vector<2x1024xf32>
      %15 = arith.addf %12, %14 : vector<2x1024xf32>
      %cst_13 = arith.constant 0.000000e+00 : f32
      %16 = vector.broadcast %cst_13 : f32 to vector<2x1024xf32>
      %17 = arith.maximumf %15, %16 : vector<2x1024xf32>
      %18 = arith.truncf %17 : vector<2x1024xf32> to vector<2x1024xbf16>
      %c0_14 = arith.constant 0 : index
      %c0_15 = arith.constant 0 : index
      %19 = vector.load %arg4[%c0_14, %c0_15] : memref<1024x512xbf16, #tpu.memory_space<vmem>>, vector<1024x512xbf16>
      %cst_16 = arith.constant dense<0.000000e+00> : vector<2x512xf32>
      %20 = tpu.matmul %18, %19, %cst_16 {dimension_numbers = #tpu.dot_dimension_numbers<[1], [0], [0], [1], [0, 0, 1, 1], [], []>} : vector<2x1024xbf16>, vector<1024x512xbf16>, vector<2x512xf32> -> vector<2x512xf32>
      %c0_17 = arith.constant 0 : index
      %c0_18 = arith.constant 0 : index
      %21 = vector.load %arg5[%c0_17, %c0_18] : memref<1x512xf32, #tpu.memory_space<vmem>>, vector<1x512xf32>
      %22 = vector.broadcast %21 : vector<1x512xf32> to vector<2x512xf32>
      %23 = arith.addf %20, %22 : vector<2x512xf32>
      %cst_19 = arith.constant 0.000000e+00 : f32
      %24 = vector.broadcast %cst_19 : f32 to vector<2x512xf32>
      %25 = arith.maximumf %23, %24 : vector<2x512xf32>
      %26 = arith.truncf %25 : vector<2x512xf32> to vector<2x512xbf16>
      %c0_20 = arith.constant 0 : index
      %c0_21 = arith.constant 0 : index
      %27 = vector.load %arg6[%c0_20, %c0_21] : memref<512x10xbf16, #tpu.memory_space<vmem>>, vector<512x10xbf16>
      %cst_22 = arith.constant dense<0.000000e+00> : vector<2x10xf32>
      %28 = tpu.matmul %26, %27, %cst_22 {dimension_numbers = #tpu.dot_dimension_numbers<[1], [0], [0], [1], [0, 0, 1, 1], [], []>} : vector<2x512xbf16>, vector<512x10xbf16>, vector<2x10xf32> -> vector<2x10xf32>
      %c0_23 = arith.constant 0 : index
      %c0_24 = arith.constant 0 : index
      %29 = vector.load %arg7[%c0_23, %c0_24] : memref<1x10xf32, #tpu.memory_space<vmem>>, vector<1x10xf32>
      %30 = vector.broadcast %29 : vector<1x10xf32> to vector<2x10xf32>
      %31 = arith.addf %28, %30 : vector<2x10xf32>
      %c0_25 = arith.constant 0 : index
      %c0_26 = arith.constant 0 : index
      %32 = vector.load %arg8[%c0_25, %c0_26] : memref<2x10xf32, #tpu.memory_space<vmem>>, vector<2x10xf32>
      tpu.vector_store %arg8[%c0_25, %c0_26], %31 {strides = array<i32>} : memref<2x10xf32, #tpu.memory_space<vmem>>, vector<2x10xf32>,
    } else {
    }
    return
  }
  func.func @transform_0(%arg0: i32) -> (i32, i32) {
    %c0_i32 = arith.constant 0 : i32
    %c0_i32_0 = arith.constant 0 : i32
    return %c0_i32, %arg0 : i32, i32
  }
  func.func @transform_1(%arg0: i32) -> (i32, i32) {
    %c0_i32 = arith.constant 0 : i32
    %c0_i32_0 = arith.constant 0 : i32
    return %arg0, %c0_i32 : i32, i32
  }
  func.func @transform_2(%arg0: i32) -> (i32, i32) {
    %c0_i32 = arith.constant 0 : i32
    %c0_i32_0 = arith.constant 0 : i32
    %c0_i32_1 = arith.constant 0 : i32
    return %c0_i32, %c0_i32_0 : i32, i32
  }
  func.func @transform_3(%arg0: i32) -> (i32, i32) {
    %c0_i32 = arith.constant 0 : i32
    %c0_i32_0 = arith.constant 0 : i32
    %c0_i32_1 = arith.constant 0 : i32
    return %c0_i32, %c0_i32_0 : i32, i32
  }
  func.func @transform_4(%arg0: i32) -> (i32, i32) {
    %c0_i32 = arith.constant 0 : i32
    %c0_i32_0 = arith.constant 0 : i32
    %c0_i32_1 = arith.constant 0 : i32
    return %c0_i32, %c0_i32_0 : i32, i32
  }
  func.func @transform_5(%arg0: i32) -> (i32, i32) {
    %c0_i32 = arith.constant 0 : i32
    %c0_i32_0 = arith.constant 0 : i32
    %c0_i32_1 = arith.constant 0 : i32
    return %c0_i32, %c0_i32_0 : i32, i32
  }
  func.func @transform_6(%arg0: i32) -> (i32, i32) {
    %c0_i32 = arith.constant 0 : i32
    %c0_i32_0 = arith.constant 0 : i32
    %c0_i32_1 = arith.constant 0 : i32
    return %c0_i32, %c0_i32_0 : i32, i32
  }
  func.func @transform_7(%arg0: i32) -> (i32, i32) {
    %c0_i32 = arith.constant 0 : i32
    %c0_i32_0 = arith.constant 0 : i32
    %c0_i32_1 = arith.constant 0 : i32
    return %c0_i32, %c0_i32_0 : i32, i32
  }
}

</mosaic_0001>

<bundles_post_ra>
// kernel: forward.9
= control target key start
LH: loop header
LB: loop body
LE: loop exit
PB: predicated region body
PF: predicated region fallthrough
CT: control target
= control target key end

     0   :  { %s590_s22 = smov 96   ;;  %vm520_vm0 = vcmask 257024   ;;  %s1561_s0 = inlined_call_operand.vmem [shape: bf16[32,2,16,64], index: 0, kind: input, shape index: {}]   ;;  %s1562_s1 = inlined_call_operand.vmem [shape: bf16[32,16,32], index: 1, kind: output, shape index: {}]  }
   0x1   :  { %v12_v0 = vld [vmem:[%s1561_s0 + $0x10] sm:$0xf]  ;;  %v14_v1 = vld [vmem:[%s1561_s0 + $0x18] sm:$0xf]  ;;  %v8_v2 = vld [vmem:[%s1561_s0] sm:$0xf] }
   0x2   :  { %v610_v3 = vmax.bf16 %v14_v1, %v12_v0  ;;  %v10_v4 = vld [vmem:[%s1561_s0 + $0x8] sm:$0xf]  ;;  %v13_v5 = vld [vmem:[%s1561_s0 + $0x14] sm:$0xf]  ;;  %v15_v6 = vld [vmem:[%s1561_s0 + $0x1c] sm:$0xf] }
   0x3   :  { %v621_v7 = vmax.bf16 %v10_v4, %v8_v2  ;;  %v9_v8 = vld [vmem:[%s1561_s0 + $0x4] sm:$0xf]  ;;  %v11_v9 = vld [vmem:[%s1561_s0 + $0xc] sm:$0xf]  ;;  %v631_v10 = vmax.bf16 %v15_v6, %v13_v5  ;;  %v16_v14 = vld [vmem:[%s1561_s0 + $0x20] sm:$0xf] }
   0x4   :  { %268 = vrot.lane.b32.xlu1 %v610_v3, %s590_s22  ;;  %v635_v11 = vmax.bf16 %v11_v9, %v9_v8  ;;  %v17_v12 = vld [vmem:[%s1561_s0 + $0x24] sm:$0xf]  ;;  %v19_v13 = vld [vmem:[%s1561_s0 + $0x2c] sm:$0xf]  ;;  %v18_v15 = vld [vmem:[%s1561_s0 + $0x28] sm:$0xf] }
   0x5   :  { %264 = vrot.lane.b32.xlu0 %v621_v7, %s590_s22  ;;  %v651_v16 = vmax.bf16 %v19_v13, %v17_v12  ;;  %v655_v17 = vmax.bf16 %v18_v15, %v16_v14  ;;  %v21_v18 = vld [vmem:[%s1561_s0 + $0x34] sm:$0xf]  ;;  %v23_v19 = vld [vmem:[%s1561_s0 + $0x3c] sm:$0xf]  ;;  %v20_v20 = vld [vmem:[%s1561_s0 + $0x30] sm:$0xf] }
   0x6   :  { %v22_v21 = vld [vmem:[%s1561_s0 + $0x38] sm:$0xf]  ;;  %v671_v22 = vmax.bf16 %v23_v19, %v21_v18  ;;  %v25_v24 = vld [vmem:[%s1561_s0 + $0x44] sm:$0xf]  ;;  %v27_v25 = vld [vmem:[%s1561_s0 + $0x4c] sm:$0xf] }
   0x7   :  { %v675_v23 = vmax.bf16 %v22_v21, %v20_v20  ;;  %v24_v26 = vld [vmem:[%s1561_s0 + $0x40] sm:$0xf]  ;;  %v26_v27 = vld [vmem:[%s1561_s0 + $0x48] sm:$0xf]  ;;  %v691_v28 = vmax.bf16 %v27_v25, %v25_v24  ;;  %v29_v30 = vld [vmem:[%s1561_s0 + $0x54] sm:$0xf] }
   0x8   :  { %270 = vrot.lane.b32.xlu1 %v631_v10, %s590_s22  ;;  %v695_v29 = vmax.bf16 %v26_v27, %v24_v26  ;;  %v31_v31 = vld [vmem:[%s1561_s0 + $0x5c] sm:$0xf]  ;;  %v28_v32 = vld [vmem:[%s1561_s0 + $0x50] sm:$0xf]  ;;  %v30_v33 = vld [vmem:[%s1561_s0 + $0x58] sm:$0xf] }
   0x9   :  { %266 = vrot.lane.b32.xlu0 %v635_v11, %s590_s22  ;;  %v711_v34 = vmax.bf16 %v31_v31, %v29_v30  ;;  %v715_v35 = vmax.bf16 %v30_v33, %v28_v32  ;;  %v33_v36 = vld [vmem:[%s1561_s0 + $0x64] sm:$0xf]  ;;  %v35_v37 = vld [vmem:[%s1561_s0 + $0x6c] sm:$0xf]  ;;  %v32_v38 = vld [vmem:[%s1561_s0 + $0x60] sm:$0xf] }
   0xa   :  { %v34_v39 = vld [vmem:[%s1561_s0 + $0x68] sm:$0xf]  ;;  %v731_v40 = vmax.bf16 %v35_v37, %v33_v36  ;;  %v37_v42 = vld [vmem:[%s1561_s0 + $0x74] sm:$0xf]  ;;  %v39_v43 = vld [vmem:[%s1561_s0 + $0x7c] sm:$0xf] }
   0xb   :  { %v735_v41 = vmax.bf16 %v34_v39, %v32_v38  ;;  %v36_v44 = vld [vmem:[%s1561_s0 + $0x70] sm:$0xf]  ;;  %v38_v45 = vld [vmem:[%s1561_s0 + $0x78] sm:$0xf]  ;;  %v751_v46 = vmax.bf16 %v39_v43, %v37_v42  ;;  %v41_v48 = vld [vmem:[%s1561_s0 + $0x84] sm:$0xf] }
   0xc   :  { %274 = vrot.lane.b32.xlu1 %v651_v16, %s590_s22  ;;  %v755_v47 = vmax.bf16 %v38_v45, %v36_v44  ;;  %v43_v49 = vld [vmem:[%s1561_s0 + $0x8c] sm:$0xf]  ;;  %v40_v50 = vld [vmem:[%s1561_s0 + $0x80] sm:$0xf]  ;;  %v42_v51 = vld [vmem:[%s1561_s0 + $0x88] sm:$0xf] }
   0xd   :  { %272 = vrot.lane.b32.xlu0 %v655_v17, %s590_s22  ;;  %v771_v52 = vmax.bf16 %v43_v49, %v41_v48  ;;  %v775_v53 = vmax.bf16 %v42_v51, %v40_v50  ;;  %v45_v54 = vld [vmem:[%s1561_s0 + $0x94] sm:$0xf]  ;;  %v47_v55 = vld [vmem:[%s1561_s0 + $0x9c] sm:$0xf]  ;;  %v44_v56 = vld [vmem:[%s1561_s0 + $0x90] sm:$0xf] }
   0xe   :  { %v46_v57 = vld [vmem:[%s1561_s0 + $0x98] sm:$0xf]  ;;  %v791_v58 = vmax.bf16 %v47_v55, %v45_v54  ;;  %v49_v60 = vld [vmem:[%s1561_s0 + $0xa4] sm:$0xf]  ;;  %v51_v61 = vld [vmem:[%s1561_s0 + $0xac] sm:$0xf] }
   0xf   :  { %v795_v59 = vmax.bf16 %v46_v57, %v44_v56  ;;  %v48_v62 = vld [vmem:[%s1561_s0 + $0xa0] sm:$0xf]  ;;  %v50_v63 = vld [vmem:[%s1561_s0 + $0xa8] sm:$0xf]  ;;  %v811_v0 = vmax.bf16 %v51_v61, %v49_v60  ;;  %v53_v2 = vld [vmem:[%s1561_s0 + $0xb4] sm:$0xf] }
  0x10   :  { %278 = vrot.lane.b32.xlu1 %v671_v22, %s590_s22  ;;  %v815_v1 = vmax.bf16 %v50_v63, %v48_v62  ;;  %v55_v4 = vld [vmem:[%s1561_s0 + $0xbc] sm:$0xf]  ;;  %v52_v5 = vld [vmem:[%s1561_s0 + $0xb0] sm:$0xf]  ;;  %v54_v6 = vld [vmem:[%s1561_s0 + $0xb8] sm:$0xf] }
  0x11   :  { %276 = vrot.lane.b32.xlu0 %v675_v23, %s590_s22  ;;  %v831_v8 = vmax.bf16 %v55_v4, %v53_v2  ;;  %v835_v9 = vmax.bf16 %v54_v6, %v52_v5  ;;  %v57_v12 = vld [vmem:[%s1561_s0 + $0xc4] sm:$0xf]  ;;  %v59_v13 = vld [vmem:[%s1561_s0 + $0xcc] sm:$0xf]  ;;  %v56_v14 = vld [vmem:[%s1561_s0 + $0xc0] sm:$0xf] }
  0x12   :  { %v58_v15 = vld [vmem:[%s1561_s0 + $0xc8] sm:$0xf]  ;;  %v851_v18 = vmax.bf16 %v59_v13, %v57_v12  ;;  %v61_v20 = vld [vmem:[%s1561_s0 + $0xd4] sm:$0xf]  ;;  %v63_v21 = vld [vmem:[%s1561_s0 + $0xdc] sm:$0xf] }
  0x13   :  { %v855_v19 = vmax.bf16 %v58_v15, %v56_v14  ;;  %v60_v24 = vld [vmem:[%s1561_s0 + $0xd0] sm:$0xf]  ;;  %v62_v25 = vld [vmem:[%s1561_s0 + $0xd8] sm:$0xf]  ;;  %v871_v26 = vmax.bf16 %v63_v21, %v61_v20  ;;  %v65_v30 = vld [vmem:[%s1561_s0 + $0xe4] sm:$0xf] }
  0x14   :  { %282 = vrot.lane.b32.xlu1 %v691_v28, %s590_s22  ;;  %v875_v27 = vmax.bf16 %v62_v25, %v60_v24  ;;  %v67_v31 = vld [vmem:[%s1561_s0 + $0xec] sm:$0xf]  ;;  %v64_v32 = vld [vmem:[%s1561_s0 + $0xe0] sm:$0xf]  ;;  %v66_v33 = vld [vmem:[%s1561_s0 + $0xe8] sm:$0xf] }
  0x15   :  { %280 = vrot.lane.b32.xlu0 %v695_v29, %s590_s22  ;;  %v891_v36 = vmax.bf16 %v67_v31, %v65_v30  ;;  %v895_v37 = vmax.bf16 %v66_v33, %v64_v32  ;;  %v69_v38 = vld [vmem:[%s1561_s0 + $0xf4] sm:$0xf]  ;;  %v71_v39 = vld [vmem:[%s1561_s0 + $0xfc] sm:$0xf]  ;;  %v68_v42 = vld [vmem:[%s1561_s0 + $0xf0] sm:$0xf] }
  0x16   :  { %v70_v43 = vld [vmem:[%s1561_s0 + $0xf8] sm:$0xf]  ;;  %v911_v44 = vmax.bf16 %v71_v39, %v69_v38  ;;  %v73_v48 = vld [vmem:[%s1561_s0 + $0x104] sm:$0xf]  ;;  %v75_v49 = vld [vmem:[%s1561_s0 + $0x10c] sm:$0xf] }
  0x17   :  { %v915_v45 = vmax.bf16 %v70_v43, %v68_v42  ;;  %v72_v50 = vld [vmem:[%s1561_s0 + $0x100] sm:$0xf]  ;;  %v74_v51 = vld [vmem:[%s1561_s0 + $0x108] sm:$0xf]  ;;  %v931_v54 = vmax.bf16 %v75_v49, %v73_v48  ;;  %v77_v56 = vld [vmem:[%s1561_s0 + $0x114] sm:$0xf] }
  0x18   :  { %286 = vrot.lane.b32.xlu1 %v711_v34, %s590_s22  ;;  %v935_v55 = vmax.bf16 %v74_v51, %v72_v50  ;;  %v79_v57 = vld [vmem:[%s1561_s0 + $0x11c] sm:$0xf]  ;;  %v76_v60 = vld [vmem:[%s1561_s0 + $0x110] sm:$0xf]  ;;  %v78_v61 = vld [vmem:[%s1561_s0 + $0x118] sm:$0xf] }
  0x19   :  { %284 = vrot.lane.b32.xlu0 %v715_v35, %s590_s22  ;;  %v951_v62 = vmax.bf16 %v79_v57, %v77_v56  ;;  %v955_v63 = vmax.bf16 %v78_v61, %v76_v60  ;;  %v81_v2 = vld [vmem:[%s1561_s0 + $0x124] sm:$0xf]  ;;  %v83_v4 = vld [vmem:[%s1561_s0 + $0x12c] sm:$0xf]  ;;  %v80_v5 = vld [vmem:[%s1561_s0 + $0x120] sm:$0xf] }
  0x1a   :  { %v82_v6 = vld [vmem:[%s1561_s0 + $0x128] sm:$0xf]  ;;  %v971_v12 = vmax.bf16 %v83_v4, %v81_v2  ;;  %v85_v14 = vld [vmem:[%s1561_s0 + $0x134] sm:$0xf]  ;;  %v87_v15 = vld [vmem:[%s1561_s0 + $0x13c] sm:$0xf] }
  0x1b   :  { %v975_v13 = vmax.bf16 %v82_v6, %v80_v5  ;;  %v84_v20 = vld [vmem:[%s1561_s0 + $0x130] sm:$0xf]  ;;  %v86_v21 = vld [vmem:[%s1561_s0 + $0x138] sm:$0xf]  ;;  %v991_v24 = vmax.bf16 %v87_v15, %v85_v14  ;;  %v89_v30 = vld [vmem:[%s1561_s0 + $0x144] sm:$0xf] }
  0x1c   :  { %290 = vrot.lane.b32.xlu1 %v731_v40, %s590_s22  ;;  %v995_v25 = vmax.bf16 %v86_v21, %v84_v20  ;;  %v91_v31 = vld [vmem:[%s1561_s0 + $0x14c] sm:$0xf]  ;;  %v88_v32 = vld [vmem:[%s1561_s0 + $0x140] sm:$0xf]  ;;  %v90_v33 = vld [vmem:[%s1561_s0 + $0x148] sm:$0xf] }
  0x1d   :  { %288 = vrot.lane.b32.xlu0 %v735_v41, %s590_s22  ;;  %v1011_v38 = vmax.bf16 %v91_v31, %v89_v30  ;;  %v1015_v39 = vmax.bf16 %v90_v33, %v88_v32  ;;  %v93_v42 = vld [vmem:[%s1561_s0 + $0x154] sm:$0xf]  ;;  %v95_v43 = vld [vmem:[%s1561_s0 + $0x15c] sm:$0xf]  ;;  %v92_v48 = vld [vmem:[%s1561_s0 + $0x150] sm:$0xf] }
  0x1e   :  { %v94_v49 = vld [vmem:[%s1561_s0 + $0x158] sm:$0xf]  ;;  %v1031_v50 = vmax.bf16 %v95_v43, %v93_v42  ;;  %v97_v56 = vld [vmem:[%s1561_s0 + $0x164] sm:$0xf]  ;;  %v99_v57 = vld [vmem:[%s1561_s0 + $0x16c] sm:$0xf] }
  0x1f   :  { %v1035_v51 = vmax.bf16 %v94_v49, %v92_v48  ;;  %v96_v60 = vld [vmem:[%s1561_s0 + $0x160] sm:$0xf]  ;;  %v98_v61 = vld [vmem:[%s1561_s0 + $0x168] sm:$0xf]  ;;  %v1051_v2 = vmax.bf16 %v99_v57, %v97_v56  ;;  %v101_v5 = vld [vmem:[%s1561_s0 + $0x174] sm:$0xf] }
  0x20   :  { %294 = vrot.lane.b32.xlu1 %v751_v46, %s590_s22  ;;  %v1055_v4 = vmax.bf16 %v98_v61, %v96_v60  ;;  %v103_v6 = vld [vmem:[%s1561_s0 + $0x17c] sm:$0xf]  ;;  %v100_v14 = vld [vmem:[%s1561_s0 + $0x170] sm:$0xf]  ;;  %v102_v15 = vld [vmem:[%s1561_s0 + $0x178] sm:$0xf] }
  0x21   :  { %292 = vrot.lane.b32.xlu0 %v755_v47, %s590_s22  ;;  %v1071_v20 = vmax.bf16 %v103_v6, %v101_v5  ;;  %v1075_v21 = vmax.bf16 %v102_v15, %v100_v14  ;;  %v105_v30 = vld [vmem:[%s1561_s0 + $0x184] sm:$0xf]  ;;  %v107_v31 = vld [vmem:[%s1561_s0 + $0x18c] sm:$0xf]  ;;  %v104_v32 = vld [vmem:[%s1561_s0 + $0x180] sm:$0xf] }
  0x22   :  { %v106_v33 = vld [vmem:[%s1561_s0 + $0x188] sm:$0xf]  ;;  %v1091_v42 = vmax.bf16 %v107_v31, %v105_v30  ;;  %v109_v48 = vld [vmem:[%s1561_s0 + $0x194] sm:$0xf]  ;;  %v111_v49 = vld [vmem:[%s1561_s0 + $0x19c] sm:$0xf] }
  0x23   :  { %v1095_v43 = vmax.bf16 %v106_v33, %v104_v32  ;;  %v108_v56 = vld [vmem:[%s1561_s0 + $0x190] sm:$0xf]  ;;  %v110_v57 = vld [vmem:[%s1561_s0 + $0x198] sm:$0xf]  ;;  %v1111_v60 = vmax.bf16 %v111_v49, %v109_v48  ;;  %v113_v5 = vld [vmem:[%s1561_s0 + $0x1a4] sm:$0xf] }
  0x24   :  { %298 = vrot.lane.b32.xlu1 %v771_v52, %s590_s22  ;;  %v1115_v61 = vmax.bf16 %v110_v57, %v108_v56  ;;  %v115_v6 = vld [vmem:[%s1561_s0 + $0x1ac] sm:$0xf]  ;;  %v112_v14 = vld [vmem:[%s1561_s0 + $0x1a0] sm:$0xf]  ;;  %v114_v15 = vld [vmem:[%s1561_s0 + $0x1a8] sm:$0xf] }
  0x25   :  { %296 = vrot.lane.b32.xlu0 %v775_v53, %s590_s22  ;;  %v1131_v30 = vmax.bf16 %v115_v6, %v113_v5  ;;  %v1135_v31 = vmax.bf16 %v114_v15, %v112_v14  ;;  %v117_v32 = vld [vmem:[%s1561_s0 + $0x1b4] sm:$0xf]  ;;  %v119_v33 = vld [vmem:[%s1561_s0 + $0x1bc] sm:$0xf]  ;;  %v116_v48 = vld [vmem:[%s1561_s0 + $0x1b0] sm:$0xf] }
  0x26   :  { %v118_v49 = vld [vmem:[%s1561_s0 + $0x1b8] sm:$0xf]  ;;  %v1151_v56 = vmax.bf16 %v119_v33, %v117_v32  ;;  %v121_v5 = vld [vmem:[%s1561_s0 + $0x1c4] sm:$0xf]  ;;  %v123_v6 = vld [vmem:[%s1561_s0 + $0x1cc] sm:$0xf] }
  0x27   :  { %1569 = vst [vmem:[#allocation2_spill] sm:$0xff] %v1131_v30  ;;  %1570 = vst [vmem:[#allocation3_spill] sm:$0xff] %v1135_v31  ;;  %v1155_v57 = vmax.bf16 %v118_v49, %v116_v48  ;;  %v120_v14 = vld [vmem:[%s1561_s0 + $0x1c0] sm:$0xf]  ;;  %v122_v15 = vld [vmem:[%s1561_s0 + $0x1c8] sm:$0xf]  ;;  %v1171_v32 = vmax.bf16 %v123_v6, %v121_v5 }
  0x28   :  { %302 = vrot.lane.b32.xlu1 %v791_v58, %s590_s22  ;;  %1571 = vst [vmem:[#allocation4_spill] sm:$0xff] %v1151_v56  ;;  %v1175_v33 = vmax.bf16 %v122_v15, %v120_v14  ;;  %v125_v48 = vld [vmem:[%s1561_s0 + $0x1d4] sm:$0xf]  ;;  %v127_v49 = vld [vmem:[%s1561_s0 + $0x1dc] sm:$0xf] }
  0x29   :  { %300 = vrot.lane.b32.xlu0 %v795_v59, %s590_s22  ;;  %1572 = vst [vmem:[#allocation5_spill] sm:$0xff] %v1155_v57  ;;  %1573 = vst [vmem:[#allocation6_spill] sm:$0xff] %v1171_v32  ;;  %v126_v5 = vld [vmem:[%s1561_s0 + $0x1d8] sm:$0xf]  ;;  %v1191_v6 = vmax.bf16 %v127_v49, %v125_v48  ;;  %v129_v15 = vld [vmem:[%s1561_s0 + $0x1e4] sm:$0xf] }
  0x2a   :  { %1574 = vst [vmem:[#allocation7_spill] sm:$0xff] %v1175_v33  ;;  %v128_v48 = vld [vmem:[%s1561_s0 + $0x1e0] sm:$0xf]  ;;  %v130_v49 = vld [vmem:[%s1561_s0 + $0x1e8] sm:$0xf] }
  0x2c   :  { %306 = vrot.lane.b32.xlu1 %v811_v0, %s590_s22 }
  0x2d   :  { %304 = vrot.lane.b32.xlu0 %v815_v1, %s590_s22 }
  0x30   :  { %310 = vrot.lane.b32.xlu1 %v831_v8, %s590_s22 }
  0x31   :  { %308 = vrot.lane.b32.xlu0 %v835_v9, %s590_s22 }
  0x34   :  { %314 = vrot.lane.b32.xlu1 %v851_v18, %s590_s22 }
  0x35   :  { %312 = vrot.lane.b32.xlu0 %v855_v19, %s590_s22 }
  0x38   :  { %318 = vrot.lane.b32.xlu1 %v871_v26, %s590_s22 }
  0x39   :  { %316 = vrot.lane.b32.xlu0 %v875_v27, %s590_s22 }
  0x3c   :  { %322 = vrot.lane.b32.xlu1 %v891_v36, %s590_s22 }
  0x3d   :  { %320 = vrot.lane.b32.xlu0 %v895_v37, %s590_s22 }
  0x40   :  { %326 = vrot.lane.b32.xlu1 %v911_v44, %s590_s22 }
  0x41   :  { %324 = vrot.lane.b32.xlu0 %v915_v45, %s590_s22 }
  0x44   :  { %330 = vrot.lane.b32.xlu1 %v931_v54, %s590_s22 }
  0x45   :  { %328 = vrot.lane.b32.xlu0 %v935_v55, %s590_s22 }
  0x48   :  { %334 = vrot.lane.b32.xlu1 %v951_v62, %s590_s22 }
  0x49   :  { %332 = vrot.lane.b32.xlu0 %v955_v63, %s590_s22 }
  0x4c   :  { %338 = vrot.lane.b32.xlu1 %v971_v12, %s590_s22 }
  0x4d   :  { %336 = vrot.lane.b32.xlu0 %v975_v13, %s590_s22 }
  0x50   :  { %342 = vrot.lane.b32.xlu1 %v991_v24, %s590_s22 }
  0x51   :  { %340 = vrot.lane.b32.xlu0 %v995_v25, %s590_s22 }
  0x54   :  { %346 = vrot.lane.b32.xlu1 %v1011_v38, %s590_s22 }
  0x55   :  { %344 = vrot.lane.b32.xlu0 %v1015_v39, %s590_s22 }
  0x58   :  { %350 = vrot.lane.b32.xlu1 %v1031_v50, %s590_s22 }
  0x59   :  { %348 = vrot.lane.b32.xlu0 %v1035_v51, %s590_s22 }
  0x5c   :  { %354 = vrot.lane.b32.xlu1 %v1051_v2, %s590_s22 }
  0x5d   :  { %352 = vrot.lane.b32.xlu0 %v1055_v4, %s590_s22 }
  0x60   :  { %358 = vrot.lane.b32.xlu1 %v1071_v20, %s590_s22 }
  0x61   :  { %356 = vrot.lane.b32.xlu0 %v1075_v21, %s590_s22 }
  0x64   :  { %362 = vrot.lane.b32.xlu1 %v1091_v42, %s590_s22 }
  0x65   :  { %360 = vrot.lane.b32.xlu0 %v1095_v43, %s590_s22 }
  0x68   :  { %366 = vrot.lane.b32.xlu1 %v1111_v60, %s590_s22 }
  0x69   :  { %364 = vrot.lane.b32.xlu0 %v1115_v61, %s590_s22 }
  0x6c   :  { %370 = vrot.lane.b32.xlu1 %v1131_v30, %s590_s22  ;;  %v1221_v30 = vmax.bf16 %v130_v49, %v128_v48 }
  0x6d   :  { %368 = vrot.lane.b32.xlu0 %v1135_v31, %s590_s22  ;;  %v124_v31 = vld [vmem:[%s1561_s0 + $0x1d0] sm:$0xf] }
  0x6e   :  { %v1195_v14 = vmax.bf16 %v126_v5, %v124_v31 }
  0x70   :  { %374 = vrot.lane.b32.xlu1 %v1151_v56, %s590_s22 }
  0x71   :  { %372 = vrot.lane.b32.xlu0 %v1155_v57, %s590_s22  ;;  %v131_v57 = vld [vmem:[%s1561_s0 + $0x1ec] sm:$0xf] }
  0x74   :  { %378 = vrot.lane.b32.xlu1 %v1171_v32, %s590_s22  ;;  %v1213_v32 = vmax.bf16 %v131_v57, %v129_v15  ;;  %v132_v57 = vld [vmem:[%s1561_s0 + $0x1f0] sm:$0xf]  ;;  %v134_v15 = vld [vmem:[%s1561_s0 + $0x1f8] sm:$0xf] }
  0x75   :  { %376 = vrot.lane.b32.xlu0 %v1175_v33, %s590_s22 }
  0x76   :  { %v269_v56 = vpop.permute.xlu1 %268 }
  0x77   :  { %v458_v31 = vmax.bf16 %v269_v56, %v610_v3  ;;  %v265_v5 = vpop.permute.xlu0 %264  ;;  %v133_v3 = vld [vmem:[%s1561_s0 + $0x1f4] sm:$0xf] }
  0x78   :  { %v456_v33 = vmax.bf16 %v265_v5, %v621_v7  ;;  %382 = vrot.lane.b32.xlu1 %v1191_v6, %s590_s22  ;;  %v135_v7 = vld [vmem:[%s1561_s0 + $0x1fc] sm:$0xf] }
  0x79   :  { %523 = vst.msk [vmem:[%s1562_s1 + $0x8] sm:$0xf] %vm520_vm0, %v458_v31  ;;  %380 = vrot.lane.b32.xlu0 %v1195_v14, %s590_s22  ;;  %v1243_v5 = vmax.bf16 %v135_v7, %v133_v3 }
  0x7a   :  { %521 = vst.msk [vmem:[%s1562_s1] sm:$0xf] %vm520_vm0, %v456_v33  ;;  %v271_v56 = vpop.permute.xlu1 %270  ;;  %v1251_v33 = vmax.bf16 %v134_v15, %v132_v57 }
  0x7b   :  { %v459_v48 = vmax.bf16 %v271_v56, %v631_v10  ;;  %v267_v49 = vpop.permute.xlu0 %266 }
  0x7c   :  { %v457_v31 = vmax.bf16 %v267_v49, %v635_v11  ;;  %386 = vrot.lane.b32.xlu1 %v1213_v32, %s590_s22 }
  0x7d   :  { %524 = vst.msk [vmem:[%s1562_s1 + $0xc] sm:$0xf] %vm520_vm0, %v459_v48  ;;  %384 = vrot.lane.b32.xlu0 %v1221_v30, %s590_s22 }
  0x7e   :  { %522 = vst.msk [vmem:[%s1562_s1 + $0x4] sm:$0xf] %vm520_vm0, %v457_v31  ;;  %v275_v10 = vpop.permute.xlu1 %274 }
  0x7f   :  { %v461_v11 = vmax.bf16 %v275_v10, %v651_v16  ;;  %v273_v3 = vpop.permute.xlu0 %272 }
  0x80   :  { %v460_v7 = vmax.bf16 %v273_v3, %v655_v17  ;;  %390 = vrot.lane.b32.xlu1 %v1243_v5, %s590_s22 }
  0x81   :  { %526 = vst.msk [vmem:[%s1562_s1 + $0x14] sm:$0xf] %vm520_vm0, %v461_v11  ;;  %388 = vrot.lane.b32.xlu0 %v1251_v33, %s590_s22 }
  0x82   :  { %525 = vst.msk [vmem:[%s1562_s1 + $0x10] sm:$0xf] %vm520_vm0, %v460_v7  ;;  %v279_v16 = vpop.permute.xlu1 %278 }
  0x83   :  { %v463_v56 = vmax.bf16 %v279_v16, %v671_v22  ;;  %v277_v17 = vpop.permute.xlu0 %276 }
  0x84   :  { %v462_v57 = vmax.bf16 %v277_v17, %v675_v23 }
  0x85   :  { %528 = vst.msk [vmem:[%s1562_s1 + $0x1c] sm:$0xf] %vm520_vm0, %v463_v56 }
  0x86   :  { %527 = vst.msk [vmem:[%s1562_s1 + $0x18] sm:$0xf] %vm520_vm0, %v462_v57  ;;  %v283_v15 = vpop.permute.xlu1 %282 }
  0x87   :  { %v465_v48 = vmax.bf16 %v283_v15, %v691_v28  ;;  %v281_v49 = vpop.permute.xlu0 %280 }
  0x88   :  { %v464_v31 = vmax.bf16 %v281_v49, %v695_v29 }
  0x89   :  { %530 = vst.msk [vmem:[%s1562_s1 + $0x24] sm:$0xf] %vm520_vm0, %v465_v48 }
  0x8a   :  { %529 = vst.msk [vmem:[%s1562_s1 + $0x20] sm:$0xf] %vm520_vm0, %v464_v31  ;;  %v287_v22 = vpop.permute.xlu1 %286 }
  0x8b   :  { %v467_v23 = vmax.bf16 %v287_v22, %v711_v34  ;;  %v285_v10 = vpop.permute.xlu0 %284 }
  0x8c   :  { %v466_v11 = vmax.bf16 %v285_v10, %v715_v35 }
  0x8d   :  { %532 = vst.msk [vmem:[%s1562_s1 + $0x2c] sm:$0xf] %vm520_vm0, %v467_v23 }
  0x8e   :  { %531 = vst.msk [vmem:[%s1562_s1 + $0x28] sm:$0xf] %vm520_vm0, %v466_v11  ;;  %v291_v28 = vpop.permute.xlu1 %290 }
  0x8f   :  { %v469_v29 = vmax.bf16 %v291_v28, %v731_v40  ;;  %v289_v3 = vpop.permute.xlu0 %288 }
  0x90   :  { %v468_v7 = vmax.bf16 %v289_v3, %v735_v41 }
  0x91   :  { %534 = vst.msk [vmem:[%s1562_s1 + $0x34] sm:$0xf] %vm520_vm0, %v469_v29 }
  0x92   :  { %533 = vst.msk [vmem:[%s1562_s1 + $0x30] sm:$0xf] %vm520_vm0, %v468_v7  ;;  %v295_v34 = vpop.permute.xlu1 %294 }
  0x93   :  { %v471_v35 = vmax.bf16 %v295_v34, %v751_v46  ;;  %v293_v16 = vpop.permute.xlu0 %292 }
  0x94   :  { %v470_v56 = vmax.bf16 %v293_v16, %v755_v47 }
  0x95   :  { %536 = vst.msk [vmem:[%s1562_s1 + $0x3c] sm:$0xf] %vm520_vm0, %v471_v35 }
  0x96   :  { %535 = vst.msk [vmem:[%s1562_s1 + $0x38] sm:$0xf] %vm520_vm0, %v470_v56  ;;  %v299_v40 = vpop.permute.xlu1 %298 }
  0x97   :  { %v473_v41 = vmax.bf16 %v299_v40, %v771_v52  ;;  %v297_v17 = vpop.permute.xlu0 %296 }
  0x98   :  { %v472_v57 = vmax.bf16 %v297_v17, %v775_v53 }
  0x99   :  { %538 = vst.msk [vmem:[%s1562_s1 + $0x44] sm:$0xf] %vm520_vm0, %v473_v41 }
  0x9a   :  { %537 = vst.msk [vmem:[%s1562_s1 + $0x40] sm:$0xf] %vm520_vm0, %v472_v57  ;;  %v303_v46 = vpop.permute.xlu1 %302 }
  0x9b   :  { %v475_v47 = vmax.bf16 %v303_v46, %v791_v58  ;;  %v301_v15 = vpop.permute.xlu0 %300 }
  0x9c   :  { %v474_v48 = vmax.bf16 %v301_v15, %v795_v59 }
  0x9d   :  { %540 = vst.msk [vmem:[%s1562_s1 + $0x4c] sm:$0xf] %vm520_vm0, %v475_v47 }
  0x9e   :  { %539 = vst.msk [vmem:[%s1562_s1 + $0x48] sm:$0xf] %vm520_vm0, %v474_v48  ;;  %v307_v52 = vpop.permute.xlu1 %306 }
  0x9f   :  { %v477_v53 = vmax.bf16 %v307_v52, %v811_v0  ;;  %v305_v49 = vpop.permute.xlu0 %304 }
  0xa0   :  { %v476_v31 = vmax.bf16 %v305_v49, %v815_v1 }
  0xa1   :  { %542 = vst.msk [vmem:[%s1562_s1 + $0x54] sm:$0xf] %vm520_vm0, %v477_v53 }
  0xa2   :  { %541 = vst.msk [vmem:[%s1562_s1 + $0x50] sm:$0xf] %vm520_vm0, %v476_v31  ;;  %v311_v58 = vpop.permute.xlu1 %310 }
  0xa3   :  { %v479_v59 = vmax.bf16 %v311_v58, %v831_v8  ;;  %v309_v22 = vpop.permute.xlu0 %308 }
  0xa4   :  { %v478_v23 = vmax.bf16 %v309_v22, %v835_v9 }
  0xa5   :  { %544 = vst.msk [vmem:[%s1562_s1 + $0x5c] sm:$0xf] %vm520_vm0, %v479_v59 }
  0xa6   :  { %543 = vst.msk [vmem:[%s1562_s1 + $0x58] sm:$0xf] %vm520_vm0, %v478_v23  ;;  %v315_v0 = vpop.permute.xlu1 %314 }
  0xa7   :  { %v481_v1 = vmax.bf16 %v315_v0, %v851_v18  ;;  %v313_v10 = vpop.permute.xlu0 %312 }
  0xa8   :  { %v480_v11 = vmax.bf16 %v313_v10, %v855_v19 }
  0xa9   :  { %546 = vst.msk [vmem:[%s1562_s1 + $0x64] sm:$0xf] %vm520_vm0, %v481_v1 }
  0xaa   :  { %545 = vst.msk [vmem:[%s1562_s1 + $0x60] sm:$0xf] %vm520_vm0, %v480_v11  ;;  %v319_v8 = vpop.permute.xlu1 %318 }
  0xab   :  { %v483_v9 = vmax.bf16 %v319_v8, %v871_v26  ;;  %v317_v28 = vpop.permute.xlu0 %316  ;;  %v1576_v8 = vld [vmem:[#allocation3_spill] sm:$0xff] }
  0xac   :  { %v482_v29 = vmax.bf16 %v317_v28, %v875_v27 }
  0xad   :  { %548 = vst.msk [vmem:[%s1562_s1 + $0x6c] sm:$0xf] %vm520_vm0, %v483_v9 }
  0xae   :  { %547 = vst.msk [vmem:[%s1562_s1 + $0x68] sm:$0xf] %vm520_vm0, %v482_v29  ;;  %v323_v18 = vpop.permute.xlu1 %322 }
  0xaf   :  { %v485_v19 = vmax.bf16 %v323_v18, %v891_v36  ;;  %v321_v3 = vpop.permute.xlu0 %320  ;;  %v1578_v18 = vld [vmem:[#allocation5_spill] sm:$0xff] }
  0xb0   :  { %v484_v7 = vmax.bf16 %v321_v3, %v895_v37 }
  0xb1   :  { %550 = vst.msk [vmem:[%s1562_s1 + $0x74] sm:$0xf] %vm520_vm0, %v485_v19 }
  0xb2   :  { %549 = vst.msk [vmem:[%s1562_s1 + $0x70] sm:$0xf] %vm520_vm0, %v484_v7  ;;  %v327_v26 = vpop.permute.xlu1 %326  ;;  %v1579_v7 = vld [vmem:[#allocation6_spill] sm:$0xff] }
  0xb3   :  { %v487_v27 = vmax.bf16 %v327_v26, %v911_v44  ;;  %v325_v34 = vpop.permute.xlu0 %324 }
  0xb4   :  { %v486_v35 = vmax.bf16 %v325_v34, %v915_v45  ;;  %v1580_v34 = vld [vmem:[#allocation7_spill] sm:$0xff] }
  0xb5   :  { %552 = vst.msk [vmem:[%s1562_s1 + $0x7c] sm:$0xf] %vm520_vm0, %v487_v27 }
  0xb6   :  { %551 = vst.msk [vmem:[%s1562_s1 + $0x78] sm:$0xf] %vm520_vm0, %v486_v35  ;;  %v331_v36 = vpop.permute.xlu1 %330 }
  0xb7   :  { %v489_v37 = vmax.bf16 %v331_v36, %v931_v54  ;;  %v329_v16 = vpop.permute.xlu0 %328 }
  0xb8   :  { %v488_v56 = vmax.bf16 %v329_v16, %v935_v55 }
  0xb9   :  { %554 = vst.msk [vmem:[%s1562_s1 + $0x84] sm:$0xf] %vm520_vm0, %v489_v37 }
  0xba   :  { %553 = vst.msk [vmem:[%s1562_s1 + $0x80] sm:$0xf] %vm520_vm0, %v488_v56  ;;  %v335_v44 = vpop.permute.xlu1 %334 }
  0xbb   :  { %v491_v45 = vmax.bf16 %v335_v44, %v951_v62  ;;  %v333_v40 = vpop.permute.xlu0 %332 }
  0xbc   :  { %v490_v41 = vmax.bf16 %v333_v40, %v955_v63 }
  0xbd   :  { %556 = vst.msk [vmem:[%s1562_s1 + $0x8c] sm:$0xf] %vm520_vm0, %v491_v45 }
  0xbe   :  { %555 = vst.msk [vmem:[%s1562_s1 + $0x88] sm:$0xf] %vm520_vm0, %v490_v41  ;;  %v339_v54 = vpop.permute.xlu1 %338 }
  0xbf   :  { %v493_v55 = vmax.bf16 %v339_v54, %v971_v12  ;;  %v337_v17 = vpop.permute.xlu0 %336 }
  0xc0   :  { %v492_v57 = vmax.bf16 %v337_v17, %v975_v13 }
  0xc1   :  { %558 = vst.msk [vmem:[%s1562_s1 + $0x94] sm:$0xf] %vm520_vm0, %v493_v55 }
  0xc2   :  { %557 = vst.msk [vmem:[%s1562_s1 + $0x90] sm:$0xf] %vm520_vm0, %v492_v57  ;;  %v343_v62 = vpop.permute.xlu1 %342 }
  0xc3   :  { %v495_v63 = vmax.bf16 %v343_v62, %v991_v24  ;;  %v341_v46 = vpop.permute.xlu0 %340 }
  0xc4   :  { %v494_v47 = vmax.bf16 %v341_v46, %v995_v25 }
  0xc5   :  { %560 = vst.msk [vmem:[%s1562_s1 + $0x9c] sm:$0xf] %vm520_vm0, %v495_v63 }
  0xc6   :  { %559 = vst.msk [vmem:[%s1562_s1 + $0x98] sm:$0xf] %vm520_vm0, %v494_v47  ;;  %v347_v12 = vpop.permute.xlu1 %346 }
  0xc7   :  { %v497_v13 = vmax.bf16 %v347_v12, %v1011_v38  ;;  %v345_v15 = vpop.permute.xlu0 %344 }
  0xc8   :  { %v496_v48 = vmax.bf16 %v345_v15, %v1015_v39 }
  0xc9   :  { %562 = vst.msk [vmem:[%s1562_s1 + $0xa4] sm:$0xf] %vm520_vm0, %v497_v13 }
  0xca   :  { %561 = vst.msk [vmem:[%s1562_s1 + $0xa0] sm:$0xf] %vm520_vm0, %v496_v48  ;;  %v351_v24 = vpop.permute.xlu1 %350 }
  0xcb   :  { %v499_v25 = vmax.bf16 %v351_v24, %v1031_v50  ;;  %v349_v52 = vpop.permute.xlu0 %348 }
  0xcc   :  { %v498_v53 = vmax.bf16 %v349_v52, %v1035_v51 }
  0xcd   :  { %564 = vst.msk [vmem:[%s1562_s1 + $0xac] sm:$0xf] %vm520_vm0, %v499_v25 }
  0xce   :  { %563 = vst.msk [vmem:[%s1562_s1 + $0xa8] sm:$0xf] %vm520_vm0, %v498_v53  ;;  %v355_v38 = vpop.permute.xlu1 %354 }
  0xcf   :  { %v501_v39 = vmax.bf16 %v355_v38, %v1051_v2  ;;  %v353_v49 = vpop.permute.xlu0 %352 }
  0xd0   :  { %v500_v31 = vmax.bf16 %v353_v49, %v1055_v4 }
  0xd1   :  { %566 = vst.msk [vmem:[%s1562_s1 + $0xb4] sm:$0xf] %vm520_vm0, %v501_v39 }
  0xd2   :  { %565 = vst.msk [vmem:[%s1562_s1 + $0xb0] sm:$0xf] %vm520_vm0, %v500_v31  ;;  %v359_v50 = vpop.permute.xlu1 %358 }
  0xd3   :  { %v503_v51 = vmax.bf16 %v359_v50, %v1071_v20  ;;  %v357_v58 = vpop.permute.xlu0 %356 }
  0xd4   :  { %v502_v59 = vmax.bf16 %v357_v58, %v1075_v21 }
  0xd5   :  { %568 = vst.msk [vmem:[%s1562_s1 + $0xbc] sm:$0xf] %vm520_vm0, %v503_v51 }
  0xd6   :  { %567 = vst.msk [vmem:[%s1562_s1 + $0xb8] sm:$0xf] %vm520_vm0, %v502_v59  ;;  %v363_v2 = vpop.permute.xlu1 %362 }
  0xd7   :  { %v505_v4 = vmax.bf16 %v363_v2, %v1091_v42  ;;  %v361_v22 = vpop.permute.xlu0 %360 }
  0xd8   :  { %v504_v23 = vmax.bf16 %v361_v22, %v1095_v43  ;;  %v1575_v43 = vld [vmem:[#allocation2_spill] sm:$0xff] }
  0xd9   :  { %570 = vst.msk [vmem:[%s1562_s1 + $0xc4] sm:$0xf] %vm520_vm0, %v505_v4 }
  0xda   :  { %569 = vst.msk [vmem:[%s1562_s1 + $0xc0] sm:$0xf] %vm520_vm0, %v504_v23  ;;  %v367_v20 = vpop.permute.xlu1 %366 }
  0xdb   :  { %v507_v21 = vmax.bf16 %v367_v20, %v1111_v60  ;;  %v365_v0 = vpop.permute.xlu0 %364 }
  0xdc   :  { %v506_v1 = vmax.bf16 %v365_v0, %v1115_v61  ;;  %v1577_v61 = vld [vmem:[#allocation4_spill] sm:$0xff] }
  0xdd   :  { %572 = vst.msk [vmem:[%s1562_s1 + $0xcc] sm:$0xf] %vm520_vm0, %v507_v21 }
  0xde   :  { %571 = vst.msk [vmem:[%s1562_s1 + $0xc8] sm:$0xf] %vm520_vm0, %v506_v1  ;;  %v371_v42 = vpop.permute.xlu1 %370 }
  0xdf   :  { %v509_v10 = vmax.bf16 %v371_v42, %v1575_v43  ;;  %v369_v11 = vpop.permute.xlu0 %368 }
  0xe0   :  { %v508_v9 = vmax.bf16 %v369_v11, %v1576_v8 }
  0xe1   :  { %574 = vst.msk [vmem:[%s1562_s1 + $0xd4] sm:$0xf] %vm520_vm0, %v509_v10 }
  0xe2   :  { %573 = vst.msk [vmem:[%s1562_s1 + $0xd0] sm:$0xf] %vm520_vm0, %v508_v9  ;;  %v375_v60 = vpop.permute.xlu1 %374 }
  0xe3   :  { %v511_v28 = vmax.bf16 %v375_v60, %v1577_v61  ;;  %v373_v29 = vpop.permute.xlu0 %372 }
  0xe4   :  { %v510_v19 = vmax.bf16 %v373_v29, %v1578_v18 }
  0xe5   :  { %576 = vst.msk [vmem:[%s1562_s1 + $0xdc] sm:$0xf] %vm520_vm0, %v511_v28 }
  0xe6   :  { %575 = vst.msk [vmem:[%s1562_s1 + $0xd8] sm:$0xf] %vm520_vm0, %v510_v19  ;;  %v379_v3 = vpop.permute.xlu1 %378 }
  0xe7   :  { %v513_v26 = vmax.bf16 %v379_v3, %v1579_v7  ;;  %v377_v27 = vpop.permute.xlu0 %376 }
  0xe8   :  { %v512_v35 = vmax.bf16 %v377_v27, %v1580_v34 }
  0xe9   :  { %578 = vst.msk [vmem:[%s1562_s1 + $0xe4] sm:$0xf] %vm520_vm0, %v513_v26 }
  0xea   :  { %577 = vst.msk [vmem:[%s1562_s1 + $0xe0] sm:$0xf] %vm520_vm0, %v512_v35  ;;  %v383_v36 = vpop.permute.xlu1 %382 }
  0xeb   :  { %v515_v37 = vmax.bf16 %v383_v36, %v1191_v6  ;;  %v381_v16 = vpop.permute.xlu0 %380 }
  0xec   :  { %v514_v56 = vmax.bf16 %v381_v16, %v1195_v14 }
  0xed   :  { %580 = vst.msk [vmem:[%s1562_s1 + $0xec] sm:$0xf] %vm520_vm0, %v515_v37 }
  0xee   :  { %579 = vst.msk [vmem:[%s1562_s1 + $0xe8] sm:$0xf] %vm520_vm0, %v514_v56  ;;  %v387_v44 = vpop.permute.xlu1 %386 }
  0xef   :  { %v517_v45 = vmax.bf16 %v387_v44, %v1213_v32  ;;  %v385_v40 = vpop.permute.xlu0 %384 }
  0xf0   :  { %v516_v41 = vmax.bf16 %v385_v40, %v1221_v30 }
  0xf1   :  { %582 = vst.msk [vmem:[%s1562_s1 + $0xf4] sm:$0xf] %vm520_vm0, %v517_v45 }
  0xf2   :  { %581 = vst.msk [vmem:[%s1562_s1 + $0xf0] sm:$0xf] %vm520_vm0, %v516_v41  ;;  %v391_v6 = vpop.permute.xlu1 %390 }
  0xf3   :  { %v519_v14 = vmax.bf16 %v391_v6, %v1243_v5  ;;  %v389_v54 = vpop.permute.xlu0 %388 }
  0xf4   :  { %v518_v55 = vmax.bf16 %v389_v54, %v1251_v33 }
  0xf5   :  { %584 = vst.msk [vmem:[%s1562_s1 + $0xfc] sm:$0xf] %vm520_vm0, %v519_v14 }
  0xf6   :  { %583 = vst.msk [vmem:[%s1562_s1 + $0xf8] sm:$0xf] %vm520_vm0, %v518_v55 }

// kernel: forward.8
= control target key start
LH: loop header
LB: loop body
LE: loop exit
PB: predicated region body
PF: predicated region fallthrough
CT: control target
= control target key end

     0   :  { %9 = vsyncpa [#allocation3], 0  ;;  %s7527_s0 = inlined_call_operand.vmem [shape: bf16[2048,128], index: 0, kind: input, shape index: {}]   ;;  %s7528_s1 = inlined_call_operand.vmem [shape: bf16[128,32], index: 1, kind: input, shape index: {}]   ;;  %s7529_s2 = inlined_call_operand.hbm [shape: f32[1,32], index: 2, kind: input, shape index: {}]   ;;  %s7530_s3 = inlined_call_operand.hbm [shape: f32[1,32], index: 3, kind: input, shape index: {}]   ;;  %s7531_s4 = inlined_call_operand.vmem [shape: bf16[2048,32], index: 4, kind: output, shape index: {}]  }
   0x1   :  { %10 = vsyncpa [#allocation5], 0  ;;  %s5520_s15 = smov [#allocation2]   ;;  %s5521_s17 = smov [#allocation4]  }
   0x2   :  { %s21_s16 = sshll.u32 %s5520_s15, 4  ;;  %s31_s18 = sshll.u32 %s5521_s17, 4  ;;  %s22_s16 = int_to_ptr.vmem [resolvable:$true] %s21_s16  ;;  %s32_s18 = int_to_ptr.vmem [resolvable:$true] %s31_s18 }
   0x3   :  { %s5472_s21 = scalar_lea.hbm %s7529_s2, 16 }
   0x4   :  { %p5473_p0 = scmp.ne.s32.totalorder %s7529_s2, %s5472_s21  ;;  %p5476_p1 = scmp.lt.u32.totalorder %s5472_s21, %s7529_s2 }
   0x6   :  { %p5478_p2 = pnand %p5476_p1, %p5473_p0 }
   0x8   :  { %5481 = shalt.err (!%p5478_p2)
}
   0x9   :  { %s5482_s26 = scalar_lea.vmem %s22_s16, 16  ;;  %s5486_s27 = scalar_lea.vmem %s22_s16, 32 }
   0xa   :  { %p5483_p3 = scmp.ne.s32.totalorder %s22_s16, %s5482_s26  ;;  %p5487_p4 = scmp.lt.s32.totalorder %s22_s16, %s22_s16 }
   0xb   :  { %p5488_p5 = scmp.lt.s32.totalorder %s5486_s27, %s5482_s26 }
   0xd   :  { %p5489_p6 = por %p5488_p5, %p5487_p4 }
   0xf   :  { %p5490_p7 = pnand %p5489_p6, %p5483_p3 }
  0x11   :  { %5493 = shalt.err (!%p5490_p7)
}
  0x12   :  { %24 = dma.hbm_to_vmem [thread:$0]  %s7529_s2, 16, %s22_s16, [#allocation3]  }
  0x13   :  { %s5494_s6 = scalar_lea.hbm %s7530_s3, 16 }
  0x14   :  { %p5495_p8 = scmp.ne.s32.totalorder %s7530_s3, %s5494_s6  ;;  %p5498_p9 = scmp.lt.u32.totalorder %s5494_s6, %s7530_s3 }
  0x16   :  { %p5500_p10 = pnand %p5498_p9, %p5495_p8 }
  0x18   :  { %5503 = shalt.err (!%p5500_p10)
}
  0x19   :  { %s5504_s11 = scalar_lea.vmem %s32_s18, 16  ;;  %s5508_s12 = scalar_lea.vmem %s32_s18, 32 }
  0x1a   :  { %p5505_p11 = scmp.ne.s32.totalorder %s32_s18, %s5504_s11  ;;  %p5509_p12 = scmp.lt.s32.totalorder %s32_s18, %s32_s18 }
  0x1b   :  { %p5510_p13 = scmp.lt.s32.totalorder %s5508_s12, %s5504_s11 }
  0x1d   :  { %p5511_p0 = por %p5510_p13, %p5509_p12 }
  0x1f   :  { %p5512_p1 = pnand %p5511_p0, %p5505_p11 }
  0x21   :  { %5515 = shalt.err (!%p5512_p1)
}
  0x22   :  { %34 = dma.hbm_to_vmem [thread:$0]  %s7530_s3, 16, %s32_s18, [#allocation5]  }
  0x23   :  { %5516 = dma.done.wait [#allocation3], 16  }
  0x24   :  { %5517 = vsyncadd [#allocation3], 4294967280 }
  0x25   :  { %5518 = dma.done.wait [#allocation5], 16  }
  0x26   :  { %5519 = vsyncadd [#allocation5], 4294967280  ;;  %v5332_v0 = vld [vmem:[%s7528_s1] sm:$0xff]   ;;  %v5333_v1 = vld [vmem:[%s7528_s1 + $0x8] sm:$0xff]   ;;  %vm3993_vm0 = vcmask 257024  }
  0x27   :  { %5042 = vmatprep.subr.bf16.mxu0 %v5332_v0  ;;  %5314 = vmatprep.subr.bf16.mxu1 %v5332_v0  ;;  %v5334_v2 = vld [vmem:[%s7528_s1 + $0x10] sm:$0xff]   ;;  %v5335_v3 = vld [vmem:[%s7528_s1 + $0x18] sm:$0xff]   ;;  %v5340_v4 = vld [vmem:[%s7527_s0] sm:$0xff]  }
  0x28   :  { %5043 = vmatpush3.bf16.msra.mxu0 %v5332_v0  ;;  %5322 = vmatpush3.bf16.msra.mxu1 %v5332_v0  ;;  %v5341_v5 = vld [vmem:[%s7527_s0 + $0x200] sm:$0xff]   ;;  %v5337_v7 = vld [vmem:[%s7528_s1 + $0x28] sm:$0xff]   ;;  %v5338_v8 = vld [vmem:[%s7528_s1 + $0x30] sm:$0xff]  }
  0x29   :  { %5044 = vmatprep.subr.bf16.mxu0 %v5333_v1  ;;  %5315 = vmatprep.subr.bf16.mxu1 %v5333_v1  ;;  %v5336_v6 = vld [vmem:[%s7528_s1 + $0x20] sm:$0xff]   ;;  %v5339_v9 = vld [vmem:[%s7528_s1 + $0x38] sm:$0xff]   ;;  %v5342_v10 = vld [vmem:[%s7527_s0 + $0x8] sm:$0xff]  }
  0x2a   :  { %5058 = vmatprep.mubr.bf16.mxu0 %v5340_v4  ;;  %5186 = vmatprep.mubr.bf16.mxu1 %v5341_v5  ;;  %v5343_v11 = vld [vmem:[%s7527_s0 + $0x208] sm:$0xff]   ;;  %v5344_v12 = vld [vmem:[%s7527_s0 + $0x10] sm:$0xff]   ;;  %v5346_v14 = vld [vmem:[%s7527_s0 + $0x18] sm:$0xff]  }
  0x2b   :  { %v5345_v13 = vld [vmem:[%s7527_s0 + $0x210] sm:$0xff]   ;;  %v5347_v15 = vld [vmem:[%s7527_s0 + $0x218] sm:$0xff]   ;;  %v5348_v16 = vld [vmem:[%s7527_s0 + $0x20] sm:$0xff]  }
  0x2c   :  { %5045 = vmatpush3.bf16.msra.mxu0 %v5333_v1  ;;  %5323 = vmatpush3.bf16.msra.mxu1 %v5333_v1  ;;  %v5349_v17 = vld [vmem:[%s7527_s0 + $0x220] sm:$0xff]   ;;  %v5350_v18 = vld [vmem:[%s7527_s0 + $0x28] sm:$0xff]   ;;  %v5352_v20 = vld [vmem:[%s7527_s0 + $0x30] sm:$0xff]  }
  0x2d   :  { %5046 = vmatprep.subr.bf16.mxu0 %v5334_v2  ;;  %5316 = vmatprep.subr.bf16.mxu1 %v5334_v2  ;;  %v5351_v19 = vld [vmem:[%s7527_s0 + $0x228] sm:$0xff]   ;;  %v5353_v21 = vld [vmem:[%s7527_s0 + $0x230] sm:$0xff]   ;;  %v5354_v22 = vld [vmem:[%s7527_s0 + $0x38] sm:$0xff]  }
  0x2e   :  { %v5355_v23 = vld [vmem:[%s7527_s0 + $0x238] sm:$0xff]   ;;  %v5356_v24 = vld [vmem:[%s7527_s0 + $0x40] sm:$0xff]   ;;  %v5358_v26 = vld [vmem:[%s7527_s0 + $0x48] sm:$0xff]  }
  0x2f   :  { %v5357_v25 = vld [vmem:[%s7527_s0 + $0x240] sm:$0xff]   ;;  %v5359_v27 = vld [vmem:[%s7527_s0 + $0x248] sm:$0xff]   ;;  %v5360_v28 = vld [vmem:[%s7527_s0 + $0x50] sm:$0xff]  }
  0x30   :  { %5047 = vmatpush3.bf16.msra.mxu0 %v5334_v2  ;;  %5324 = vmatpush3.bf16.msra.mxu1 %v5334_v2  ;;  %v5361_v29 = vld [vmem:[%s7527_s0 + $0x250] sm:$0xff]   ;;  %v5362_v30 = vld [vmem:[%s7527_s0 + $0x58] sm:$0xff]   ;;  %v5364_v32 = vld [vmem:[%s7527_s0 + $0x60] sm:$0xff]  }
  0x31   :  { %5048 = vmatprep.subr.bf16.mxu0 %v5335_v3  ;;  %5317 = vmatprep.subr.bf16.mxu1 %v5335_v3  ;;  %v5363_v31 = vld [vmem:[%s7527_s0 + $0x258] sm:$0xff]   ;;  %v5365_v33 = vld [vmem:[%s7527_s0 + $0x260] sm:$0xff]   ;;  %v5366_v34 = vld [vmem:[%s7527_s0 + $0x68] sm:$0xff]  }
  0x32   :  { %v5367_v35 = vld [vmem:[%s7527_s0 + $0x268] sm:$0xff]   ;;  %v5368_v36 = vld [vmem:[%s7527_s0 + $0x70] sm:$0xff]   ;;  %v5370_v38 = vld [vmem:[%s7527_s0 + $0x78] sm:$0xff]  }
  0x33   :  { %v5369_v37 = vld [vmem:[%s7527_s0 + $0x270] sm:$0xff]   ;;  %v5371_v39 = vld [vmem:[%s7527_s0 + $0x278] sm:$0xff]   ;;  %v5372_v40 = vld [vmem:[%s7527_s0 + $0x80] sm:$0xff]  }
  0x34   :  { %5049 = vmatpush3.bf16.msra.mxu0 %v5335_v3  ;;  %5325 = vmatpush3.bf16.msra.mxu1 %v5335_v3  ;;  %v5373_v41 = vld [vmem:[%s7527_s0 + $0x280] sm:$0xff]   ;;  %v5374_v42 = vld [vmem:[%s7527_s0 + $0x88] sm:$0xff]   ;;  %v5376_v44 = vld [vmem:[%s7527_s0 + $0x90] sm:$0xff]  }
  0x35   :  { %5050 = vmatprep.subr.bf16.mxu0 %v5336_v6  ;;  %5318 = vmatprep.subr.bf16.mxu1 %v5336_v6  ;;  %v5375_v43 = vld [vmem:[%s7527_s0 + $0x288] sm:$0xff]   ;;  %v5377_v45 = vld [vmem:[%s7527_s0 + $0x290] sm:$0xff]   ;;  %v5378_v46 = vld [vmem:[%s7527_s0 + $0x98] sm:$0xff]  }
  0x36   :  { %v5379_v47 = vld [vmem:[%s7527_s0 + $0x298] sm:$0xff]   ;;  %v5380_v48 = vld [vmem:[%s7527_s0 + $0xa0] sm:$0xff]   ;;  %v5382_v50 = vld [vmem:[%s7527_s0 + $0xa8] sm:$0xff]  }
  0x37   :  { %v5381_v49 = vld [vmem:[%s7527_s0 + $0x2a0] sm:$0xff]   ;;  %v5383_v51 = vld [vmem:[%s7527_s0 + $0x2a8] sm:$0xff]   ;;  %v5384_v52 = vld [vmem:[%s7527_s0 + $0xb0] sm:$0xff]  }
  0x38   :  { %5051 = vmatpush3.bf16.msra.mxu0 %v5336_v6  ;;  %5326 = vmatpush3.bf16.msra.mxu1 %v5336_v6  ;;  %v5385_v53 = vld [vmem:[%s7527_s0 + $0x2b0] sm:$0xff]   ;;  %v5386_v54 = vld [vmem:[%s7527_s0 + $0xb8] sm:$0xff]   ;;  %v5388_v56 = vld [vmem:[%s7527_s0 + $0xc0] sm:$0xff]  }
  0x39   :  { %5052 = vmatprep.subr.bf16.mxu0 %v5337_v7  ;;  %5319 = vmatprep.subr.bf16.mxu1 %v5337_v7  ;;  %v5387_v55 = vld [vmem:[%s7527_s0 + $0x2b8] sm:$0xff]   ;;  %v5389_v57 = vld [vmem:[%s7527_s0 + $0x2c0] sm:$0xff]   ;;  %v5390_v58 = vld [vmem:[%s7527_s0 + $0xc8] sm:$0xff]  }
  0x3a   :  { %v5391_v59 = vld [vmem:[%s7527_s0 + $0x2c8] sm:$0xff]   ;;  %v5392_v60 = vld [vmem:[%s7527_s0 + $0xd0] sm:$0xff]   ;;  %v5394_v62 = vld [vmem:[%s7527_s0 + $0xd8] sm:$0xff]  }
  0x3b   :  { %v5393_v61 = vld [vmem:[%s7527_s0 + $0x2d0] sm:$0xff]   ;;  %v5395_v63 = vld [vmem:[%s7527_s0 + $0x2d8] sm:$0xff]   ;;  %v5396_v0 = vld [vmem:[%s7527_s0 + $0xe0] sm:$0xff]  }
  0x3c   :  { %5053 = vmatpush3.bf16.msra.mxu0 %v5337_v7  ;;  %5327 = vmatpush3.bf16.msra.mxu1 %v5337_v7  ;;  %v5397_v1 = vld [vmem:[%s7527_s0 + $0x2e0] sm:$0xff]   ;;  %v5398_v2 = vld [vmem:[%s7527_s0 + $0xe8] sm:$0xff]   ;;  %v5400_v4 = vld [vmem:[%s7527_s0 + $0xf0] sm:$0xff]  }
  0x3d   :  { %5054 = vmatprep.subr.bf16.mxu0 %v5338_v8  ;;  %5320 = vmatprep.subr.bf16.mxu1 %v5338_v8  ;;  %v5399_v3 = vld [vmem:[%s7527_s0 + $0x2e8] sm:$0xff]   ;;  %v5401_v5 = vld [vmem:[%s7527_s0 + $0x2f0] sm:$0xff]   ;;  %v5402_v6 = vld [vmem:[%s7527_s0 + $0xf8] sm:$0xff]  }
  0x3e   :  { %v5403_v7 = vld [vmem:[%s7527_s0 + $0x2f8] sm:$0xff]  }
  0x40   :  { %5055 = vmatpush3.bf16.msra.mxu0 %v5338_v8  ;;  %5328 = vmatpush3.bf16.msra.mxu1 %v5338_v8  ;;  %v5404_v8 = vld [vmem:[%s7527_s0 + $0x100] sm:$0xff]  }
  0x41   :  { %5056 = vmatprep.subr.bf16.mxu0 %v5339_v9  ;;  %5321 = vmatprep.subr.bf16.mxu1 %v5339_v9 }
  0x44   :  { %5057 = vmatpush3.bf16.msra.mxu0 %v5339_v9  ;;  %5329 = vmatpush3.bf16.msra.mxu1 %v5339_v9  ;;  %v5405_v9 = vld [vmem:[%s7527_s0 + $0x300] sm:$0xff]  }
  0x47   :  { %5059 = vmatmul.mubr.bf16.vlgmr.msra.gmra.mrb[0].mxu0 %v5342_v10  ;;  %5187 = vmatmul.mubr.bf16.vlgmr.msra.gmra.mrb[0].mxu1 %v5343_v11  ;;  %v5406_v10 = vld [vmem:[%s7527_s0 + $0x108] sm:$0xff]  }
  0x48   :  { %5062 = vmatprep.mubr.bf16.mxu0 %v5344_v12  ;;  %5190 = vmatprep.mubr.bf16.mxu1 %v5345_v13  ;;  %v5407_v11 = vld [vmem:[%s7527_s0 + $0x308] sm:$0xff]   ;;  %v5408_v12 = vld [vmem:[%s7527_s0 + $0x110] sm:$0xff]  }
  0x49   :  { %v5409_v13 = vld [vmem:[%s7527_s0 + $0x310] sm:$0xff]  }
  0x4f   :  { %5063 = vmatmul.mubr.bf16.gmra.mrb[4].mxu0 %v5346_v14  ;;  %5191 = vmatmul.mubr.bf16.gmra.mrb[4].mxu1 %v5347_v15  ;;  %v5410_v14 = vld [vmem:[%s7527_s0 + $0x118] sm:$0xff]  }
  0x50   :  { %5066 = vmatprep.mubr.bf16.mxu0 %v5348_v16  ;;  %5194 = vmatprep.mubr.bf16.mxu1 %v5349_v17  ;;  %v5411_v15 = vld [vmem:[%s7527_s0 + $0x318] sm:$0xff]   ;;  %v5412_v16 = vld [vmem:[%s7527_s0 + $0x120] sm:$0xff]  }
  0x51   :  { %v5413_v17 = vld [vmem:[%s7527_s0 + $0x320] sm:$0xff]  }
  0x57   :  { %5067 = vmatmul.mubr.bf16.gmra.mrb[8].mxu0 %v5350_v18  ;;  %5195 = vmatmul.mubr.bf16.gmra.mrb[8].mxu1 %v5351_v19  ;;  %v5414_v18 = vld [vmem:[%s7527_s0 + $0x128] sm:$0xff]  }
  0x58   :  { %5070 = vmatprep.mubr.bf16.mxu0 %v5352_v20  ;;  %5198 = vmatprep.mubr.bf16.mxu1 %v5353_v21  ;;  %v5415_v19 = vld [vmem:[%s7527_s0 + $0x328] sm:$0xff]   ;;  %v5416_v20 = vld [vmem:[%s7527_s0 + $0x130] sm:$0xff]  }
  0x59   :  { %v5417_v21 = vld [vmem:[%s7527_s0 + $0x330] sm:$0xff]  }
  0x5f   :  { %5071 = vmatmul.mubr.bf16.gmra.mrb[12].mxu0 %v5354_v22  ;;  %5199 = vmatmul.mubr.bf16.gmra.mrb[12].mxu1 %v5355_v23  ;;  %v5418_v22 = vld [vmem:[%s7527_s0 + $0x138] sm:$0xff]  }
  0x60   :  { %5074 = vmatprep.mubr.bf16.mxu0 %v5356_v24  ;;  %5202 = vmatprep.mubr.bf16.mxu1 %v5357_v25  ;;  %v5419_v23 = vld [vmem:[%s7527_s0 + $0x338] sm:$0xff]   ;;  %v5420_v24 = vld [vmem:[%s7527_s0 + $0x140] sm:$0xff]  }
  0x61   :  { %v5421_v25 = vld [vmem:[%s7527_s0 + $0x340] sm:$0xff]  }
  0x67   :  { %5075 = vmatmul.mubr.bf16.gmra.mrb[16].mxu0 %v5358_v26  ;;  %5203 = vmatmul.mubr.bf16.gmra.mrb[16].mxu1 %v5359_v27  ;;  %v5422_v26 = vld [vmem:[%s7527_s0 + $0x148] sm:$0xff]  }
  0x68   :  { %5078 = vmatprep.mubr.bf16.mxu0 %v5360_v28  ;;  %5206 = vmatprep.mubr.bf16.mxu1 %v5361_v29  ;;  %v5423_v27 = vld [vmem:[%s7527_s0 + $0x348] sm:$0xff]   ;;  %v5424_v28 = vld [vmem:[%s7527_s0 + $0x150] sm:$0xff]  }
  0x69   :  { %v5425_v29 = vld [vmem:[%s7527_s0 + $0x350] sm:$0xff]  }
  0x6f   :  { %5079 = vmatmul.mubr.bf16.gmra.mrb[20].mxu0 %v5362_v30  ;;  %5207 = vmatmul.mubr.bf16.gmra.mrb[20].mxu1 %v5363_v31  ;;  %v5426_v30 = vld [vmem:[%s7527_s0 + $0x158] sm:$0xff]  }
  0x70   :  { %5082 = vmatprep.mubr.bf16.mxu0 %v5364_v32  ;;  %5210 = vmatprep.mubr.bf16.mxu1 %v5365_v33  ;;  %v5427_v31 = vld [vmem:[%s7527_s0 + $0x358] sm:$0xff]   ;;  %v5428_v32 = vld [vmem:[%s7527_s0 + $0x160] sm:$0xff]  }
  0x71   :  { %v5429_v33 = vld [vmem:[%s7527_s0 + $0x360] sm:$0xff]  }
  0x77   :  { %5083 = vmatmul.mubr.bf16.gmra.mrb[24].mxu0 %v5366_v34  ;;  %5211 = vmatmul.mubr.bf16.gmra.mrb[24].mxu1 %v5367_v35  ;;  %v5430_v34 = vld [vmem:[%s7527_s0 + $0x168] sm:$0xff]  }
  0x78   :  { %5086 = vmatprep.mubr.bf16.mxu0 %v5368_v36  ;;  %5214 = vmatprep.mubr.bf16.mxu1 %v5369_v37  ;;  %v5431_v35 = vld [vmem:[%s7527_s0 + $0x368] sm:$0xff]   ;;  %v5432_v36 = vld [vmem:[%s7527_s0 + $0x170] sm:$0xff]  }
  0x79   :  { %v5433_v37 = vld [vmem:[%s7527_s0 + $0x370] sm:$0xff]  }
  0x7f   :  { %5087 = vmatmul.mubr.bf16.gmra.mrb[28].mxu0 %v5370_v38  ;;  %5215 = vmatmul.mubr.bf16.gmra.mrb[28].mxu1 %v5371_v39  ;;  %v5434_v38 = vld [vmem:[%s7527_s0 + $0x178] sm:$0xff]  }
  0x80   :  { %5090 = vmatprep.mubr.bf16.mxu0 %v5372_v40  ;;  %5218 = vmatprep.mubr.bf16.mxu1 %v5373_v41  ;;  %v5435_v39 = vld [vmem:[%s7527_s0 + $0x378] sm:$0xff]   ;;  %v5436_v40 = vld [vmem:[%s7527_s0 + $0x180] sm:$0xff]  }
  0x81   :  { %v5437_v41 = vld [vmem:[%s7527_s0 + $0x380] sm:$0xff]  }
  0x87   :  { %5091 = vmatmul.mubr.bf16.gmra.mrb[32].mxu0 %v5374_v42  ;;  %5219 = vmatmul.mubr.bf16.gmra.mrb[32].mxu1 %v5375_v43  ;;  %v5438_v42 = vld [vmem:[%s7527_s0 + $0x188] sm:$0xff]  }
  0x88   :  { %5094 = vmatprep.mubr.bf16.mxu0 %v5376_v44  ;;  %5222 = vmatprep.mubr.bf16.mxu1 %v5377_v45  ;;  %v5439_v43 = vld [vmem:[%s7527_s0 + $0x388] sm:$0xff]   ;;  %v5440_v44 = vld [vmem:[%s7527_s0 + $0x190] sm:$0xff]  }
  0x89   :  { %v5441_v45 = vld [vmem:[%s7527_s0 + $0x390] sm:$0xff]  }
  0x8f   :  { %5095 = vmatmul.mubr.bf16.gmra.mrb[36].mxu0 %v5378_v46  ;;  %5223 = vmatmul.mubr.bf16.gmra.mrb[36].mxu1 %v5379_v47  ;;  %v5442_v46 = vld [vmem:[%s7527_s0 + $0x198] sm:$0xff]  }
  0x90   :  { %5098 = vmatprep.mubr.bf16.mxu0 %v5380_v48  ;;  %5226 = vmatprep.mubr.bf16.mxu1 %v5381_v49  ;;  %v5443_v47 = vld [vmem:[%s7527_s0 + $0x398] sm:$0xff]   ;;  %v5444_v48 = vld [vmem:[%s7527_s0 + $0x1a0] sm:$0xff]  }
  0x91   :  { %v5445_v49 = vld [vmem:[%s7527_s0 + $0x3a0] sm:$0xff]  }
  0x97   :  { %5099 = vmatmul.mubr.bf16.gmra.mrb[40].mxu0 %v5382_v50  ;;  %5227 = vmatmul.mubr.bf16.gmra.mrb[40].mxu1 %v5383_v51  ;;  %v5446_v50 = vld [vmem:[%s7527_s0 + $0x1a8] sm:$0xff]  }
  0x98   :  { %5102 = vmatprep.mubr.bf16.mxu0 %v5384_v52  ;;  %5230 = vmatprep.mubr.bf16.mxu1 %v5385_v53  ;;  %v5447_v51 = vld [vmem:[%s7527_s0 + $0x3a8] sm:$0xff]   ;;  %v5448_v52 = vld [vmem:[%s7527_s0 + $0x1b0] sm:$0xff]  }
  0x99   :  { %v5449_v53 = vld [vmem:[%s7527_s0 + $0x3b0] sm:$0xff]  }
  0x9f   :  { %5103 = vmatmul.mubr.bf16.gmra.mrb[44].mxu0 %v5386_v54  ;;  %5231 = vmatmul.mubr.bf16.gmra.mrb[44].mxu1 %v5387_v55  ;;  %v5925_v54 = vld [vmem:[#allocation2] ss:$0 sm:$0xff] }
  0xa0   :  { %5106 = vmatprep.mubr.bf16.mxu0 %v5388_v56  ;;  %5234 = vmatprep.mubr.bf16.mxu1 %v5389_v57  ;;  %v5927_v56 = vld [vmem:[#allocation4] ss:$0 sm:$0xff] }
  0xa7   :  { %5107 = vmatmul.mubr.bf16.gmra.mrb[48].mxu0 %v5390_v58  ;;  %5235 = vmatmul.mubr.bf16.gmra.mrb[48].mxu1 %v5391_v59 }
  0xa8   :  { %5110 = vmatprep.mubr.bf16.mxu0 %v5392_v60  ;;  %5238 = vmatprep.mubr.bf16.mxu1 %v5393_v61 }
  0xaf   :  { %5111 = vmatmul.mubr.bf16.gmra.mrb[52].mxu0 %v5394_v62  ;;  %5239 = vmatmul.mubr.bf16.gmra.mrb[52].mxu1 %v5395_v63  ;;  %v5450_v62 = vld [vmem:[%s7527_s0 + $0x1b8] sm:$0xff]  }
  0xb0   :  { %5114 = vmatprep.mubr.bf16.mxu0 %v5396_v0  ;;  %5242 = vmatprep.mubr.bf16.mxu1 %v5397_v1  ;;  %v5451_v63 = vld [vmem:[%s7527_s0 + $0x3b8] sm:$0xff]  }
  0xb7   :  { %5115 = vmatmul.mubr.bf16.gmra.mrb[56].mxu0 %v5398_v2  ;;  %5243 = vmatmul.mubr.bf16.gmra.mrb[56].mxu1 %v5399_v3 }
  0xb8   :  { %5118 = vmatprep.mubr.bf16.mxu0 %v5400_v4  ;;  %5246 = vmatprep.mubr.bf16.mxu1 %v5401_v5  ;;  %v5452_v4 = vld [vmem:[%s7527_s0 + $0x1c0] sm:$0xff]  }
  0xb9   :  { %v5453_v5 = vld [vmem:[%s7527_s0 + $0x3c0] sm:$0xff]  }
  0xbf   :  { %5119 = vmatmul.mubr.bf16.gmra.mrb[60].mxu0 %v5402_v6  ;;  %5247 = vmatmul.mubr.bf16.gmra.mrb[60].mxu1 %v5403_v7 }
  0xc0   :  { %5122 = vmatprep.mubr.bf16.mxu0 %v5404_v8  ;;  %5250 = vmatprep.mubr.bf16.mxu1 %v5405_v9 }
  0xc7   :  { %5123 = vmatmul.mubr.bf16.gmra.mrb[64].mxu0 %v5406_v10  ;;  %5251 = vmatmul.mubr.bf16.gmra.mrb[64].mxu1 %v5407_v11 }
  0xc8   :  { %5126 = vmatprep.mubr.bf16.mxu0 %v5408_v12  ;;  %5254 = vmatprep.mubr.bf16.mxu1 %v5409_v13 }
  0xcf   :  { %5127 = vmatmul.mubr.bf16.gmra.mrb[68].mxu0 %v5410_v14  ;;  %5255 = vmatmul.mubr.bf16.gmra.mrb[68].mxu1 %v5411_v15 }
  0xd0   :  { %5130 = vmatprep.mubr.bf16.mxu0 %v5412_v16  ;;  %5258 = vmatprep.mubr.bf16.mxu1 %v5413_v17 }
  0xd7   :  { %5131 = vmatmul.mubr.bf16.gmra.mrb[72].mxu0 %v5414_v18  ;;  %5259 = vmatmul.mubr.bf16.gmra.mrb[72].mxu1 %v5415_v19 }
  0xd8   :  { %5134 = vmatprep.mubr.bf16.mxu0 %v5416_v20  ;;  %5262 = vmatprep.mubr.bf16.mxu1 %v5417_v21 }
  0xdf   :  { %5135 = vmatmul.mubr.bf16.gmra.mrb[76].mxu0 %v5418_v22  ;;  %5263 = vmatmul.mubr.bf16.gmra.mrb[76].mxu1 %v5419_v23 }
  0xe0   :  { %5138 = vmatprep.mubr.bf16.mxu0 %v5420_v24  ;;  %5266 = vmatprep.mubr.bf16.mxu1 %v5421_v25 }
  0xe7   :  { %5139 = vmatmul.mubr.bf16.gmra.mrb[80].mxu0 %v5422_v26  ;;  %5267 = vmatmul.mubr.bf16.gmra.mrb[80].mxu1 %v5423_v27 }
  0xe8   :  { %5142 = vmatprep.mubr.bf16.mxu0 %v5424_v28  ;;  %5270 = vmatprep.mubr.bf16.mxu1 %v5425_v29 }
  0xef   :  { %5143 = vmatmul.mubr.bf16.gmra.mrb[84].mxu0 %v5426_v30  ;;  %5271 = vmatmul.mubr.bf16.gmra.mrb[84].mxu1 %v5427_v31 }
  0xf0   :  { %5146 = vmatprep.mubr.bf16.mxu0 %v5428_v32  ;;  %5274 = vmatprep.mubr.bf16.mxu1 %v5429_v33 }
  0xf7   :  { %5147 = vmatmul.mubr.bf16.gmra.mrb[88].mxu0 %v5430_v34  ;;  %5275 = vmatmul.mubr.bf16.gmra.mrb[88].mxu1 %v5431_v35 }
  0xf8   :  { %5150 = vmatprep.mubr.bf16.mxu0 %v5432_v36  ;;  %5278 = vmatprep.mubr.bf16.mxu1 %v5433_v37 }
  0xff   :  { %5151 = vmatmul.mubr.bf16.gmra.mrb[92].mxu0 %v5434_v38  ;;  %5279 = vmatmul.mubr.bf16.gmra.mrb[92].mxu1 %v5435_v39 }
 0x100   :  { %5154 = vmatprep.mubr.bf16.mxu0 %v5436_v40  ;;  %5282 = vmatprep.mubr.bf16.mxu1 %v5437_v41  ;;  %v5454_v40 = vld [vmem:[%s7527_s0 + $0x1c8] sm:$0xff]  }
 0x101   :  { %v5455_v41 = vld [vmem:[%s7527_s0 + $0x3c8] sm:$0xff]  }
 0x107   :  { %5155 = vmatmul.mubr.bf16.gmra.mrb[96].mxu0 %v5438_v42  ;;  %5283 = vmatmul.mubr.bf16.gmra.mrb[96].mxu1 %v5439_v43 }
 0x108   :  { %5158 = vmatprep.mubr.bf16.mxu0 %v5440_v44  ;;  %5286 = vmatprep.mubr.bf16.mxu1 %v5441_v45 }
 0x10f   :  { %5159 = vmatmul.mubr.bf16.gmra.mrb[100].mxu0 %v5442_v46  ;;  %5287 = vmatmul.mubr.bf16.gmra.mrb[100].mxu1 %v5443_v47 }
 0x110   :  { %5162 = vmatprep.mubr.bf16.mxu0 %v5444_v48  ;;  %5290 = vmatprep.mubr.bf16.mxu1 %v5445_v49  ;;  %v5456_v48 = vld [vmem:[%s7527_s0 + $0x1d0] sm:$0xff]  }
 0x111   :  { %v5457_v49 = vld [vmem:[%s7527_s0 + $0x3d0] sm:$0xff]  }
 0x117   :  { %5163 = vmatmul.mubr.bf16.gmra.mrb[104].mxu0 %v5446_v50  ;;  %5291 = vmatmul.mubr.bf16.gmra.mrb[104].mxu1 %v5447_v51 }
 0x118   :  { %5166 = vmatprep.mubr.bf16.mxu0 %v5448_v52  ;;  %5294 = vmatprep.mubr.bf16.mxu1 %v5449_v53 }
 0x11a   :  { %v5060_v55 = vpop.f32.mrb[0].mxu0  ;;  %v5188_v57 = vpop.f32.mrb[0].mxu1 }
 0x11b   :  { %v2196_v58 = vmul.f32 %v5060_v55, %v5925_v54  ;;  %v2324_v59 = vmul.f32 %v5188_v57, %v5925_v54  ;;  %v1164_v60 = vpop.f32.mrb[1].mxu0  ;;  %v1676_v61 = vpop.f32.mrb[1].mxu1 }
 0x11c   :  { %v2194_v0 = vmul.f32 %v5925_v54, %v1164_v60  ;;  %v2322_v1 = vmul.f32 %v5925_v54, %v1676_v61  ;;  %v5061_v2 = vpop.f32.mrb[2].mxu0  ;;  %v5189_v3 = vpop.f32.mrb[2].mxu1 }
 0x11d   :  { %v2459_v6 = vadd.f32 %v5927_v56, %v2196_v58  ;;  %v2587_v7 = vadd.f32 %v5927_v56, %v2324_v59  ;;  %v2197_v8 = vmul.f32 %v5061_v2, %v5925_v54  ;;  %v2325_v9 = vmul.f32 %v5189_v3, %v5925_v54  ;;  %v1167_v10 = vpop.f32.mrb[3].mxu0  ;;  %v1679_v11 = vpop.f32.mrb[3].mxu1 }
 0x11e   :  { %v2457_v12 = vadd.f32 %v5927_v56, %v2194_v0  ;;  %v2585_v13 = vadd.f32 %v5927_v56, %v2322_v1  ;;  %v2195_v14 = vmul.f32 %v5925_v54, %v1167_v10  ;;  %v2323_v15 = vmul.f32 %v5925_v54, %v1679_v11 }
 0x11f   :  { %v2715_v16 = vmax.f32 %v2459_v6, 0.0  ;;  %v2843_v17 = vmax.f32 %v2587_v7, 0.0  ;;  %v2460_v18 = vadd.f32 %v5927_v56, %v2197_v8  ;;  %v2588_v19 = vadd.f32 %v5927_v56, %v2325_v9  ;;  %5167 = vmatmul.mubr.bf16.gmra.mrb[108].mxu0 %v5450_v62  ;;  %5295 = vmatmul.mubr.bf16.gmra.mrb[108].mxu1 %v5451_v63 }
 0x120   :  { %v2713_v20 = vmax.f32 %v2457_v12, 0.0  ;;  %v2841_v21 = vmax.f32 %v2585_v13, 0.0  ;;  %v2458_v22 = vadd.f32 %v5927_v56, %v2195_v14  ;;  %v2586_v23 = vadd.f32 %v5927_v56, %v2323_v15  ;;  %5170 = vmatprep.mubr.bf16.mxu0 %v5452_v4  ;;  %5298 = vmatprep.mubr.bf16.mxu1 %v5453_v5 }
 0x121   :  { %v4652_v24 = vpack.c.bf16 %v2715_v16, %v2715_v16  ;;  %v4780_v25 = vpack.c.bf16 %v2843_v17, %v2843_v17  ;;  %v2716_v26 = vmax.f32 %v2460_v18, 0.0  ;;  %v2844_v27 = vmax.f32 %v2588_v19, 0.0 }
 0x122   :  { %v4650_v28 = vpack.c.bf16 %v2713_v20, %v2713_v20  ;;  %v4778_v29 = vpack.c.bf16 %v2841_v21, %v2841_v21  ;;  %v2714_v30 = vmax.f32 %v2458_v22, 0.0  ;;  %v2842_v31 = vmax.f32 %v2586_v23, 0.0  ;;  %v5064_v32 = vpop.f32.mrb[4].mxu0  ;;  %v5192_v33 = vpop.f32.mrb[4].mxu1  ;;  %v5458_v22 = vld [vmem:[%s7527_s0 + $0x1d8] sm:$0xff]  }
 0x123   :  { %3996 = vst.msk [vmem:[%s7531_s4 + $0x8] sm:$0xf] %vm3993_vm0, %v4652_v24  ;;  %4124 = vst.msk [vmem:[%s7531_s4 + $0x208] sm:$0xf] %vm3993_vm0, %v4780_v25  ;;  %v4653_v34 = vpack.c.bf16 %v2716_v26, %v2716_v26  ;;  %v4781_v35 = vpack.c.bf16 %v2844_v27, %v2844_v27  ;;  %v2200_v36 = vmul.f32 %v5064_v32, %v5925_v54  ;;  %v1180_v38 = vpop.f32.mrb[5].mxu0  ;;  %v1692_v39 = vpop.f32.mrb[5].mxu1 }
 0x124   :  { %v2328_v37 = vmul.f32 %v5192_v33, %v5925_v54  ;;  %3994 = vst.msk [vmem:[%s7531_s4] sm:$0xf] %vm3993_vm0, %v4650_v28  ;;  %4122 = vst.msk [vmem:[%s7531_s4 + $0x200] sm:$0xf] %vm3993_vm0, %v4778_v29  ;;  %v4651_v42 = vpack.c.bf16 %v2714_v30, %v2714_v30  ;;  %v4779_v43 = vpack.c.bf16 %v2842_v31, %v2842_v31  ;;  %v5065_v46 = vpop.f32.mrb[6].mxu0  ;;  %v5193_v47 = vpop.f32.mrb[6].mxu1 }
 0x125   :  { %v2198_v44 = vmul.f32 %v5925_v54, %v1180_v38  ;;  %v2326_v45 = vmul.f32 %v5925_v54, %v1692_v39  ;;  %3997 = vst.msk [vmem:[%s7531_s4 + $0xc] sm:$0xf] %vm3993_vm0, %v4653_v34  ;;  %4125 = vst.msk [vmem:[%s7531_s4 + $0x20c] sm:$0xf] %vm3993_vm0, %v4781_v35  ;;  %v2463_v50 = vadd.f32 %v5927_v56, %v2200_v36  ;;  %v1183_v55 = vpop.f32.mrb[7].mxu0  ;;  %v1695_v57 = vpop.f32.mrb[7].mxu1 }
 0x126   :  { %v2591_v51 = vadd.f32 %v5927_v56, %v2328_v37  ;;  %v2201_v52 = vmul.f32 %v5065_v46, %v5925_v54  ;;  %v2329_v53 = vmul.f32 %v5193_v47, %v5925_v54  ;;  %3995 = vst.msk [vmem:[%s7531_s4 + $0x4] sm:$0xf] %vm3993_vm0, %v4651_v42  ;;  %4123 = vst.msk [vmem:[%s7531_s4 + $0x204] sm:$0xf] %vm3993_vm0, %v4779_v43  ;;  %v5459_v23 = vld [vmem:[%s7527_s0 + $0x3d8] sm:$0xff]   ;;  %v5460_v30 = vld [vmem:[%s7527_s0 + $0x1e0] sm:$0xff]  }
 0x127   :  { %v2461_v58 = vadd.f32 %v5927_v56, %v2198_v44  ;;  %v2589_v59 = vadd.f32 %v5927_v56, %v2326_v45  ;;  %v2199_v60 = vmul.f32 %v5925_v54, %v1183_v55  ;;  %v2327_v61 = vmul.f32 %v5925_v54, %v1695_v57  ;;  %5171 = vmatmul.mubr.bf16.gmra.mrb[112].mxu0 %v5454_v40  ;;  %v5461_v31 = vld [vmem:[%s7527_s0 + $0x3e0] sm:$0xff]  }
 0x128   :  { %v2719_v62 = vmax.f32 %v2463_v50, 0.0  ;;  %v2847_v63 = vmax.f32 %v2591_v51, 0.0  ;;  %v2464_v0 = vadd.f32 %v5927_v56, %v2201_v52  ;;  %v2592_v1 = vadd.f32 %v5927_v56, %v2329_v53  ;;  %5299 = vmatmul.mubr.bf16.gmra.mrb[112].mxu1 %v5455_v41  ;;  %5174 = vmatprep.mubr.bf16.mxu0 %v5456_v48 }
 0x129   :  { %v2717_v2 = vmax.f32 %v2461_v58, 0.0  ;;  %v2845_v3 = vmax.f32 %v2589_v59, 0.0  ;;  %v2462_v4 = vadd.f32 %v5927_v56, %v2199_v60  ;;  %v2590_v5 = vadd.f32 %v5927_v56, %v2327_v61  ;;  %5302 = vmatprep.mubr.bf16.mxu1 %v5457_v49 }
 0x12a   :  { %v4656_v6 = vpack.c.bf16 %v2719_v62, %v2719_v62  ;;  %v4784_v7 = vpack.c.bf16 %v2847_v63, %v2847_v63  ;;  %v2720_v8 = vmax.f32 %v2464_v0, 0.0  ;;  %v2848_v9 = vmax.f32 %v2592_v1, 0.0  ;;  %v5068_v14 = vpop.f32.mrb[8].mxu0  ;;  %v5196_v15 = vpop.f32.mrb[8].mxu1 }
 0x12b   :  { %v4654_v10 = vpack.c.bf16 %v2717_v2, %v2717_v2  ;;  %v4782_v11 = vpack.c.bf16 %v2845_v3, %v2845_v3  ;;  %v2718_v12 = vmax.f32 %v2462_v4, 0.0  ;;  %v2846_v13 = vmax.f32 %v2590_v5, 0.0  ;;  %v1196_v20 = vpop.f32.mrb[9].mxu0  ;;  %v1708_v21 = vpop.f32.mrb[9].mxu1  ;;  %v5462_v4 = vld [vmem:[%s7527_s0 + $0x1e8] sm:$0xff]  }
 0x12c   :  { %4000 = vst.msk [vmem:[%s7531_s4 + $0x18] sm:$0xf] %vm3993_vm0, %v4656_v6  ;;  %4128 = vst.msk [vmem:[%s7531_s4 + $0x218] sm:$0xf] %vm3993_vm0, %v4784_v7  ;;  %v4657_v16 = vpack.c.bf16 %v2720_v8, %v2720_v8  ;;  %v4785_v17 = vpack.c.bf16 %v2848_v9, %v2848_v9  ;;  %v2204_v18 = vmul.f32 %v5068_v14, %v5925_v54  ;;  %v5069_v28 = vpop.f32.mrb[10].mxu0  ;;  %v5197_v29 = vpop.f32.mrb[10].mxu1 }
 0x12d   :  { %v2332_v19 = vmul.f32 %v5196_v15, %v5925_v54  ;;  %3998 = vst.msk [vmem:[%s7531_s4 + $0x10] sm:$0xf] %vm3993_vm0, %v4654_v10  ;;  %4126 = vst.msk [vmem:[%s7531_s4 + $0x210] sm:$0xf] %vm3993_vm0, %v4782_v11  ;;  %v4655_v24 = vpack.c.bf16 %v2718_v12, %v2718_v12  ;;  %v4783_v25 = vpack.c.bf16 %v2846_v13, %v2846_v13  ;;  %v1199_v36 = vpop.f32.mrb[11].mxu0  ;;  %v1711_v37 = vpop.f32.mrb[11].mxu1 }
 0x12e   :  { %v2202_v26 = vmul.f32 %v5925_v54, %v1196_v20  ;;  %v2330_v27 = vmul.f32 %v5925_v54, %v1708_v21  ;;  %4001 = vst.msk [vmem:[%s7531_s4 + $0x1c] sm:$0xf] %vm3993_vm0, %v4657_v16  ;;  %4129 = vst.msk [vmem:[%s7531_s4 + $0x21c] sm:$0xf] %vm3993_vm0, %v4785_v17  ;;  %v2467_v32 = vadd.f32 %v5927_v56, %v2204_v18  ;;  %v5463_v5 = vld [vmem:[%s7527_s0 + $0x3e8] sm:$0xff]   ;;  %v5464_v12 = vld [vmem:[%s7527_s0 + $0x1f0] sm:$0xff]  }
 0x12f   :  { %v2595_v33 = vadd.f32 %v5927_v56, %v2332_v19  ;;  %v2205_v34 = vmul.f32 %v5069_v28, %v5925_v54  ;;  %v2333_v35 = vmul.f32 %v5197_v29, %v5925_v54  ;;  %3999 = vst.msk [vmem:[%s7531_s4 + $0x14] sm:$0xf] %vm3993_vm0, %v4655_v24  ;;  %4127 = vst.msk [vmem:[%s7531_s4 + $0x214] sm:$0xf] %vm3993_vm0, %v4783_v25  ;;  %5175 = vmatmul.mubr.bf16.gmra.mrb[116].mxu0 %v5458_v22  ;;  %v5465_v13 = vld [vmem:[%s7527_s0 + $0x3f0] sm:$0xff]  }
 0x130   :  { %v2465_v38 = vadd.f32 %v5927_v56, %v2202_v26  ;;  %v2593_v39 = vadd.f32 %v5927_v56, %v2330_v27  ;;  %v2203_v40 = vmul.f32 %v5925_v54, %v1199_v36  ;;  %v2331_v41 = vmul.f32 %v5925_v54, %v1711_v37  ;;  %5303 = vmatmul.mubr.bf16.gmra.mrb[116].mxu1 %v5459_v23 }
 0x131   :  { %v2723_v42 = vmax.f32 %v2467_v32, 0.0  ;;  %v2851_v43 = vmax.f32 %v2595_v33, 0.0  ;;  %v2468_v44 = vadd.f32 %v5927_v56, %v2205_v34  ;;  %v2596_v45 = vadd.f32 %v5927_v56, %v2333_v35  ;;  %5178 = vmatprep.mubr.bf16.mxu0 %v5460_v30  ;;  %5306 = vmatprep.mubr.bf16.mxu1 %v5461_v31 }
 0x132   :  { %v2721_v46 = vmax.f32 %v2465_v38, 0.0  ;;  %v2849_v47 = vmax.f32 %v2593_v39, 0.0  ;;  %v2466_v48 = vadd.f32 %v5927_v56, %v2203_v40  ;;  %v2594_v49 = vadd.f32 %v5927_v56, %v2331_v41  ;;  %v5072_v60 = vpop.f32.mrb[12].mxu0  ;;  %v5200_v61 = vpop.f32.mrb[12].mxu1 }
 0x133   :  { %v4660_v50 = vpack.c.bf16 %v2723_v42, %v2723_v42  ;;  %v4788_v51 = vpack.c.bf16 %v2851_v43, %v2851_v43  ;;  %v2724_v52 = vmax.f32 %v2468_v44, 0.0  ;;  %v2852_v53 = vmax.f32 %v2596_v45, 0.0  ;;  %v1212_v2 = vpop.f32.mrb[13].mxu0  ;;  %v1724_v3 = vpop.f32.mrb[13].mxu1 }
 0x134   :  { %v4658_v55 = vpack.c.bf16 %v2721_v46, %v2721_v46  ;;  %v4786_v57 = vpack.c.bf16 %v2849_v47, %v2849_v47  ;;  %v2722_v58 = vmax.f32 %v2466_v48, 0.0  ;;  %v2850_v59 = vmax.f32 %v2594_v49, 0.0  ;;  %v5073_v10 = vpop.f32.mrb[14].mxu0  ;;  %v5201_v11 = vpop.f32.mrb[14].mxu1  ;;  %v5466_v48 = vld [vmem:[%s7527_s0 + $0x1f8] sm:$0xff]  }
 0x135   :  { %4004 = vst.msk [vmem:[%s7531_s4 + $0x28] sm:$0xf] %vm3993_vm0, %v4660_v50  ;;  %4132 = vst.msk [vmem:[%s7531_s4 + $0x228] sm:$0xf] %vm3993_vm0, %v4788_v51  ;;  %v4661_v62 = vpack.c.bf16 %v2724_v52, %v2724_v52  ;;  %v4789_v63 = vpack.c.bf16 %v2852_v53, %v2852_v53  ;;  %v2208_v0 = vmul.f32 %v5072_v60, %v5925_v54  ;;  %v1215_v18 = vpop.f32.mrb[15].mxu0  ;;  %v1727_v19 = vpop.f32.mrb[15].mxu1 }
 0x136   :  { %v2336_v1 = vmul.f32 %v5200_v61, %v5925_v54  ;;  %4002 = vst.msk [vmem:[%s7531_s4 + $0x20] sm:$0xf] %vm3993_vm0, %v4658_v55  ;;  %4130 = vst.msk [vmem:[%s7531_s4 + $0x220] sm:$0xf] %vm3993_vm0, %v4786_v57  ;;  %v4659_v6 = vpack.c.bf16 %v2722_v58, %v2722_v58  ;;  %v4787_v7 = vpack.c.bf16 %v2850_v59, %v2850_v59  ;;  %v5467_v49 = vld [vmem:[%s7527_s0 + $0x3f8] sm:$0xff]  }
 0x137   :  { %v2206_v8 = vmul.f32 %v5925_v54, %v1212_v2  ;;  %v2334_v9 = vmul.f32 %v5925_v54, %v1724_v3  ;;  %4005 = vst.msk [vmem:[%s7531_s4 + $0x2c] sm:$0xf] %vm3993_vm0, %v4661_v62  ;;  %4133 = vst.msk [vmem:[%s7531_s4 + $0x22c] sm:$0xf] %vm3993_vm0, %v4789_v63  ;;  %v2471_v14 = vadd.f32 %v5927_v56, %v2208_v0  ;;  %5179 = vmatmul.mubr.bf16.gmra.mrb[120].mxu0 %v5462_v4 }
 0x138   :  { %v2599_v15 = vadd.f32 %v5927_v56, %v2336_v1  ;;  %v2209_v16 = vmul.f32 %v5073_v10, %v5925_v54  ;;  %v2337_v17 = vmul.f32 %v5201_v11, %v5925_v54  ;;  %4003 = vst.msk [vmem:[%s7531_s4 + $0x24] sm:$0xf] %vm3993_vm0, %v4659_v6  ;;  %4131 = vst.msk [vmem:[%s7531_s4 + $0x224] sm:$0xf] %vm3993_vm0, %v4787_v7  ;;  %5307 = vmatmul.mubr.bf16.gmra.mrb[120].mxu1 %v5463_v5 }
 0x139   :  { %v2469_v20 = vadd.f32 %v5927_v56, %v2206_v8  ;;  %v2597_v21 = vadd.f32 %v5927_v56, %v2334_v9  ;;  %v2207_v22 = vmul.f32 %v5925_v54, %v1215_v18  ;;  %v2335_v23 = vmul.f32 %v5925_v54, %v1727_v19  ;;  %5182 = vmatprep.mubr.bf16.mxu0 %v5464_v12 }
 0x13a   :  { %v2727_v24 = vmax.f32 %v2471_v14, 0.0  ;;  %v2855_v25 = vmax.f32 %v2599_v15, 0.0  ;;  %v2472_v26 = vadd.f32 %v5927_v56, %v2209_v16  ;;  %v2600_v27 = vadd.f32 %v5927_v56, %v2337_v17  ;;  %5310 = vmatprep.mubr.bf16.mxu1 %v5465_v13  ;;  %v5076_v40 = vpop.f32.mrb[16].mxu0  ;;  %v5204_v41 = vpop.f32.mrb[16].mxu1 }
 0x13b   :  { %v2725_v28 = vmax.f32 %v2469_v20, 0.0  ;;  %v2853_v29 = vmax.f32 %v2597_v21, 0.0  ;;  %v2470_v30 = vadd.f32 %v5927_v56, %v2207_v22  ;;  %v2598_v31 = vadd.f32 %v5927_v56, %v2335_v23  ;;  %v1228_v46 = vpop.f32.mrb[17].mxu0  ;;  %v1740_v47 = vpop.f32.mrb[17].mxu1 }
 0x13c   :  { %v4664_v32 = vpack.c.bf16 %v2727_v24, %v2727_v24  ;;  %v4792_v33 = vpack.c.bf16 %v2855_v25, %v2855_v25  ;;  %v2728_v34 = vmax.f32 %v2472_v26, 0.0  ;;  %v2856_v35 = vmax.f32 %v2600_v27, 0.0  ;;  %v5077_v55 = vpop.f32.mrb[18].mxu0  ;;  %v5205_v57 = vpop.f32.mrb[18].mxu1 }
 0x13d   :  { %v4662_v36 = vpack.c.bf16 %v2725_v28, %v2725_v28  ;;  %v4790_v37 = vpack.c.bf16 %v2853_v29, %v2853_v29  ;;  %v2726_v38 = vmax.f32 %v2470_v30, 0.0  ;;  %v2854_v39 = vmax.f32 %v2598_v31, 0.0  ;;  %v1231_v62 = vpop.f32.mrb[19].mxu0  ;;  %v1743_v63 = vpop.f32.mrb[19].mxu1 }
 0x13e   :  { %4008 = vst.msk [vmem:[%s7531_s4 + $0x38] sm:$0xf] %vm3993_vm0, %v4664_v32  ;;  %4136 = vst.msk [vmem:[%s7531_s4 + $0x238] sm:$0xf] %vm3993_vm0, %v4792_v33  ;;  %v4665_v42 = vpack.c.bf16 %v2728_v34, %v2728_v34  ;;  %v4793_v43 = vpack.c.bf16 %v2856_v35, %v2856_v35  ;;  %v2212_v44 = vmul.f32 %v5076_v40, %v5925_v54 }
 0x13f   :  { %v2340_v45 = vmul.f32 %v5204_v41, %v5925_v54  ;;  %4006 = vst.msk [vmem:[%s7531_s4 + $0x30] sm:$0xf] %vm3993_vm0, %v4662_v36  ;;  %4134 = vst.msk [vmem:[%s7531_s4 + $0x230] sm:$0xf] %vm3993_vm0, %v4790_v37  ;;  %v4663_v50 = vpack.c.bf16 %v2726_v38, %v2726_v38  ;;  %v4791_v51 = vpack.c.bf16 %v2854_v39, %v2854_v39  ;;  %5183 = vmatmul.mubr.bf16.gmra.mrb[124].mxu0 %v5466_v48 }
 0x140   :  { %v2210_v52 = vmul.f32 %v5925_v54, %v1228_v46  ;;  %v2338_v53 = vmul.f32 %v5925_v54, %v1740_v47  ;;  %4009 = vst.msk [vmem:[%s7531_s4 + $0x3c] sm:$0xf] %vm3993_vm0, %v4665_v42  ;;  %4137 = vst.msk [vmem:[%s7531_s4 + $0x23c] sm:$0xf] %vm3993_vm0, %v4793_v43  ;;  %v2475_v58 = vadd.f32 %v5927_v56, %v2212_v44  ;;  %5311 = vmatmul.mubr.bf16.gmra.mrb[124].mxu1 %v5467_v49 }
 0x141   :  { %v2603_v59 = vadd.f32 %v5927_v56, %v2340_v45  ;;  %v2213_v60 = vmul.f32 %v5077_v55, %v5925_v54  ;;  %v2341_v61 = vmul.f32 %v5205_v57, %v5925_v54  ;;  %4007 = vst.msk [vmem:[%s7531_s4 + $0x34] sm:$0xf] %vm3993_vm0, %v4663_v50  ;;  %4135 = vst.msk [vmem:[%s7531_s4 + $0x234] sm:$0xf] %vm3993_vm0, %v4791_v51 }
 0x142   :  { %v2473_v0 = vadd.f32 %v5927_v56, %v2210_v52  ;;  %v2601_v1 = vadd.f32 %v5927_v56, %v2338_v53  ;;  %v2211_v2 = vmul.f32 %v5925_v54, %v1231_v62  ;;  %v2339_v3 = vmul.f32 %v5925_v54, %v1743_v63  ;;  %v5080_v20 = vpop.f32.mrb[20].mxu0  ;;  %v5208_v21 = vpop.f32.mrb[20].mxu1 }
 0x143   :  { %v2731_v4 = vmax.f32 %v2475_v58, 0.0  ;;  %v2859_v5 = vmax.f32 %v2603_v59, 0.0  ;;  %v2476_v6 = vadd.f32 %v5927_v56, %v2213_v60  ;;  %v2604_v7 = vadd.f32 %v5927_v56, %v2341_v61  ;;  %v1244_v26 = vpop.f32.mrb[21].mxu0  ;;  %v1756_v27 = vpop.f32.mrb[21].mxu1 }
 0x144   :  { %v2729_v8 = vmax.f32 %v2473_v0, 0.0  ;;  %v2857_v9 = vmax.f32 %v2601_v1, 0.0  ;;  %v2474_v10 = vadd.f32 %v5927_v56, %v2211_v2  ;;  %v2602_v11 = vadd.f32 %v5927_v56, %v2339_v3  ;;  %v5081_v32 = vpop.f32.mrb[22].mxu0  ;;  %v5209_v33 = vpop.f32.mrb[22].mxu1 }
 0x145   :  { %v4668_v12 = vpack.c.bf16 %v2731_v4, %v2731_v4  ;;  %v4796_v13 = vpack.c.bf16 %v2859_v5, %v2859_v5  ;;  %v2732_v14 = vmax.f32 %v2476_v6, 0.0  ;;  %v2860_v15 = vmax.f32 %v2604_v7, 0.0  ;;  %v1247_v38 = vpop.f32.mrb[23].mxu0  ;;  %v1759_v39 = vpop.f32.mrb[23].mxu1 }
 0x146   :  { %v4666_v16 = vpack.c.bf16 %v2729_v8, %v2729_v8  ;;  %v4794_v17 = vpack.c.bf16 %v2857_v9, %v2857_v9  ;;  %v2730_v18 = vmax.f32 %v2474_v10, 0.0  ;;  %v2858_v19 = vmax.f32 %v2602_v11, 0.0 }
 0x147   :  { %4012 = vst.msk [vmem:[%s7531_s4 + $0x48] sm:$0xf] %vm3993_vm0, %v4668_v12  ;;  %4140 = vst.msk [vmem:[%s7531_s4 + $0x248] sm:$0xf] %vm3993_vm0, %v4796_v13  ;;  %v4669_v22 = vpack.c.bf16 %v2732_v14, %v2732_v14  ;;  %v4797_v23 = vpack.c.bf16 %v2860_v15, %v2860_v15  ;;  %v2216_v24 = vmul.f32 %v5080_v20, %v5925_v54 }
 0x148   :  { %v2344_v25 = vmul.f32 %v5208_v21, %v5925_v54  ;;  %4010 = vst.msk [vmem:[%s7531_s4 + $0x40] sm:$0xf] %vm3993_vm0, %v4666_v16  ;;  %4138 = vst.msk [vmem:[%s7531_s4 + $0x240] sm:$0xf] %vm3993_vm0, %v4794_v17  ;;  %v4667_v28 = vpack.c.bf16 %v2730_v18, %v2730_v18  ;;  %v4795_v29 = vpack.c.bf16 %v2858_v19, %v2858_v19 }
 0x149   :  { %v2214_v30 = vmul.f32 %v5925_v54, %v1244_v26  ;;  %v2342_v31 = vmul.f32 %v5925_v54, %v1756_v27  ;;  %4013 = vst.msk [vmem:[%s7531_s4 + $0x4c] sm:$0xf] %vm3993_vm0, %v4669_v22  ;;  %4141 = vst.msk [vmem:[%s7531_s4 + $0x24c] sm:$0xf] %vm3993_vm0, %v4797_v23  ;;  %v2479_v34 = vadd.f32 %v5927_v56, %v2216_v24 }
 0x14a   :  { %v2607_v35 = vadd.f32 %v5927_v56, %v2344_v25  ;;  %v2217_v36 = vmul.f32 %v5081_v32, %v5925_v54  ;;  %v2345_v37 = vmul.f32 %v5209_v33, %v5925_v54  ;;  %4011 = vst.msk [vmem:[%s7531_s4 + $0x44] sm:$0xf] %vm3993_vm0, %v4667_v28  ;;  %4139 = vst.msk [vmem:[%s7531_s4 + $0x244] sm:$0xf] %vm3993_vm0, %v4795_v29  ;;  %v5084_v62 = vpop.f32.mrb[24].mxu0  ;;  %v5212_v63 = vpop.f32.mrb[24].mxu1 }
 0x14b   :  { %v2477_v40 = vadd.f32 %v5927_v56, %v2214_v30  ;;  %v2605_v41 = vadd.f32 %v5927_v56, %v2342_v31  ;;  %v2215_v42 = vmul.f32 %v5925_v54, %v1247_v38  ;;  %v2343_v43 = vmul.f32 %v5925_v54, %v1759_v39  ;;  %v1260_v4 = vpop.f32.mrb[25].mxu0  ;;  %v1772_v5 = vpop.f32.mrb[25].mxu1 }
 0x14c   :  { %v2735_v44 = vmax.f32 %v2479_v34, 0.0  ;;  %v2863_v45 = vmax.f32 %v2607_v35, 0.0  ;;  %v2480_v46 = vadd.f32 %v5927_v56, %v2217_v36  ;;  %v2608_v47 = vadd.f32 %v5927_v56, %v2345_v37  ;;  %v5085_v10 = vpop.f32.mrb[26].mxu0  ;;  %v5213_v11 = vpop.f32.mrb[26].mxu1 }
 0x14d   :  { %v2733_v48 = vmax.f32 %v2477_v40, 0.0  ;;  %v2861_v49 = vmax.f32 %v2605_v41, 0.0  ;;  %v2478_v50 = vadd.f32 %v5927_v56, %v2215_v42  ;;  %v2606_v51 = vadd.f32 %v5927_v56, %v2343_v43  ;;  %v1263_v16 = vpop.f32.mrb[27].mxu0  ;;  %v1775_v17 = vpop.f32.mrb[27].mxu1 }
 0x14e   :  { %v4672_v52 = vpack.c.bf16 %v2735_v44, %v2735_v44  ;;  %v4800_v53 = vpack.c.bf16 %v2863_v45, %v2863_v45  ;;  %v2736_v55 = vmax.f32 %v2480_v46, 0.0  ;;  %v2864_v57 = vmax.f32 %v2608_v47, 0.0 }
 0x14f   :  { %v4670_v58 = vpack.c.bf16 %v2733_v48, %v2733_v48  ;;  %v4798_v59 = vpack.c.bf16 %v2861_v49, %v2861_v49  ;;  %v2734_v60 = vmax.f32 %v2478_v50, 0.0  ;;  %v2862_v61 = vmax.f32 %v2606_v51, 0.0 }
 0x150   :  { %4016 = vst.msk [vmem:[%s7531_s4 + $0x58] sm:$0xf] %vm3993_vm0, %v4672_v52  ;;  %4144 = vst.msk [vmem:[%s7531_s4 + $0x258] sm:$0xf] %vm3993_vm0, %v4800_v53  ;;  %v4673_v0 = vpack.c.bf16 %v2736_v55, %v2736_v55  ;;  %v4801_v1 = vpack.c.bf16 %v2864_v57, %v2864_v57  ;;  %v2220_v2 = vmul.f32 %v5084_v62, %v5925_v54 }
 0x151   :  { %v2348_v3 = vmul.f32 %v5212_v63, %v5925_v54  ;;  %4014 = vst.msk [vmem:[%s7531_s4 + $0x50] sm:$0xf] %vm3993_vm0, %v4670_v58  ;;  %4142 = vst.msk [vmem:[%s7531_s4 + $0x250] sm:$0xf] %vm3993_vm0, %v4798_v59  ;;  %v4671_v6 = vpack.c.bf16 %v2734_v60, %v2734_v60  ;;  %v4799_v7 = vpack.c.bf16 %v2862_v61, %v2862_v61 }
 0x152   :  { %v2218_v8 = vmul.f32 %v5925_v54, %v1260_v4  ;;  %v2346_v9 = vmul.f32 %v5925_v54, %v1772_v5  ;;  %4017 = vst.msk [vmem:[%s7531_s4 + $0x5c] sm:$0xf] %vm3993_vm0, %v4673_v0  ;;  %4145 = vst.msk [vmem:[%s7531_s4 + $0x25c] sm:$0xf] %vm3993_vm0, %v4801_v1  ;;  %v2483_v12 = vadd.f32 %v5927_v56, %v2220_v2  ;;  %v5088_v38 = vpop.f32.mrb[28].mxu0  ;;  %v5216_v39 = vpop.f32.mrb[28].mxu1 }
 0x153   :  { %v2611_v13 = vadd.f32 %v5927_v56, %v2348_v3  ;;  %v2221_v14 = vmul.f32 %v5085_v10, %v5925_v54  ;;  %v2349_v15 = vmul.f32 %v5213_v11, %v5925_v54  ;;  %4015 = vst.msk [vmem:[%s7531_s4 + $0x54] sm:$0xf] %vm3993_vm0, %v4671_v6  ;;  %4143 = vst.msk [vmem:[%s7531_s4 + $0x254] sm:$0xf] %vm3993_vm0, %v4799_v7  ;;  %v1276_v44 = vpop.f32.mrb[29].mxu0  ;;  %v1788_v45 = vpop.f32.mrb[29].mxu1 }
 0x154   :  { %v2481_v18 = vadd.f32 %v5927_v56, %v2218_v8  ;;  %v2609_v19 = vadd.f32 %v5927_v56, %v2346_v9  ;;  %v2219_v20 = vmul.f32 %v5925_v54, %v1263_v16  ;;  %v2347_v21 = vmul.f32 %v5925_v54, %v1775_v17  ;;  %v5089_v50 = vpop.f32.mrb[30].mxu0  ;;  %v5217_v51 = vpop.f32.mrb[30].mxu1 }
 0x155   :  { %v2739_v22 = vmax.f32 %v2483_v12, 0.0  ;;  %v2867_v23 = vmax.f32 %v2611_v13, 0.0  ;;  %v2484_v24 = vadd.f32 %v5927_v56, %v2221_v14  ;;  %v2612_v25 = vadd.f32 %v5927_v56, %v2349_v15  ;;  %v1279_v58 = vpop.f32.mrb[31].mxu0  ;;  %v1791_v59 = vpop.f32.mrb[31].mxu1 }
 0x156   :  { %v2737_v26 = vmax.f32 %v2481_v18, 0.0  ;;  %v2865_v27 = vmax.f32 %v2609_v19, 0.0  ;;  %v2482_v28 = vadd.f32 %v5927_v56, %v2219_v20  ;;  %v2610_v29 = vadd.f32 %v5927_v56, %v2347_v21 }
 0x157   :  { %v4676_v30 = vpack.c.bf16 %v2739_v22, %v2739_v22  ;;  %v4804_v31 = vpack.c.bf16 %v2867_v23, %v2867_v23  ;;  %v2740_v32 = vmax.f32 %v2484_v24, 0.0  ;;  %v2868_v33 = vmax.f32 %v2612_v25, 0.0 }
 0x158   :  { %v4674_v34 = vpack.c.bf16 %v2737_v26, %v2737_v26  ;;  %v4802_v35 = vpack.c.bf16 %v2865_v27, %v2865_v27  ;;  %v2738_v36 = vmax.f32 %v2482_v28, 0.0  ;;  %v2866_v37 = vmax.f32 %v2610_v29, 0.0 }
 0x159   :  { %4020 = vst.msk [vmem:[%s7531_s4 + $0x68] sm:$0xf] %vm3993_vm0, %v4676_v30  ;;  %4148 = vst.msk [vmem:[%s7531_s4 + $0x268] sm:$0xf] %vm3993_vm0, %v4804_v31  ;;  %v4677_v40 = vpack.c.bf16 %v2740_v32, %v2740_v32  ;;  %v4805_v41 = vpack.c.bf16 %v2868_v33, %v2868_v33  ;;  %v2224_v42 = vmul.f32 %v5088_v38, %v5925_v54 }
 0x15a   :  { %v2352_v43 = vmul.f32 %v5216_v39, %v5925_v54  ;;  %4018 = vst.msk [vmem:[%s7531_s4 + $0x60] sm:$0xf] %vm3993_vm0, %v4674_v34  ;;  %4146 = vst.msk [vmem:[%s7531_s4 + $0x260] sm:$0xf] %vm3993_vm0, %v4802_v35  ;;  %v4675_v46 = vpack.c.bf16 %v2738_v36, %v2738_v36  ;;  %v4803_v47 = vpack.c.bf16 %v2866_v37, %v2866_v37  ;;  %v5092_v16 = vpop.f32.mrb[32].mxu0  ;;  %v5220_v17 = vpop.f32.mrb[32].mxu1 }
 0x15b   :  { %v2222_v48 = vmul.f32 %v5925_v54, %v1276_v44  ;;  %v2350_v49 = vmul.f32 %v5925_v54, %v1788_v45  ;;  %4021 = vst.msk [vmem:[%s7531_s4 + $0x6c] sm:$0xf] %vm3993_vm0, %v4677_v40  ;;  %4149 = vst.msk [vmem:[%s7531_s4 + $0x26c] sm:$0xf] %vm3993_vm0, %v4805_v41  ;;  %v2487_v52 = vadd.f32 %v5927_v56, %v2224_v42  ;;  %v1292_v22 = vpop.f32.mrb[33].mxu0  ;;  %v1804_v23 = vpop.f32.mrb[33].mxu1 }
 0x15c   :  { %v2615_v53 = vadd.f32 %v5927_v56, %v2352_v43  ;;  %v2225_v55 = vmul.f32 %v5089_v50, %v5925_v54  ;;  %v2353_v57 = vmul.f32 %v5217_v51, %v5925_v54  ;;  %4019 = vst.msk [vmem:[%s7531_s4 + $0x64] sm:$0xf] %vm3993_vm0, %v4675_v46  ;;  %4147 = vst.msk [vmem:[%s7531_s4 + $0x264] sm:$0xf] %vm3993_vm0, %v4803_v47  ;;  %v5093_v28 = vpop.f32.mrb[34].mxu0  ;;  %v5221_v29 = vpop.f32.mrb[34].mxu1 }
 0x15d   :  { %v2485_v60 = vadd.f32 %v5927_v56, %v2222_v48  ;;  %v2613_v61 = vadd.f32 %v5927_v56, %v2350_v49  ;;  %v2223_v62 = vmul.f32 %v5925_v54, %v1279_v58  ;;  %v2351_v63 = vmul.f32 %v5925_v54, %v1791_v59  ;;  %v1295_v34 = vpop.f32.mrb[35].mxu0  ;;  %v1807_v35 = vpop.f32.mrb[35].mxu1 }
 0x15e   :  { %v2743_v0 = vmax.f32 %v2487_v52, 0.0  ;;  %v2871_v1 = vmax.f32 %v2615_v53, 0.0  ;;  %v2488_v2 = vadd.f32 %v5927_v56, %v2225_v55  ;;  %v2616_v3 = vadd.f32 %v5927_v56, %v2353_v57 }
 0x15f   :  { %v2741_v4 = vmax.f32 %v2485_v60, 0.0  ;;  %v2869_v5 = vmax.f32 %v2613_v61, 0.0  ;;  %v2486_v6 = vadd.f32 %v5927_v56, %v2223_v62  ;;  %v2614_v7 = vadd.f32 %v5927_v56, %v2351_v63 }
 0x160   :  { %v4680_v8 = vpack.c.bf16 %v2743_v0, %v2743_v0  ;;  %v4808_v9 = vpack.c.bf16 %v2871_v1, %v2871_v1  ;;  %v2744_v10 = vmax.f32 %v2488_v2, 0.0  ;;  %v2872_v11 = vmax.f32 %v2616_v3, 0.0 }
 0x161   :  { %v4678_v12 = vpack.c.bf16 %v2741_v4, %v2741_v4  ;;  %v4806_v13 = vpack.c.bf16 %v2869_v5, %v2869_v5  ;;  %v2742_v14 = vmax.f32 %v2486_v6, 0.0  ;;  %v2870_v15 = vmax.f32 %v2614_v7, 0.0 }
 0x162   :  { %4024 = vst.msk [vmem:[%s7531_s4 + $0x78] sm:$0xf] %vm3993_vm0, %v4680_v8  ;;  %4152 = vst.msk [vmem:[%s7531_s4 + $0x278] sm:$0xf] %vm3993_vm0, %v4808_v9  ;;  %v4681_v18 = vpack.c.bf16 %v2744_v10, %v2744_v10  ;;  %v4809_v19 = vpack.c.bf16 %v2872_v11, %v2872_v11  ;;  %v2228_v20 = vmul.f32 %v5092_v16, %v5925_v54  ;;  %v5096_v58 = vpop.f32.mrb[36].mxu0  ;;  %v5224_v59 = vpop.f32.mrb[36].mxu1 }
 0x163   :  { %v2356_v21 = vmul.f32 %v5220_v17, %v5925_v54  ;;  %4022 = vst.msk [vmem:[%s7531_s4 + $0x70] sm:$0xf] %vm3993_vm0, %v4678_v12  ;;  %4150 = vst.msk [vmem:[%s7531_s4 + $0x270] sm:$0xf] %vm3993_vm0, %v4806_v13  ;;  %v4679_v24 = vpack.c.bf16 %v2742_v14, %v2742_v14  ;;  %v4807_v25 = vpack.c.bf16 %v2870_v15, %v2870_v15  ;;  %v1308_v0 = vpop.f32.mrb[37].mxu0  ;;  %v1820_v1 = vpop.f32.mrb[37].mxu1 }
 0x164   :  { %v2226_v26 = vmul.f32 %v5925_v54, %v1292_v22  ;;  %v2354_v27 = vmul.f32 %v5925_v54, %v1804_v23  ;;  %4025 = vst.msk [vmem:[%s7531_s4 + $0x7c] sm:$0xf] %vm3993_vm0, %v4681_v18  ;;  %4153 = vst.msk [vmem:[%s7531_s4 + $0x27c] sm:$0xf] %vm3993_vm0, %v4809_v19  ;;  %v2491_v30 = vadd.f32 %v5927_v56, %v2228_v20  ;;  %v5097_v6 = vpop.f32.mrb[38].mxu0  ;;  %v5225_v7 = vpop.f32.mrb[38].mxu1 }
 0x165   :  { %v2619_v31 = vadd.f32 %v5927_v56, %v2356_v21  ;;  %v2229_v32 = vmul.f32 %v5093_v28, %v5925_v54  ;;  %v2357_v33 = vmul.f32 %v5221_v29, %v5925_v54  ;;  %4023 = vst.msk [vmem:[%s7531_s4 + $0x74] sm:$0xf] %vm3993_vm0, %v4679_v24  ;;  %4151 = vst.msk [vmem:[%s7531_s4 + $0x274] sm:$0xf] %vm3993_vm0, %v4807_v25  ;;  %v1311_v12 = vpop.f32.mrb[39].mxu0  ;;  %v1823_v13 = vpop.f32.mrb[39].mxu1 }
 0x166   :  { %v2489_v36 = vadd.f32 %v5927_v56, %v2226_v26  ;;  %v2617_v37 = vadd.f32 %v5927_v56, %v2354_v27  ;;  %v2227_v38 = vmul.f32 %v5925_v54, %v1295_v34  ;;  %v2355_v39 = vmul.f32 %v5925_v54, %v1807_v35 }
 0x167   :  { %v2747_v40 = vmax.f32 %v2491_v30, 0.0  ;;  %v2875_v41 = vmax.f32 %v2619_v31, 0.0  ;;  %v2492_v42 = vadd.f32 %v5927_v56, %v2229_v32  ;;  %v2620_v43 = vadd.f32 %v5927_v56, %v2357_v33 }
 0x168   :  { %v2745_v44 = vmax.f32 %v2489_v36, 0.0  ;;  %v2873_v45 = vmax.f32 %v2617_v37, 0.0  ;;  %v2490_v46 = vadd.f32 %v5927_v56, %v2227_v38  ;;  %v2618_v47 = vadd.f32 %v5927_v56, %v2355_v39  ;;  %v6439_v36 = vld [vmem:[#allocation2] ss:$0 sm:$0xff] }
 0x169   :  { %v4684_v48 = vpack.c.bf16 %v2747_v40, %v2747_v40  ;;  %v4812_v49 = vpack.c.bf16 %v2875_v41, %v2875_v41  ;;  %v2748_v50 = vmax.f32 %v2492_v42, 0.0  ;;  %v2876_v51 = vmax.f32 %v2620_v43, 0.0 }
 0x16a   :  { %v4682_v52 = vpack.c.bf16 %v2745_v44, %v2745_v44  ;;  %v4810_v53 = vpack.c.bf16 %v2873_v45, %v2873_v45  ;;  %v2746_v55 = vmax.f32 %v2490_v46, 0.0  ;;  %v2874_v57 = vmax.f32 %v2618_v47, 0.0  ;;  %v5100_v33 = vpop.f32.mrb[40].mxu0  ;;  %v5228_v34 = vpop.f32.mrb[40].mxu1  ;;  %v6461_v47 = vld [vmem:[#allocation4] ss:$0 sm:$0xff] }
 0x16b   :  { %4028 = vst.msk [vmem:[%s7531_s4 + $0x88] sm:$0xf] %vm3993_vm0, %v4684_v48  ;;  %4156 = vst.msk [vmem:[%s7531_s4 + $0x288] sm:$0xf] %vm3993_vm0, %v4812_v49  ;;  %v4685_v60 = vpack.c.bf16 %v2748_v50, %v2748_v50  ;;  %v4813_v61 = vpack.c.bf16 %v2876_v51, %v2876_v51  ;;  %v2232_v62 = vmul.f32 %v5096_v58, %v5925_v54  ;;  %v1324_v39 = vpop.f32.mrb[41].mxu0  ;;  %v1836_v40 = vpop.f32.mrb[41].mxu1 }
 0x16c   :  { %v2360_v63 = vmul.f32 %v5224_v59, %v5925_v54  ;;  %4026 = vst.msk [vmem:[%s7531_s4 + $0x80] sm:$0xf] %vm3993_vm0, %v4682_v52  ;;  %4154 = vst.msk [vmem:[%s7531_s4 + $0x280] sm:$0xf] %vm3993_vm0, %v4810_v53  ;;  %v4683_v2 = vpack.c.bf16 %v2746_v55, %v2746_v55  ;;  %v4811_v3 = vpack.c.bf16 %v2874_v57, %v2874_v57  ;;  %v5101_v45 = vpop.f32.mrb[42].mxu0  ;;  %v5229_v46 = vpop.f32.mrb[42].mxu1 }
 0x16d   :  { %v2230_v4 = vmul.f32 %v5925_v54, %v1308_v0  ;;  %v2358_v5 = vmul.f32 %v5925_v54, %v1820_v1  ;;  %4029 = vst.msk [vmem:[%s7531_s4 + $0x8c] sm:$0xf] %vm3993_vm0, %v4685_v60  ;;  %4157 = vst.msk [vmem:[%s7531_s4 + $0x28c] sm:$0xf] %vm3993_vm0, %v4813_v61  ;;  %v2495_v8 = vadd.f32 %v5927_v56, %v2232_v62  ;;  %v1327_v52 = vpop.f32.mrb[43].mxu0  ;;  %v1839_v53 = vpop.f32.mrb[43].mxu1 }
 0x16e   :  { %v2623_v9 = vadd.f32 %v5927_v56, %v2360_v63  ;;  %v2233_v10 = vmul.f32 %v5097_v6, %v5925_v54  ;;  %v2361_v11 = vmul.f32 %v5225_v7, %v5925_v54  ;;  %4027 = vst.msk [vmem:[%s7531_s4 + $0x84] sm:$0xf] %vm3993_vm0, %v4683_v2  ;;  %4155 = vst.msk [vmem:[%s7531_s4 + $0x284] sm:$0xf] %vm3993_vm0, %v4811_v3 }
 0x16f   :  { %v2493_v14 = vadd.f32 %v5927_v56, %v2230_v4  ;;  %v2621_v15 = vadd.f32 %v5927_v56, %v2358_v5  ;;  %v2231_v16 = vmul.f32 %v5925_v54, %v1311_v12  ;;  %v2359_v17 = vmul.f32 %v5925_v54, %v1823_v13 }
 0x170   :  { %v2751_v18 = vmax.f32 %v2495_v8, 0.0  ;;  %v2879_v19 = vmax.f32 %v2623_v9, 0.0  ;;  %v2496_v20 = vadd.f32 %v5927_v56, %v2233_v10  ;;  %v2624_v21 = vadd.f32 %v5927_v56, %v2361_v11 }
 0x171   :  { %v2749_v22 = vmax.f32 %v2493_v14, 0.0  ;;  %v2877_v23 = vmax.f32 %v2621_v15, 0.0  ;;  %v2494_v24 = vadd.f32 %v5927_v56, %v2231_v16  ;;  %v2622_v25 = vadd.f32 %v5927_v56, %v2359_v17 }
 0x172   :  { %v4688_v26 = vpack.c.bf16 %v2751_v18, %v2751_v18  ;;  %v4816_v27 = vpack.c.bf16 %v2879_v19, %v2879_v19  ;;  %v2752_v28 = vmax.f32 %v2496_v20, 0.0  ;;  %v2880_v29 = vmax.f32 %v2624_v21, 0.0  ;;  %v5104_v12 = vpop.f32.mrb[44].mxu0  ;;  %v5232_v13 = vpop.f32.mrb[44].mxu1 }
 0x173   :  { %v4686_v30 = vpack.c.bf16 %v2749_v22, %v2749_v22  ;;  %v4814_v31 = vpack.c.bf16 %v2877_v23, %v2877_v23  ;;  %v2750_v32 = vmax.f32 %v2494_v24, 0.0  ;;  %v2878_v54 = vmax.f32 %v2622_v25, 0.0  ;;  %v1340_v18 = vpop.f32.mrb[45].mxu0  ;;  %v1852_v19 = vpop.f32.mrb[45].mxu1 }
 0x174   :  { %4032 = vst.msk [vmem:[%s7531_s4 + $0x98] sm:$0xf] %vm3993_vm0, %v4688_v26  ;;  %4160 = vst.msk [vmem:[%s7531_s4 + $0x298] sm:$0xf] %vm3993_vm0, %v4816_v27  ;;  %v4689_v56 = vpack.c.bf16 %v2752_v28, %v2752_v28  ;;  %v4817_v35 = vpack.c.bf16 %v2880_v29, %v2880_v29  ;;  %v2236_v37 = vmul.f32 %v6439_v36, %v5100_v33  ;;  %v5105_v24 = vpop.f32.mrb[46].mxu0  ;;  %v5233_v25 = vpop.f32.mrb[46].mxu1 }
 0x175   :  { %v2364_v38 = vmul.f32 %v6439_v36, %v5228_v34  ;;  %4030 = vst.msk [vmem:[%s7531_s4 + $0x90] sm:$0xf] %vm3993_vm0, %v4686_v30  ;;  %4158 = vst.msk [vmem:[%s7531_s4 + $0x290] sm:$0xf] %vm3993_vm0, %v4814_v31  ;;  %v4687_v41 = vpack.c.bf16 %v2750_v32, %v2750_v32  ;;  %v4815_v42 = vpack.c.bf16 %v2878_v54, %v2878_v54  ;;  %v1343_v30 = vpop.f32.mrb[47].mxu0  ;;  %v1855_v31 = vpop.f32.mrb[47].mxu1 }
 0x176   :  { %v2234_v43 = vmul.f32 %v6439_v36, %v1324_v39  ;;  %v2362_v44 = vmul.f32 %v6439_v36, %v1836_v40  ;;  %4033 = vst.msk [vmem:[%s7531_s4 + $0x9c] sm:$0xf] %vm3993_vm0, %v4689_v56  ;;  %4161 = vst.msk [vmem:[%s7531_s4 + $0x29c] sm:$0xf] %vm3993_vm0, %v4817_v35  ;;  %v2499_v48 = vadd.f32 %v6461_v47, %v2236_v37 }
 0x177   :  { %v2627_v49 = vadd.f32 %v6461_v47, %v2364_v38  ;;  %v2237_v50 = vmul.f32 %v6439_v36, %v5101_v45  ;;  %v2365_v51 = vmul.f32 %v6439_v36, %v5229_v46  ;;  %4031 = vst.msk [vmem:[%s7531_s4 + $0x94] sm:$0xf] %vm3993_vm0, %v4687_v41  ;;  %4159 = vst.msk [vmem:[%s7531_s4 + $0x294] sm:$0xf] %vm3993_vm0, %v4815_v42 }
 0x178   :  { %v2497_v55 = vadd.f32 %v6461_v47, %v2234_v43  ;;  %v2625_v57 = vadd.f32 %v6461_v47, %v2362_v44  ;;  %v2235_v58 = vmul.f32 %v6439_v36, %v1327_v52  ;;  %v2363_v59 = vmul.f32 %v6439_v36, %v1839_v53 }
 0x179   :  { %v2755_v60 = vmax.f32 %v2499_v48, 0.0  ;;  %v2883_v61 = vmax.f32 %v2627_v49, 0.0  ;;  %v2500_v62 = vadd.f32 %v6461_v47, %v2237_v50  ;;  %v2628_v63 = vadd.f32 %v6461_v47, %v2365_v51 }
 0x17a   :  { %v2753_v0 = vmax.f32 %v2497_v55, 0.0  ;;  %v2881_v1 = vmax.f32 %v2625_v57, 0.0  ;;  %v2498_v2 = vadd.f32 %v6461_v47, %v2235_v58  ;;  %v2626_v3 = vadd.f32 %v6461_v47, %v2363_v59  ;;  %v5108_v52 = vpop.f32.mrb[48].mxu0  ;;  %v5236_v53 = vpop.f32.mrb[48].mxu1 }
 0x17b   :  { %v4692_v4 = vpack.c.bf16 %v2755_v60, %v2755_v60  ;;  %v4820_v5 = vpack.c.bf16 %v2883_v61, %v2883_v61  ;;  %v2756_v6 = vmax.f32 %v2500_v62, 0.0  ;;  %v2884_v7 = vmax.f32 %v2628_v63, 0.0  ;;  %v1356_v60 = vpop.f32.mrb[49].mxu0  ;;  %v1868_v61 = vpop.f32.mrb[49].mxu1 }
 0x17c   :  { %v4690_v8 = vpack.c.bf16 %v2753_v0, %v2753_v0  ;;  %v4818_v9 = vpack.c.bf16 %v2881_v1, %v2881_v1  ;;  %v2754_v10 = vmax.f32 %v2498_v2, 0.0  ;;  %v2882_v11 = vmax.f32 %v2626_v3, 0.0  ;;  %v5109_v2 = vpop.f32.mrb[50].mxu0  ;;  %v5237_v3 = vpop.f32.mrb[50].mxu1 }
 0x17d   :  { %4036 = vst.msk [vmem:[%s7531_s4 + $0xa8] sm:$0xf] %vm3993_vm0, %v4692_v4  ;;  %4164 = vst.msk [vmem:[%s7531_s4 + $0x2a8] sm:$0xf] %vm3993_vm0, %v4820_v5  ;;  %v4693_v14 = vpack.c.bf16 %v2756_v6, %v2756_v6  ;;  %v4821_v15 = vpack.c.bf16 %v2884_v7, %v2884_v7  ;;  %v2240_v16 = vmul.f32 %v6439_v36, %v5104_v12 }
 0x17e   :  { %v2368_v17 = vmul.f32 %v6439_v36, %v5232_v13  ;;  %4034 = vst.msk [vmem:[%s7531_s4 + $0xa0] sm:$0xf] %vm3993_vm0, %v4690_v8  ;;  %4162 = vst.msk [vmem:[%s7531_s4 + $0x2a0] sm:$0xf] %vm3993_vm0, %v4818_v9  ;;  %v4691_v20 = vpack.c.bf16 %v2754_v10, %v2754_v10  ;;  %v4819_v21 = vpack.c.bf16 %v2882_v11, %v2882_v11  ;;  %v1359_v8 = vpop.f32.mrb[51].mxu0  ;;  %v1871_v9 = vpop.f32.mrb[51].mxu1 }
 0x17f   :  { %v2238_v22 = vmul.f32 %v6439_v36, %v1340_v18  ;;  %v2366_v23 = vmul.f32 %v6439_v36, %v1852_v19  ;;  %4037 = vst.msk [vmem:[%s7531_s4 + $0xac] sm:$0xf] %vm3993_vm0, %v4693_v14  ;;  %4165 = vst.msk [vmem:[%s7531_s4 + $0x2ac] sm:$0xf] %vm3993_vm0, %v4821_v15  ;;  %v2503_v26 = vadd.f32 %v6461_v47, %v2240_v16 }
 0x180   :  { %v2631_v27 = vadd.f32 %v6461_v47, %v2368_v17  ;;  %v2241_v28 = vmul.f32 %v6439_v36, %v5105_v24  ;;  %v2369_v29 = vmul.f32 %v6439_v36, %v5233_v25  ;;  %4035 = vst.msk [vmem:[%s7531_s4 + $0xa4] sm:$0xf] %vm3993_vm0, %v4691_v20  ;;  %4163 = vst.msk [vmem:[%s7531_s4 + $0x2a4] sm:$0xf] %vm3993_vm0, %v4819_v21 }
 0x181   :  { %v2501_v32 = vadd.f32 %v6461_v47, %v2238_v22  ;;  %v2629_v54 = vadd.f32 %v6461_v47, %v2366_v23  ;;  %v2239_v33 = vmul.f32 %v6439_v36, %v1343_v30  ;;  %v2367_v34 = vmul.f32 %v6439_v36, %v1855_v31 }
 0x182   :  { %v2759_v56 = vmax.f32 %v2503_v26, 0.0  ;;  %v2887_v35 = vmax.f32 %v2631_v27, 0.0  ;;  %v2504_v37 = vadd.f32 %v6461_v47, %v2241_v28  ;;  %v2632_v38 = vadd.f32 %v6461_v47, %v2369_v29  ;;  %v5112_v30 = vpop.f32.mrb[52].mxu0  ;;  %v5240_v31 = vpop.f32.mrb[52].mxu1 }
 0x183   :  { %v2757_v39 = vmax.f32 %v2501_v32, 0.0  ;;  %v2885_v40 = vmax.f32 %v2629_v54, 0.0  ;;  %v2502_v41 = vadd.f32 %v6461_v47, %v2239_v33  ;;  %v2630_v42 = vadd.f32 %v6461_v47, %v2367_v34 }
 0x184   :  { %v4696_v43 = vpack.c.bf16 %v2759_v56, %v2759_v56  ;;  %v4824_v44 = vpack.c.bf16 %v2887_v35, %v2887_v35  ;;  %v2760_v45 = vmax.f32 %v2504_v37, 0.0  ;;  %v2888_v46 = vmax.f32 %v2632_v38, 0.0  ;;  %v1372_v56 = vpop.f32.mrb[53].mxu0  ;;  %v1884_v35 = vpop.f32.mrb[53].mxu1 }
 0x185   :  { %v4694_v48 = vpack.c.bf16 %v2757_v39, %v2757_v39  ;;  %v4822_v49 = vpack.c.bf16 %v2885_v40, %v2885_v40  ;;  %v2758_v50 = vmax.f32 %v2502_v41, 0.0  ;;  %v2886_v51 = vmax.f32 %v2630_v42, 0.0  ;;  %v5113_v41 = vpop.f32.mrb[54].mxu0  ;;  %v5241_v42 = vpop.f32.mrb[54].mxu1 }
 0x186   :  { %4040 = vst.msk [vmem:[%s7531_s4 + $0xb8] sm:$0xf] %vm3993_vm0, %v4696_v43  ;;  %4168 = vst.msk [vmem:[%s7531_s4 + $0x2b8] sm:$0xf] %vm3993_vm0, %v4824_v44  ;;  %v4697_v55 = vpack.c.bf16 %v2760_v45, %v2760_v45  ;;  %v4825_v57 = vpack.c.bf16 %v2888_v46, %v2888_v46  ;;  %v2244_v58 = vmul.f32 %v6439_v36, %v5108_v52 }
 0x187   :  { %v2372_v59 = vmul.f32 %v6439_v36, %v5236_v53  ;;  %4038 = vst.msk [vmem:[%s7531_s4 + $0xb0] sm:$0xf] %vm3993_vm0, %v4694_v48  ;;  %4166 = vst.msk [vmem:[%s7531_s4 + $0x2b0] sm:$0xf] %vm3993_vm0, %v4822_v49  ;;  %v4695_v62 = vpack.c.bf16 %v2758_v50, %v2758_v50  ;;  %v4823_v63 = vpack.c.bf16 %v2886_v51, %v2886_v51  ;;  %v1375_v48 = vpop.f32.mrb[55].mxu0  ;;  %v1887_v49 = vpop.f32.mrb[55].mxu1 }
 0x188   :  { %v2242_v0 = vmul.f32 %v6439_v36, %v1356_v60  ;;  %v2370_v1 = vmul.f32 %v6439_v36, %v1868_v61  ;;  %4041 = vst.msk [vmem:[%s7531_s4 + $0xbc] sm:$0xf] %vm3993_vm0, %v4697_v55  ;;  %4169 = vst.msk [vmem:[%s7531_s4 + $0x2bc] sm:$0xf] %vm3993_vm0, %v4825_v57  ;;  %v2507_v4 = vadd.f32 %v6461_v47, %v2244_v58 }
 0x189   :  { %v2635_v5 = vadd.f32 %v6461_v47, %v2372_v59  ;;  %v2245_v6 = vmul.f32 %v6439_v36, %v5109_v2  ;;  %v2373_v7 = vmul.f32 %v6439_v36, %v5237_v3  ;;  %4039 = vst.msk [vmem:[%s7531_s4 + $0xb4] sm:$0xf] %vm3993_vm0, %v4695_v62  ;;  %4167 = vst.msk [vmem:[%s7531_s4 + $0x2b4] sm:$0xf] %vm3993_vm0, %v4823_v63 }
 0x18a   :  { %v2505_v10 = vadd.f32 %v6461_v47, %v2242_v0  ;;  %v2633_v11 = vadd.f32 %v6461_v47, %v2370_v1  ;;  %v2243_v12 = vmul.f32 %v6439_v36, %v1359_v8  ;;  %v2371_v13 = vmul.f32 %v6439_v36, %v1871_v9  ;;  %v5116_v8 = vpop.f32.mrb[56].mxu0  ;;  %v5244_v9 = vpop.f32.mrb[56].mxu1 }
 0x18b   :  { %v2763_v14 = vmax.f32 %v2507_v4, 0.0  ;;  %v2891_v15 = vmax.f32 %v2635_v5, 0.0  ;;  %v2508_v16 = vadd.f32 %v6461_v47, %v2245_v6  ;;  %v2636_v17 = vadd.f32 %v6461_v47, %v2373_v7 }
 0x18c   :  { %v2761_v18 = vmax.f32 %v2505_v10, 0.0  ;;  %v2889_v19 = vmax.f32 %v2633_v11, 0.0  ;;  %v2506_v20 = vadd.f32 %v6461_v47, %v2243_v12  ;;  %v2634_v21 = vadd.f32 %v6461_v47, %v2371_v13 }
 0x18d   :  { %v4700_v22 = vpack.c.bf16 %v2763_v14, %v2763_v14  ;;  %v4828_v23 = vpack.c.bf16 %v2891_v15, %v2891_v15  ;;  %v2764_v24 = vmax.f32 %v2508_v16, 0.0  ;;  %v2892_v25 = vmax.f32 %v2636_v17, 0.0  ;;  %v1388_v14 = vpop.f32.mrb[57].mxu0  ;;  %v1900_v15 = vpop.f32.mrb[57].mxu1 }
 0x18e   :  { %v4698_v26 = vpack.c.bf16 %v2761_v18, %v2761_v18  ;;  %v4826_v27 = vpack.c.bf16 %v2889_v19, %v2889_v19  ;;  %v2762_v28 = vmax.f32 %v2506_v20, 0.0  ;;  %v2890_v29 = vmax.f32 %v2634_v21, 0.0  ;;  %v5117_v20 = vpop.f32.mrb[58].mxu0  ;;  %v5245_v21 = vpop.f32.mrb[58].mxu1 }
 0x18f   :  { %4044 = vst.msk [vmem:[%s7531_s4 + $0xc8] sm:$0xf] %vm3993_vm0, %v4700_v22  ;;  %4172 = vst.msk [vmem:[%s7531_s4 + $0x2c8] sm:$0xf] %vm3993_vm0, %v4828_v23  ;;  %v4701_v32 = vpack.c.bf16 %v2764_v24, %v2764_v24  ;;  %v4829_v54 = vpack.c.bf16 %v2892_v25, %v2892_v25  ;;  %v2248_v33 = vmul.f32 %v6439_v36, %v5112_v30 }
 0x190   :  { %v2376_v34 = vmul.f32 %v6439_v36, %v5240_v31  ;;  %4042 = vst.msk [vmem:[%s7531_s4 + $0xc0] sm:$0xf] %vm3993_vm0, %v4698_v26  ;;  %4170 = vst.msk [vmem:[%s7531_s4 + $0x2c0] sm:$0xf] %vm3993_vm0, %v4826_v27  ;;  %v4699_v37 = vpack.c.bf16 %v2762_v28, %v2762_v28  ;;  %v4827_v38 = vpack.c.bf16 %v2890_v29, %v2890_v29  ;;  %v1391_v26 = vpop.f32.mrb[59].mxu0  ;;  %v1903_v27 = vpop.f32.mrb[59].mxu1 }
 0x191   :  { %v2246_v39 = vmul.f32 %v6439_v36, %v1372_v56  ;;  %v2374_v40 = vmul.f32 %v6439_v36, %v1884_v35  ;;  %4045 = vst.msk [vmem:[%s7531_s4 + $0xcc] sm:$0xf] %vm3993_vm0, %v4701_v32  ;;  %4173 = vst.msk [vmem:[%s7531_s4 + $0x2cc] sm:$0xf] %vm3993_vm0, %v4829_v54  ;;  %v2511_v43 = vadd.f32 %v6461_v47, %v2248_v33 }
 0x192   :  { %v2639_v44 = vadd.f32 %v6461_v47, %v2376_v34  ;;  %v2249_v45 = vmul.f32 %v6439_v36, %v5113_v41  ;;  %v2377_v46 = vmul.f32 %v6439_v36, %v5241_v42  ;;  %4043 = vst.msk [vmem:[%s7531_s4 + $0xc4] sm:$0xf] %vm3993_vm0, %v4699_v37  ;;  %4171 = vst.msk [vmem:[%s7531_s4 + $0x2c4] sm:$0xf] %vm3993_vm0, %v4827_v38 }
 0x193   :  { %v2509_v50 = vadd.f32 %v6461_v47, %v2246_v39  ;;  %v2637_v51 = vadd.f32 %v6461_v47, %v2374_v40  ;;  %v2247_v52 = vmul.f32 %v6439_v36, %v1375_v48  ;;  %v2375_v53 = vmul.f32 %v6439_v36, %v1887_v49  ;;  %v5120_v48 = vpop.f32.mrb[60].mxu0  ;;  %v5248_v49 = vpop.f32.mrb[60].mxu1 }
 0x194   :  { %v2767_v55 = vmax.f32 %v2511_v43, 0.0  ;;  %v2895_v57 = vmax.f32 %v2639_v44, 0.0  ;;  %v2512_v58 = vadd.f32 %v6461_v47, %v2249_v45  ;;  %v2640_v59 = vadd.f32 %v6461_v47, %v2377_v46 }
 0x195   :  { %v2765_v60 = vmax.f32 %v2509_v50, 0.0  ;;  %v2893_v61 = vmax.f32 %v2637_v51, 0.0  ;;  %v2510_v62 = vadd.f32 %v6461_v47, %v2247_v52  ;;  %v2638_v63 = vadd.f32 %v6461_v47, %v2375_v53 }
 0x196   :  { %v4704_v0 = vpack.c.bf16 %v2767_v55, %v2767_v55  ;;  %v4832_v1 = vpack.c.bf16 %v2895_v57, %v2895_v57  ;;  %v2768_v2 = vmax.f32 %v2512_v58, 0.0  ;;  %v2896_v3 = vmax.f32 %v2640_v59, 0.0  ;;  %v1404_v55 = vpop.f32.mrb[61].mxu0  ;;  %v1916_v57 = vpop.f32.mrb[61].mxu1 }
 0x197   :  { %v4702_v4 = vpack.c.bf16 %v2765_v60, %v2765_v60  ;;  %v4830_v5 = vpack.c.bf16 %v2893_v61, %v2893_v61  ;;  %v2766_v6 = vmax.f32 %v2510_v62, 0.0  ;;  %v2894_v7 = vmax.f32 %v2638_v63, 0.0  ;;  %v5121_v62 = vpop.f32.mrb[62].mxu0  ;;  %v5249_v63 = vpop.f32.mrb[62].mxu1 }
 0x198   :  { %4048 = vst.msk [vmem:[%s7531_s4 + $0xd8] sm:$0xf] %vm3993_vm0, %v4704_v0  ;;  %4176 = vst.msk [vmem:[%s7531_s4 + $0x2d8] sm:$0xf] %vm3993_vm0, %v4832_v1  ;;  %v4705_v10 = vpack.c.bf16 %v2768_v2, %v2768_v2  ;;  %v4833_v11 = vpack.c.bf16 %v2896_v3, %v2896_v3  ;;  %v2252_v12 = vmul.f32 %v6439_v36, %v5116_v8 }
 0x199   :  { %v2380_v13 = vmul.f32 %v6439_v36, %v5244_v9  ;;  %4046 = vst.msk [vmem:[%s7531_s4 + $0xd0] sm:$0xf] %vm3993_vm0, %v4702_v4  ;;  %4174 = vst.msk [vmem:[%s7531_s4 + $0x2d0] sm:$0xf] %vm3993_vm0, %v4830_v5  ;;  %v4703_v16 = vpack.c.bf16 %v2766_v6, %v2766_v6  ;;  %v4831_v17 = vpack.c.bf16 %v2894_v7, %v2894_v7  ;;  %v1407_v4 = vpop.f32.mrb[63].mxu0  ;;  %v1919_v5 = vpop.f32.mrb[63].mxu1 }
 0x19a   :  { %v2250_v18 = vmul.f32 %v6439_v36, %v1388_v14  ;;  %v2378_v19 = vmul.f32 %v6439_v36, %v1900_v15  ;;  %4049 = vst.msk [vmem:[%s7531_s4 + $0xdc] sm:$0xf] %vm3993_vm0, %v4705_v10  ;;  %4177 = vst.msk [vmem:[%s7531_s4 + $0x2dc] sm:$0xf] %vm3993_vm0, %v4833_v11  ;;  %v2515_v22 = vadd.f32 %v6461_v47, %v2252_v12 }
 0x19b   :  { %v2643_v23 = vadd.f32 %v6461_v47, %v2380_v13  ;;  %v2253_v24 = vmul.f32 %v6439_v36, %v5117_v20  ;;  %v2381_v25 = vmul.f32 %v6439_v36, %v5245_v21  ;;  %4047 = vst.msk [vmem:[%s7531_s4 + $0xd4] sm:$0xf] %vm3993_vm0, %v4703_v16  ;;  %4175 = vst.msk [vmem:[%s7531_s4 + $0x2d4] sm:$0xf] %vm3993_vm0, %v4831_v17 }
 0x19c   :  { %v2513_v28 = vadd.f32 %v6461_v47, %v2250_v18  ;;  %v2641_v29 = vadd.f32 %v6461_v47, %v2378_v19  ;;  %v2251_v30 = vmul.f32 %v6439_v36, %v1391_v26  ;;  %v2379_v31 = vmul.f32 %v6439_v36, %v1903_v27  ;;  %v5124_v26 = vpop.f32.mrb[64].mxu0  ;;  %v5252_v27 = vpop.f32.mrb[64].mxu1 }
 0x19d   :  { %v2771_v32 = vmax.f32 %v2515_v22, 0.0  ;;  %v2899_v54 = vmax.f32 %v2643_v23, 0.0  ;;  %v2516_v33 = vadd.f32 %v6461_v47, %v2253_v24  ;;  %v2644_v34 = vadd.f32 %v6461_v47, %v2381_v25 }
 0x19e   :  { %v2769_v56 = vmax.f32 %v2513_v28, 0.0  ;;  %v2897_v35 = vmax.f32 %v2641_v29, 0.0  ;;  %v2514_v37 = vadd.f32 %v6461_v47, %v2251_v30  ;;  %v2642_v38 = vadd.f32 %v6461_v47, %v2379_v31 }
 0x19f   :  { %v4708_v39 = vpack.c.bf16 %v2771_v32, %v2771_v32  ;;  %v4836_v40 = vpack.c.bf16 %v2899_v54, %v2899_v54  ;;  %v2772_v41 = vmax.f32 %v2516_v33, 0.0  ;;  %v2900_v42 = vmax.f32 %v2644_v34, 0.0  ;;  %v1420_v32 = vpop.f32.mrb[65].mxu0  ;;  %v1932_v54 = vpop.f32.mrb[65].mxu1 }
 0x1a0   :  { %v4706_v43 = vpack.c.bf16 %v2769_v56, %v2769_v56  ;;  %v4834_v44 = vpack.c.bf16 %v2897_v35, %v2897_v35  ;;  %v2770_v45 = vmax.f32 %v2514_v37, 0.0  ;;  %v2898_v46 = vmax.f32 %v2642_v38, 0.0  ;;  %v5125_v37 = vpop.f32.mrb[66].mxu0  ;;  %v5253_v38 = vpop.f32.mrb[66].mxu1 }
 0x1a1   :  { %4052 = vst.msk [vmem:[%s7531_s4 + $0xe8] sm:$0xf] %vm3993_vm0, %v4708_v39  ;;  %4180 = vst.msk [vmem:[%s7531_s4 + $0x2e8] sm:$0xf] %vm3993_vm0, %v4836_v40  ;;  %v4709_v50 = vpack.c.bf16 %v2772_v41, %v2772_v41  ;;  %v4837_v51 = vpack.c.bf16 %v2900_v42, %v2900_v42  ;;  %v2256_v52 = vmul.f32 %v6439_v36, %v5120_v48 }
 0x1a2   :  { %v2384_v53 = vmul.f32 %v6439_v36, %v5248_v49  ;;  %4050 = vst.msk [vmem:[%s7531_s4 + $0xe0] sm:$0xf] %vm3993_vm0, %v4706_v43  ;;  %4178 = vst.msk [vmem:[%s7531_s4 + $0x2e0] sm:$0xf] %vm3993_vm0, %v4834_v44  ;;  %v4707_v58 = vpack.c.bf16 %v2770_v45, %v2770_v45  ;;  %v4835_v59 = vpack.c.bf16 %v2898_v46, %v2898_v46  ;;  %v1423_v43 = vpop.f32.mrb[67].mxu0  ;;  %v1935_v44 = vpop.f32.mrb[67].mxu1 }
 0x1a3   :  { %v2254_v60 = vmul.f32 %v6439_v36, %v1404_v55  ;;  %v2382_v61 = vmul.f32 %v6439_v36, %v1916_v57  ;;  %4053 = vst.msk [vmem:[%s7531_s4 + $0xec] sm:$0xf] %vm3993_vm0, %v4709_v50  ;;  %4181 = vst.msk [vmem:[%s7531_s4 + $0x2ec] sm:$0xf] %vm3993_vm0, %v4837_v51  ;;  %v2519_v0 = vadd.f32 %v6461_v47, %v2256_v52 }
 0x1a4   :  { %v2647_v1 = vadd.f32 %v6461_v47, %v2384_v53  ;;  %v2257_v2 = vmul.f32 %v6439_v36, %v5121_v62  ;;  %v2385_v3 = vmul.f32 %v6439_v36, %v5249_v63  ;;  %4051 = vst.msk [vmem:[%s7531_s4 + $0xe4] sm:$0xf] %vm3993_vm0, %v4707_v58  ;;  %4179 = vst.msk [vmem:[%s7531_s4 + $0x2e4] sm:$0xf] %vm3993_vm0, %v4835_v59 }
 0x1a5   :  { %v2517_v6 = vadd.f32 %v6461_v47, %v2254_v60  ;;  %v2645_v7 = vadd.f32 %v6461_v47, %v2382_v61  ;;  %v2255_v8 = vmul.f32 %v6439_v36, %v1407_v4  ;;  %v2383_v9 = vmul.f32 %v6439_v36, %v1919_v5  ;;  %v5128_v4 = vpop.f32.mrb[68].mxu0  ;;  %v5256_v5 = vpop.f32.mrb[68].mxu1 }
 0x1a6   :  { %v2775_v10 = vmax.f32 %v2519_v0, 0.0  ;;  %v2903_v11 = vmax.f32 %v2647_v1, 0.0  ;;  %v2520_v12 = vadd.f32 %v6461_v47, %v2257_v2  ;;  %v2648_v13 = vadd.f32 %v6461_v47, %v2385_v3 }
 0x1a7   :  { %v2773_v14 = vmax.f32 %v2517_v6, 0.0  ;;  %v2901_v15 = vmax.f32 %v2645_v7, 0.0  ;;  %v2518_v16 = vadd.f32 %v6461_v47, %v2255_v8  ;;  %v2646_v17 = vadd.f32 %v6461_v47, %v2383_v9 }
 0x1a8   :  { %v4712_v18 = vpack.c.bf16 %v2775_v10, %v2775_v10  ;;  %v4840_v19 = vpack.c.bf16 %v2903_v11, %v2903_v11  ;;  %v2776_v20 = vmax.f32 %v2520_v12, 0.0  ;;  %v2904_v21 = vmax.f32 %v2648_v13, 0.0  ;;  %v1436_v10 = vpop.f32.mrb[69].mxu0  ;;  %v1948_v11 = vpop.f32.mrb[69].mxu1 }
 0x1a9   :  { %v4710_v22 = vpack.c.bf16 %v2773_v14, %v2773_v14  ;;  %v4838_v23 = vpack.c.bf16 %v2901_v15, %v2901_v15  ;;  %v2774_v24 = vmax.f32 %v2518_v16, 0.0  ;;  %v2902_v25 = vmax.f32 %v2646_v17, 0.0  ;;  %v5129_v16 = vpop.f32.mrb[70].mxu0  ;;  %v5257_v17 = vpop.f32.mrb[70].mxu1 }
 0x1aa   :  { %4056 = vst.msk [vmem:[%s7531_s4 + $0xf8] sm:$0xf] %vm3993_vm0, %v4712_v18  ;;  %4184 = vst.msk [vmem:[%s7531_s4 + $0x2f8] sm:$0xf] %vm3993_vm0, %v4840_v19  ;;  %v4713_v28 = vpack.c.bf16 %v2776_v20, %v2776_v20  ;;  %v4841_v29 = vpack.c.bf16 %v2904_v21, %v2904_v21  ;;  %v2260_v30 = vmul.f32 %v6439_v36, %v5124_v26 }
 0x1ab   :  { %v2388_v31 = vmul.f32 %v6439_v36, %v5252_v27  ;;  %4054 = vst.msk [vmem:[%s7531_s4 + $0xf0] sm:$0xf] %vm3993_vm0, %v4710_v22  ;;  %4182 = vst.msk [vmem:[%s7531_s4 + $0x2f0] sm:$0xf] %vm3993_vm0, %v4838_v23  ;;  %v4711_v33 = vpack.c.bf16 %v2774_v24, %v2774_v24  ;;  %v4839_v34 = vpack.c.bf16 %v2902_v25, %v2902_v25  ;;  %v1439_v22 = vpop.f32.mrb[71].mxu0  ;;  %v1951_v23 = vpop.f32.mrb[71].mxu1 }
 0x1ac   :  { %v2258_v56 = vmul.f32 %v6439_v36, %v1420_v32  ;;  %v2386_v35 = vmul.f32 %v6439_v36, %v1932_v54  ;;  %4057 = vst.msk [vmem:[%s7531_s4 + $0xfc] sm:$0xf] %vm3993_vm0, %v4713_v28  ;;  %4185 = vst.msk [vmem:[%s7531_s4 + $0x2fc] sm:$0xf] %vm3993_vm0, %v4841_v29  ;;  %v2523_v39 = vadd.f32 %v6461_v47, %v2260_v30 }
 0x1ad   :  { %v2651_v40 = vadd.f32 %v6461_v47, %v2388_v31  ;;  %v2261_v41 = vmul.f32 %v6439_v36, %v5125_v37  ;;  %v2389_v42 = vmul.f32 %v6439_v36, %v5253_v38  ;;  %4055 = vst.msk [vmem:[%s7531_s4 + $0xf4] sm:$0xf] %vm3993_vm0, %v4711_v33  ;;  %4183 = vst.msk [vmem:[%s7531_s4 + $0x2f4] sm:$0xf] %vm3993_vm0, %v4839_v34 }
 0x1ae   :  { %v2521_v45 = vadd.f32 %v6461_v47, %v2258_v56  ;;  %v2649_v46 = vadd.f32 %v6461_v47, %v2386_v35  ;;  %v2259_v48 = vmul.f32 %v6439_v36, %v1423_v43  ;;  %v2387_v49 = vmul.f32 %v6439_v36, %v1935_v44  ;;  %v5132_v43 = vpop.f32.mrb[72].mxu0  ;;  %v5260_v44 = vpop.f32.mrb[72].mxu1 }
 0x1af   :  { %v2779_v50 = vmax.f32 %v2523_v39, 0.0  ;;  %v2907_v51 = vmax.f32 %v2651_v40, 0.0  ;;  %v2524_v52 = vadd.f32 %v6461_v47, %v2261_v41  ;;  %v2652_v53 = vadd.f32 %v6461_v47, %v2389_v42 }
 0x1b0   :  { %v2777_v55 = vmax.f32 %v2521_v45, 0.0  ;;  %v2905_v57 = vmax.f32 %v2649_v46, 0.0  ;;  %v2522_v58 = vadd.f32 %v6461_v47, %v2259_v48  ;;  %v2650_v59 = vadd.f32 %v6461_v47, %v2387_v49 }
 0x1b1   :  { %v4716_v60 = vpack.c.bf16 %v2779_v50, %v2779_v50  ;;  %v4844_v61 = vpack.c.bf16 %v2907_v51, %v2907_v51  ;;  %v2780_v62 = vmax.f32 %v2524_v52, 0.0  ;;  %v2908_v63 = vmax.f32 %v2652_v53, 0.0  ;;  %v1452_v50 = vpop.f32.mrb[73].mxu0  ;;  %v1964_v51 = vpop.f32.mrb[73].mxu1 }
 0x1b2   :  { %v4714_v0 = vpack.c.bf16 %v2777_v55, %v2777_v55  ;;  %v4842_v1 = vpack.c.bf16 %v2905_v57, %v2905_v57  ;;  %v2778_v2 = vmax.f32 %v2522_v58, 0.0  ;;  %v2906_v3 = vmax.f32 %v2650_v59, 0.0  ;;  %v5133_v58 = vpop.f32.mrb[74].mxu0  ;;  %v5261_v59 = vpop.f32.mrb[74].mxu1 }
 0x1b3   :  { %4060 = vst.msk [vmem:[%s7531_s4 + $0x108] sm:$0xf] %vm3993_vm0, %v4716_v60  ;;  %4188 = vst.msk [vmem:[%s7531_s4 + $0x308] sm:$0xf] %vm3993_vm0, %v4844_v61  ;;  %v4717_v6 = vpack.c.bf16 %v2780_v62, %v2780_v62  ;;  %v4845_v7 = vpack.c.bf16 %v2908_v63, %v2908_v63  ;;  %v2264_v8 = vmul.f32 %v6439_v36, %v5128_v4 }
 0x1b4   :  { %v2392_v9 = vmul.f32 %v6439_v36, %v5256_v5  ;;  %4058 = vst.msk [vmem:[%s7531_s4 + $0x100] sm:$0xf] %vm3993_vm0, %v4714_v0  ;;  %4186 = vst.msk [vmem:[%s7531_s4 + $0x300] sm:$0xf] %vm3993_vm0, %v4842_v1  ;;  %v4715_v12 = vpack.c.bf16 %v2778_v2, %v2778_v2  ;;  %v4843_v13 = vpack.c.bf16 %v2906_v3, %v2906_v3  ;;  %v1455_v0 = vpop.f32.mrb[75].mxu0  ;;  %v1967_v1 = vpop.f32.mrb[75].mxu1 }
 0x1b5   :  { %v2262_v14 = vmul.f32 %v6439_v36, %v1436_v10  ;;  %v2390_v15 = vmul.f32 %v6439_v36, %v1948_v11  ;;  %4061 = vst.msk [vmem:[%s7531_s4 + $0x10c] sm:$0xf] %vm3993_vm0, %v4717_v6  ;;  %4189 = vst.msk [vmem:[%s7531_s4 + $0x30c] sm:$0xf] %vm3993_vm0, %v4845_v7  ;;  %v2527_v18 = vadd.f32 %v6461_v47, %v2264_v8 }
 0x1b6   :  { %v2655_v19 = vadd.f32 %v6461_v47, %v2392_v9  ;;  %v2265_v20 = vmul.f32 %v6439_v36, %v5129_v16  ;;  %v2393_v21 = vmul.f32 %v6439_v36, %v5257_v17  ;;  %4059 = vst.msk [vmem:[%s7531_s4 + $0x104] sm:$0xf] %vm3993_vm0, %v4715_v12  ;;  %4187 = vst.msk [vmem:[%s7531_s4 + $0x304] sm:$0xf] %vm3993_vm0, %v4843_v13 }
 0x1b7   :  { %v2525_v24 = vadd.f32 %v6461_v47, %v2262_v14  ;;  %v2653_v25 = vadd.f32 %v6461_v47, %v2390_v15  ;;  %v2263_v26 = vmul.f32 %v6439_v36, %v1439_v22  ;;  %v2391_v27 = vmul.f32 %v6439_v36, %v1951_v23  ;;  %v5136_v22 = vpop.f32.mrb[76].mxu0  ;;  %v5264_v23 = vpop.f32.mrb[76].mxu1 }
 0x1b8   :  { %v2783_v28 = vmax.f32 %v2527_v18, 0.0  ;;  %v2911_v29 = vmax.f32 %v2655_v19, 0.0  ;;  %v2528_v30 = vadd.f32 %v6461_v47, %v2265_v20  ;;  %v2656_v31 = vadd.f32 %v6461_v47, %v2393_v21 }
 0x1b9   :  { %v2781_v32 = vmax.f32 %v2525_v24, 0.0  ;;  %v2909_v54 = vmax.f32 %v2653_v25, 0.0  ;;  %v2526_v33 = vadd.f32 %v6461_v47, %v2263_v26  ;;  %v2654_v34 = vadd.f32 %v6461_v47, %v2391_v27 }
 0x1ba   :  { %v4720_v56 = vpack.c.bf16 %v2783_v28, %v2783_v28  ;;  %v4848_v35 = vpack.c.bf16 %v2911_v29, %v2911_v29  ;;  %v2784_v37 = vmax.f32 %v2528_v30, 0.0  ;;  %v2912_v38 = vmax.f32 %v2656_v31, 0.0  ;;  %v1468_v28 = vpop.f32.mrb[77].mxu0  ;;  %v1980_v29 = vpop.f32.mrb[77].mxu1 }
 0x1bb   :  { %v4718_v39 = vpack.c.bf16 %v2781_v32, %v2781_v32  ;;  %v4846_v40 = vpack.c.bf16 %v2909_v54, %v2909_v54  ;;  %v2782_v41 = vmax.f32 %v2526_v33, 0.0  ;;  %v2910_v42 = vmax.f32 %v2654_v34, 0.0  ;;  %v5137_v33 = vpop.f32.mrb[78].mxu0  ;;  %v5265_v34 = vpop.f32.mrb[78].mxu1 }
 0x1bc   :  { %4064 = vst.msk [vmem:[%s7531_s4 + $0x118] sm:$0xf] %vm3993_vm0, %v4720_v56  ;;  %4192 = vst.msk [vmem:[%s7531_s4 + $0x318] sm:$0xf] %vm3993_vm0, %v4848_v35  ;;  %v4721_v45 = vpack.c.bf16 %v2784_v37, %v2784_v37  ;;  %v4849_v46 = vpack.c.bf16 %v2912_v38, %v2912_v38  ;;  %v2268_v48 = vmul.f32 %v6439_v36, %v5132_v43 }
 0x1bd   :  { %v2396_v49 = vmul.f32 %v6439_v36, %v5260_v44  ;;  %4062 = vst.msk [vmem:[%s7531_s4 + $0x110] sm:$0xf] %vm3993_vm0, %v4718_v39  ;;  %4190 = vst.msk [vmem:[%s7531_s4 + $0x310] sm:$0xf] %vm3993_vm0, %v4846_v40  ;;  %v4719_v52 = vpack.c.bf16 %v2782_v41, %v2782_v41  ;;  %v4847_v53 = vpack.c.bf16 %v2910_v42, %v2910_v42  ;;  %v1471_v39 = vpop.f32.mrb[79].mxu0  ;;  %v1983_v40 = vpop.f32.mrb[79].mxu1 }
 0x1be   :  { %v2266_v55 = vmul.f32 %v6439_v36, %v1452_v50  ;;  %v2394_v57 = vmul.f32 %v6439_v36, %v1964_v51  ;;  %4065 = vst.msk [vmem:[%s7531_s4 + $0x11c] sm:$0xf] %vm3993_vm0, %v4721_v45  ;;  %4193 = vst.msk [vmem:[%s7531_s4 + $0x31c] sm:$0xf] %vm3993_vm0, %v4849_v46  ;;  %v2531_v60 = vadd.f32 %v6461_v47, %v2268_v48 }
 0x1bf   :  { %v2659_v61 = vadd.f32 %v6461_v47, %v2396_v49  ;;  %v2269_v62 = vmul.f32 %v6439_v36, %v5133_v58  ;;  %v2397_v63 = vmul.f32 %v6439_v36, %v5261_v59  ;;  %4063 = vst.msk [vmem:[%s7531_s4 + $0x114] sm:$0xf] %vm3993_vm0, %v4719_v52  ;;  %4191 = vst.msk [vmem:[%s7531_s4 + $0x314] sm:$0xf] %vm3993_vm0, %v4847_v53 }
 0x1c0   :  { %v2529_v2 = vadd.f32 %v6461_v47, %v2266_v55  ;;  %v2657_v3 = vadd.f32 %v6461_v47, %v2394_v57  ;;  %v2267_v4 = vmul.f32 %v6439_v36, %v1455_v0  ;;  %v2395_v5 = vmul.f32 %v6439_v36, %v1967_v1  ;;  %v5140_v0 = vpop.f32.mrb[80].mxu0  ;;  %v5268_v1 = vpop.f32.mrb[80].mxu1 }
 0x1c1   :  { %v2787_v6 = vmax.f32 %v2531_v60, 0.0  ;;  %v2915_v7 = vmax.f32 %v2659_v61, 0.0  ;;  %v2532_v8 = vadd.f32 %v6461_v47, %v2269_v62  ;;  %v2660_v9 = vadd.f32 %v6461_v47, %v2397_v63 }
 0x1c2   :  { %v2785_v10 = vmax.f32 %v2529_v2, 0.0  ;;  %v2913_v11 = vmax.f32 %v2657_v3, 0.0  ;;  %v2530_v12 = vadd.f32 %v6461_v47, %v2267_v4  ;;  %v2658_v13 = vadd.f32 %v6461_v47, %v2395_v5 }
 0x1c3   :  { %v4724_v14 = vpack.c.bf16 %v2787_v6, %v2787_v6  ;;  %v4852_v15 = vpack.c.bf16 %v2915_v7, %v2915_v7  ;;  %v2788_v16 = vmax.f32 %v2532_v8, 0.0  ;;  %v2916_v17 = vmax.f32 %v2660_v9, 0.0  ;;  %v1484_v6 = vpop.f32.mrb[81].mxu0  ;;  %v1996_v7 = vpop.f32.mrb[81].mxu1 }
 0x1c4   :  { %v4722_v18 = vpack.c.bf16 %v2785_v10, %v2785_v10  ;;  %v4850_v19 = vpack.c.bf16 %v2913_v11, %v2913_v11  ;;  %v2786_v20 = vmax.f32 %v2530_v12, 0.0  ;;  %v2914_v21 = vmax.f32 %v2658_v13, 0.0  ;;  %v5141_v12 = vpop.f32.mrb[82].mxu0  ;;  %v5269_v13 = vpop.f32.mrb[82].mxu1 }
 0x1c5   :  { %4068 = vst.msk [vmem:[%s7531_s4 + $0x128] sm:$0xf] %vm3993_vm0, %v4724_v14  ;;  %4196 = vst.msk [vmem:[%s7531_s4 + $0x328] sm:$0xf] %vm3993_vm0, %v4852_v15  ;;  %v4725_v24 = vpack.c.bf16 %v2788_v16, %v2788_v16  ;;  %v4853_v25 = vpack.c.bf16 %v2916_v17, %v2916_v17  ;;  %v2272_v26 = vmul.f32 %v6439_v36, %v5136_v22 }
 0x1c6   :  { %v2400_v27 = vmul.f32 %v6439_v36, %v5264_v23  ;;  %4066 = vst.msk [vmem:[%s7531_s4 + $0x120] sm:$0xf] %vm3993_vm0, %v4722_v18  ;;  %4194 = vst.msk [vmem:[%s7531_s4 + $0x320] sm:$0xf] %vm3993_vm0, %v4850_v19  ;;  %v4723_v30 = vpack.c.bf16 %v2786_v20, %v2786_v20  ;;  %v4851_v31 = vpack.c.bf16 %v2914_v21, %v2914_v21  ;;  %v1487_v18 = vpop.f32.mrb[83].mxu0  ;;  %v1999_v19 = vpop.f32.mrb[83].mxu1 }
 0x1c7   :  { %v2270_v32 = vmul.f32 %v6439_v36, %v1468_v28  ;;  %v2398_v54 = vmul.f32 %v6439_v36, %v1980_v29  ;;  %4069 = vst.msk [vmem:[%s7531_s4 + $0x12c] sm:$0xf] %vm3993_vm0, %v4725_v24  ;;  %4197 = vst.msk [vmem:[%s7531_s4 + $0x32c] sm:$0xf] %vm3993_vm0, %v4853_v25  ;;  %v2535_v56 = vadd.f32 %v6461_v47, %v2272_v26 }
 0x1c8   :  { %v2663_v35 = vadd.f32 %v6461_v47, %v2400_v27  ;;  %v2273_v37 = vmul.f32 %v6439_v36, %v5137_v33  ;;  %v2401_v38 = vmul.f32 %v6439_v36, %v5265_v34  ;;  %4067 = vst.msk [vmem:[%s7531_s4 + $0x124] sm:$0xf] %vm3993_vm0, %v4723_v30  ;;  %4195 = vst.msk [vmem:[%s7531_s4 + $0x324] sm:$0xf] %vm3993_vm0, %v4851_v31 }
 0x1c9   :  { %v2533_v41 = vadd.f32 %v6461_v47, %v2270_v32  ;;  %v2661_v42 = vadd.f32 %v6461_v47, %v2398_v54  ;;  %v2271_v43 = vmul.f32 %v6439_v36, %v1471_v39  ;;  %v2399_v44 = vmul.f32 %v6439_v36, %v1983_v40  ;;  %v5272_v39 = vpop.f32.mrb[84].mxu1 }
 0x1ca   :  { %v2791_v45 = vmax.f32 %v2535_v56, 0.0  ;;  %v2919_v46 = vmax.f32 %v2663_v35, 0.0  ;;  %v2536_v48 = vadd.f32 %v6461_v47, %v2273_v37  ;;  %v2664_v49 = vadd.f32 %v6461_v47, %v2401_v38  ;;  %v5144_v38 = vpop.f32.mrb[84].mxu0 }
 0x1cb   :  { %v2789_v50 = vmax.f32 %v2533_v41, 0.0  ;;  %v2917_v51 = vmax.f32 %v2661_v42, 0.0  ;;  %v2534_v52 = vadd.f32 %v6461_v47, %v2271_v43  ;;  %v2662_v53 = vadd.f32 %v6461_v47, %v2399_v44  ;;  %v6971_v41 = vld [vmem:[#allocation2] ss:$0 sm:$0xff]  ;;  %v1500_v44 = vpop.f32.mrb[85].mxu0 }
 0x1cc   :  { %v4728_v55 = vpack.c.bf16 %v2791_v45, %v2791_v45  ;;  %v4856_v57 = vpack.c.bf16 %v2919_v46, %v2919_v46  ;;  %v2792_v58 = vmax.f32 %v2536_v48, 0.0  ;;  %v2920_v59 = vmax.f32 %v2664_v49, 0.0  ;;  %v2012_v45 = vpop.f32.mrb[85].mxu1 }
 0x1cd   :  { %v4726_v60 = vpack.c.bf16 %v2789_v50, %v2789_v50  ;;  %v4854_v61 = vpack.c.bf16 %v2917_v51, %v2917_v51  ;;  %v2790_v62 = vmax.f32 %v2534_v52, 0.0  ;;  %v2918_v63 = vmax.f32 %v2662_v53, 0.0  ;;  %v5145_v51 = vpop.f32.mrb[86].mxu0  ;;  %v5273_v52 = vpop.f32.mrb[86].mxu1  ;;  %v6993_v53 = vld [vmem:[#allocation4] ss:$0 sm:$0xff] }
 0x1ce   :  { %4072 = vst.msk [vmem:[%s7531_s4 + $0x138] sm:$0xf] %vm3993_vm0, %v4728_v55  ;;  %4200 = vst.msk [vmem:[%s7531_s4 + $0x338] sm:$0xf] %vm3993_vm0, %v4856_v57  ;;  %v4729_v2 = vpack.c.bf16 %v2792_v58, %v2792_v58  ;;  %v4857_v3 = vpack.c.bf16 %v2920_v59, %v2920_v59  ;;  %v2276_v4 = vmul.f32 %v6439_v36, %v5140_v0 }
 0x1cf   :  { %v2404_v5 = vmul.f32 %v6439_v36, %v5268_v1  ;;  %4070 = vst.msk [vmem:[%s7531_s4 + $0x130] sm:$0xf] %vm3993_vm0, %v4726_v60  ;;  %4198 = vst.msk [vmem:[%s7531_s4 + $0x330] sm:$0xf] %vm3993_vm0, %v4854_v61  ;;  %v4727_v8 = vpack.c.bf16 %v2790_v62, %v2790_v62  ;;  %v4855_v9 = vpack.c.bf16 %v2918_v63, %v2918_v63  ;;  %v1503_v60 = vpop.f32.mrb[87].mxu0  ;;  %v2015_v61 = vpop.f32.mrb[87].mxu1 }
 0x1d0   :  { %v2274_v10 = vmul.f32 %v6439_v36, %v1484_v6  ;;  %v2402_v11 = vmul.f32 %v6439_v36, %v1996_v7  ;;  %4073 = vst.msk [vmem:[%s7531_s4 + $0x13c] sm:$0xf] %vm3993_vm0, %v4729_v2  ;;  %4201 = vst.msk [vmem:[%s7531_s4 + $0x33c] sm:$0xf] %vm3993_vm0, %v4857_v3  ;;  %v2539_v14 = vadd.f32 %v6461_v47, %v2276_v4 }
 0x1d1   :  { %v2667_v15 = vadd.f32 %v6461_v47, %v2404_v5  ;;  %v2277_v16 = vmul.f32 %v6439_v36, %v5141_v12  ;;  %v2405_v17 = vmul.f32 %v6439_v36, %v5269_v13  ;;  %4071 = vst.msk [vmem:[%s7531_s4 + $0x134] sm:$0xf] %vm3993_vm0, %v4727_v8  ;;  %4199 = vst.msk [vmem:[%s7531_s4 + $0x334] sm:$0xf] %vm3993_vm0, %v4855_v9 }
 0x1d2   :  { %v2537_v20 = vadd.f32 %v6461_v47, %v2274_v10  ;;  %v2665_v21 = vadd.f32 %v6461_v47, %v2402_v11  ;;  %v2275_v22 = vmul.f32 %v6439_v36, %v1487_v18  ;;  %v2403_v23 = vmul.f32 %v6439_v36, %v1999_v19  ;;  %v5148_v18 = vpop.f32.mrb[88].mxu0  ;;  %v5276_v19 = vpop.f32.mrb[88].mxu1 }
 0x1d3   :  { %v2795_v24 = vmax.f32 %v2539_v14, 0.0  ;;  %v2923_v25 = vmax.f32 %v2667_v15, 0.0  ;;  %v2540_v26 = vadd.f32 %v6461_v47, %v2277_v16  ;;  %v2668_v27 = vadd.f32 %v6461_v47, %v2405_v17 }
 0x1d4   :  { %v2793_v28 = vmax.f32 %v2537_v20, 0.0  ;;  %v2921_v29 = vmax.f32 %v2665_v21, 0.0  ;;  %v2538_v30 = vadd.f32 %v6461_v47, %v2275_v22  ;;  %v2666_v31 = vadd.f32 %v6461_v47, %v2403_v23 }
 0x1d5   :  { %v4732_v32 = vpack.c.bf16 %v2795_v24, %v2795_v24  ;;  %v4860_v54 = vpack.c.bf16 %v2923_v25, %v2923_v25  ;;  %v2796_v33 = vmax.f32 %v2540_v26, 0.0  ;;  %v2924_v34 = vmax.f32 %v2668_v27, 0.0  ;;  %v1516_v24 = vpop.f32.mrb[89].mxu0  ;;  %v2028_v25 = vpop.f32.mrb[89].mxu1 }
 0x1d6   :  { %v4730_v56 = vpack.c.bf16 %v2793_v28, %v2793_v28  ;;  %v4858_v35 = vpack.c.bf16 %v2921_v29, %v2921_v29  ;;  %v2794_v37 = vmax.f32 %v2538_v30, 0.0  ;;  %v2922_v36 = vmax.f32 %v2666_v31, 0.0  ;;  %v5149_v30 = vpop.f32.mrb[90].mxu0  ;;  %v5277_v31 = vpop.f32.mrb[90].mxu1 }
 0x1d7   :  { %4076 = vst.msk [vmem:[%s7531_s4 + $0x148] sm:$0xf] %vm3993_vm0, %v4732_v32  ;;  %4204 = vst.msk [vmem:[%s7531_s4 + $0x348] sm:$0xf] %vm3993_vm0, %v4860_v54  ;;  %v4733_v47 = vpack.c.bf16 %v2796_v33, %v2796_v33  ;;  %v4861_v40 = vpack.c.bf16 %v2924_v34, %v2924_v34  ;;  %v2280_v42 = vmul.f32 %v6971_v41, %v5144_v38 }
 0x1d8   :  { %v2408_v43 = vmul.f32 %v6971_v41, %v5272_v39  ;;  %4074 = vst.msk [vmem:[%s7531_s4 + $0x140] sm:$0xf] %vm3993_vm0, %v4730_v56  ;;  %4202 = vst.msk [vmem:[%s7531_s4 + $0x340] sm:$0xf] %vm3993_vm0, %v4858_v35  ;;  %v4731_v46 = vpack.c.bf16 %v2794_v37, %v2794_v37  ;;  %v4859_v48 = vpack.c.bf16 %v2922_v36, %v2922_v36  ;;  %v1519_v56 = vpop.f32.mrb[91].mxu0  ;;  %v2031_v35 = vpop.f32.mrb[91].mxu1 }
 0x1d9   :  { %v2278_v49 = vmul.f32 %v6971_v41, %v1500_v44  ;;  %v2406_v50 = vmul.f32 %v6971_v41, %v2012_v45  ;;  %4077 = vst.msk [vmem:[%s7531_s4 + $0x14c] sm:$0xf] %vm3993_vm0, %v4733_v47  ;;  %4205 = vst.msk [vmem:[%s7531_s4 + $0x34c] sm:$0xf] %vm3993_vm0, %v4861_v40  ;;  %v2543_v55 = vadd.f32 %v6993_v53, %v2280_v42 }
 0x1da   :  { %v2671_v57 = vadd.f32 %v6993_v53, %v2408_v43  ;;  %v2281_v58 = vmul.f32 %v6971_v41, %v5145_v51  ;;  %v2409_v59 = vmul.f32 %v6971_v41, %v5273_v52  ;;  %4075 = vst.msk [vmem:[%s7531_s4 + $0x144] sm:$0xf] %vm3993_vm0, %v4731_v46  ;;  %4203 = vst.msk [vmem:[%s7531_s4 + $0x344] sm:$0xf] %vm3993_vm0, %v4859_v48 }
 0x1db   :  { %v2541_v62 = vadd.f32 %v6993_v53, %v2278_v49  ;;  %v2669_v63 = vadd.f32 %v6993_v53, %v2406_v50  ;;  %v2279_v0 = vmul.f32 %v6971_v41, %v1503_v60  ;;  %v2407_v1 = vmul.f32 %v6971_v41, %v2015_v61  ;;  %v5152_v60 = vpop.f32.mrb[92].mxu0  ;;  %v5280_v61 = vpop.f32.mrb[92].mxu1 }
 0x1dc   :  { %v2799_v2 = vmax.f32 %v2543_v55, 0.0  ;;  %v2927_v3 = vmax.f32 %v2671_v57, 0.0  ;;  %v2544_v4 = vadd.f32 %v6993_v53, %v2281_v58  ;;  %v2672_v5 = vadd.f32 %v6993_v53, %v2409_v59 }
 0x1dd   :  { %v2797_v6 = vmax.f32 %v2541_v62, 0.0  ;;  %v2925_v7 = vmax.f32 %v2669_v63, 0.0  ;;  %v2542_v8 = vadd.f32 %v6993_v53, %v2279_v0  ;;  %v2670_v9 = vadd.f32 %v6993_v53, %v2407_v1 }
 0x1de   :  { %v4736_v10 = vpack.c.bf16 %v2799_v2, %v2799_v2  ;;  %v4864_v11 = vpack.c.bf16 %v2927_v3, %v2927_v3  ;;  %v2800_v12 = vmax.f32 %v2544_v4, 0.0  ;;  %v2928_v13 = vmax.f32 %v2672_v5, 0.0  ;;  %v1532_v2 = vpop.f32.mrb[93].mxu0  ;;  %v2044_v3 = vpop.f32.mrb[93].mxu1 }
 0x1df   :  { %v4734_v14 = vpack.c.bf16 %v2797_v6, %v2797_v6  ;;  %v4862_v15 = vpack.c.bf16 %v2925_v7, %v2925_v7  ;;  %v2798_v16 = vmax.f32 %v2542_v8, 0.0  ;;  %v2926_v17 = vmax.f32 %v2670_v9, 0.0  ;;  %v5153_v8 = vpop.f32.mrb[94].mxu0  ;;  %v5281_v9 = vpop.f32.mrb[94].mxu1 }
 0x1e0   :  { %4080 = vst.msk [vmem:[%s7531_s4 + $0x158] sm:$0xf] %vm3993_vm0, %v4736_v10  ;;  %4208 = vst.msk [vmem:[%s7531_s4 + $0x358] sm:$0xf] %vm3993_vm0, %v4864_v11  ;;  %v4737_v20 = vpack.c.bf16 %v2800_v12, %v2800_v12  ;;  %v4865_v21 = vpack.c.bf16 %v2928_v13, %v2928_v13  ;;  %v2284_v22 = vmul.f32 %v6971_v41, %v5148_v18 }
 0x1e1   :  { %v2412_v23 = vmul.f32 %v6971_v41, %v5276_v19  ;;  %4078 = vst.msk [vmem:[%s7531_s4 + $0x150] sm:$0xf] %vm3993_vm0, %v4734_v14  ;;  %4206 = vst.msk [vmem:[%s7531_s4 + $0x350] sm:$0xf] %vm3993_vm0, %v4862_v15  ;;  %v4735_v26 = vpack.c.bf16 %v2798_v16, %v2798_v16  ;;  %v4863_v27 = vpack.c.bf16 %v2926_v17, %v2926_v17  ;;  %v1535_v14 = vpop.f32.mrb[95].mxu0  ;;  %v2047_v15 = vpop.f32.mrb[95].mxu1 }
 0x1e2   :  { %v2282_v28 = vmul.f32 %v6971_v41, %v1516_v24  ;;  %v2410_v29 = vmul.f32 %v6971_v41, %v2028_v25  ;;  %4081 = vst.msk [vmem:[%s7531_s4 + $0x15c] sm:$0xf] %vm3993_vm0, %v4737_v20  ;;  %4209 = vst.msk [vmem:[%s7531_s4 + $0x35c] sm:$0xf] %vm3993_vm0, %v4865_v21  ;;  %v2547_v32 = vadd.f32 %v6993_v53, %v2284_v22 }
 0x1e3   :  { %v2675_v54 = vadd.f32 %v6993_v53, %v2412_v23  ;;  %v2285_v33 = vmul.f32 %v6971_v41, %v5149_v30  ;;  %v2413_v34 = vmul.f32 %v6971_v41, %v5277_v31  ;;  %4079 = vst.msk [vmem:[%s7531_s4 + $0x154] sm:$0xf] %vm3993_vm0, %v4735_v26  ;;  %4207 = vst.msk [vmem:[%s7531_s4 + $0x354] sm:$0xf] %vm3993_vm0, %v4863_v27 }
 0x1e4   :  { %v2545_v37 = vadd.f32 %v6993_v53, %v2282_v28  ;;  %v2673_v36 = vadd.f32 %v6993_v53, %v2410_v29  ;;  %v2283_v38 = vmul.f32 %v6971_v41, %v1519_v56  ;;  %v2411_v39 = vmul.f32 %v6971_v41, %v2031_v35  ;;  %v5156_v56 = vpop.f32.mrb[96].mxu0  ;;  %v5284_v35 = vpop.f32.mrb[96].mxu1 }
 0x1e5   :  { %v2803_v47 = vmax.f32 %v2547_v32, 0.0  ;;  %v2931_v40 = vmax.f32 %v2675_v54, 0.0  ;;  %v2548_v42 = vadd.f32 %v6993_v53, %v2285_v33  ;;  %v2676_v43 = vadd.f32 %v6993_v53, %v2413_v34 }
 0x1e6   :  { %v2801_v44 = vmax.f32 %v2545_v37, 0.0  ;;  %v2929_v45 = vmax.f32 %v2673_v36, 0.0  ;;  %v2546_v46 = vadd.f32 %v6993_v53, %v2283_v38  ;;  %v2674_v48 = vadd.f32 %v6993_v53, %v2411_v39 }
 0x1e7   :  { %v4740_v49 = vpack.c.bf16 %v2803_v47, %v2803_v47  ;;  %v4868_v50 = vpack.c.bf16 %v2931_v40, %v2931_v40  ;;  %v2804_v51 = vmax.f32 %v2548_v42, 0.0  ;;  %v2932_v52 = vmax.f32 %v2676_v43, 0.0  ;;  %v1548_v47 = vpop.f32.mrb[97].mxu0  ;;  %v2060_v40 = vpop.f32.mrb[97].mxu1 }
 0x1e8   :  { %v4738_v55 = vpack.c.bf16 %v2801_v44, %v2801_v44  ;;  %v4866_v57 = vpack.c.bf16 %v2929_v45, %v2929_v45  ;;  %v2802_v58 = vmax.f32 %v2546_v46, 0.0  ;;  %v2930_v59 = vmax.f32 %v2674_v48, 0.0  ;;  %v5157_v46 = vpop.f32.mrb[98].mxu0  ;;  %v5285_v48 = vpop.f32.mrb[98].mxu1 }
 0x1e9   :  { %4084 = vst.msk [vmem:[%s7531_s4 + $0x168] sm:$0xf] %vm3993_vm0, %v4740_v49  ;;  %4212 = vst.msk [vmem:[%s7531_s4 + $0x368] sm:$0xf] %vm3993_vm0, %v4868_v50  ;;  %v4741_v62 = vpack.c.bf16 %v2804_v51, %v2804_v51  ;;  %v4869_v63 = vpack.c.bf16 %v2932_v52, %v2932_v52  ;;  %v2288_v0 = vmul.f32 %v6971_v41, %v5152_v60 }
 0x1ea   :  { %v2416_v1 = vmul.f32 %v6971_v41, %v5280_v61  ;;  %4082 = vst.msk [vmem:[%s7531_s4 + $0x160] sm:$0xf] %vm3993_vm0, %v4738_v55  ;;  %4210 = vst.msk [vmem:[%s7531_s4 + $0x360] sm:$0xf] %vm3993_vm0, %v4866_v57  ;;  %v4739_v4 = vpack.c.bf16 %v2802_v58, %v2802_v58  ;;  %v4867_v5 = vpack.c.bf16 %v2930_v59, %v2930_v59  ;;  %v1551_v55 = vpop.f32.mrb[99].mxu0  ;;  %v2063_v57 = vpop.f32.mrb[99].mxu1 }
 0x1eb   :  { %v2286_v6 = vmul.f32 %v6971_v41, %v1532_v2  ;;  %v2414_v7 = vmul.f32 %v6971_v41, %v2044_v3  ;;  %4085 = vst.msk [vmem:[%s7531_s4 + $0x16c] sm:$0xf] %vm3993_vm0, %v4741_v62  ;;  %4213 = vst.msk [vmem:[%s7531_s4 + $0x36c] sm:$0xf] %vm3993_vm0, %v4869_v63  ;;  %v2551_v10 = vadd.f32 %v6993_v53, %v2288_v0 }
 0x1ec   :  { %v2679_v11 = vadd.f32 %v6993_v53, %v2416_v1  ;;  %v2289_v12 = vmul.f32 %v6971_v41, %v5153_v8  ;;  %v2417_v13 = vmul.f32 %v6971_v41, %v5281_v9  ;;  %4083 = vst.msk [vmem:[%s7531_s4 + $0x164] sm:$0xf] %vm3993_vm0, %v4739_v4  ;;  %4211 = vst.msk [vmem:[%s7531_s4 + $0x364] sm:$0xf] %vm3993_vm0, %v4867_v5 }
 0x1ed   :  { %v2549_v16 = vadd.f32 %v6993_v53, %v2286_v6  ;;  %v2677_v17 = vadd.f32 %v6993_v53, %v2414_v7  ;;  %v2287_v18 = vmul.f32 %v6971_v41, %v1535_v14  ;;  %v2415_v19 = vmul.f32 %v6971_v41, %v2047_v15  ;;  %v5160_v14 = vpop.f32.mrb[100].mxu0  ;;  %v5288_v15 = vpop.f32.mrb[100].mxu1 }
 0x1ee   :  { %v2807_v20 = vmax.f32 %v2551_v10, 0.0  ;;  %v2935_v21 = vmax.f32 %v2679_v11, 0.0  ;;  %v2552_v22 = vadd.f32 %v6993_v53, %v2289_v12  ;;  %v2680_v23 = vadd.f32 %v6993_v53, %v2417_v13 }
 0x1ef   :  { %v2805_v24 = vmax.f32 %v2549_v16, 0.0  ;;  %v2933_v25 = vmax.f32 %v2677_v17, 0.0  ;;  %v2550_v26 = vadd.f32 %v6993_v53, %v2287_v18  ;;  %v2678_v27 = vadd.f32 %v6993_v53, %v2415_v19 }
 0x1f0   :  { %v4744_v28 = vpack.c.bf16 %v2807_v20, %v2807_v20  ;;  %v4872_v29 = vpack.c.bf16 %v2935_v21, %v2935_v21  ;;  %v2808_v30 = vmax.f32 %v2552_v22, 0.0  ;;  %v2936_v31 = vmax.f32 %v2680_v23, 0.0  ;;  %v1564_v20 = vpop.f32.mrb[101].mxu0  ;;  %v2076_v21 = vpop.f32.mrb[101].mxu1 }
 0x1f1   :  { %v4742_v32 = vpack.c.bf16 %v2805_v24, %v2805_v24  ;;  %v4870_v54 = vpack.c.bf16 %v2933_v25, %v2933_v25  ;;  %v2806_v33 = vmax.f32 %v2550_v26, 0.0  ;;  %v2934_v34 = vmax.f32 %v2678_v27, 0.0  ;;  %v5161_v26 = vpop.f32.mrb[102].mxu0  ;;  %v5289_v27 = vpop.f32.mrb[102].mxu1 }
 0x1f2   :  { %4088 = vst.msk [vmem:[%s7531_s4 + $0x178] sm:$0xf] %vm3993_vm0, %v4744_v28  ;;  %4216 = vst.msk [vmem:[%s7531_s4 + $0x378] sm:$0xf] %vm3993_vm0, %v4872_v29  ;;  %v4745_v37 = vpack.c.bf16 %v2808_v30, %v2808_v30  ;;  %v4873_v36 = vpack.c.bf16 %v2936_v31, %v2936_v31  ;;  %v2292_v38 = vmul.f32 %v6971_v41, %v5156_v56 }
 0x1f3   :  { %v2420_v39 = vmul.f32 %v6971_v41, %v5284_v35  ;;  %4086 = vst.msk [vmem:[%s7531_s4 + $0x170] sm:$0xf] %vm3993_vm0, %v4742_v32  ;;  %4214 = vst.msk [vmem:[%s7531_s4 + $0x370] sm:$0xf] %vm3993_vm0, %v4870_v54  ;;  %v4743_v42 = vpack.c.bf16 %v2806_v33, %v2806_v33  ;;  %v4871_v43 = vpack.c.bf16 %v2934_v34, %v2934_v34  ;;  %v1567_v32 = vpop.f32.mrb[103].mxu0  ;;  %v2079_v54 = vpop.f32.mrb[103].mxu1 }
 0x1f4   :  { %v2290_v44 = vmul.f32 %v6971_v41, %v1548_v47  ;;  %v2418_v45 = vmul.f32 %v6971_v41, %v2060_v40  ;;  %4089 = vst.msk [vmem:[%s7531_s4 + $0x17c] sm:$0xf] %vm3993_vm0, %v4745_v37  ;;  %4217 = vst.msk [vmem:[%s7531_s4 + $0x37c] sm:$0xf] %vm3993_vm0, %v4873_v36  ;;  %v2555_v49 = vadd.f32 %v6993_v53, %v2292_v38 }
 0x1f5   :  { %v2683_v50 = vadd.f32 %v6993_v53, %v2420_v39  ;;  %v2293_v51 = vmul.f32 %v6971_v41, %v5157_v46  ;;  %v2421_v52 = vmul.f32 %v6971_v41, %v5285_v48  ;;  %4087 = vst.msk [vmem:[%s7531_s4 + $0x174] sm:$0xf] %vm3993_vm0, %v4743_v42  ;;  %4215 = vst.msk [vmem:[%s7531_s4 + $0x374] sm:$0xf] %vm3993_vm0, %v4871_v43 }
 0x1f6   :  { %v2553_v58 = vadd.f32 %v6993_v53, %v2290_v44  ;;  %v2681_v59 = vadd.f32 %v6993_v53, %v2418_v45  ;;  %v2291_v60 = vmul.f32 %v6971_v41, %v1551_v55  ;;  %v2419_v61 = vmul.f32 %v6971_v41, %v2063_v57  ;;  %v5164_v55 = vpop.f32.mrb[104].mxu0  ;;  %v5292_v57 = vpop.f32.mrb[104].mxu1 }
 0x1f7   :  { %v2811_v62 = vmax.f32 %v2555_v49, 0.0  ;;  %v2939_v63 = vmax.f32 %v2683_v50, 0.0  ;;  %v2556_v0 = vadd.f32 %v6993_v53, %v2293_v51  ;;  %v2684_v1 = vadd.f32 %v6993_v53, %v2421_v52 }
 0x1f8   :  { %v2809_v2 = vmax.f32 %v2553_v58, 0.0  ;;  %v2937_v3 = vmax.f32 %v2681_v59, 0.0  ;;  %v2554_v4 = vadd.f32 %v6993_v53, %v2291_v60  ;;  %v2682_v5 = vadd.f32 %v6993_v53, %v2419_v61 }
 0x1f9   :  { %v4748_v6 = vpack.c.bf16 %v2811_v62, %v2811_v62  ;;  %v4876_v7 = vpack.c.bf16 %v2939_v63, %v2939_v63  ;;  %v2812_v8 = vmax.f32 %v2556_v0, 0.0  ;;  %v2940_v9 = vmax.f32 %v2684_v1, 0.0  ;;  %v1580_v62 = vpop.f32.mrb[105].mxu0  ;;  %v2092_v63 = vpop.f32.mrb[105].mxu1 }
 0x1fa   :  { %v4746_v10 = vpack.c.bf16 %v2809_v2, %v2809_v2  ;;  %v4874_v11 = vpack.c.bf16 %v2937_v3, %v2937_v3  ;;  %v2810_v12 = vmax.f32 %v2554_v4, 0.0  ;;  %v2938_v13 = vmax.f32 %v2682_v5, 0.0  ;;  %v5165_v4 = vpop.f32.mrb[106].mxu0  ;;  %v5293_v5 = vpop.f32.mrb[106].mxu1 }
 0x1fb   :  { %4092 = vst.msk [vmem:[%s7531_s4 + $0x188] sm:$0xf] %vm3993_vm0, %v4748_v6  ;;  %4220 = vst.msk [vmem:[%s7531_s4 + $0x388] sm:$0xf] %vm3993_vm0, %v4876_v7  ;;  %v4749_v16 = vpack.c.bf16 %v2812_v8, %v2812_v8  ;;  %v4877_v17 = vpack.c.bf16 %v2940_v9, %v2940_v9  ;;  %v2296_v18 = vmul.f32 %v6971_v41, %v5160_v14 }
 0x1fc   :  { %v2424_v19 = vmul.f32 %v6971_v41, %v5288_v15  ;;  %4090 = vst.msk [vmem:[%s7531_s4 + $0x180] sm:$0xf] %vm3993_vm0, %v4746_v10  ;;  %4218 = vst.msk [vmem:[%s7531_s4 + $0x380] sm:$0xf] %vm3993_vm0, %v4874_v11  ;;  %v4747_v22 = vpack.c.bf16 %v2810_v12, %v2810_v12  ;;  %v4875_v23 = vpack.c.bf16 %v2938_v13, %v2938_v13  ;;  %v1583_v10 = vpop.f32.mrb[107].mxu0  ;;  %v2095_v11 = vpop.f32.mrb[107].mxu1 }
 0x1fd   :  { %v2294_v24 = vmul.f32 %v6971_v41, %v1564_v20  ;;  %v2422_v25 = vmul.f32 %v6971_v41, %v2076_v21  ;;  %4093 = vst.msk [vmem:[%s7531_s4 + $0x18c] sm:$0xf] %vm3993_vm0, %v4749_v16  ;;  %4221 = vst.msk [vmem:[%s7531_s4 + $0x38c] sm:$0xf] %vm3993_vm0, %v4877_v17  ;;  %v2559_v28 = vadd.f32 %v6993_v53, %v2296_v18 }
 0x1fe   :  { %v2687_v29 = vadd.f32 %v6993_v53, %v2424_v19  ;;  %v2297_v30 = vmul.f32 %v6971_v41, %v5161_v26  ;;  %v2425_v31 = vmul.f32 %v6971_v41, %v5289_v27  ;;  %4091 = vst.msk [vmem:[%s7531_s4 + $0x184] sm:$0xf] %vm3993_vm0, %v4747_v22  ;;  %4219 = vst.msk [vmem:[%s7531_s4 + $0x384] sm:$0xf] %vm3993_vm0, %v4875_v23 }
 0x1ff   :  { %v2557_v33 = vadd.f32 %v6993_v53, %v2294_v24  ;;  %v2685_v34 = vadd.f32 %v6993_v53, %v2422_v25  ;;  %v2295_v56 = vmul.f32 %v6971_v41, %v1567_v32  ;;  %v2423_v35 = vmul.f32 %v6971_v41, %v2079_v54  ;;  %v5168_v32 = vpop.f32.mrb[108].mxu0  ;;  %v5296_v54 = vpop.f32.mrb[108].mxu1 }
 0x200   :  { %v2815_v37 = vmax.f32 %v2559_v28, 0.0  ;;  %v2943_v36 = vmax.f32 %v2687_v29, 0.0  ;;  %v2560_v38 = vadd.f32 %v6993_v53, %v2297_v30  ;;  %v2688_v39 = vadd.f32 %v6993_v53, %v2425_v31 }
 0x201   :  { %v2813_v47 = vmax.f32 %v2557_v33, 0.0  ;;  %v2941_v40 = vmax.f32 %v2685_v34, 0.0  ;;  %v2558_v42 = vadd.f32 %v6993_v53, %v2295_v56  ;;  %v2686_v43 = vadd.f32 %v6993_v53, %v2423_v35 }
 0x202   :  { %v4752_v44 = vpack.c.bf16 %v2815_v37, %v2815_v37  ;;  %v4880_v45 = vpack.c.bf16 %v2943_v36, %v2943_v36  ;;  %v2816_v46 = vmax.f32 %v2560_v38, 0.0  ;;  %v2944_v48 = vmax.f32 %v2688_v39, 0.0  ;;  %v1596_v37 = vpop.f32.mrb[109].mxu0  ;;  %v2108_v36 = vpop.f32.mrb[109].mxu1 }
 0x203   :  { %v4750_v49 = vpack.c.bf16 %v2813_v47, %v2813_v47  ;;  %v4878_v50 = vpack.c.bf16 %v2941_v40, %v2941_v40  ;;  %v2814_v51 = vmax.f32 %v2558_v42, 0.0  ;;  %v2942_v52 = vmax.f32 %v2686_v43, 0.0  ;;  %v5169_v42 = vpop.f32.mrb[110].mxu0  ;;  %v5297_v43 = vpop.f32.mrb[110].mxu1 }
 0x204   :  { %4096 = vst.msk [vmem:[%s7531_s4 + $0x198] sm:$0xf] %vm3993_vm0, %v4752_v44  ;;  %4224 = vst.msk [vmem:[%s7531_s4 + $0x398] sm:$0xf] %vm3993_vm0, %v4880_v45  ;;  %v4753_v58 = vpack.c.bf16 %v2816_v46, %v2816_v46  ;;  %v4881_v59 = vpack.c.bf16 %v2944_v48, %v2944_v48  ;;  %v2300_v60 = vmul.f32 %v6971_v41, %v5164_v55 }
 0x205   :  { %v2428_v61 = vmul.f32 %v6971_v41, %v5292_v57  ;;  %4094 = vst.msk [vmem:[%s7531_s4 + $0x190] sm:$0xf] %vm3993_vm0, %v4750_v49  ;;  %4222 = vst.msk [vmem:[%s7531_s4 + $0x390] sm:$0xf] %vm3993_vm0, %v4878_v50  ;;  %v4751_v0 = vpack.c.bf16 %v2814_v51, %v2814_v51  ;;  %v4879_v1 = vpack.c.bf16 %v2942_v52, %v2942_v52  ;;  %v1599_v49 = vpop.f32.mrb[111].mxu0  ;;  %v2111_v50 = vpop.f32.mrb[111].mxu1 }
 0x206   :  { %v2298_v2 = vmul.f32 %v6971_v41, %v1580_v62  ;;  %v2426_v3 = vmul.f32 %v6971_v41, %v2092_v63  ;;  %4097 = vst.msk [vmem:[%s7531_s4 + $0x19c] sm:$0xf] %vm3993_vm0, %v4753_v58  ;;  %4225 = vst.msk [vmem:[%s7531_s4 + $0x39c] sm:$0xf] %vm3993_vm0, %v4881_v59  ;;  %v2563_v6 = vadd.f32 %v6993_v53, %v2300_v60 }
 0x207   :  { %v2691_v7 = vadd.f32 %v6993_v53, %v2428_v61  ;;  %v2301_v8 = vmul.f32 %v6971_v41, %v5165_v4  ;;  %v2429_v9 = vmul.f32 %v6971_v41, %v5293_v5  ;;  %4095 = vst.msk [vmem:[%s7531_s4 + $0x194] sm:$0xf] %vm3993_vm0, %v4751_v0  ;;  %4223 = vst.msk [vmem:[%s7531_s4 + $0x394] sm:$0xf] %vm3993_vm0, %v4879_v1 }
 0x208   :  { %v2561_v12 = vadd.f32 %v6993_v53, %v2298_v2  ;;  %v2689_v13 = vadd.f32 %v6993_v53, %v2426_v3  ;;  %v2299_v14 = vmul.f32 %v6971_v41, %v1583_v10  ;;  %v2427_v15 = vmul.f32 %v6971_v41, %v2095_v11  ;;  %v5172_v10 = vpop.f32.mrb[112].mxu0  ;;  %v5300_v11 = vpop.f32.mrb[112].mxu1 }
 0x209   :  { %v2819_v16 = vmax.f32 %v2563_v6, 0.0  ;;  %v2947_v17 = vmax.f32 %v2691_v7, 0.0  ;;  %v2564_v18 = vadd.f32 %v6993_v53, %v2301_v8  ;;  %v2692_v19 = vadd.f32 %v6993_v53, %v2429_v9 }
 0x20a   :  { %v2817_v20 = vmax.f32 %v2561_v12, 0.0  ;;  %v2945_v21 = vmax.f32 %v2689_v13, 0.0  ;;  %v2562_v22 = vadd.f32 %v6993_v53, %v2299_v14  ;;  %v2690_v23 = vadd.f32 %v6993_v53, %v2427_v15 }
 0x20b   :  { %v4756_v24 = vpack.c.bf16 %v2819_v16, %v2819_v16  ;;  %v4884_v25 = vpack.c.bf16 %v2947_v17, %v2947_v17  ;;  %v2820_v26 = vmax.f32 %v2564_v18, 0.0  ;;  %v2948_v27 = vmax.f32 %v2692_v19, 0.0  ;;  %v1612_v16 = vpop.f32.mrb[113].mxu0  ;;  %v2124_v17 = vpop.f32.mrb[113].mxu1 }
 0x20c   :  { %v4754_v28 = vpack.c.bf16 %v2817_v20, %v2817_v20  ;;  %v4882_v29 = vpack.c.bf16 %v2945_v21, %v2945_v21  ;;  %v2818_v30 = vmax.f32 %v2562_v22, 0.0  ;;  %v2946_v31 = vmax.f32 %v2690_v23, 0.0  ;;  %v5173_v22 = vpop.f32.mrb[114].mxu0  ;;  %v5301_v23 = vpop.f32.mrb[114].mxu1 }
 0x20d   :  { %4100 = vst.msk [vmem:[%s7531_s4 + $0x1a8] sm:$0xf] %vm3993_vm0, %v4756_v24  ;;  %4228 = vst.msk [vmem:[%s7531_s4 + $0x3a8] sm:$0xf] %vm3993_vm0, %v4884_v25  ;;  %v4757_v33 = vpack.c.bf16 %v2820_v26, %v2820_v26  ;;  %v4885_v34 = vpack.c.bf16 %v2948_v27, %v2948_v27  ;;  %v2304_v56 = vmul.f32 %v6971_v41, %v5168_v32 }
 0x20e   :  { %v2432_v35 = vmul.f32 %v6971_v41, %v5296_v54  ;;  %4098 = vst.msk [vmem:[%s7531_s4 + $0x1a0] sm:$0xf] %vm3993_vm0, %v4754_v28  ;;  %4226 = vst.msk [vmem:[%s7531_s4 + $0x3a0] sm:$0xf] %vm3993_vm0, %v4882_v29  ;;  %v4755_v38 = vpack.c.bf16 %v2818_v30, %v2818_v30  ;;  %v4883_v39 = vpack.c.bf16 %v2946_v31, %v2946_v31  ;;  %v1615_v28 = vpop.f32.mrb[115].mxu0  ;;  %v2127_v29 = vpop.f32.mrb[115].mxu1 }
 0x20f   :  { %v2302_v47 = vmul.f32 %v6971_v41, %v1596_v37  ;;  %v2430_v40 = vmul.f32 %v6971_v41, %v2108_v36  ;;  %4101 = vst.msk [vmem:[%s7531_s4 + $0x1ac] sm:$0xf] %vm3993_vm0, %v4757_v33  ;;  %4229 = vst.msk [vmem:[%s7531_s4 + $0x3ac] sm:$0xf] %vm3993_vm0, %v4885_v34  ;;  %v2567_v44 = vadd.f32 %v6993_v53, %v2304_v56 }
 0x210   :  { %v2695_v45 = vadd.f32 %v6993_v53, %v2432_v35  ;;  %v2305_v46 = vmul.f32 %v6971_v41, %v5169_v42  ;;  %v2433_v48 = vmul.f32 %v6971_v41, %v5297_v43  ;;  %4099 = vst.msk [vmem:[%s7531_s4 + $0x1a4] sm:$0xf] %vm3993_vm0, %v4755_v38  ;;  %4227 = vst.msk [vmem:[%s7531_s4 + $0x3a4] sm:$0xf] %vm3993_vm0, %v4883_v39 }
 0x211   :  { %v2565_v51 = vadd.f32 %v6993_v53, %v2302_v47  ;;  %v2693_v52 = vadd.f32 %v6993_v53, %v2430_v40  ;;  %v2303_v55 = vmul.f32 %v6971_v41, %v1599_v49  ;;  %v2431_v57 = vmul.f32 %v6971_v41, %v2111_v50  ;;  %v5176_v49 = vpop.f32.mrb[116].mxu0  ;;  %v5304_v50 = vpop.f32.mrb[116].mxu1 }
 0x212   :  { %v2823_v58 = vmax.f32 %v2567_v44, 0.0  ;;  %v2951_v59 = vmax.f32 %v2695_v45, 0.0  ;;  %v2568_v60 = vadd.f32 %v6993_v53, %v2305_v46  ;;  %v2696_v61 = vadd.f32 %v6993_v53, %v2433_v48 }
 0x213   :  { %v2821_v62 = vmax.f32 %v2565_v51, 0.0  ;;  %v2949_v63 = vmax.f32 %v2693_v52, 0.0  ;;  %v2566_v0 = vadd.f32 %v6993_v53, %v2303_v55  ;;  %v2694_v1 = vadd.f32 %v6993_v53, %v2431_v57 }
 0x214   :  { %v4760_v2 = vpack.c.bf16 %v2823_v58, %v2823_v58  ;;  %v4888_v3 = vpack.c.bf16 %v2951_v59, %v2951_v59  ;;  %v2824_v4 = vmax.f32 %v2568_v60, 0.0  ;;  %v2952_v5 = vmax.f32 %v2696_v61, 0.0  ;;  %v1628_v58 = vpop.f32.mrb[117].mxu0  ;;  %v2140_v59 = vpop.f32.mrb[117].mxu1 }
 0x215   :  { %v4758_v6 = vpack.c.bf16 %v2821_v62, %v2821_v62  ;;  %v4886_v7 = vpack.c.bf16 %v2949_v63, %v2949_v63  ;;  %v2822_v8 = vmax.f32 %v2566_v0, 0.0  ;;  %v2950_v9 = vmax.f32 %v2694_v1, 0.0  ;;  %v5177_v0 = vpop.f32.mrb[118].mxu0  ;;  %v5305_v1 = vpop.f32.mrb[118].mxu1 }
 0x216   :  { %4104 = vst.msk [vmem:[%s7531_s4 + $0x1b8] sm:$0xf] %vm3993_vm0, %v4760_v2  ;;  %4232 = vst.msk [vmem:[%s7531_s4 + $0x3b8] sm:$0xf] %vm3993_vm0, %v4888_v3  ;;  %v4761_v12 = vpack.c.bf16 %v2824_v4, %v2824_v4  ;;  %v4889_v13 = vpack.c.bf16 %v2952_v5, %v2952_v5  ;;  %v2308_v14 = vmul.f32 %v6971_v41, %v5172_v10 }
 0x217   :  { %v2436_v15 = vmul.f32 %v6971_v41, %v5300_v11  ;;  %4102 = vst.msk [vmem:[%s7531_s4 + $0x1b0] sm:$0xf] %vm3993_vm0, %v4758_v6  ;;  %4230 = vst.msk [vmem:[%s7531_s4 + $0x3b0] sm:$0xf] %vm3993_vm0, %v4886_v7  ;;  %v4759_v18 = vpack.c.bf16 %v2822_v8, %v2822_v8  ;;  %v4887_v19 = vpack.c.bf16 %v2950_v9, %v2950_v9  ;;  %v1631_v6 = vpop.f32.mrb[119].mxu0  ;;  %v2143_v7 = vpop.f32.mrb[119].mxu1 }
 0x218   :  { %v2306_v20 = vmul.f32 %v6971_v41, %v1612_v16  ;;  %v2434_v21 = vmul.f32 %v6971_v41, %v2124_v17  ;;  %4105 = vst.msk [vmem:[%s7531_s4 + $0x1bc] sm:$0xf] %vm3993_vm0, %v4761_v12  ;;  %4233 = vst.msk [vmem:[%s7531_s4 + $0x3bc] sm:$0xf] %vm3993_vm0, %v4889_v13  ;;  %v2571_v24 = vadd.f32 %v6993_v53, %v2308_v14 }
 0x219   :  { %v2699_v25 = vadd.f32 %v6993_v53, %v2436_v15  ;;  %v2309_v26 = vmul.f32 %v6971_v41, %v5173_v22  ;;  %v2437_v27 = vmul.f32 %v6971_v41, %v5301_v23  ;;  %4103 = vst.msk [vmem:[%s7531_s4 + $0x1b4] sm:$0xf] %vm3993_vm0, %v4759_v18  ;;  %4231 = vst.msk [vmem:[%s7531_s4 + $0x3b4] sm:$0xf] %vm3993_vm0, %v4887_v19 }
 0x21a   :  { %v2569_v30 = vadd.f32 %v6993_v53, %v2306_v20  ;;  %v2697_v31 = vadd.f32 %v6993_v53, %v2434_v21  ;;  %v2307_v32 = vmul.f32 %v6971_v41, %v1615_v28  ;;  %v2435_v54 = vmul.f32 %v6971_v41, %v2127_v29  ;;  %v5180_v28 = vpop.f32.mrb[120].mxu0  ;;  %v5308_v29 = vpop.f32.mrb[120].mxu1 }
 0x21b   :  { %v2827_v33 = vmax.f32 %v2571_v24, 0.0  ;;  %v2955_v34 = vmax.f32 %v2699_v25, 0.0  ;;  %v2572_v56 = vadd.f32 %v6993_v53, %v2309_v26  ;;  %v2700_v35 = vadd.f32 %v6993_v53, %v2437_v27 }
 0x21c   :  { %v2825_v37 = vmax.f32 %v2569_v30, 0.0  ;;  %v2953_v36 = vmax.f32 %v2697_v31, 0.0  ;;  %v2570_v38 = vadd.f32 %v6993_v53, %v2307_v32  ;;  %v2698_v39 = vadd.f32 %v6993_v53, %v2435_v54 }
 0x21d   :  { %v4764_v47 = vpack.c.bf16 %v2827_v33, %v2827_v33  ;;  %v4892_v40 = vpack.c.bf16 %v2955_v34, %v2955_v34  ;;  %v2828_v42 = vmax.f32 %v2572_v56, 0.0  ;;  %v2956_v43 = vmax.f32 %v2700_v35, 0.0  ;;  %v1644_v33 = vpop.f32.mrb[121].mxu0  ;;  %v2156_v34 = vpop.f32.mrb[121].mxu1 }
 0x21e   :  { %v4762_v44 = vpack.c.bf16 %v2825_v37, %v2825_v37  ;;  %v4890_v45 = vpack.c.bf16 %v2953_v36, %v2953_v36  ;;  %v2826_v46 = vmax.f32 %v2570_v38, 0.0  ;;  %v2954_v48 = vmax.f32 %v2698_v39, 0.0  ;;  %v5181_v38 = vpop.f32.mrb[122].mxu0  ;;  %v5309_v39 = vpop.f32.mrb[122].mxu1 }
 0x21f   :  { %4108 = vst.msk [vmem:[%s7531_s4 + $0x1c8] sm:$0xf] %vm3993_vm0, %v4764_v47  ;;  %4236 = vst.msk [vmem:[%s7531_s4 + $0x3c8] sm:$0xf] %vm3993_vm0, %v4892_v40  ;;  %v4765_v51 = vpack.c.bf16 %v2828_v42, %v2828_v42  ;;  %v4893_v52 = vpack.c.bf16 %v2956_v43, %v2956_v43  ;;  %v2312_v55 = vmul.f32 %v6971_v41, %v5176_v49 }
 0x220   :  { %v2440_v57 = vmul.f32 %v6971_v41, %v5304_v50  ;;  %4106 = vst.msk [vmem:[%s7531_s4 + $0x1c0] sm:$0xf] %vm3993_vm0, %v4762_v44  ;;  %4234 = vst.msk [vmem:[%s7531_s4 + $0x3c0] sm:$0xf] %vm3993_vm0, %v4890_v45  ;;  %v4763_v60 = vpack.c.bf16 %v2826_v46, %v2826_v46  ;;  %v4891_v61 = vpack.c.bf16 %v2954_v48, %v2954_v48  ;;  %v1647_v44 = vpop.f32.mrb[123].mxu0  ;;  %v2159_v45 = vpop.f32.mrb[123].mxu1 }
 0x221   :  { %v2310_v62 = vmul.f32 %v6971_v41, %v1628_v58  ;;  %v2438_v63 = vmul.f32 %v6971_v41, %v2140_v59  ;;  %4109 = vst.msk [vmem:[%s7531_s4 + $0x1cc] sm:$0xf] %vm3993_vm0, %v4765_v51  ;;  %4237 = vst.msk [vmem:[%s7531_s4 + $0x3cc] sm:$0xf] %vm3993_vm0, %v4893_v52  ;;  %v2575_v2 = vadd.f32 %v6993_v53, %v2312_v55 }
 0x222   :  { %v2703_v3 = vadd.f32 %v6993_v53, %v2440_v57  ;;  %v2313_v4 = vmul.f32 %v6971_v41, %v5177_v0  ;;  %v2441_v5 = vmul.f32 %v6971_v41, %v5305_v1  ;;  %4107 = vst.msk [vmem:[%s7531_s4 + $0x1c4] sm:$0xf] %vm3993_vm0, %v4763_v60  ;;  %4235 = vst.msk [vmem:[%s7531_s4 + $0x3c4] sm:$0xf] %vm3993_vm0, %v4891_v61 }
 0x223   :  { %v2573_v8 = vadd.f32 %v6993_v53, %v2310_v62  ;;  %v2701_v9 = vadd.f32 %v6993_v53, %v2438_v63  ;;  %v2311_v10 = vmul.f32 %v6971_v41, %v1631_v6  ;;  %v2439_v11 = vmul.f32 %v6971_v41, %v2143_v7  ;;  %v5184_v6 = vpop.f32.mrb[124].mxu0  ;;  %v5312_v7 = vpop.f32.mrb[124].mxu1 }
 0x224   :  { %v2831_v12 = vmax.f32 %v2575_v2, 0.0  ;;  %v2959_v13 = vmax.f32 %v2703_v3, 0.0  ;;  %v2576_v14 = vadd.f32 %v6993_v53, %v2313_v4  ;;  %v2704_v15 = vadd.f32 %v6993_v53, %v2441_v5 }
 0x225   :  { %v2829_v16 = vmax.f32 %v2573_v8, 0.0  ;;  %v2957_v17 = vmax.f32 %v2701_v9, 0.0  ;;  %v2574_v18 = vadd.f32 %v6993_v53, %v2311_v10  ;;  %v2702_v19 = vadd.f32 %v6993_v53, %v2439_v11 }
 0x226   :  { %v4768_v20 = vpack.c.bf16 %v2831_v12, %v2831_v12  ;;  %v4896_v21 = vpack.c.bf16 %v2959_v13, %v2959_v13  ;;  %v2832_v22 = vmax.f32 %v2576_v14, 0.0  ;;  %v2960_v23 = vmax.f32 %v2704_v15, 0.0  ;;  %v1660_v12 = vpop.f32.mrb[125].mxu0  ;;  %v2172_v13 = vpop.f32.mrb[125].mxu1 }
 0x227   :  { %v4766_v24 = vpack.c.bf16 %v2829_v16, %v2829_v16  ;;  %v4894_v25 = vpack.c.bf16 %v2957_v17, %v2957_v17  ;;  %v2830_v26 = vmax.f32 %v2574_v18, 0.0  ;;  %v2958_v27 = vmax.f32 %v2702_v19, 0.0  ;;  %v5185_v18 = vpop.f32.mrb[126].mxu0  ;;  %v5313_v19 = vpop.f32.mrb[126].mxu1 }
 0x228   :  { %4112 = vst.msk [vmem:[%s7531_s4 + $0x1d8] sm:$0xf] %vm3993_vm0, %v4768_v20  ;;  %4240 = vst.msk [vmem:[%s7531_s4 + $0x3d8] sm:$0xf] %vm3993_vm0, %v4896_v21  ;;  %v4769_v30 = vpack.c.bf16 %v2832_v22, %v2832_v22  ;;  %v4897_v31 = vpack.c.bf16 %v2960_v23, %v2960_v23  ;;  %v2316_v32 = vmul.f32 %v6971_v41, %v5180_v28 }
 0x229   :  { %v2444_v54 = vmul.f32 %v6971_v41, %v5308_v29  ;;  %4110 = vst.msk [vmem:[%s7531_s4 + $0x1d0] sm:$0xf] %vm3993_vm0, %v4766_v24  ;;  %4238 = vst.msk [vmem:[%s7531_s4 + $0x3d0] sm:$0xf] %vm3993_vm0, %v4894_v25  ;;  %v4767_v56 = vpack.c.bf16 %v2830_v26, %v2830_v26  ;;  %v4895_v35 = vpack.c.bf16 %v2958_v27, %v2958_v27  ;;  %v1663_v24 = vpop.f32.mrb[127].mxu0  ;;  %v2175_v25 = vpop.f32.mrb[127].mxu1 }
 0x22a   :  { %v2314_v37 = vmul.f32 %v6971_v41, %v1644_v33  ;;  %v2442_v36 = vmul.f32 %v6971_v41, %v2156_v34  ;;  %4113 = vst.msk [vmem:[%s7531_s4 + $0x1dc] sm:$0xf] %vm3993_vm0, %v4769_v30  ;;  %4241 = vst.msk [vmem:[%s7531_s4 + $0x3dc] sm:$0xf] %vm3993_vm0, %v4897_v31  ;;  %v2579_v47 = vadd.f32 %v6993_v53, %v2316_v32 }
 0x22b   :  { %v2707_v40 = vadd.f32 %v6993_v53, %v2444_v54  ;;  %v2317_v42 = vmul.f32 %v6971_v41, %v5181_v38  ;;  %v2445_v43 = vmul.f32 %v6971_v41, %v5309_v39  ;;  %4111 = vst.msk [vmem:[%s7531_s4 + $0x1d4] sm:$0xf] %vm3993_vm0, %v4767_v56  ;;  %4239 = vst.msk [vmem:[%s7531_s4 + $0x3d4] sm:$0xf] %vm3993_vm0, %v4895_v35 }
 0x22c   :  { %v2577_v46 = vadd.f32 %v6993_v53, %v2314_v37  ;;  %v2705_v48 = vadd.f32 %v6993_v53, %v2442_v36  ;;  %v2315_v49 = vmul.f32 %v6971_v41, %v1647_v44  ;;  %v2443_v50 = vmul.f32 %v6971_v41, %v2159_v45 }
 0x22d   :  { %v2835_v51 = vmax.f32 %v2579_v47, 0.0  ;;  %v2963_v52 = vmax.f32 %v2707_v40, 0.0  ;;  %v2580_v55 = vadd.f32 %v6993_v53, %v2317_v42  ;;  %v2708_v57 = vadd.f32 %v6993_v53, %v2445_v43 }
 0x22e   :  { %v2833_v58 = vmax.f32 %v2577_v46, 0.0  ;;  %v2961_v59 = vmax.f32 %v2705_v48, 0.0  ;;  %v2578_v60 = vadd.f32 %v6993_v53, %v2315_v49  ;;  %v2706_v61 = vadd.f32 %v6993_v53, %v2443_v50 }
 0x22f   :  { %v4772_v62 = vpack.c.bf16 %v2835_v51, %v2835_v51  ;;  %v4900_v63 = vpack.c.bf16 %v2963_v52, %v2963_v52  ;;  %v2836_v0 = vmax.f32 %v2580_v55, 0.0  ;;  %v2964_v1 = vmax.f32 %v2708_v57, 0.0 }
 0x230   :  { %v4770_v2 = vpack.c.bf16 %v2833_v58, %v2833_v58  ;;  %v4898_v3 = vpack.c.bf16 %v2961_v59, %v2961_v59  ;;  %v2834_v4 = vmax.f32 %v2578_v60, 0.0  ;;  %v2962_v5 = vmax.f32 %v2706_v61, 0.0 }
 0x231   :  { %4116 = vst.msk [vmem:[%s7531_s4 + $0x1e8] sm:$0xf] %vm3993_vm0, %v4772_v62  ;;  %4244 = vst.msk [vmem:[%s7531_s4 + $0x3e8] sm:$0xf] %vm3993_vm0, %v4900_v63  ;;  %v4773_v8 = vpack.c.bf16 %v2836_v0, %v2836_v0  ;;  %v4901_v9 = vpack.c.bf16 %v2964_v1, %v2964_v1  ;;  %v2320_v10 = vmul.f32 %v6971_v41, %v5184_v6 }
 0x232   :  { %v2448_v11 = vmul.f32 %v6971_v41, %v5312_v7  ;;  %4114 = vst.msk [vmem:[%s7531_s4 + $0x1e0] sm:$0xf] %vm3993_vm0, %v4770_v2  ;;  %4242 = vst.msk [vmem:[%s7531_s4 + $0x3e0] sm:$0xf] %vm3993_vm0, %v4898_v3  ;;  %v4771_v14 = vpack.c.bf16 %v2834_v4, %v2834_v4  ;;  %v4899_v15 = vpack.c.bf16 %v2962_v5, %v2962_v5 }
 0x233   :  { %v2318_v16 = vmul.f32 %v6971_v41, %v1660_v12  ;;  %v2446_v17 = vmul.f32 %v6971_v41, %v2172_v13  ;;  %4117 = vst.msk [vmem:[%s7531_s4 + $0x1ec] sm:$0xf] %vm3993_vm0, %v4773_v8  ;;  %4245 = vst.msk [vmem:[%s7531_s4 + $0x3ec] sm:$0xf] %vm3993_vm0, %v4901_v9  ;;  %v2583_v20 = vadd.f32 %v6993_v53, %v2320_v10 }
 0x234   :  { %v2711_v21 = vadd.f32 %v6993_v53, %v2448_v11  ;;  %v2321_v22 = vmul.f32 %v6971_v41, %v5185_v18  ;;  %v2449_v23 = vmul.f32 %v6971_v41, %v5313_v19  ;;  %4115 = vst.msk [vmem:[%s7531_s4 + $0x1e4] sm:$0xf] %vm3993_vm0, %v4771_v14  ;;  %4243 = vst.msk [vmem:[%s7531_s4 + $0x3e4] sm:$0xf] %vm3993_vm0, %v4899_v15 }
 0x235   :  { %v2581_v26 = vadd.f32 %v6993_v53, %v2318_v16  ;;  %v2709_v27 = vadd.f32 %v6993_v53, %v2446_v17  ;;  %v2319_v28 = vmul.f32 %v6971_v41, %v1663_v24  ;;  %v2447_v29 = vmul.f32 %v6971_v41, %v2175_v25 }
 0x236   :  { %v2839_v30 = vmax.f32 %v2583_v20, 0.0  ;;  %v2967_v31 = vmax.f32 %v2711_v21, 0.0  ;;  %v2584_v32 = vadd.f32 %v6993_v53, %v2321_v22  ;;  %v2712_v54 = vadd.f32 %v6993_v53, %v2449_v23 }
 0x237   :  { %v2837_v33 = vmax.f32 %v2581_v26, 0.0  ;;  %v2965_v34 = vmax.f32 %v2709_v27, 0.0  ;;  %v2582_v56 = vadd.f32 %v6993_v53, %v2319_v28  ;;  %v2710_v35 = vadd.f32 %v6993_v53, %v2447_v29 }
 0x238   :  { %v4776_v37 = vpack.c.bf16 %v2839_v30, %v2839_v30  ;;  %v4904_v36 = vpack.c.bf16 %v2967_v31, %v2967_v31  ;;  %v2840_v38 = vmax.f32 %v2584_v32, 0.0  ;;  %v2968_v39 = vmax.f32 %v2712_v54, 0.0 }
 0x239   :  { %v4774_v47 = vpack.c.bf16 %v2837_v33, %v2837_v33  ;;  %v4902_v40 = vpack.c.bf16 %v2965_v34, %v2965_v34  ;;  %v2838_v42 = vmax.f32 %v2582_v56, 0.0  ;;  %v2966_v41 = vmax.f32 %v2710_v35, 0.0 }
 0x23a   :  { %4120 = vst.msk [vmem:[%s7531_s4 + $0x1f8] sm:$0xf] %vm3993_vm0, %v4776_v37  ;;  %4248 = vst.msk [vmem:[%s7531_s4 + $0x3f8] sm:$0xf] %vm3993_vm0, %v4904_v36  ;;  %v4777_v43 = vpack.c.bf16 %v2840_v38, %v2840_v38  ;;  %v4905_v53 = vpack.c.bf16 %v2968_v39, %v2968_v39 }
 0x23b   :  { %4118 = vst.msk [vmem:[%s7531_s4 + $0x1f0] sm:$0xf] %vm3993_vm0, %v4774_v47  ;;  %4246 = vst.msk [vmem:[%s7531_s4 + $0x3f0] sm:$0xf] %vm3993_vm0, %v4902_v40  ;;  %v4775_v44 = vpack.c.bf16 %v2838_v42, %v2838_v42  ;;  %v4903_v45 = vpack.c.bf16 %v2966_v41, %v2966_v41 }
 0x23c   :  { %4121 = vst.msk [vmem:[%s7531_s4 + $0x1fc] sm:$0xf] %vm3993_vm0, %v4777_v43  ;;  %4249 = vst.msk [vmem:[%s7531_s4 + $0x3fc] sm:$0xf] %vm3993_vm0, %v4905_v53 }
 0x23d   :  { %4119 = vst.msk [vmem:[%s7531_s4 + $0x1f4] sm:$0xf] %vm3993_vm0, %v4775_v44  ;;  %4247 = vst.msk [vmem:[%s7531_s4 + $0x3f4] sm:$0xf] %vm3993_vm0, %v4903_v45 }
 0x23e   :  { %4254 = vsyncpa [#allocation3], 1 }
 0x23f   :  { %4255 = vsyncpa [#allocation5], 1 }

// kernel: forward.11
= control target key start
LH: loop header
LB: loop body
LE: loop exit
PB: predicated region body
PF: predicated region fallthrough
CT: control target
= control target key end

     0   :  { %s158_s22 = smov 64   ;;  %vm136_vm0 = vcmask 519168   ;;  %s369_s0 = inlined_call_operand.vmem [shape: bf16[16,2,8,128], index: 0, kind: input, shape index: {}]   ;;  %s370_s1 = inlined_call_operand.vmem [shape: bf16[16,8,64], index: 1, kind: output, shape index: {}]  }
   0x1   :  { %v12_v0 = vld [vmem:[%s369_s0 + $0x10] sm:$0xf]  ;;  %v13_v1 = vld [vmem:[%s369_s0 + $0x14] sm:$0xf]  ;;  %v8_v2 = vld [vmem:[%s369_s0] sm:$0xf] }
   0x2   :  { %v178_v3 = vmax.bf16 %v13_v1, %v12_v0  ;;  %v9_v4 = vld [vmem:[%s369_s0 + $0x4] sm:$0xf]  ;;  %v14_v5 = vld [vmem:[%s369_s0 + $0x18] sm:$0xf]  ;;  %v15_v6 = vld [vmem:[%s369_s0 + $0x1c] sm:$0xf] }
   0x3   :  { %v189_v7 = vmax.bf16 %v9_v4, %v8_v2  ;;  %v10_v8 = vld [vmem:[%s369_s0 + $0x8] sm:$0xf]  ;;  %v11_v9 = vld [vmem:[%s369_s0 + $0xc] sm:$0xf]  ;;  %v199_v10 = vmax.bf16 %v15_v6, %v14_v5  ;;  %v16_v14 = vld [vmem:[%s369_s0 + $0x20] sm:$0xf] }
   0x4   :  { %76 = vrot.lane.b32.xlu1 %v178_v3, %s158_s22  ;;  %v203_v11 = vmax.bf16 %v11_v9, %v10_v8  ;;  %v18_v12 = vld [vmem:[%s369_s0 + $0x28] sm:$0xf]  ;;  %v19_v13 = vld [vmem:[%s369_s0 + $0x2c] sm:$0xf]  ;;  %v17_v15 = vld [vmem:[%s369_s0 + $0x24] sm:$0xf] }
   0x5   :  { %72 = vrot.lane.b32.xlu0 %v189_v7, %s158_s22  ;;  %v219_v16 = vmax.bf16 %v19_v13, %v18_v12  ;;  %v223_v17 = vmax.bf16 %v17_v15, %v16_v14  ;;  %v22_v18 = vld [vmem:[%s369_s0 + $0x38] sm:$0xf]  ;;  %v23_v19 = vld [vmem:[%s369_s0 + $0x3c] sm:$0xf]  ;;  %v20_v20 = vld [vmem:[%s369_s0 + $0x30] sm:$0xf] }
   0x6   :  { %v21_v21 = vld [vmem:[%s369_s0 + $0x34] sm:$0xf]  ;;  %v47_v22 = vmax.bf16 %v23_v19, %v22_v18  ;;  %v26_v24 = vld [vmem:[%s369_s0 + $0x48] sm:$0xf]  ;;  %v27_v25 = vld [vmem:[%s369_s0 + $0x4c] sm:$0xf] }
   0x7   :  { %v46_v23 = vmax.bf16 %v21_v21, %v20_v20  ;;  %v24_v26 = vld [vmem:[%s369_s0 + $0x40] sm:$0xf]  ;;  %v25_v27 = vld [vmem:[%s369_s0 + $0x44] sm:$0xf]  ;;  %v49_v28 = vmax.bf16 %v27_v25, %v26_v24  ;;  %v30_v30 = vld [vmem:[%s369_s0 + $0x58] sm:$0xf] }
   0x8   :  { %78 = vrot.lane.b32.xlu1 %v199_v10, %s158_s22  ;;  %v48_v29 = vmax.bf16 %v25_v27, %v24_v26  ;;  %v31_v31 = vld [vmem:[%s369_s0 + $0x5c] sm:$0xf]  ;;  %v28_v32 = vld [vmem:[%s369_s0 + $0x50] sm:$0xf]  ;;  %v29_v33 = vld [vmem:[%s369_s0 + $0x54] sm:$0xf] }
   0x9   :  { %74 = vrot.lane.b32.xlu0 %v203_v11, %s158_s22  ;;  %v51_v34 = vmax.bf16 %v31_v31, %v30_v30  ;;  %v50_v35 = vmax.bf16 %v29_v33, %v28_v32  ;;  %v34_v36 = vld [vmem:[%s369_s0 + $0x68] sm:$0xf]  ;;  %v35_v37 = vld [vmem:[%s369_s0 + $0x6c] sm:$0xf]  ;;  %v32_v38 = vld [vmem:[%s369_s0 + $0x60] sm:$0xf] }
   0xa   :  { %v33_v39 = vld [vmem:[%s369_s0 + $0x64] sm:$0xf]  ;;  %v53_v40 = vmax.bf16 %v35_v37, %v34_v36  ;;  %v38_v42 = vld [vmem:[%s369_s0 + $0x78] sm:$0xf]  ;;  %v39_v43 = vld [vmem:[%s369_s0 + $0x7c] sm:$0xf] }
   0xb   :  { %v52_v41 = vmax.bf16 %v33_v39, %v32_v38  ;;  %v36_v44 = vld [vmem:[%s369_s0 + $0x70] sm:$0xf]  ;;  %v37_v45 = vld [vmem:[%s369_s0 + $0x74] sm:$0xf]  ;;  %v55_v46 = vmax.bf16 %v39_v43, %v38_v42 }
   0xc   :  { %82 = vrot.lane.b32.xlu1 %v219_v16, %s158_s22  ;;  %v54_v47 = vmax.bf16 %v37_v45, %v36_v44 }
   0xd   :  { %80 = vrot.lane.b32.xlu0 %v223_v17, %s158_s22 }
  0x10   :  { %86 = vrot.lane.b32.xlu1 %v47_v22, %s158_s22 }
  0x11   :  { %84 = vrot.lane.b32.xlu0 %v46_v23, %s158_s22 }
  0x14   :  { %90 = vrot.lane.b32.xlu1 %v49_v28, %s158_s22 }
  0x15   :  { %88 = vrot.lane.b32.xlu0 %v48_v29, %s158_s22 }
  0x18   :  { %94 = vrot.lane.b32.xlu1 %v51_v34, %s158_s22 }
  0x19   :  { %92 = vrot.lane.b32.xlu0 %v50_v35, %s158_s22 }
  0x1c   :  { %98 = vrot.lane.b32.xlu1 %v53_v40, %s158_s22 }
  0x1d   :  { %96 = vrot.lane.b32.xlu0 %v52_v41, %s158_s22 }
  0x20   :  { %102 = vrot.lane.b32.xlu1 %v55_v46, %s158_s22 }
  0x21   :  { %100 = vrot.lane.b32.xlu0 %v54_v47, %s158_s22 }
  0x76   :  { %v77_v48 = vpop.permute.xlu1 %76 }
  0x77   :  { %v122_v49 = vmax.bf16 %v77_v48, %v178_v3  ;;  %v73_v50 = vpop.permute.xlu0 %72 }
  0x78   :  { %v120_v51 = vmax.bf16 %v73_v50, %v189_v7 }
  0x79   :  { %139 = vst.msk [vmem:[%s370_s1 + $0x8] sm:$0xf] %vm136_vm0, %v122_v49 }
  0x7a   :  { %137 = vst.msk [vmem:[%s370_s1] sm:$0xf] %vm136_vm0, %v120_v51  ;;  %v79_v52 = vpop.permute.xlu1 %78 }
  0x7b   :  { %v123_v53 = vmax.bf16 %v79_v52, %v199_v10  ;;  %v75_v54 = vpop.permute.xlu0 %74 }
  0x7c   :  { %v121_v55 = vmax.bf16 %v75_v54, %v203_v11 }
  0x7d   :  { %140 = vst.msk [vmem:[%s370_s1 + $0xc] sm:$0xf] %vm136_vm0, %v123_v53 }
  0x7e   :  { %138 = vst.msk [vmem:[%s370_s1 + $0x4] sm:$0xf] %vm136_vm0, %v121_v55  ;;  %v83_v56 = vpop.permute.xlu1 %82 }
  0x7f   :  { %v125_v57 = vmax.bf16 %v83_v56, %v219_v16  ;;  %v81_v58 = vpop.permute.xlu0 %80 }
  0x80   :  { %v124_v59 = vmax.bf16 %v81_v58, %v223_v17 }
  0x81   :  { %142 = vst.msk [vmem:[%s370_s1 + $0x14] sm:$0xf] %vm136_vm0, %v125_v57 }
  0x82   :  { %141 = vst.msk [vmem:[%s370_s1 + $0x10] sm:$0xf] %vm136_vm0, %v124_v59  ;;  %v87_v60 = vpop.permute.xlu1 %86 }
  0x83   :  { %v127_v61 = vmax.bf16 %v87_v60, %v47_v22  ;;  %v85_v62 = vpop.permute.xlu0 %84 }
  0x84   :  { %v126_v63 = vmax.bf16 %v85_v62, %v46_v23 }
  0x85   :  { %144 = vst.msk [vmem:[%s370_s1 + $0x1c] sm:$0xf] %vm136_vm0, %v127_v61 }
  0x86   :  { %143 = vst.msk [vmem:[%s370_s1 + $0x18] sm:$0xf] %vm136_vm0, %v126_v63  ;;  %v91_v0 = vpop.permute.xlu1 %90 }
  0x87   :  { %v129_v1 = vmax.bf16 %v91_v0, %v49_v28  ;;  %v89_v2 = vpop.permute.xlu0 %88 }
  0x88   :  { %v128_v3 = vmax.bf16 %v89_v2, %v48_v29 }
  0x89   :  { %146 = vst.msk [vmem:[%s370_s1 + $0x24] sm:$0xf] %vm136_vm0, %v129_v1 }
  0x8a   :  { %145 = vst.msk [vmem:[%s370_s1 + $0x20] sm:$0xf] %vm136_vm0, %v128_v3  ;;  %v95_v4 = vpop.permute.xlu1 %94 }
  0x8b   :  { %v131_v5 = vmax.bf16 %v95_v4, %v51_v34  ;;  %v93_v6 = vpop.permute.xlu0 %92 }
  0x8c   :  { %v130_v7 = vmax.bf16 %v93_v6, %v50_v35 }
  0x8d   :  { %148 = vst.msk [vmem:[%s370_s1 + $0x2c] sm:$0xf] %vm136_vm0, %v131_v5 }
  0x8e   :  { %147 = vst.msk [vmem:[%s370_s1 + $0x28] sm:$0xf] %vm136_vm0, %v130_v7  ;;  %v99_v8 = vpop.permute.xlu1 %98 }
  0x8f   :  { %v133_v9 = vmax.bf16 %v99_v8, %v53_v40  ;;  %v97_v10 = vpop.permute.xlu0 %96 }
  0x90   :  { %v132_v11 = vmax.bf16 %v97_v10, %v52_v41 }
  0x91   :  { %150 = vst.msk [vmem:[%s370_s1 + $0x34] sm:$0xf] %vm136_vm0, %v133_v9 }
  0x92   :  { %149 = vst.msk [vmem:[%s370_s1 + $0x30] sm:$0xf] %vm136_vm0, %v132_v11  ;;  %v103_v12 = vpop.permute.xlu1 %102 }
  0x93   :  { %v135_v13 = vmax.bf16 %v103_v12, %v55_v46  ;;  %v101_v14 = vpop.permute.xlu0 %100 }
  0x94   :  { %v134_v15 = vmax.bf16 %v101_v14, %v54_v47 }
  0x95   :  { %152 = vst.msk [vmem:[%s370_s1 + $0x3c] sm:$0xf] %vm136_vm0, %v135_v13 }
  0x96   :  { %151 = vst.msk [vmem:[%s370_s1 + $0x38] sm:$0xf] %vm136_vm0, %v134_v15 }

// kernel: forward.10
= control target key start
LH: loop header
LB: loop body
LE: loop exit
PB: predicated region body
PF: predicated region fallthrough
CT: control target
= control target key end

     0   :  { %v2375_v0 = vmov 0   ;;  %vm1752_vm0 = vcmask 519168   ;;  %s3239_s1 = inlined_call_operand.vmem [shape: bf16[384,64], index: 1, kind: input, shape index: {}]   ;;  %s3240_s0 = inlined_call_operand.vmem [shape: bf16[512,384], index: 0, kind: input, shape index: {}]   ;;  %s3241_s2 = inlined_call_operand.vmem [shape: f32[1,64], index: 2, kind: input, shape index: {}]   ;;  %s3242_s3 = inlined_call_operand.vmem [shape: bf16[512,64], index: 3, kind: output, shape index: {}]  }
   0x1   :  { %854 = vmatprep.subr.bf16.mxu0 %v2375_v0  ;;  %2190 = vmatprep.subr.bf16.mxu1 %v2375_v0  ;;  %v2223_v1 = vld [vmem:[%s3239_s1] sm:$0xff]   ;;  %v2224_v2 = vld [vmem:[%s3239_s1 + $0x8] sm:$0xff]   ;;  %v2225_v3 = vld [vmem:[%s3239_s1 + $0x10] sm:$0xff]  }
   0x2   :  { %855 = vmatpush1.bf16.msra.mxu0 %v2223_v1  ;;  %2206 = vmatpush1.bf16.msra.mxu1 %v2223_v1  ;;  %v2226_v4 = vld [vmem:[%s3239_s1 + $0x18] sm:$0xff]   ;;  %v2227_v5 = vld [vmem:[%s3239_s1 + $0x20] sm:$0xff]   ;;  %v2228_v7 = vld [vmem:[%s3239_s1 + $0x28] sm:$0xff]  }
   0x3   :  { %856 = vmatprep.subr.bf16.mxu0 %v2375_v0  ;;  %2191 = vmatprep.subr.bf16.mxu1 %v2375_v0  ;;  %v2241_v6 = vld [vmem:[%s3240_s0 + $0x4] ss:$12 sps:$4 sm:$0xff]   ;;  %v2230_v10 = vld [vmem:[%s3239_s1 + $0x38] sm:$0xff]   ;;  %v2232_v12 = vld [vmem:[%s3239_s1 + $0x48] sm:$0xff]  }
   0x4   :  { %v2244_v8 = vld [vmem:[%s3240_s0 + $0x244] ss:$12 sps:$4 sm:$0xff]   ;;  %886 = vmatprep.mubr.bf16.mxu0 %v2241_v6  ;;  %v2234_v14 = vld [vmem:[%s3239_s1 + $0x58] sm:$0xff]   ;;  %v2236_v16 = vld [vmem:[%s3239_s1 + $0x68] sm:$0xff]  }
   0x5   :  { %1078 = vmatprep.mubr.bf16.mxu1 %v2244_v8  ;;  %v2229_v9 = vld [vmem:[%s3239_s1 + $0x30] sm:$0xff]   ;;  %v2231_v11 = vld [vmem:[%s3239_s1 + $0x40] sm:$0xff]   ;;  %v2238_v18 = vld [vmem:[%s3239_s1 + $0x78] sm:$0xff]  }
   0x6   :  { %857 = vmatpush1.bf16.msra.mxu0 %v2224_v2  ;;  %2207 = vmatpush1.bf16.msra.mxu1 %v2224_v2  ;;  %v2233_v13 = vld [vmem:[%s3239_s1 + $0x50] sm:$0xff]   ;;  %v2235_v15 = vld [vmem:[%s3239_s1 + $0x60] sm:$0xff]   ;;  %v2246_v22 = vld [vmem:[%s3240_s0 + $0x1c] ss:$12 sps:$4 sm:$0xff]  }
   0x7   :  { %858 = vmatprep.subr.bf16.mxu0 %v2375_v0  ;;  %2192 = vmatprep.subr.bf16.mxu1 %v2375_v0  ;;  %v2237_v17 = vld [vmem:[%s3239_s1 + $0x70] sm:$0xff]   ;;  %v2245_v19 = vld [vmem:[%s3239_s1 + $0x80] sm:$0xff]   ;;  %v2248_v23 = vld [vmem:[%s3240_s0 + $0x25c] ss:$12 sps:$4 sm:$0xff]  }
   0x8   :  { %v2239_v20 = vld [vmem:[%s3240_s0] ss:$12 sps:$4 sm:$0xff]   ;;  %v2259_v25 = vld [vmem:[%s3239_s1 + $0x90] sm:$0xff]   ;;  %v2250_v26 = vld [vmem:[%s3240_s0 + $0x18] ss:$12 sps:$4 sm:$0xff]  }
   0x9   :  { %v2242_v21 = vld [vmem:[%s3240_s0 + $0x240] ss:$12 sps:$4 sm:$0xff]   ;;  %v2251_v27 = vld [vmem:[%s3240_s0 + $0x258] ss:$12 sps:$4 sm:$0xff]   ;;  %v2257_v31 = vld [vmem:[%s3240_s0 + $0x30] ss:$12 sps:$4 sm:$0xff]  }
   0xa   :  { %859 = vmatpush1.bf16.msra.mxu0 %v2225_v3  ;;  %2208 = vmatpush1.bf16.msra.mxu1 %v2225_v3  ;;  %v2252_v24 = vld [vmem:[%s3239_s1 + $0x88] sm:$0xff]   ;;  %v2253_v28 = vld [vmem:[%s3240_s0 + $0x34] ss:$12 sps:$4 sm:$0xff]   ;;  %v2266_v30 = vld [vmem:[%s3239_s1 + $0x98] sm:$0xff]  }
   0xb   :  { %860 = vmatprep.subr.bf16.mxu0 %v2375_v0  ;;  %2193 = vmatprep.subr.bf16.mxu1 %v2375_v0  ;;  %v2255_v29 = vld [vmem:[%s3240_s0 + $0x274] ss:$12 sps:$4 sm:$0xff]   ;;  %v2258_v33 = vld [vmem:[%s3240_s0 + $0x270] ss:$12 sps:$4 sm:$0xff]   ;;  %v2260_v34 = vld [vmem:[%s3240_s0 + $0x4c] ss:$12 sps:$4 sm:$0xff]  }
   0xc   :  { %v2273_v32 = vld [vmem:[%s3239_s1 + $0xa0] sm:$0xff]   ;;  %v2262_v35 = vld [vmem:[%s3240_s0 + $0x28c] ss:$12 sps:$4 sm:$0xff]   ;;  %v2264_v37 = vld [vmem:[%s3240_s0 + $0x48] ss:$12 sps:$4 sm:$0xff]  }
   0xd   :  { %v2280_v36 = vld [vmem:[%s3239_s1 + $0xa8] sm:$0xff]   ;;  %v2267_v39 = vld [vmem:[%s3240_s0 + $0x64] ss:$12 sps:$4 sm:$0xff]   ;;  %v2294_v42 = vld [vmem:[%s3239_s1 + $0xb8] sm:$0xff]  }
   0xe   :  { %861 = vmatpush1.bf16.msra.mxu0 %v2226_v4  ;;  %2209 = vmatpush1.bf16.msra.mxu1 %v2226_v4  ;;  %v2265_v38 = vld [vmem:[%s3240_s0 + $0x288] ss:$12 sps:$4 sm:$0xff]   ;;  %v2269_v40 = vld [vmem:[%s3240_s0 + $0x2a4] ss:$12 sps:$4 sm:$0xff]   ;;  %v2271_v43 = vld [vmem:[%s3240_s0 + $0x60] ss:$12 sps:$4 sm:$0xff]  }
   0xf   :  { %862 = vmatprep.subr.bf16.mxu0 %v2375_v0  ;;  %2194 = vmatprep.subr.bf16.mxu1 %v2375_v0  ;;  %v2287_v41 = vld [vmem:[%s3239_s1 + $0xb0] sm:$0xff]   ;;  %v2272_v44 = vld [vmem:[%s3240_s0 + $0x2a0] ss:$12 sps:$4 sm:$0xff]   ;;  %v2274_v45 = vld [vmem:[%s3240_s0 + $0x7c] ss:$12 sps:$4 sm:$0xff]  }
  0x10   :  { %v2276_v46 = vld [vmem:[%s3240_s0 + $0x2bc] ss:$12 sps:$4 sm:$0xff]   ;;  %v2278_v47 = vld [vmem:[%s3240_s0 + $0x78] ss:$12 sps:$4 sm:$0xff]   ;;  %v2281_v49 = vld [vmem:[%s3240_s0 + $0x94] ss:$12 sps:$4 sm:$0xff]  }
  0x11   :  { %v2279_v48 = vld [vmem:[%s3240_s0 + $0x2b8] ss:$12 sps:$4 sm:$0xff]   ;;  %v2283_v50 = vld [vmem:[%s3240_s0 + $0x2d4] ss:$12 sps:$4 sm:$0xff]   ;;  %v2285_v51 = vld [vmem:[%s3240_s0 + $0x90] ss:$12 sps:$4 sm:$0xff]  }
  0x12   :  { %863 = vmatpush1.bf16.msra.mxu0 %v2227_v5  ;;  %2210 = vmatpush1.bf16.msra.mxu1 %v2227_v5  ;;  %v2286_v52 = vld [vmem:[%s3240_s0 + $0x2d0] ss:$12 sps:$4 sm:$0xff]   ;;  %v2288_v53 = vld [vmem:[%s3240_s0 + $0xac] ss:$12 sps:$4 sm:$0xff]   ;;  %v2292_v55 = vld [vmem:[%s3240_s0 + $0xa8] ss:$12 sps:$4 sm:$0xff]  }
  0x13   :  { %864 = vmatprep.subr.bf16.mxu0 %v2375_v0  ;;  %2195 = vmatprep.subr.bf16.mxu1 %v2375_v0  ;;  %v2290_v54 = vld [vmem:[%s3240_s0 + $0x2ec] ss:$12 sps:$4 sm:$0xff]   ;;  %v2293_v56 = vld [vmem:[%s3240_s0 + $0x2e8] ss:$12 sps:$4 sm:$0xff]   ;;  %v2295_v57 = vld [vmem:[%s3240_s0 + $0xc4] ss:$12 sps:$4 sm:$0xff]  }
  0x14   :  { %v2297_v58 = vld [vmem:[%s3240_s0 + $0x8] ss:$12 sps:$4 sm:$0xff]   ;;  %v2298_v59 = vld [vmem:[%s3240_s0 + $0xc0] ss:$12 sps:$4 sm:$0xff]   ;;  %v2302_v62 = vld [vmem:[%s3240_s0 + $0x38] ss:$12 sps:$4 sm:$0xff]  }
  0x15   :  { %v2299_v60 = vld [vmem:[%s3240_s0 + $0x20] ss:$12 sps:$4 sm:$0xff]   ;;  %v2300_v61 = vld [vmem:[%s3240_s0 + $0xdc] ss:$12 sps:$4 sm:$0xff]   ;;  %v2303_v63 = vld [vmem:[%s3240_s0 + $0xd8] ss:$12 sps:$4 sm:$0xff]  }
  0x16   :  { %865 = vmatpush1.bf16.msra.mxu0 %v2228_v7  ;;  %2211 = vmatpush1.bf16.msra.mxu1 %v2228_v7  ;;  %v2305_v1 = vld [vmem:[%s3240_s0 + $0xf4] ss:$12 sps:$4 sm:$0xff]   ;;  %v2308_v3 = vld [vmem:[%s3240_s0 + $0xf0] ss:$12 sps:$4 sm:$0xff]   ;;  %v2310_v5 = vld [vmem:[%s3240_s0 + $0x10c] ss:$12 sps:$4 sm:$0xff]  }
  0x17   :  { %866 = vmatprep.subr.bf16.mxu0 %v2375_v0  ;;  %2196 = vmatprep.subr.bf16.mxu1 %v2375_v0  ;;  %v2307_v2 = vld [vmem:[%s3240_s0 + $0x68] ss:$12 sps:$4 sm:$0xff]   ;;  %v2309_v4 = vld [vmem:[%s3240_s0 + $0x80] ss:$12 sps:$4 sm:$0xff]   ;;  %v2312_v6 = vld [vmem:[%s3240_s0 + $0x98] ss:$12 sps:$4 sm:$0xff]  }
  0x18   :  { %v2313_v7 = vld [vmem:[%s3240_s0 + $0x108] ss:$12 sps:$4 sm:$0xff]   ;;  %v2314_v8 = vld [vmem:[%s3240_s0 + $0xb0] ss:$12 sps:$4 sm:$0xff]  }
  0x1a   :  { %867 = vmatpush1.bf16.msra.mxu0 %v2229_v9  ;;  %2212 = vmatpush1.bf16.msra.mxu1 %v2229_v9  ;;  %v2315_v9 = vld [vmem:[%s3240_s0 + $0x124] ss:$12 sps:$4 sm:$0xff]  }
  0x1b   :  { %868 = vmatprep.subr.bf16.mxu0 %v2375_v0  ;;  %2197 = vmatprep.subr.bf16.mxu1 %v2375_v0 }
  0x1e   :  { %869 = vmatpush1.bf16.msra.mxu0 %v2230_v10  ;;  %2213 = vmatpush1.bf16.msra.mxu1 %v2230_v10  ;;  %v2317_v10 = vld [vmem:[%s3240_s0 + $0xc8] ss:$12 sps:$4 sm:$0xff]  }
  0x1f   :  { %870 = vmatprep.subr.bf16.mxu0 %v2375_v0  ;;  %2198 = vmatprep.subr.bf16.mxu1 %v2375_v0 }
  0x22   :  { %871 = vmatpush1.bf16.msra.mxu0 %v2231_v11  ;;  %2214 = vmatpush1.bf16.msra.mxu1 %v2231_v11  ;;  %v2318_v11 = vld [vmem:[%s3240_s0 + $0x120] ss:$12 sps:$4 sm:$0xff]  }
  0x23   :  { %872 = vmatprep.subr.bf16.mxu0 %v2375_v0  ;;  %2199 = vmatprep.subr.bf16.mxu1 %v2375_v0 }
  0x26   :  { %873 = vmatpush1.bf16.msra.mxu0 %v2232_v12  ;;  %2215 = vmatpush1.bf16.msra.mxu1 %v2232_v12  ;;  %v2319_v12 = vld [vmem:[%s3240_s0 + $0xe0] ss:$12 sps:$4 sm:$0xff]  }
  0x27   :  { %874 = vmatprep.subr.bf16.mxu0 %v2375_v0  ;;  %2200 = vmatprep.subr.bf16.mxu1 %v2375_v0 }
  0x2a   :  { %875 = vmatpush1.bf16.msra.mxu0 %v2233_v13  ;;  %2216 = vmatpush1.bf16.msra.mxu1 %v2233_v13  ;;  %v2320_v13 = vld [vmem:[%s3240_s0 + $0x13c] ss:$12 sps:$4 sm:$0xff]  }
  0x2b   :  { %876 = vmatprep.subr.bf16.mxu0 %v2375_v0  ;;  %2201 = vmatprep.subr.bf16.mxu1 %v2375_v0 }
  0x2e   :  { %877 = vmatpush1.bf16.msra.mxu0 %v2234_v14  ;;  %2217 = vmatpush1.bf16.msra.mxu1 %v2234_v14  ;;  %v2322_v14 = vld [vmem:[%s3240_s0 + $0xf8] ss:$12 sps:$4 sm:$0xff]  }
  0x2f   :  { %878 = vmatprep.subr.bf16.mxu0 %v2375_v0  ;;  %2202 = vmatprep.subr.bf16.mxu1 %v2375_v0 }
  0x32   :  { %879 = vmatpush1.bf16.msra.mxu0 %v2235_v15  ;;  %2218 = vmatpush1.bf16.msra.mxu1 %v2235_v15  ;;  %v2323_v15 = vld [vmem:[%s3240_s0 + $0x138] ss:$12 sps:$4 sm:$0xff]  }
  0x33   :  { %880 = vmatprep.subr.bf16.mxu0 %v2375_v0  ;;  %2203 = vmatprep.subr.bf16.mxu1 %v2375_v0 }
  0x36   :  { %881 = vmatpush1.bf16.msra.mxu0 %v2236_v16  ;;  %2219 = vmatpush1.bf16.msra.mxu1 %v2236_v16  ;;  %v2324_v16 = vld [vmem:[%s3240_s0 + $0x110] ss:$12 sps:$4 sm:$0xff]  }
  0x37   :  { %882 = vmatprep.subr.bf16.mxu0 %v2375_v0  ;;  %2204 = vmatprep.subr.bf16.mxu1 %v2375_v0 }
  0x3a   :  { %883 = vmatpush1.bf16.msra.mxu0 %v2237_v17  ;;  %2220 = vmatpush1.bf16.msra.mxu1 %v2237_v17  ;;  %v2325_v17 = vld [vmem:[%s3240_s0 + $0x154] ss:$12 sps:$4 sm:$0xff]  }
  0x3b   :  { %884 = vmatprep.subr.bf16.mxu0 %v2375_v0  ;;  %2205 = vmatprep.subr.bf16.mxu1 %v2375_v0  ;;  %v2304_v0 = vld [vmem:[%s3240_s0 + $0x50] ss:$12 sps:$4 sm:$0xff]  }
  0x3e   :  { %885 = vmatpush1.bf16.msra.mxu0 %v2238_v18  ;;  %2221 = vmatpush1.bf16.msra.mxu1 %v2238_v18  ;;  %v2327_v18 = vld [vmem:[%s3240_s0 + $0x128] ss:$12 sps:$4 sm:$0xff]  }
  0x3f   :  { %2110 = vmatprep.subr.bf16.mxu1 %v2245_v19 }
  0x41   :  { %887 = vmatmul.mubr.bf16.vlgmr.msra.gmra.mrb[0].mxu0 %v2239_v20  ;;  %1079 = vmatmul.mubr.bf16.vlgmr.msra.gmra.mrb[0].mxu1 %v2242_v21  ;;  %v2329_v20 = vld [vmem:[%s3240_s0 + $0x140] ss:$12 sps:$4 sm:$0xff]  }
  0x42   :  { %2111 = vmatpush3.bf16.msra.mxu1 %v2245_v19  ;;  %894 = vmatprep.mubr.bf16.mxu0 %v2246_v22  ;;  %v2328_v19 = vld [vmem:[%s3240_s0 + $0x150] ss:$12 sps:$4 sm:$0xff]   ;;  %v2330_v21 = vld [vmem:[%s3240_s0 + $0x16c] ss:$12 sps:$4 sm:$0xff]  }
  0x43   :  { %1086 = vmatprep.mubr.bf16.mxu1 %v2248_v23  ;;  %2112 = vmatprep.subr.bf16.mxu1 %v2252_v24  ;;  %v2332_v22 = vld [vmem:[%s3240_s0 + $0x158] ss:$12 sps:$4 sm:$0xff]   ;;  %v2333_v23 = vld [vmem:[%s3240_s0 + $0x168] ss:$12 sps:$4 sm:$0xff]  }
  0x46   :  { %2113 = vmatpush3.bf16.msra.mxu1 %v2252_v24  ;;  %v2334_v24 = vld [vmem:[%s3240_s0 + $0x170] ss:$12 sps:$4 sm:$0xff]  }
  0x47   :  { %2114 = vmatprep.subr.bf16.mxu1 %v2259_v25 }
  0x49   :  { %895 = vmatmul.mubr.bf16.gmra.mrb[4].mxu0 %v2250_v26  ;;  %1087 = vmatmul.mubr.bf16.gmra.mrb[4].mxu1 %v2251_v27  ;;  %v2337_v26 = vld [vmem:[%s3240_s0 + $0x188] ss:$12 sps:$4 sm:$0xff]   ;;  %v2338_v27 = vld [vmem:[%s3240_s0 + $0x180] ss:$12 sps:$4 sm:$0xff]  }
  0x4a   :  { %902 = vmatprep.mubr.bf16.mxu0 %v2253_v28  ;;  %1094 = vmatprep.mubr.bf16.mxu1 %v2255_v29  ;;  %v2339_v28 = vld [vmem:[%s3240_s0 + $0x1a0] ss:$12 sps:$4 sm:$0xff]   ;;  %v2340_v29 = vld [vmem:[%s3240_s0 + $0x19c] ss:$12 sps:$4 sm:$0xff]  }
  0x4b   :  { %2115 = vmatpush3.bf16.msra.mxu1 %v2259_v25  ;;  %v2335_v25 = vld [vmem:[%s3240_s0 + $0x184] ss:$12 sps:$4 sm:$0xff]  }
  0x4c   :  { %2116 = vmatprep.subr.bf16.mxu1 %v2266_v30 }
  0x4f   :  { %2117 = vmatpush3.bf16.msra.mxu1 %v2266_v30  ;;  %v2342_v30 = vld [vmem:[%s3240_s0 + $0x1b8] ss:$12 sps:$4 sm:$0xff]  }
  0x50   :  { %2118 = vmatprep.subr.bf16.mxu1 %v2273_v32 }
  0x51   :  { %903 = vmatmul.mubr.bf16.gmra.mrb[8].mxu0 %v2257_v31  ;;  %1095 = vmatmul.mubr.bf16.gmra.mrb[8].mxu1 %v2258_v33  ;;  %v2343_v31 = vld [vmem:[%s3240_s0 + $0x198] ss:$12 sps:$4 sm:$0xff]   ;;  %v2345_v33 = vld [vmem:[%s3240_s0 + $0x1b4] ss:$12 sps:$4 sm:$0xff]  }
  0x52   :  { %910 = vmatprep.mubr.bf16.mxu0 %v2260_v34  ;;  %1102 = vmatprep.mubr.bf16.mxu1 %v2262_v35  ;;  %v2347_v34 = vld [vmem:[%s3240_s0 + $0x1e8] ss:$12 sps:$4 sm:$0xff]   ;;  %v2348_v35 = vld [vmem:[%s3240_s0 + $0x1b0] ss:$12 sps:$4 sm:$0xff]  }
  0x53   :  { %2119 = vmatpush3.bf16.msra.mxu1 %v2273_v32  ;;  %v2344_v32 = vld [vmem:[%s3240_s0 + $0x1d0] ss:$12 sps:$4 sm:$0xff]  }
  0x54   :  { %2120 = vmatprep.subr.bf16.mxu1 %v2280_v36 }
  0x57   :  { %2121 = vmatpush3.bf16.msra.mxu1 %v2280_v36  ;;  %v2349_v36 = vld [vmem:[%s3240_s0 + $0x200] ss:$12 sps:$4 sm:$0xff]  }
  0x58   :  { %2122 = vmatprep.subr.bf16.mxu1 %v2287_v41 }
  0x59   :  { %911 = vmatmul.mubr.bf16.gmra.mrb[12].mxu0 %v2264_v37  ;;  %1103 = vmatmul.mubr.bf16.gmra.mrb[12].mxu1 %v2265_v38  ;;  %v2350_v37 = vld [vmem:[%s3240_s0 + $0x1cc] ss:$12 sps:$4 sm:$0xff]  }
  0x5a   :  { %918 = vmatprep.mubr.bf16.mxu0 %v2267_v39  ;;  %1110 = vmatprep.mubr.bf16.mxu1 %v2269_v40  ;;  %v2352_v38 = vld [vmem:[%s3240_s0 + $0x218] ss:$12 sps:$4 sm:$0xff]   ;;  %v2353_v39 = vld [vmem:[%s3240_s0 + $0x1c8] ss:$12 sps:$4 sm:$0xff]   ;;  %v2354_v40 = vld [vmem:[%s3240_s0 + $0x230] ss:$12 sps:$4 sm:$0xff]  }
  0x5b   :  { %2123 = vmatpush3.bf16.msra.mxu1 %v2287_v41  ;;  %v2355_v41 = vld [vmem:[%s3240_s0 + $0x1e4] ss:$12 sps:$4 sm:$0xff]  }
  0x5c   :  { %2124 = vmatprep.subr.bf16.mxu1 %v2294_v42 }
  0x5f   :  { %2125 = vmatpush3.bf16.msra.mxu1 %v2294_v42  ;;  %v2357_v42 = vld [vmem:[%s3240_s0 + $0x248] ss:$12 sps:$4 sm:$0xff]  }
  0x61   :  { %919 = vmatmul.mubr.bf16.gmra.mrb[16].mxu0 %v2271_v43  ;;  %1111 = vmatmul.mubr.bf16.gmra.mrb[16].mxu1 %v2272_v44  ;;  %v2358_v43 = vld [vmem:[%s3240_s0 + $0x1e0] ss:$12 sps:$4 sm:$0xff]  }
  0x62   :  { %926 = vmatprep.mubr.bf16.mxu0 %v2274_v45  ;;  %1118 = vmatprep.mubr.bf16.mxu1 %v2276_v46  ;;  %v2359_v44 = vld [vmem:[%s3240_s0 + $0x260] ss:$12 sps:$4 sm:$0xff]   ;;  %v2360_v45 = vld [vmem:[%s3240_s0 + $0x1fc] ss:$12 sps:$4 sm:$0xff]   ;;  %v2362_v46 = vld [vmem:[%s3240_s0 + $0x278] ss:$12 sps:$4 sm:$0xff]  }
  0x69   :  { %927 = vmatmul.mubr.bf16.gmra.mrb[20].mxu0 %v2278_v47  ;;  %1119 = vmatmul.mubr.bf16.gmra.mrb[20].mxu1 %v2279_v48  ;;  %v2363_v47 = vld [vmem:[%s3240_s0 + $0x1f8] ss:$12 sps:$4 sm:$0xff]   ;;  %v2364_v48 = vld [vmem:[%s3240_s0 + $0x290] ss:$12 sps:$4 sm:$0xff]  }
  0x6a   :  { %934 = vmatprep.mubr.bf16.mxu0 %v2281_v49  ;;  %1126 = vmatprep.mubr.bf16.mxu1 %v2283_v50  ;;  %v2365_v49 = vld [vmem:[%s3240_s0 + $0x214] ss:$12 sps:$4 sm:$0xff]  }
  0x6b   :  { %v2367_v50 = vld [vmem:[%s3240_s0 + $0x2a8] ss:$12 sps:$4 sm:$0xff]  }
  0x71   :  { %935 = vmatmul.mubr.bf16.gmra.mrb[24].mxu0 %v2285_v51  ;;  %1127 = vmatmul.mubr.bf16.gmra.mrb[24].mxu1 %v2286_v52  ;;  %v2368_v51 = vld [vmem:[%s3240_s0 + $0x210] ss:$12 sps:$4 sm:$0xff]   ;;  %v2369_v52 = vld [vmem:[%s3240_s0 + $0x2c0] ss:$12 sps:$4 sm:$0xff]  }
  0x72   :  { %942 = vmatprep.mubr.bf16.mxu0 %v2288_v53  ;;  %1134 = vmatprep.mubr.bf16.mxu1 %v2290_v54  ;;  %v2370_v53 = vld [vmem:[%s3240_s0 + $0x22c] ss:$12 sps:$4 sm:$0xff]  }
  0x73   :  { %v2372_v54 = vld [vmem:[%s3240_s0 + $0x2d8] ss:$12 sps:$4 sm:$0xff]  }
  0x79   :  { %943 = vmatmul.mubr.bf16.gmra.mrb[28].mxu0 %v2292_v55  ;;  %1135 = vmatmul.mubr.bf16.gmra.mrb[28].mxu1 %v2293_v56  ;;  %v2373_v55 = vld [vmem:[%s3240_s0 + $0x228] ss:$12 sps:$4 sm:$0xff]   ;;  %v2374_v56 = vld [vmem:[%s3240_s0 + $0x2f0] ss:$12 sps:$4 sm:$0xff]  }
  0x7a   :  { %950 = vmatprep.mubr.bf16.mxu0 %v2295_v57  ;;  %2126 = vmatprep.mubr.bf16.mxu1 %v2297_v58 }
  0x81   :  { %951 = vmatmul.mubr.bf16.gmra.mrb[32].mxu0 %v2298_v59  ;;  %2127 = vmatmul.mubr.bf16.vlgmr.msra.gmra.mrb[32].mxu1 %v2299_v60 }
  0x82   :  { %958 = vmatprep.mubr.bf16.mxu0 %v2300_v61  ;;  %2130 = vmatprep.mubr.bf16.mxu1 %v2302_v62 }
  0x89   :  { %959 = vmatmul.mubr.bf16.gmra.mrb[36].mxu0 %v2303_v63  ;;  %2131 = vmatmul.mubr.bf16.gmra.mrb[36].mxu1 %v2304_v0 }
  0x8a   :  { %966 = vmatprep.mubr.bf16.mxu0 %v2305_v1  ;;  %2134 = vmatprep.mubr.bf16.mxu1 %v2307_v2 }
  0x91   :  { %967 = vmatmul.mubr.bf16.gmra.mrb[40].mxu0 %v2308_v3  ;;  %2135 = vmatmul.mubr.bf16.gmra.mrb[40].mxu1 %v2309_v4 }
  0x92   :  { %974 = vmatprep.mubr.bf16.mxu0 %v2310_v5  ;;  %2138 = vmatprep.mubr.bf16.mxu1 %v2312_v6 }
  0x99   :  { %975 = vmatmul.mubr.bf16.gmra.mrb[44].mxu0 %v2313_v7  ;;  %2139 = vmatmul.mubr.bf16.gmra.mrb[44].mxu1 %v2314_v8 }
  0x9a   :  { %982 = vmatprep.mubr.bf16.mxu0 %v2315_v9  ;;  %2142 = vmatprep.mubr.bf16.mxu1 %v2317_v10 }
  0xa1   :  { %983 = vmatmul.mubr.bf16.gmra.mrb[48].mxu0 %v2318_v11  ;;  %2143 = vmatmul.mubr.bf16.gmra.mrb[48].mxu1 %v2319_v12 }
  0xa2   :  { %990 = vmatprep.mubr.bf16.mxu0 %v2320_v13  ;;  %2146 = vmatprep.mubr.bf16.mxu1 %v2322_v14 }
  0xa9   :  { %991 = vmatmul.mubr.bf16.gmra.mrb[52].mxu0 %v2323_v15  ;;  %2147 = vmatmul.mubr.bf16.gmra.mrb[52].mxu1 %v2324_v16 }
  0xaa   :  { %998 = vmatprep.mubr.bf16.mxu0 %v2325_v17  ;;  %2150 = vmatprep.mubr.bf16.mxu1 %v2327_v18 }
  0xb1   :  { %999 = vmatmul.mubr.bf16.gmra.mrb[56].mxu0 %v2328_v19  ;;  %2151 = vmatmul.mubr.bf16.gmra.mrb[56].mxu1 %v2329_v20 }
  0xb2   :  { %1006 = vmatprep.mubr.bf16.mxu0 %v2330_v21  ;;  %2154 = vmatprep.mubr.bf16.mxu1 %v2332_v22 }
  0xb9   :  { %1007 = vmatmul.mubr.bf16.gmra.mrb[60].mxu0 %v2333_v23  ;;  %2155 = vmatmul.mubr.bf16.gmra.mrb[60].mxu1 %v2334_v24 }
  0xba   :  { %1014 = vmatprep.mubr.bf16.mxu0 %v2335_v25  ;;  %2158 = vmatprep.mubr.bf16.mxu1 %v2337_v26 }
  0xc1   :  { %1015 = vmatmul.mubr.bf16.gmra.mrb[64].mxu0 %v2338_v27  ;;  %2159 = vmatmul.mubr.bf16.gmra.mrb[64].mxu1 %v2339_v28 }
  0xc2   :  { %1022 = vmatprep.mubr.bf16.mxu0 %v2340_v29  ;;  %2162 = vmatprep.mubr.bf16.mxu1 %v2342_v30 }
  0xc9   :  { %1023 = vmatmul.mubr.bf16.gmra.mrb[68].mxu0 %v2343_v31  ;;  %2163 = vmatmul.mubr.bf16.gmra.mrb[68].mxu1 %v2344_v32 }
  0xca   :  { %1030 = vmatprep.mubr.bf16.mxu0 %v2345_v33  ;;  %2166 = vmatprep.mubr.bf16.mxu1 %v2347_v34 }
  0xd1   :  { %1031 = vmatmul.mubr.bf16.gmra.mrb[72].mxu0 %v2348_v35  ;;  %2167 = vmatmul.mubr.bf16.gmra.mrb[72].mxu1 %v2349_v36 }
  0xd2   :  { %1038 = vmatprep.mubr.bf16.mxu0 %v2350_v37  ;;  %2170 = vmatprep.mubr.bf16.mxu1 %v2352_v38 }
  0xd9   :  { %1039 = vmatmul.mubr.bf16.gmra.mrb[76].mxu0 %v2353_v39  ;;  %2171 = vmatmul.mubr.bf16.gmra.mrb[76].mxu1 %v2354_v40 }
  0xda   :  { %1046 = vmatprep.mubr.bf16.mxu0 %v2355_v41  ;;  %2174 = vmatprep.mubr.bf16.mxu1 %v2357_v42 }
  0xe1   :  { %1047 = vmatmul.mubr.bf16.gmra.mrb[80].mxu0 %v2358_v43  ;;  %2175 = vmatmul.mubr.bf16.gmra.mrb[80].mxu1 %v2359_v44 }
  0xe2   :  { %1054 = vmatprep.mubr.bf16.mxu0 %v2360_v45  ;;  %2178 = vmatprep.mubr.bf16.mxu1 %v2362_v46 }
  0xe9   :  { %1055 = vmatmul.mubr.bf16.gmra.mrb[84].mxu0 %v2363_v47  ;;  %2179 = vmatmul.mubr.bf16.gmra.mrb[84].mxu1 %v2364_v48 }
  0xea   :  { %1062 = vmatprep.mubr.bf16.mxu0 %v2365_v49  ;;  %2182 = vmatprep.mubr.bf16.mxu1 %v2367_v50 }
  0xf1   :  { %1063 = vmatmul.mubr.bf16.gmra.mrb[88].mxu0 %v2368_v51  ;;  %2183 = vmatmul.mubr.bf16.gmra.mrb[88].mxu1 %v2369_v52 }
  0xf2   :  { %1070 = vmatprep.mubr.bf16.mxu0 %v2370_v53  ;;  %2186 = vmatprep.mubr.bf16.mxu1 %v2372_v54 }
  0xf9   :  { %1071 = vmatmul.mubr.bf16.gmra.mrb[92].mxu0 %v2373_v55  ;;  %2187 = vmatmul.mubr.bf16.gmra.mrb[92].mxu1 %v2374_v56 }
 0x114   :  { %v2788_v57 = vpop.f32.mrb[0].mxu0  ;;  %v2790_v58 = vpop.f32.mrb[0].mxu1 }
 0x115   :  { %v890_v59 = vpop.f32.mrb[1].mxu0  ;;  %v1082_v60 = vpop.f32.mrb[1].mxu1 }
 0x116   :  { %v2792_v61 = vpop.f32.mrb[2].mxu0  ;;  %v2794_v62 = vpop.f32.mrb[2].mxu1  ;;  %v2851_v59 = vld [vmem:[%s3241_s2] ss:$0 sm:$0xff] }
 0x117   :  { %v893_v63 = vpop.f32.mrb[3].mxu0  ;;  %v1085_v0 = vpop.f32.mrb[3].mxu1 }
 0x118   :  { %v889_v63 = vadd.f32 %v2851_v59, %v2788_v57 }
 0x11c   :  { %v896_v1 = vpop.f32.mrb[4].mxu0  ;;  %v2796_v2 = vpop.f32.mrb[4].mxu1 }
 0x11d   :  { %v898_v3 = vpop.f32.mrb[5].mxu0  ;;  %v1090_v4 = vpop.f32.mrb[5].mxu1  ;;  %v897_v60 = vadd.f32 %v2851_v59, %v896_v1 }
 0x11e   :  { %v899_v5 = vpop.f32.mrb[6].mxu0  ;;  %v2798_v6 = vpop.f32.mrb[6].mxu1 }
 0x11f   :  { %v901_v7 = vpop.f32.mrb[7].mxu0  ;;  %v1093_v8 = vpop.f32.mrb[7].mxu1  ;;  %v900_v4 = vadd.f32 %v2851_v59, %v899_v5 }
 0x124   :  { %v2800_v9 = vpop.f32.mrb[8].mxu0  ;;  %v2802_v10 = vpop.f32.mrb[8].mxu1 }
 0x125   :  { %v906_v11 = vpop.f32.mrb[9].mxu0  ;;  %v1098_v12 = vpop.f32.mrb[9].mxu1 }
 0x126   :  { %v2804_v13 = vpop.f32.mrb[10].mxu0  ;;  %v2806_v14 = vpop.f32.mrb[10].mxu1  ;;  %v892_v12 = vadd.f32 %v2851_v59, %v2792_v61 }
 0x127   :  { %v909_v15 = vpop.f32.mrb[11].mxu0  ;;  %v1101_v16 = vpop.f32.mrb[11].mxu1 }
 0x12c   :  { %v2808_v17 = vpop.f32.mrb[12].mxu0  ;;  %v2810_v18 = vpop.f32.mrb[12].mxu1 }
 0x12d   :  { %v914_v19 = vpop.f32.mrb[13].mxu0  ;;  %v1106_v20 = vpop.f32.mrb[13].mxu1 }
 0x12e   :  { %v2812_v21 = vpop.f32.mrb[14].mxu0  ;;  %v2814_v22 = vpop.f32.mrb[14].mxu1 }
 0x12f   :  { %v917_v23 = vpop.f32.mrb[15].mxu0  ;;  %v1109_v24 = vpop.f32.mrb[15].mxu1 }
 0x134   :  { %v2816_v25 = vpop.f32.mrb[16].mxu0  ;;  %v2818_v26 = vpop.f32.mrb[16].mxu1 }
 0x135   :  { %v922_v27 = vpop.f32.mrb[17].mxu0  ;;  %v1114_v28 = vpop.f32.mrb[17].mxu1 }
 0x136   :  { %v2820_v29 = vpop.f32.mrb[18].mxu0  ;;  %v2822_v30 = vpop.f32.mrb[18].mxu1 }
 0x137   :  { %v925_v31 = vpop.f32.mrb[19].mxu0  ;;  %v1117_v32 = vpop.f32.mrb[19].mxu1 }
 0x13c   :  { %v2824_v33 = vpop.f32.mrb[20].mxu0  ;;  %v2826_v34 = vpop.f32.mrb[20].mxu1 }
 0x13d   :  { %v930_v35 = vpop.f32.mrb[21].mxu0  ;;  %v1122_v36 = vpop.f32.mrb[21].mxu1 }
 0x13e   :  { %v2828_v37 = vpop.f32.mrb[22].mxu0  ;;  %v2830_v38 = vpop.f32.mrb[22].mxu1  ;;  %v913_v35 = vadd.f32 %v2851_v59, %v2808_v17  ;;  %v905_v36 = vadd.f32 %v2851_v59, %v2800_v9  ;;  %v916_v17 = vadd.f32 %v2851_v59, %v2812_v21 }
 0x13f   :  { %v933_v39 = vpop.f32.mrb[23].mxu0  ;;  %v1125_v40 = vpop.f32.mrb[23].mxu1 }
 0x144   :  { %v2832_v41 = vpop.f32.mrb[24].mxu0  ;;  %v2834_v42 = vpop.f32.mrb[24].mxu1 }
 0x145   :  { %v938_v43 = vpop.f32.mrb[25].mxu0  ;;  %v1130_v44 = vpop.f32.mrb[25].mxu1 }
 0x146   :  { %v2836_v45 = vpop.f32.mrb[26].mxu0  ;;  %v2838_v46 = vpop.f32.mrb[26].mxu1 }
 0x147   :  { %v941_v47 = vpop.f32.mrb[27].mxu0  ;;  %v1133_v48 = vpop.f32.mrb[27].mxu1 }
 0x148   :  { %v908_v48 = vadd.f32 %v2851_v59, %v2804_v13  ;;  %v929_v13 = vadd.f32 %v2851_v59, %v2824_v33  ;;  %v932_v33 = vadd.f32 %v2851_v59, %v2828_v37 }
 0x14c   :  { %v2840_v49 = vpop.f32.mrb[28].mxu0  ;;  %v2842_v50 = vpop.f32.mrb[28].mxu1 }
 0x14d   :  { %v946_v51 = vpop.f32.mrb[29].mxu0  ;;  %v1138_v52 = vpop.f32.mrb[29].mxu1 }
 0x14e   :  { %v2844_v53 = vpop.f32.mrb[30].mxu0  ;;  %v2846_v54 = vpop.f32.mrb[30].mxu1 }
 0x14f   :  { %v949_v55 = vpop.f32.mrb[31].mxu0  ;;  %v1141_v56 = vpop.f32.mrb[31].mxu1 }
 0x154   :  { %v2856_v0 = vpop.f32.mrb[32].mxu0  ;;  %v2128_v3 = vpop.f32.mrb[32].mxu1 }
 0x155   :  { %v1186_v7 = vadd.f32 %v2128_v3, %v897_v60  ;;  %v954_v8 = vpop.f32.mrb[33].mxu0  ;;  %v1177_v11 = vpop.f32.mrb[33].mxu1 }
 0x156   :  { %v1178_v15 = vadd.f32 %v1177_v11, %v889_v63  ;;  %v2861_v16 = vpop.f32.mrb[34].mxu0  ;;  %v2129_v19 = vpop.f32.mrb[34].mxu1 }
 0x157   :  { %v1434_v20 = vmax.f32 %v1186_v7, 0.0  ;;  %v1189_v1 = vadd.f32 %v2129_v19, %v900_v4  ;;  %v957_v23 = vpop.f32.mrb[35].mxu0  ;;  %v1180_v24 = vpop.f32.mrb[35].mxu1  ;;  %v921_v19 = vadd.f32 %v2851_v59, %v2816_v25 }
 0x158   :  { %v1432_v57 = vmax.f32 %v1178_v15, 0.0  ;;  %v1181_v27 = vadd.f32 %v1180_v24, %v892_v12 }
 0x159   :  { %v2008_v28 = vpack.c.bf16 %v1434_v20, %v1434_v20  ;;  %v1435_v31 = vmax.f32 %v1189_v1, 0.0 }
 0x15a   :  { %v2006_v5 = vpack.c.bf16 %v1432_v57, %v1432_v57  ;;  %v1433_v32 = vmax.f32 %v1181_v27, 0.0  ;;  %v924_v27 = vadd.f32 %v2851_v59, %v2820_v29  ;;  %v945_v29 = vadd.f32 %v2851_v59, %v2840_v49 }
 0x15b   :  { %1755 = vst.msk [vmem:[%s3242_s3 + $0x8] sm:$0xf] %vm1752_vm0, %v2008_v28  ;;  %v2009_v61 = vpack.c.bf16 %v1435_v31, %v1435_v31  ;;  %v948_v49 = vadd.f32 %v2851_v59, %v2844_v53 }
 0x15c   :  { %1753 = vst.msk [vmem:[%s3242_s3] sm:$0xf] %vm1752_vm0, %v2006_v5  ;;  %v2007_v39 = vpack.c.bf16 %v1433_v32, %v1433_v32  ;;  %v2875_v40 = vpop.f32.mrb[36].mxu0  ;;  %v2132_v43 = vpop.f32.mrb[36].mxu1 }
 0x15d   :  { %1756 = vst.msk [vmem:[%s3242_s3 + $0xc] sm:$0xf] %vm1752_vm0, %v2009_v61  ;;  %v1202_v44 = vadd.f32 %v2132_v43, %v913_v35  ;;  %v962_v47 = vpop.f32.mrb[37].mxu0  ;;  %v1193_v9 = vpop.f32.mrb[37].mxu1 }
 0x15e   :  { %1754 = vst.msk [vmem:[%s3242_s3 + $0x4] sm:$0xf] %vm1752_vm0, %v2007_v39  ;;  %v1194_v51 = vadd.f32 %v1193_v9, %v905_v36  ;;  %v2889_v52 = vpop.f32.mrb[38].mxu0  ;;  %v2133_v21 = vpop.f32.mrb[38].mxu1 }
 0x15f   :  { %v1438_v55 = vmax.f32 %v1202_v44, 0.0  ;;  %v1205_v56 = vadd.f32 %v2133_v21, %v916_v17  ;;  %v965_v60 = vpop.f32.mrb[39].mxu0  ;;  %v1196_v63 = vpop.f32.mrb[39].mxu1 }
 0x160   :  { %v1436_v3 = vmax.f32 %v1194_v51, 0.0  ;;  %v1197_v4 = vadd.f32 %v1196_v63, %v908_v48  ;;  %v937_v48 = vadd.f32 %v2851_v59, %v2832_v41  ;;  %v940_v41 = vadd.f32 %v2851_v59, %v2836_v45 }
 0x161   :  { %v2012_v7 = vpack.c.bf16 %v1438_v55, %v1438_v55  ;;  %v1439_v8 = vmax.f32 %v1205_v56, 0.0  ;;  %v961_v45 = vadd.f32 %v2851_v59, %v2875_v40  ;;  %v964_v40 = vadd.f32 %v2851_v59, %v2889_v52 }
 0x162   :  { %v2010_v11 = vpack.c.bf16 %v1436_v3, %v1436_v3  ;;  %v1437_v12 = vmax.f32 %v1197_v4, 0.0 }
 0x163   :  { %1759 = vst.msk [vmem:[%s3242_s3 + $0x18] sm:$0xf] %vm1752_vm0, %v2012_v7  ;;  %v2013_v15 = vpack.c.bf16 %v1439_v8, %v1439_v8 }
 0x164   :  { %1757 = vst.msk [vmem:[%s3242_s3 + $0x10] sm:$0xf] %vm1752_vm0, %v2010_v11  ;;  %v2011_v20 = vpack.c.bf16 %v1437_v12, %v1437_v12  ;;  %v2903_v1 = vpop.f32.mrb[40].mxu0  ;;  %v2136_v23 = vpop.f32.mrb[40].mxu1 }
 0x165   :  { %1760 = vst.msk [vmem:[%s3242_s3 + $0x1c] sm:$0xf] %vm1752_vm0, %v2013_v15  ;;  %v1218_v24 = vadd.f32 %v2136_v23, %v929_v13  ;;  %v970_v57 = vpop.f32.mrb[41].mxu0  ;;  %v1209_v25 = vpop.f32.mrb[41].mxu1 }
 0x166   :  { %1758 = vst.msk [vmem:[%s3242_s3 + $0x14] sm:$0xf] %vm1752_vm0, %v2011_v20  ;;  %v1210_v28 = vadd.f32 %v1209_v25, %v921_v19  ;;  %v2917_v31 = vpop.f32.mrb[42].mxu0  ;;  %v2137_v37 = vpop.f32.mrb[42].mxu1  ;;  %v953_v57 = vadd.f32 %v2851_v59, %v2856_v0  ;;  %v956_v0 = vadd.f32 %v2851_v59, %v2861_v16 }
 0x167   :  { %v1442_v5 = vmax.f32 %v1218_v24, 0.0  ;;  %v1221_v32 = vadd.f32 %v2137_v37, %v932_v33  ;;  %v973_v35 = vpop.f32.mrb[43].mxu0  ;;  %v1212_v61 = vpop.f32.mrb[43].mxu1 }
 0x168   :  { %v1440_v36 = vmax.f32 %v1210_v28, 0.0  ;;  %v1213_v39 = vadd.f32 %v1212_v61, %v924_v27 }
 0x169   :  { %v2016_v43 = vpack.c.bf16 %v1442_v5, %v1442_v5  ;;  %v1443_v17 = vmax.f32 %v1221_v32, 0.0 }
 0x16a   :  { %v2014_v44 = vpack.c.bf16 %v1440_v36, %v1440_v36  ;;  %v1441_v47 = vmax.f32 %v1213_v39, 0.0 }
 0x16b   :  { %1763 = vst.msk [vmem:[%s3242_s3 + $0x28] sm:$0xf] %vm1752_vm0, %v2016_v43  ;;  %v2017_v9 = vpack.c.bf16 %v1443_v17, %v1443_v17 }
 0x16c   :  { %1761 = vst.msk [vmem:[%s3242_s3 + $0x20] sm:$0xf] %vm1752_vm0, %v2014_v44  ;;  %v2015_v51 = vpack.c.bf16 %v1441_v47, %v1441_v47  ;;  %v976_v21 = vpop.f32.mrb[44].mxu0  ;;  %v2140_v55 = vpop.f32.mrb[44].mxu1 }
 0x16d   :  { %1764 = vst.msk [vmem:[%s3242_s3 + $0x2c] sm:$0xf] %vm1752_vm0, %v2017_v9  ;;  %v1234_v56 = vadd.f32 %v2140_v55, %v945_v29  ;;  %v978_v60 = vpop.f32.mrb[45].mxu0  ;;  %v1225_v63 = vpop.f32.mrb[45].mxu1  ;;  %v977_v16 = vadd.f32 %v2851_v59, %v976_v21 }
 0x16e   :  { %1762 = vst.msk [vmem:[%s3242_s3 + $0x24] sm:$0xf] %vm1752_vm0, %v2015_v51  ;;  %v1226_v3 = vadd.f32 %v1225_v63, %v937_v48  ;;  %v979_v4 = vpop.f32.mrb[46].mxu0  ;;  %v2141_v7 = vpop.f32.mrb[46].mxu1 }
 0x16f   :  { %v1446_v53 = vmax.f32 %v1234_v56, 0.0  ;;  %v1237_v8 = vadd.f32 %v2141_v7, %v948_v49  ;;  %v981_v11 = vpop.f32.mrb[47].mxu0  ;;  %v1228_v12 = vpop.f32.mrb[47].mxu1  ;;  %v969_v49 = vadd.f32 %v2851_v59, %v2903_v1  ;;  %v972_v1 = vadd.f32 %v2851_v59, %v2917_v31 }
 0x170   :  { %v1444_v13 = vmax.f32 %v1226_v3, 0.0  ;;  %v1229_v15 = vadd.f32 %v1228_v12, %v940_v41  ;;  %v980_v41 = vadd.f32 %v2851_v59, %v979_v4 }
 0x171   :  { %v2020_v19 = vpack.c.bf16 %v1446_v53, %v1446_v53  ;;  %v1447_v20 = vmax.f32 %v1237_v8, 0.0 }
 0x172   :  { %v2018_v23 = vpack.c.bf16 %v1444_v13, %v1444_v13  ;;  %v1445_v33 = vmax.f32 %v1229_v15, 0.0 }
 0x173   :  { %1767 = vst.msk [vmem:[%s3242_s3 + $0x38] sm:$0xf] %vm1752_vm0, %v2020_v19  ;;  %v2021_v24 = vpack.c.bf16 %v1447_v20, %v1447_v20 }
 0x174   :  { %1765 = vst.msk [vmem:[%s3242_s3 + $0x30] sm:$0xf] %vm1752_vm0, %v2018_v23  ;;  %v2019_v25 = vpack.c.bf16 %v1445_v33, %v1445_v33  ;;  %v984_v27 = vpop.f32.mrb[48].mxu0  ;;  %v2144_v28 = vpop.f32.mrb[48].mxu1 }
 0x175   :  { %1768 = vst.msk [vmem:[%s3242_s3 + $0x3c] sm:$0xf] %vm1752_vm0, %v2021_v24  ;;  %v1250_v37 = vadd.f32 %v2144_v28, %v961_v45  ;;  %v986_v5 = vpop.f32.mrb[49].mxu0  ;;  %v1241_v32 = vpop.f32.mrb[49].mxu1 }
 0x176   :  { %1766 = vst.msk [vmem:[%s3242_s3 + $0x34] sm:$0xf] %vm1752_vm0, %v2019_v25  ;;  %v1242_v35 = vadd.f32 %v1241_v32, %v953_v57  ;;  %v987_v61 = vpop.f32.mrb[50].mxu0  ;;  %v2145_v36 = vpop.f32.mrb[50].mxu1  ;;  %v985_v25 = vadd.f32 %v2851_v59, %v984_v27 }
 0x177   :  { %v1450_v52 = vmax.f32 %v1250_v37, 0.0  ;;  %v1253_v39 = vadd.f32 %v2145_v36, %v964_v40  ;;  %v989_v43 = vpop.f32.mrb[51].mxu0  ;;  %v1244_v17 = vpop.f32.mrb[51].mxu1  ;;  %v988_v27 = vadd.f32 %v2851_v59, %v987_v61 }
 0x178   :  { %v1448_v44 = vmax.f32 %v1242_v35, 0.0  ;;  %v1245_v47 = vadd.f32 %v1244_v17, %v956_v0 }
 0x179   :  { %v2024_v29 = vpack.c.bf16 %v1450_v52, %v1450_v52  ;;  %v1451_v9 = vmax.f32 %v1253_v39, 0.0 }
 0x17a   :  { %v2022_v48 = vpack.c.bf16 %v1448_v44, %v1448_v44  ;;  %v1449_v51 = vmax.f32 %v1245_v47, 0.0 }
 0x17b   :  { %1771 = vst.msk [vmem:[%s3242_s3 + $0x48] sm:$0xf] %vm1752_vm0, %v2024_v29  ;;  %v2025_v55 = vpack.c.bf16 %v1451_v9, %v1451_v9 }
 0x17c   :  { %1769 = vst.msk [vmem:[%s3242_s3 + $0x40] sm:$0xf] %vm1752_vm0, %v2022_v48  ;;  %v2023_v56 = vpack.c.bf16 %v1449_v51, %v1449_v51  ;;  %v992_v60 = vpop.f32.mrb[52].mxu0  ;;  %v2148_v63 = vpop.f32.mrb[52].mxu1 }
 0x17d   :  { %1772 = vst.msk [vmem:[%s3242_s3 + $0x4c] sm:$0xf] %vm1752_vm0, %v2025_v55  ;;  %v1266_v21 = vadd.f32 %v2148_v63, %v977_v16  ;;  %v994_v3 = vpop.f32.mrb[53].mxu0  ;;  %v1257_v7 = vpop.f32.mrb[53].mxu1  ;;  %v993_v31 = vadd.f32 %v2851_v59, %v992_v60 }
 0x17e   :  { %1770 = vst.msk [vmem:[%s3242_s3 + $0x44] sm:$0xf] %vm1752_vm0, %v2023_v56  ;;  %v1258_v53 = vadd.f32 %v1257_v7, %v969_v49  ;;  %v995_v8 = vpop.f32.mrb[54].mxu0  ;;  %v2149_v11 = vpop.f32.mrb[54].mxu1 }
 0x17f   :  { %v1454_v4 = vmax.f32 %v1266_v21, 0.0  ;;  %v1269_v12 = vadd.f32 %v2149_v11, %v980_v41  ;;  %v997_v13 = vpop.f32.mrb[55].mxu0  ;;  %v1260_v15 = vpop.f32.mrb[55].mxu1  ;;  %v996_v5 = vadd.f32 %v2851_v59, %v995_v8 }
 0x180   :  { %v1452_v19 = vmax.f32 %v1258_v53, 0.0  ;;  %v1261_v20 = vadd.f32 %v1260_v15, %v972_v1 }
 0x181   :  { %v2028_v23 = vpack.c.bf16 %v1454_v4, %v1454_v4  ;;  %v1455_v33 = vmax.f32 %v1269_v12, 0.0 }
 0x182   :  { %v2026_v45 = vpack.c.bf16 %v1452_v19, %v1452_v19  ;;  %v1453_v24 = vmax.f32 %v1261_v20, 0.0 }
 0x183   :  { %1775 = vst.msk [vmem:[%s3242_s3 + $0x58] sm:$0xf] %vm1752_vm0, %v2028_v23  ;;  %v2029_v57 = vpack.c.bf16 %v1455_v33, %v1455_v33 }
 0x184   :  { %1773 = vst.msk [vmem:[%s3242_s3 + $0x50] sm:$0xf] %vm1752_vm0, %v2026_v45  ;;  %v2027_v28 = vpack.c.bf16 %v1453_v24, %v1453_v24  ;;  %v1000_v40 = vpop.f32.mrb[56].mxu0  ;;  %v2152_v37 = vpop.f32.mrb[56].mxu1 }
 0x185   :  { %1776 = vst.msk [vmem:[%s3242_s3 + $0x5c] sm:$0xf] %vm1752_vm0, %v2029_v57  ;;  %v1282_v32 = vadd.f32 %v2152_v37, %v993_v31  ;;  %v1002_v0 = vpop.f32.mrb[57].mxu0  ;;  %v1273_v35 = vpop.f32.mrb[57].mxu1  ;;  %v1001_v49 = vadd.f32 %v2851_v59, %v1000_v40 }
 0x186   :  { %1774 = vst.msk [vmem:[%s3242_s3 + $0x54] sm:$0xf] %vm1752_vm0, %v2027_v28  ;;  %v1274_v36 = vadd.f32 %v1273_v35, %v985_v25  ;;  %v1003_v52 = vpop.f32.mrb[58].mxu0  ;;  %v2153_v39 = vpop.f32.mrb[58].mxu1 }
 0x187   :  { %v1458_v43 = vmax.f32 %v1282_v32, 0.0  ;;  %v1285_v17 = vadd.f32 %v2153_v39, %v996_v5  ;;  %v1005_v44 = vpop.f32.mrb[59].mxu0  ;;  %v1276_v47 = vpop.f32.mrb[59].mxu1  ;;  %v1004_v7 = vadd.f32 %v2851_v59, %v1003_v52 }
 0x188   :  { %v1456_v29 = vmax.f32 %v1274_v36, 0.0  ;;  %v1277_v9 = vadd.f32 %v1276_v47, %v988_v27 }
 0x189   :  { %v2032_v48 = vpack.c.bf16 %v1458_v43, %v1458_v43  ;;  %v1459_v51 = vmax.f32 %v1285_v17, 0.0 }
 0x18a   :  { %v2030_v16 = vpack.c.bf16 %v1456_v29, %v1456_v29  ;;  %v1457_v55 = vmax.f32 %v1277_v9, 0.0 }
 0x18b   :  { %1779 = vst.msk [vmem:[%s3242_s3 + $0x68] sm:$0xf] %vm1752_vm0, %v2032_v48  ;;  %v2033_v61 = vpack.c.bf16 %v1459_v51, %v1459_v51 }
 0x18c   :  { %1777 = vst.msk [vmem:[%s3242_s3 + $0x60] sm:$0xf] %vm1752_vm0, %v2030_v16  ;;  %v2031_v56 = vpack.c.bf16 %v1457_v55, %v1457_v55  ;;  %v1008_v60 = vpop.f32.mrb[60].mxu0  ;;  %v2156_v63 = vpop.f32.mrb[60].mxu1 }
 0x18d   :  { %1780 = vst.msk [vmem:[%s3242_s3 + $0x6c] sm:$0xf] %vm1752_vm0, %v2033_v61  ;;  %v1009_v41 = vadd.f32 %v2851_v59, %v1008_v60  ;;  %v1010_v21 = vpop.f32.mrb[61].mxu0  ;;  %v1289_v3 = vpop.f32.mrb[61].mxu1 }
 0x18e   :  { %1778 = vst.msk [vmem:[%s3242_s3 + $0x64] sm:$0xf] %vm1752_vm0, %v2031_v56  ;;  %v1290_v1 = vadd.f32 %v1289_v3, %v1001_v49  ;;  %v1011_v53 = vpop.f32.mrb[62].mxu0  ;;  %v2157_v8 = vpop.f32.mrb[62].mxu1 }
 0x18f   :  { %v1298_v11 = vadd.f32 %v2156_v63, %v1009_v41  ;;  %v1012_v4 = vadd.f32 %v2851_v59, %v1011_v53  ;;  %v1013_v12 = vpop.f32.mrb[63].mxu0  ;;  %v1292_v13 = vpop.f32.mrb[63].mxu1 }
 0x190   :  { %v1460_v15 = vmax.f32 %v1290_v1, 0.0  ;;  %v1293_v19 = vadd.f32 %v1292_v13, %v1004_v7 }
 0x191   :  { %v1462_v20 = vmax.f32 %v1298_v11, 0.0  ;;  %v1301_v23 = vadd.f32 %v2157_v8, %v1012_v4 }
 0x192   :  { %v2034_v33 = vpack.c.bf16 %v1460_v15, %v1460_v15  ;;  %v1461_v45 = vmax.f32 %v1293_v19, 0.0 }
 0x193   :  { %v2036_v24 = vpack.c.bf16 %v1462_v20, %v1462_v20  ;;  %v1463_v31 = vmax.f32 %v1301_v23, 0.0 }
 0x194   :  { %1781 = vst.msk [vmem:[%s3242_s3 + $0x70] sm:$0xf] %vm1752_vm0, %v2034_v33  ;;  %v2035_v57 = vpack.c.bf16 %v1461_v45, %v1461_v45  ;;  %v1016_v25 = vpop.f32.mrb[64].mxu0  ;;  %v2160_v28 = vpop.f32.mrb[64].mxu1 }
 0x195   :  { %1783 = vst.msk [vmem:[%s3242_s3 + $0x78] sm:$0xf] %vm1752_vm0, %v2036_v24  ;;  %v2037_v40 = vpack.c.bf16 %v1463_v31, %v1463_v31  ;;  %v1017_v37 = vadd.f32 %v2851_v59, %v1016_v25  ;;  %v1018_v5 = vpop.f32.mrb[65].mxu0  ;;  %v1305_v32 = vpop.f32.mrb[65].mxu1 }
 0x196   :  { %1782 = vst.msk [vmem:[%s3242_s3 + $0x74] sm:$0xf] %vm1752_vm0, %v2035_v57  ;;  %v1019_v0 = vpop.f32.mrb[66].mxu0  ;;  %v2161_v35 = vpop.f32.mrb[66].mxu1 }
 0x197   :  { %1784 = vst.msk [vmem:[%s3242_s3 + $0x7c] sm:$0xf] %vm1752_vm0, %v2037_v40  ;;  %v1306_v27 = vadd.f32 %v1305_v32, %v1017_v37  ;;  %v1020_v36 = vadd.f32 %v2851_v59, %v1019_v0  ;;  %v1021_v52 = vpop.f32.mrb[67].mxu0  ;;  %v1308_v39 = vpop.f32.mrb[67].mxu1 }
 0x199   :  { %v1464_v43 = vmax.f32 %v1306_v27, 0.0  ;;  %v1309_v17 = vadd.f32 %v1308_v39, %v1020_v36 }
 0x19b   :  { %v2038_v44 = vpack.c.bf16 %v1464_v43, %v1464_v43  ;;  %v1465_v47 = vmax.f32 %v1309_v17, 0.0 }
 0x19c   :  { %v1024_v29 = vpop.f32.mrb[68].mxu0  ;;  %v2164_v9 = vpop.f32.mrb[68].mxu1 }
 0x19d   :  { %1785 = vst.msk [vmem:[%s3242_s3 + $0x80] sm:$0xf] %vm1752_vm0, %v2038_v44  ;;  %v2039_v48 = vpack.c.bf16 %v1465_v47, %v1465_v47  ;;  %v1025_v51 = vadd.f32 %v2851_v59, %v1024_v29  ;;  %v1026_v16 = vpop.f32.mrb[69].mxu0  ;;  %v1321_v55 = vpop.f32.mrb[69].mxu1  ;;  %v1089_v47 = vadd.f32 %v2851_v59, %v2796_v2 }
 0x19e   :  { %v1027_v61 = vpop.f32.mrb[70].mxu0  ;;  %v2165_v49 = vpop.f32.mrb[70].mxu1 }
 0x19f   :  { %1786 = vst.msk [vmem:[%s3242_s3 + $0x84] sm:$0xf] %vm1752_vm0, %v2039_v48  ;;  %v1314_v56 = vadd.f32 %v2160_v28, %v1025_v51  ;;  %v1028_v60 = vadd.f32 %v2851_v59, %v1027_v61  ;;  %v1029_v63 = vpop.f32.mrb[71].mxu0  ;;  %v1324_v41 = vpop.f32.mrb[71].mxu1  ;;  %v1081_v51 = vadd.f32 %v2851_v59, %v2790_v58 }
 0x1a0   :  { %v1084_v63 = vadd.f32 %v2851_v59, %v2794_v62 }
 0x1a1   :  { %v1466_v21 = vmax.f32 %v1314_v56, 0.0  ;;  %v1317_v3 = vadd.f32 %v2161_v35, %v1028_v60 }
 0x1a3   :  { %v2040_v7 = vpack.c.bf16 %v1466_v21, %v1466_v21  ;;  %v1467_v1 = vmax.f32 %v1317_v3, 0.0 }
 0x1a4   :  { %v1032_v53 = vpop.f32.mrb[72].mxu0  ;;  %v3057_v8 = vpop.f32.mrb[72].mxu1 }
 0x1a5   :  { %1787 = vst.msk [vmem:[%s3242_s3 + $0x88] sm:$0xf] %vm1752_vm0, %v2040_v7  ;;  %v2041_v11 = vpack.c.bf16 %v1467_v1, %v1467_v1  ;;  %v1033_v4 = vadd.f32 %v2851_v59, %v1032_v53  ;;  %v1034_v12 = vpop.f32.mrb[73].mxu0  ;;  %v1337_v13 = vpop.f32.mrb[73].mxu1 }
 0x1a6   :  { %v1035_v15 = vpop.f32.mrb[74].mxu0  ;;  %v3064_v19 = vpop.f32.mrb[74].mxu1 }
 0x1a7   :  { %1788 = vst.msk [vmem:[%s3242_s3 + $0x8c] sm:$0xf] %vm1752_vm0, %v2041_v11  ;;  %v1322_v20 = vadd.f32 %v1321_v55, %v1033_v4  ;;  %v1036_v23 = vadd.f32 %v2851_v59, %v1035_v15  ;;  %v1037_v33 = vpop.f32.mrb[75].mxu0  ;;  %v1340_v45 = vpop.f32.mrb[75].mxu1 }
 0x1a9   :  { %v1468_v24 = vmax.f32 %v1322_v20, 0.0  ;;  %v1325_v31 = vadd.f32 %v1324_v41, %v1036_v23 }
 0x1ab   :  { %v2042_v57 = vpack.c.bf16 %v1468_v24, %v1468_v24  ;;  %v1469_v25 = vmax.f32 %v1325_v31, 0.0  ;;  %v1105_v31 = vadd.f32 %v2851_v59, %v2810_v18  ;;  %v1108_v18 = vadd.f32 %v2851_v59, %v2814_v22 }
 0x1ac   :  { %v1040_v28 = vpop.f32.mrb[76].mxu0  ;;  %v3071_v40 = vpop.f32.mrb[76].mxu1 }
 0x1ad   :  { %1789 = vst.msk [vmem:[%s3242_s3 + $0x90] sm:$0xf] %vm1752_vm0, %v2042_v57  ;;  %v2043_v37 = vpack.c.bf16 %v1469_v25, %v1469_v25  ;;  %v1041_v5 = vadd.f32 %v2851_v59, %v1040_v28  ;;  %v1042_v32 = vpop.f32.mrb[77].mxu0  ;;  %v3078_v0 = vpop.f32.mrb[77].mxu1  ;;  %v1097_v28 = vadd.f32 %v2851_v59, %v2802_v10 }
 0x1ae   :  { %v1043_v35 = vpop.f32.mrb[78].mxu0  ;;  %v3080_v27 = vpop.f32.mrb[78].mxu1 }
 0x1af   :  { %1790 = vst.msk [vmem:[%s3242_s3 + $0x94] sm:$0xf] %vm1752_vm0, %v2043_v37  ;;  %v1330_v36 = vadd.f32 %v2164_v9, %v1041_v5  ;;  %v1044_v52 = vadd.f32 %v2851_v59, %v1043_v35  ;;  %v1045_v39 = vpop.f32.mrb[79].mxu0  ;;  %v3087_v43 = vpop.f32.mrb[79].mxu1  ;;  %v1092_v9 = vadd.f32 %v2851_v59, %v2798_v6 }
 0x1b0   :  { %v1100_v39 = vadd.f32 %v2851_v59, %v2806_v14 }
 0x1b1   :  { %v1470_v17 = vmax.f32 %v1330_v36, 0.0  ;;  %v1333_v44 = vadd.f32 %v2165_v49, %v1044_v52 }
 0x1b3   :  { %v2044_v29 = vpack.c.bf16 %v1470_v17, %v1470_v17  ;;  %v1471_v48 = vmax.f32 %v1333_v44, 0.0 }
 0x1b4   :  { %v1048_v16 = vpop.f32.mrb[80].mxu0  ;;  %v2176_v55 = vpop.f32.mrb[80].mxu1 }
 0x1b5   :  { %1791 = vst.msk [vmem:[%s3242_s3 + $0x98] sm:$0xf] %vm1752_vm0, %v2044_v29  ;;  %v2045_v61 = vpack.c.bf16 %v1471_v48, %v1471_v48  ;;  %v1049_v49 = vadd.f32 %v2851_v59, %v1048_v16  ;;  %v1378_v56 = vadd.f32 %v2176_v55, %v1089_v47  ;;  %v1050_v2 = vpop.f32.mrb[81].mxu0  ;;  %v1369_v60 = vpop.f32.mrb[81].mxu1 }
 0x1b6   :  { %v1370_v58 = vadd.f32 %v1369_v60, %v1081_v51  ;;  %v1051_v41 = vpop.f32.mrb[82].mxu0  ;;  %v2177_v21 = vpop.f32.mrb[82].mxu1 }
 0x1b7   :  { %1792 = vst.msk [vmem:[%s3242_s3 + $0x9c] sm:$0xf] %vm1752_vm0, %v2045_v61  ;;  %v1338_v6 = vadd.f32 %v1337_v13, %v1049_v49  ;;  %v1482_v3 = vmax.f32 %v1378_v56, 0.0  ;;  %v1052_v7 = vadd.f32 %v2851_v59, %v1051_v41  ;;  %v1381_v1 = vadd.f32 %v2177_v21, %v1092_v9  ;;  %v1053_v53 = vpop.f32.mrb[83].mxu0  ;;  %v1372_v11 = vpop.f32.mrb[83].mxu1 }
 0x1b8   :  { %v1480_v4 = vmax.f32 %v1370_v58, 0.0  ;;  %v1373_v12 = vadd.f32 %v1372_v11, %v1084_v63  ;;  %v1121_v58 = vadd.f32 %v2851_v59, %v2826_v34  ;;  %v1124_v34 = vadd.f32 %v2851_v59, %v2830_v38 }
 0x1b9   :  { %v1472_v15 = vmax.f32 %v1338_v6, 0.0  ;;  %v2056_v20 = vpack.c.bf16 %v1482_v3, %v1482_v3  ;;  %v1341_v62 = vadd.f32 %v1340_v45, %v1052_v7  ;;  %v1483_v23 = vmax.f32 %v1381_v1, 0.0 }
 0x1ba   :  { %v2054_v33 = vpack.c.bf16 %v1480_v4, %v1480_v4  ;;  %v1481_v24 = vmax.f32 %v1373_v12, 0.0  ;;  %v1113_v6 = vadd.f32 %v2851_v59, %v2818_v26  ;;  %v1116_v12 = vadd.f32 %v2851_v59, %v2822_v30 }
 0x1bb   :  { %v2046_v57 = vpack.c.bf16 %v1472_v15, %v1472_v15  ;;  %1803 = vst.msk [vmem:[%s3242_s3 + $0xc8] sm:$0xf] %vm1752_vm0, %v2056_v20  ;;  %v1473_v13 = vmax.f32 %v1341_v62, 0.0  ;;  %v2057_v25 = vpack.c.bf16 %v1483_v23, %v1483_v23 }
 0x1bc   :  { %1801 = vst.msk [vmem:[%s3242_s3 + $0xc0] sm:$0xf] %vm1752_vm0, %v2054_v33  ;;  %v2055_v45 = vpack.c.bf16 %v1481_v24, %v1481_v24  ;;  %v1056_v37 = vpop.f32.mrb[84].mxu0  ;;  %v2180_v5 = vpop.f32.mrb[84].mxu1 }
 0x1bd   :  { %1793 = vst.msk [vmem:[%s3242_s3 + $0xa0] sm:$0xf] %vm1752_vm0, %v2046_v57  ;;  %v2047_v32 = vpack.c.bf16 %v1473_v13, %v1473_v13  ;;  %1804 = vst.msk [vmem:[%s3242_s3 + $0xcc] sm:$0xf] %vm1752_vm0, %v2057_v25  ;;  %v1057_v10 = vadd.f32 %v2851_v59, %v1056_v37  ;;  %v1394_v35 = vadd.f32 %v2180_v5, %v1105_v31  ;;  %v1058_v36 = vpop.f32.mrb[85].mxu0  ;;  %v1385_v52 = vpop.f32.mrb[85].mxu1 }
 0x1be   :  { %1802 = vst.msk [vmem:[%s3242_s3 + $0xc4] sm:$0xf] %vm1752_vm0, %v2055_v45  ;;  %v1386_v22 = vadd.f32 %v1385_v52, %v1097_v28  ;;  %v1059_v17 = vpop.f32.mrb[86].mxu0  ;;  %v2181_v44 = vpop.f32.mrb[86].mxu1  ;;  %v1129_v36 = vadd.f32 %v2851_v59, %v2834_v42 }
 0x1bf   :  { %1794 = vst.msk [vmem:[%s3242_s3 + $0xa4] sm:$0xf] %vm1752_vm0, %v2047_v32  ;;  %v1346_v47 = vadd.f32 %v3057_v8, %v1057_v10  ;;  %v1486_v29 = vmax.f32 %v1394_v35, 0.0  ;;  %v1060_v48 = vadd.f32 %v2851_v59, %v1059_v17  ;;  %v1397_v51 = vadd.f32 %v2181_v44, %v1108_v18  ;;  %v1061_v14 = vpop.f32.mrb[87].mxu0  ;;  %v1388_v16 = vpop.f32.mrb[87].mxu1 }
 0x1c0   :  { %v1484_v55 = vmax.f32 %v1386_v22, 0.0  ;;  %v1389_v9 = vadd.f32 %v1388_v16, %v1100_v39  ;;  %v1137_v32 = vadd.f32 %v2851_v59, %v2842_v50  ;;  %v1140_v50 = vadd.f32 %v2851_v59, %v2846_v54 }
 0x1c1   :  { %v1474_v61 = vmax.f32 %v1346_v47, 0.0  ;;  %v2060_v49 = vpack.c.bf16 %v1486_v29, %v1486_v29  ;;  %v1349_v56 = vadd.f32 %v3064_v19, %v1060_v48  ;;  %v1487_v2 = vmax.f32 %v1397_v51, 0.0 }
 0x1c2   :  { %v2058_v60 = vpack.c.bf16 %v1484_v55, %v1484_v55  ;;  %v1485_v63 = vmax.f32 %v1389_v9, 0.0  ;;  %v1132_v29 = vadd.f32 %v2851_v59, %v2838_v46 }
 0x1c3   :  { %v2048_v41 = vpack.c.bf16 %v1474_v61, %v1474_v61  ;;  %1807 = vst.msk [vmem:[%s3242_s3 + $0xd8] sm:$0xf] %vm1752_vm0, %v2060_v49  ;;  %v1475_v8 = vmax.f32 %v1349_v56, 0.0  ;;  %v2061_v21 = vpack.c.bf16 %v1487_v2, %v1487_v2 }
 0x1c4   :  { %1805 = vst.msk [vmem:[%s3242_s3 + $0xd0] sm:$0xf] %vm1752_vm0, %v2058_v60  ;;  %v2059_v19 = vpack.c.bf16 %v1485_v63, %v1485_v63  ;;  %v1064_v3 = vpop.f32.mrb[88].mxu0  ;;  %v2184_v7 = vpop.f32.mrb[88].mxu1 }
 0x1c5   :  { %1795 = vst.msk [vmem:[%s3242_s3 + $0xa8] sm:$0xf] %vm1752_vm0, %v2048_v41  ;;  %v2049_v1 = vpack.c.bf16 %v1475_v8, %v1475_v8  ;;  %1808 = vst.msk [vmem:[%s3242_s3 + $0xdc] sm:$0xf] %vm1752_vm0, %v2061_v21  ;;  %v1065_v26 = vadd.f32 %v2851_v59, %v1064_v3  ;;  %v1410_v53 = vadd.f32 %v2184_v7, %v1121_v58  ;;  %v1066_v11 = vpop.f32.mrb[89].mxu0  ;;  %v1401_v4 = vpop.f32.mrb[89].mxu1 }
 0x1c6   :  { %1806 = vst.msk [vmem:[%s3242_s3 + $0xd4] sm:$0xf] %vm1752_vm0, %v2059_v19  ;;  %v1402_v38 = vadd.f32 %v1401_v4, %v1113_v6  ;;  %v1067_v15 = vpop.f32.mrb[90].mxu0  ;;  %v2185_v20 = vpop.f32.mrb[90].mxu1 }
 0x1c7   :  { %1796 = vst.msk [vmem:[%s3242_s3 + $0xac] sm:$0xf] %vm1752_vm0, %v2049_v1  ;;  %v1354_v62 = vadd.f32 %v3078_v0, %v1065_v26  ;;  %v1490_v23 = vmax.f32 %v1410_v53, 0.0  ;;  %v1068_v33 = vadd.f32 %v2851_v59, %v1067_v15  ;;  %v1413_v24 = vadd.f32 %v2185_v20, %v1124_v34  ;;  %v1069_v30 = vpop.f32.mrb[91].mxu0  ;;  %v1404_v31 = vpop.f32.mrb[91].mxu1 }
 0x1c8   :  { %v1488_v57 = vmax.f32 %v1402_v38, 0.0  ;;  %v1405_v13 = vadd.f32 %v1404_v31, %v1116_v12 }
 0x1c9   :  { %v1476_v25 = vmax.f32 %v1354_v62, 0.0  ;;  %v2064_v28 = vpack.c.bf16 %v1490_v23, %v1490_v23  ;;  %v1357_v45 = vadd.f32 %v3087_v43, %v1068_v33  ;;  %v1491_v37 = vmax.f32 %v1413_v24, 0.0 }
 0x1ca   :  { %v2062_v5 = vpack.c.bf16 %v1488_v57, %v1488_v57  ;;  %v1489_v18 = vmax.f32 %v1405_v13, 0.0 }
 0x1cb   :  { %v2050_v10 = vpack.c.bf16 %v1476_v25, %v1476_v25  ;;  %1811 = vst.msk [vmem:[%s3242_s3 + $0xe8] sm:$0xf] %vm1752_vm0, %v2064_v28  ;;  %v1477_v0 = vmax.f32 %v1357_v45, 0.0  ;;  %v2065_v35 = vpack.c.bf16 %v1491_v37, %v1491_v37 }
 0x1cc   :  { %1809 = vst.msk [vmem:[%s3242_s3 + $0xe0] sm:$0xf] %vm1752_vm0, %v2062_v5  ;;  %v2063_v43 = vpack.c.bf16 %v1489_v18, %v1489_v18  ;;  %v1072_v52 = vpop.f32.mrb[92].mxu0  ;;  %v2188_v39 = vpop.f32.mrb[92].mxu1 }
 0x1cd   :  { %1797 = vst.msk [vmem:[%s3242_s3 + $0xb0] sm:$0xf] %vm1752_vm0, %v2050_v10  ;;  %v2051_v22 = vpack.c.bf16 %v1477_v0, %v1477_v0  ;;  %1812 = vst.msk [vmem:[%s3242_s3 + $0xec] sm:$0xf] %vm1752_vm0, %v2065_v35  ;;  %v1073_v42 = vadd.f32 %v2851_v59, %v1072_v52  ;;  %v1426_v17 = vadd.f32 %v2188_v39, %v1137_v32  ;;  %v1074_v44 = vpop.f32.mrb[93].mxu0  ;;  %v1417_v47 = vpop.f32.mrb[93].mxu1 }
 0x1ce   :  { %1810 = vst.msk [vmem:[%s3242_s3 + $0xe4] sm:$0xf] %vm1752_vm0, %v2063_v43  ;;  %v1418_v54 = vadd.f32 %v1417_v47, %v1129_v36  ;;  %v1075_v48 = vpop.f32.mrb[94].mxu0  ;;  %v2189_v51 = vpop.f32.mrb[94].mxu1 }
 0x1cf   :  { %1798 = vst.msk [vmem:[%s3242_s3 + $0xb4] sm:$0xf] %vm1752_vm0, %v2051_v22  ;;  %v1362_v14 = vadd.f32 %v3071_v40, %v1073_v42  ;;  %v1494_v16 = vmax.f32 %v1426_v17, 0.0  ;;  %v1076_v55 = vadd.f32 %v2851_v59, %v1075_v48  ;;  %v1429_v9 = vadd.f32 %v2189_v51, %v1140_v50  ;;  %v1077_v46 = vpop.f32.mrb[95].mxu0  ;;  %v1420_v61 = vpop.f32.mrb[95].mxu1 }
 0x1d0   :  { %v1492_v49 = vmax.f32 %v1418_v54, 0.0  ;;  %v1421_v56 = vadd.f32 %v1420_v61, %v1132_v29 }
 0x1d1   :  { %v1478_v2 = vmax.f32 %v1362_v14, 0.0  ;;  %v2068_v60 = vpack.c.bf16 %v1494_v16, %v1494_v16  ;;  %v1365_v63 = vadd.f32 %v3080_v27, %v1076_v55  ;;  %v1495_v58 = vmax.f32 %v1429_v9, 0.0 }
 0x1d2   :  { %v2066_v41 = vpack.c.bf16 %v1492_v49, %v1492_v49  ;;  %v1493_v8 = vmax.f32 %v1421_v56, 0.0 }
 0x1d3   :  { %v2052_v21 = vpack.c.bf16 %v1478_v2, %v1478_v2  ;;  %1815 = vst.msk [vmem:[%s3242_s3 + $0xf8] sm:$0xf] %vm1752_vm0, %v2068_v60  ;;  %v1479_v40 = vmax.f32 %v1365_v63, 0.0  ;;  %v2069_v59 = vpack.c.bf16 %v1495_v58, %v1495_v58 }
 0x1d4   :  { %1813 = vst.msk [vmem:[%s3242_s3 + $0xf0] sm:$0xf] %vm1752_vm0, %v2066_v41  ;;  %v2067_v6 = vpack.c.bf16 %v1493_v8, %v1493_v8 }
 0x1d5   :  { %1799 = vst.msk [vmem:[%s3242_s3 + $0xb8] sm:$0xf] %vm1752_vm0, %v2052_v21  ;;  %v2053_v27 = vpack.c.bf16 %v1479_v40, %v1479_v40  ;;  %1816 = vst.msk [vmem:[%s3242_s3 + $0xfc] sm:$0xf] %vm1752_vm0, %v2069_v59 }
 0x1d6   :  { %1814 = vst.msk [vmem:[%s3242_s3 + $0xf4] sm:$0xf] %vm1752_vm0, %v2067_v6 }
 0x1d7   :  { %1800 = vst.msk [vmem:[%s3242_s3 + $0xbc] sm:$0xf] %vm1752_vm0, %v2053_v27 }

// kernel: forward.13
= control target key start
LH: loop header
LB: loop body
LE: loop exit
PB: predicated region body
PF: predicated region fallthrough
CT: control target
= control target key end

     0   :  { %s158_s0 = inlined_call_operand.vmem [shape: bf16[8,2,4,256], index: 0, kind: input, shape index: {}]   ;;  %s159_s1 = inlined_call_operand.vmem [shape: bf16[8,4,128], index: 1, kind: output, shape index: {}]  }
   0x1   :  { %v8_v0 = vld [vmem:[%s158_s0] sm:$0xf]  ;;  %v9_v1 = vld [vmem:[%s158_s0 + $0x4] sm:$0xf]  ;;  %v10_v2 = vld [vmem:[%s158_s0 + $0x8] sm:$0xf] }
   0x2   :  { %v24_v3 = vmax.bf16 %v9_v1, %v8_v0  ;;  %v11_v4 = vld [vmem:[%s158_s0 + $0xc] sm:$0xf]  ;;  %v12_v5 = vld [vmem:[%s158_s0 + $0x10] sm:$0xf]  ;;  %v13_v6 = vld [vmem:[%s158_s0 + $0x14] sm:$0xf] }
   0x3   :  { %v25_v7 = vmax.bf16 %v11_v4, %v10_v2  ;;  %v26_v8 = vmax.bf16 %v13_v6, %v12_v5  ;;  %v14_v9 = vld [vmem:[%s158_s0 + $0x18] sm:$0xf]  ;;  %v15_v10 = vld [vmem:[%s158_s0 + $0x1c] sm:$0xf]  ;;  %v16_v11 = vld [vmem:[%s158_s0 + $0x20] sm:$0xf] }
   0x4   :  { %v40_v12 = vrot.slane %v24_v3, 2  ;;  %v27_v13 = vmax.bf16 %v15_v10, %v14_v9  ;;  %v17_v14 = vld [vmem:[%s158_s0 + $0x24] sm:$0xf]  ;;  %v18_v15 = vld [vmem:[%s158_s0 + $0x28] sm:$0xf] }
   0x5   :  { %v41_v16 = vrot.slane %v25_v7, 2  ;;  %v42_v17 = vrot.slane %v26_v8, 2  ;;  %v28_v18 = vmax.bf16 %v17_v14, %v16_v11  ;;  %v19_v19 = vld [vmem:[%s158_s0 + $0x2c] sm:$0xf]  ;;  %v20_v20 = vld [vmem:[%s158_s0 + $0x30] sm:$0xf] }
   0x6   :  { %v56_v21 = vmax.bf16 %v40_v12, %v24_v3  ;;  %v43_v22 = vrot.slane %v27_v13, 2  ;;  %v29_v23 = vmax.bf16 %v19_v19, %v18_v15  ;;  %v21_v24 = vld [vmem:[%s158_s0 + $0x34] sm:$0xf]  ;;  %v22_v25 = vld [vmem:[%s158_s0 + $0x38] sm:$0xf] }
   0x7   :  { %v57_v26 = vmax.bf16 %v41_v16, %v25_v7  ;;  %v58_v27 = vmax.bf16 %v42_v17, %v26_v8  ;;  %v44_v28 = vrot.slane %v28_v18, 2  ;;  %v30_v29 = vmax.bf16 %v21_v24, %v20_v20  ;;  %v23_v30 = vld [vmem:[%s158_s0 + $0x3c] sm:$0xf] }
   0x8   :  { %64 = vst [vmem:[%s159_s1] sm:$0x3] %v56_v21  ;;  %v59_v31 = vmax.bf16 %v43_v22, %v27_v13  ;;  %v45_v32 = vrot.slane %v29_v23, 2  ;;  %v31_v33 = vmax.bf16 %v23_v30, %v22_v25 }
   0x9   :  { %65 = vst [vmem:[%s159_s1 + $0x2] sm:$0x3] %v57_v26  ;;  %66 = vst [vmem:[%s159_s1 + $0x4] sm:$0x3] %v58_v27  ;;  %v60_v34 = vmax.bf16 %v44_v28, %v28_v18  ;;  %v46_v35 = vrot.slane %v30_v29, 2 }
   0xa   :  { %67 = vst [vmem:[%s159_s1 + $0x6] sm:$0x3] %v59_v31  ;;  %v61_v36 = vmax.bf16 %v45_v32, %v29_v23  ;;  %v47_v37 = vrot.slane %v31_v33, 2 }
   0xb   :  { %68 = vst [vmem:[%s159_s1 + $0x8] sm:$0x3] %v60_v34  ;;  %v62_v38 = vmax.bf16 %v46_v35, %v30_v29 }
   0xc   :  { %69 = vst [vmem:[%s159_s1 + $0xa] sm:$0x3] %v61_v36  ;;  %v63_v39 = vmax.bf16 %v47_v37, %v31_v33 }
   0xd   :  { %70 = vst [vmem:[%s159_s1 + $0xc] sm:$0x3] %v62_v38 }
   0xe   :  { %71 = vst [vmem:[%s159_s1 + $0xe] sm:$0x3] %v63_v39 }

// kernel: forward.12
= control target key start
LH: loop header
LB: loop body
LE: loop exit
PB: predicated region body
PF: predicated region fallthrough
CT: control target
= control target key end

     0   :  { %s1847_s1 = inlined_call_operand.vmem [shape: bf16[640,128], index: 1, kind: input, shape index: {}]   ;;  %s1848_s0 = inlined_call_operand.vmem [shape: bf16[128,640], index: 0, kind: input, shape index: {}]   ;;  %s1849_s2 = inlined_call_operand.vmem [shape: f32[1,128], index: 2, kind: input, shape index: {}]   ;;  %s1850_s3 = inlined_call_operand.vmem [shape: f32[1,128], index: 3, kind: input, shape index: {}]   ;;  %s1851_s4 = inlined_call_operand.vmem [shape: bf16[128,128], index: 4, kind: output, shape index: {}]  }
   0x1   :  { %v1384_v0 = vld [vmem:[%s1847_s1 + $0x40] sm:$0xff]   ;;  %v1388_v4 = vld [vmem:[%s1847_s1 + $0x48] sm:$0xff]   ;;  %v1392_v8 = vld [vmem:[%s1847_s1 + $0x50] sm:$0xff]  }
   0x2   :  { %v1385_v1 = vld [vmem:[%s1847_s1 + $0xc0] sm:$0xff]   ;;  %1192 = vmatprep.subr.bf16.mxu0 %v1384_v0  ;;  %v1389_v5 = vld [vmem:[%s1847_s1 + $0xc8] sm:$0xff]   ;;  %v1393_v9 = vld [vmem:[%s1847_s1 + $0xd0] sm:$0xff]  }
   0x3   :  { %v1386_v2 = vld [vmem:[%s1847_s1] sm:$0xff]   ;;  %1256 = vmatprep.subr.bf16.mxu1 %v1385_v1  ;;  %v1390_v6 = vld [vmem:[%s1847_s1 + $0x8] sm:$0xff]   ;;  %v1394_v10 = vld [vmem:[%s1847_s1 + $0x10] sm:$0xff]  }
   0x4   :  { %v1387_v3 = vld [vmem:[%s1847_s1 + $0x80] sm:$0xff]   ;;  %1193 = vmatpush3.bf16.msra.mxu0 %v1386_v2  ;;  %v1391_v7 = vld [vmem:[%s1847_s1 + $0x88] sm:$0xff]   ;;  %v1395_v11 = vld [vmem:[%s1847_s1 + $0x90] sm:$0xff]  }
   0x5   :  { %1257 = vmatpush3.bf16.msra.mxu1 %v1387_v3  ;;  %1194 = vmatprep.subr.bf16.mxu0 %v1388_v4  ;;  %v1396_v12 = vld [vmem:[%s1847_s1 + $0x58] sm:$0xff]   ;;  %v1400_v16 = vld [vmem:[%s1847_s1 + $0x60] sm:$0xff]   ;;  %v1404_v20 = vld [vmem:[%s1847_s1 + $0x68] sm:$0xff]  }
   0x6   :  { %1258 = vmatprep.subr.bf16.mxu1 %v1389_v5  ;;  %v1397_v13 = vld [vmem:[%s1847_s1 + $0xd8] sm:$0xff]   ;;  %v1401_v17 = vld [vmem:[%s1847_s1 + $0xe0] sm:$0xff]   ;;  %v1405_v21 = vld [vmem:[%s1847_s1 + $0xe8] sm:$0xff]  }
   0x7   :  { %v1398_v14 = vld [vmem:[%s1847_s1 + $0x18] sm:$0xff]   ;;  %v1402_v18 = vld [vmem:[%s1847_s1 + $0x20] sm:$0xff]   ;;  %v1406_v22 = vld [vmem:[%s1847_s1 + $0x28] sm:$0xff]  }
   0x8   :  { %1195 = vmatpush3.bf16.msra.mxu0 %v1390_v6  ;;  %v1399_v15 = vld [vmem:[%s1847_s1 + $0x98] sm:$0xff]   ;;  %v1403_v19 = vld [vmem:[%s1847_s1 + $0xa0] sm:$0xff]   ;;  %v1407_v23 = vld [vmem:[%s1847_s1 + $0xa8] sm:$0xff]  }
   0x9   :  { %1259 = vmatpush3.bf16.msra.mxu1 %v1391_v7  ;;  %1196 = vmatprep.subr.bf16.mxu0 %v1392_v8  ;;  %v1408_v24 = vld [vmem:[%s1847_s1 + $0x70] sm:$0xff]   ;;  %v1412_v28 = vld [vmem:[%s1847_s1 + $0x78] sm:$0xff]   ;;  %v1421_v35 = vld [vmem:[%s1848_s0 + $0xc] ss:$20 sps:$4 sm:$0xff]  }
   0xa   :  { %1260 = vmatprep.subr.bf16.mxu1 %v1393_v9  ;;  %v1409_v25 = vld [vmem:[%s1847_s1 + $0xf0] sm:$0xff]   ;;  %v1413_v29 = vld [vmem:[%s1847_s1 + $0xf8] sm:$0xff]   ;;  %v1422_v36 = vld [vmem:[%s1847_s1 + $0x100] sm:$0xff]   ;;  %723 = vmatprep.mubr.bf16.mxu1 %v1421_v35 }
   0xb   :  { %v1410_v26 = vld [vmem:[%s1847_s1 + $0x30] sm:$0xff]   ;;  %v1414_v30 = vld [vmem:[%s1847_s1 + $0x38] sm:$0xff]   ;;  %v1423_v37 = vld [vmem:[%s1848_s0 + $0x2c] ss:$20 sps:$4 sm:$0xff]  }
   0xc   :  { %1197 = vmatpush3.bf16.msra.mxu0 %v1394_v10  ;;  %v1411_v27 = vld [vmem:[%s1847_s1 + $0xb0] sm:$0xff]   ;;  %v1415_v31 = vld [vmem:[%s1847_s1 + $0xb8] sm:$0xff]   ;;  %v1429_v39 = vld [vmem:[%s1847_s1 + $0x108] sm:$0xff]  }
   0xd   :  { %1261 = vmatpush3.bf16.msra.mxu1 %v1395_v11  ;;  %1198 = vmatprep.subr.bf16.mxu0 %v1396_v12  ;;  %v1416_v32 = vld [vmem:[%s1848_s0] ss:$20 sps:$4 sm:$0xff]   ;;  %v1418_v33 = vld [vmem:[%s1848_s0 + $0x4] ss:$20 sps:$4 sm:$0xff]   ;;  %v1419_v34 = vld [vmem:[%s1848_s0 + $0x8] ss:$20 sps:$4 sm:$0xff]  }
   0xe   :  { %1262 = vmatprep.subr.bf16.mxu1 %v1397_v13  ;;  %626 = vmatprep.mubr.bf16.mxu0 %v1418_v33  ;;  %v1425_v38 = vld [vmem:[%s1848_s0 + $0x34] ss:$20 sps:$4 sm:$0xff]   ;;  %v1428_v41 = vld [vmem:[%s1848_s0 + $0x30] ss:$20 sps:$4 sm:$0xff]   ;;  %v1443_v45 = vld [vmem:[%s1847_s1 + $0x118] sm:$0xff]  }
   0xf   :  { %v1427_v40 = vld [vmem:[%s1848_s0 + $0x28] ss:$20 sps:$4 sm:$0xff]   ;;  %v1436_v44 = vld [vmem:[%s1847_s1 + $0x110] sm:$0xff]   ;;  %v1435_v47 = vld [vmem:[%s1848_s0 + $0x58] ss:$20 sps:$4 sm:$0xff]  }
  0x10   :  { %1199 = vmatpush3.bf16.msra.mxu0 %v1398_v14  ;;  %v1430_v42 = vld [vmem:[%s1848_s0 + $0x54] ss:$20 sps:$4 sm:$0xff]   ;;  %v1432_v43 = vld [vmem:[%s1848_s0 + $0x5c] ss:$20 sps:$4 sm:$0xff]   ;;  %v1439_v49 = vld [vmem:[%s1848_s0 + $0x84] ss:$20 sps:$4 sm:$0xff]  }
  0x11   :  { %1263 = vmatpush3.bf16.msra.mxu1 %v1399_v15  ;;  %1200 = vmatprep.subr.bf16.mxu0 %v1400_v16  ;;  %v1434_v46 = vld [vmem:[%s1848_s0 + $0x50] ss:$20 sps:$4 sm:$0xff]   ;;  %v1457_v51 = vld [vmem:[%s1847_s1 + $0x128] sm:$0xff]   ;;  %v1442_v53 = vld [vmem:[%s1848_s0 + $0x80] ss:$20 sps:$4 sm:$0xff]  }
  0x12   :  { %1264 = vmatprep.subr.bf16.mxu1 %v1401_v17  ;;  %v1437_v48 = vld [vmem:[%s1848_s0 + $0x7c] ss:$20 sps:$4 sm:$0xff]   ;;  %v1450_v50 = vld [vmem:[%s1847_s1 + $0x120] sm:$0xff]   ;;  %v1441_v52 = vld [vmem:[%s1848_s0 + $0x78] ss:$20 sps:$4 sm:$0xff]  }
  0x13   :  { %v1444_v54 = vld [vmem:[%s1848_s0 + $0xa4] ss:$20 sps:$4 sm:$0xff]   ;;  %v1464_v55 = vld [vmem:[%s1847_s1 + $0x130] sm:$0xff]   ;;  %v1446_v56 = vld [vmem:[%s1848_s0 + $0xac] ss:$20 sps:$4 sm:$0xff]  }
  0x14   :  { %1201 = vmatpush3.bf16.msra.mxu0 %v1402_v18  ;;  %v1471_v57 = vld [vmem:[%s1847_s1 + $0x138] sm:$0xff]   ;;  %v1448_v58 = vld [vmem:[%s1848_s0 + $0xa0] ss:$20 sps:$4 sm:$0xff]   ;;  %v1456_v63 = vld [vmem:[%s1848_s0 + $0xd0] ss:$20 sps:$4 sm:$0xff]  }
  0x15   :  { %1265 = vmatpush3.bf16.msra.mxu1 %v1403_v19  ;;  %1202 = vmatprep.subr.bf16.mxu0 %v1404_v20  ;;  %v1449_v59 = vld [vmem:[%s1848_s0 + $0xa8] ss:$20 sps:$4 sm:$0xff]   ;;  %v1451_v60 = vld [vmem:[%s1848_s0 + $0xcc] ss:$20 sps:$4 sm:$0xff]   ;;  %v1462_v2 = vld [vmem:[%s1848_s0 + $0xf0] ss:$20 sps:$4 sm:$0xff]  }
  0x16   :  { %1266 = vmatprep.subr.bf16.mxu1 %v1405_v21  ;;  %v1453_v61 = vld [vmem:[%s1848_s0 + $0xd4] ss:$20 sps:$4 sm:$0xff]   ;;  %v1460_v1 = vld [vmem:[%s1848_s0 + $0xfc] ss:$20 sps:$4 sm:$0xff]   ;;  %v1463_v3 = vld [vmem:[%s1848_s0 + $0xf8] ss:$20 sps:$4 sm:$0xff]  }
  0x17   :  { %v1455_v62 = vld [vmem:[%s1848_s0 + $0xc8] ss:$20 sps:$4 sm:$0xff]   ;;  %v1467_v5 = vld [vmem:[%s1848_s0 + $0x124] ss:$20 sps:$4 sm:$0xff]   ;;  %v1470_v7 = vld [vmem:[%s1848_s0 + $0x120] ss:$20 sps:$4 sm:$0xff]  }
  0x18   :  { %1203 = vmatpush3.bf16.msra.mxu0 %v1406_v22  ;;  %v1458_v0 = vld [vmem:[%s1848_s0 + $0xf4] ss:$20 sps:$4 sm:$0xff]   ;;  %v1465_v4 = vld [vmem:[%s1848_s0 + $0x11c] ss:$20 sps:$4 sm:$0xff]   ;;  %v1469_v6 = vld [vmem:[%s1848_s0 + $0x118] ss:$20 sps:$4 sm:$0xff]  }
  0x19   :  { %1267 = vmatpush3.bf16.msra.mxu1 %v1407_v23  ;;  %1204 = vmatprep.subr.bf16.mxu0 %v1408_v24  ;;  %v1472_v8 = vld [vmem:[%s1848_s0 + $0x10] ss:$20 sps:$4 sm:$0xff]   ;;  %v1474_v10 = vld [vmem:[%s1848_s0 + $0x38] ss:$20 sps:$4 sm:$0xff]   ;;  %v1476_v12 = vld [vmem:[%s1848_s0 + $0x60] ss:$20 sps:$4 sm:$0xff]  }
  0x1a   :  { %1268 = vmatprep.subr.bf16.mxu1 %v1409_v25  ;;  %v1473_v9 = vld [vmem:[%s1848_s0 + $0xb0] ss:$20 sps:$4 sm:$0xff]   ;;  %v1475_v11 = vld [vmem:[%s1848_s0 + $0xd8] ss:$20 sps:$4 sm:$0xff]   ;;  %v1477_v13 = vld [vmem:[%s1848_s0 + $0x100] ss:$20 sps:$4 sm:$0xff]  }
  0x1b   :  { %v1478_v14 = vld [vmem:[%s1848_s0 + $0x88] ss:$20 sps:$4 sm:$0xff]  }
  0x1c   :  { %1205 = vmatpush3.bf16.msra.mxu0 %v1410_v26  ;;  %v1479_v15 = vld [vmem:[%s1848_s0 + $0x128] ss:$20 sps:$4 sm:$0xff]  }
  0x1d   :  { %1269 = vmatpush3.bf16.msra.mxu1 %v1411_v27  ;;  %1206 = vmatprep.subr.bf16.mxu0 %v1412_v28 }
  0x1e   :  { %1270 = vmatprep.subr.bf16.mxu1 %v1413_v29 }
  0x20   :  { %1207 = vmatpush3.bf16.msra.mxu0 %v1414_v30 }
  0x21   :  { %1271 = vmatpush3.bf16.msra.mxu1 %v1415_v31  ;;  %1336 = vmatprep.subr.bf16.mxu0 %v1422_v36 }
  0x22   :  { %1368 = vmatprep.subr.bf16.mxu1 %v1422_v36 }
  0x23   :  { %627 = vmatmul.mubr.bf16.vlgmr.msra.gmra.mrb[0].mxu0 %v1416_v32 }
  0x24   :  { %724 = vmatmul.mubr.bf16.vlgmr.msra.gmra.mrb[0].mxu1 %v1419_v34  ;;  %1337 = vmatpush3.bf16.msra.mxu0 %v1422_v36 }
  0x25   :  { %1376 = vmatpush3.bf16.msra.mxu1 %v1422_v36  ;;  %634 = vmatprep.mubr.bf16.mxu0 %v1423_v37 }
  0x26   :  { %731 = vmatprep.mubr.bf16.mxu1 %v1425_v38  ;;  %1338 = vmatprep.subr.bf16.mxu0 %v1429_v39 }
  0x27   :  { %1369 = vmatprep.subr.bf16.mxu1 %v1429_v39 }
  0x28   :  { %1339 = vmatpush3.bf16.msra.mxu0 %v1429_v39 }
  0x29   :  { %1377 = vmatpush3.bf16.msra.mxu1 %v1429_v39  ;;  %1340 = vmatprep.subr.bf16.mxu0 %v1436_v44 }
  0x2a   :  { %1370 = vmatprep.subr.bf16.mxu1 %v1436_v44 }
  0x2b   :  { %635 = vmatmul.mubr.bf16.gmra.mrb[4].mxu0 %v1427_v40 }
  0x2c   :  { %732 = vmatmul.mubr.bf16.gmra.mrb[4].mxu1 %v1428_v41  ;;  %642 = vmatprep.mubr.bf16.mxu0 %v1430_v42 }
  0x2d   :  { %739 = vmatprep.mubr.bf16.mxu1 %v1432_v43  ;;  %1341 = vmatpush3.bf16.msra.mxu0 %v1436_v44 }
  0x2e   :  { %1378 = vmatpush3.bf16.msra.mxu1 %v1436_v44  ;;  %1342 = vmatprep.subr.bf16.mxu0 %v1443_v45 }
  0x2f   :  { %1371 = vmatprep.subr.bf16.mxu1 %v1443_v45 }
  0x31   :  { %1343 = vmatpush3.bf16.msra.mxu0 %v1443_v45 }
  0x32   :  { %1379 = vmatpush3.bf16.msra.mxu1 %v1443_v45  ;;  %1344 = vmatprep.subr.bf16.mxu0 %v1450_v50 }
  0x33   :  { %643 = vmatmul.mubr.bf16.gmra.mrb[8].mxu0 %v1434_v46  ;;  %1372 = vmatprep.subr.bf16.mxu1 %v1450_v50 }
  0x34   :  { %740 = vmatmul.mubr.bf16.gmra.mrb[8].mxu1 %v1435_v47  ;;  %650 = vmatprep.mubr.bf16.mxu0 %v1437_v48 }
  0x35   :  { %747 = vmatprep.mubr.bf16.mxu1 %v1439_v49  ;;  %1345 = vmatpush3.bf16.msra.mxu0 %v1450_v50 }
  0x36   :  { %1380 = vmatpush3.bf16.msra.mxu1 %v1450_v50  ;;  %1346 = vmatprep.subr.bf16.mxu0 %v1457_v51 }
  0x37   :  { %1373 = vmatprep.subr.bf16.mxu1 %v1457_v51 }
  0x39   :  { %1347 = vmatpush3.bf16.msra.mxu0 %v1457_v51 }
  0x3a   :  { %1381 = vmatpush3.bf16.msra.mxu1 %v1457_v51  ;;  %1348 = vmatprep.subr.bf16.mxu0 %v1464_v55 }
  0x3b   :  { %651 = vmatmul.mubr.bf16.gmra.mrb[12].mxu0 %v1441_v52  ;;  %1374 = vmatprep.subr.bf16.mxu1 %v1464_v55 }
  0x3c   :  { %748 = vmatmul.mubr.bf16.gmra.mrb[12].mxu1 %v1442_v53  ;;  %658 = vmatprep.mubr.bf16.mxu0 %v1444_v54 }
  0x3d   :  { %755 = vmatprep.mubr.bf16.mxu1 %v1446_v56  ;;  %1349 = vmatpush3.bf16.msra.mxu0 %v1464_v55 }
  0x3e   :  { %1382 = vmatpush3.bf16.msra.mxu1 %v1464_v55  ;;  %1350 = vmatprep.subr.bf16.mxu0 %v1471_v57 }
  0x3f   :  { %1375 = vmatprep.subr.bf16.mxu1 %v1471_v57 }
  0x41   :  { %1351 = vmatpush3.bf16.msra.mxu0 %v1471_v57 }
  0x42   :  { %1383 = vmatpush3.bf16.msra.mxu1 %v1471_v57 }
  0x43   :  { %659 = vmatmul.mubr.bf16.gmra.mrb[16].mxu0 %v1448_v58 }
  0x44   :  { %756 = vmatmul.mubr.bf16.gmra.mrb[16].mxu1 %v1449_v59  ;;  %666 = vmatprep.mubr.bf16.mxu0 %v1451_v60 }
  0x45   :  { %763 = vmatprep.mubr.bf16.mxu1 %v1453_v61 }
  0x4b   :  { %667 = vmatmul.mubr.bf16.gmra.mrb[20].mxu0 %v1455_v62 }
  0x4c   :  { %764 = vmatmul.mubr.bf16.gmra.mrb[20].mxu1 %v1456_v63  ;;  %674 = vmatprep.mubr.bf16.mxu0 %v1458_v0 }
  0x4d   :  { %771 = vmatprep.mubr.bf16.mxu1 %v1460_v1 }
  0x53   :  { %675 = vmatmul.mubr.bf16.gmra.mrb[24].mxu0 %v1462_v2 }
  0x54   :  { %772 = vmatmul.mubr.bf16.gmra.mrb[24].mxu1 %v1463_v3  ;;  %682 = vmatprep.mubr.bf16.mxu0 %v1465_v4 }
  0x55   :  { %779 = vmatprep.mubr.bf16.mxu1 %v1467_v5 }
  0x5b   :  { %683 = vmatmul.mubr.bf16.gmra.mrb[28].mxu0 %v1469_v6 }
  0x5c   :  { %780 = vmatmul.mubr.bf16.gmra.mrb[28].mxu1 %v1470_v7  ;;  %1352 = vmatprep.mubr.bf16.mxu0 %v1472_v8 }
  0x5d   :  { %1360 = vmatprep.mubr.bf16.mxu1 %v1473_v9 }
  0x63   :  { %1353 = vmatmul.mubr.bf16.vlgmr.msra.gmra.mrb[32].mxu0 %v1474_v10 }
  0x64   :  { %1361 = vmatmul.mubr.bf16.vlgmr.msra.gmra.mrb[32].mxu1 %v1475_v11  ;;  %1356 = vmatprep.mubr.bf16.mxu0 %v1476_v12 }
  0x65   :  { %1364 = vmatprep.mubr.bf16.mxu1 %v1477_v13 }
  0x6b   :  { %1357 = vmatmul.mubr.bf16.gmra.mrb[36].mxu0 %v1478_v14 }
  0x6c   :  { %1365 = vmatmul.mubr.bf16.gmra.mrb[36].mxu1 %v1479_v15 }
  0xf6   :  { %v1208_v16 = vpop.f32.mrb[0].mxu0 }
  0xf7   :  { %v1272_v17 = vpop.f32.mrb[0].mxu1  ;;  %v1209_v18 = vpop.f32.mrb[1].mxu0 }
  0xf8   :  { %v1210_v19 = vadd.f32 %v1209_v18, %v1208_v16  ;;  %v1273_v20 = vpop.f32.mrb[1].mxu1  ;;  %v1211_v21 = vpop.f32.mrb[2].mxu0 }
  0xf9   :  { %v1274_v22 = vadd.f32 %v1273_v20, %v1272_v17  ;;  %v1275_v23 = vpop.f32.mrb[2].mxu1  ;;  %v1212_v24 = vpop.f32.mrb[3].mxu0 }
  0xfa   :  { %v1213_v25 = vadd.f32 %v1212_v24, %v1211_v21  ;;  %v1276_v26 = vpop.f32.mrb[3].mxu1 }
  0xfb   :  { %v1277_v27 = vadd.f32 %v1276_v26, %v1275_v23  ;;  %v1745_v28 = vadd.f32 %v1274_v22, %v1210_v19 }
  0xfd   :  { %v1747_v29 = vadd.f32 %v1277_v27, %v1213_v25 }
  0xfe   :  { %v1214_v30 = vpop.f32.mrb[4].mxu0 }
  0xff   :  { %v1278_v31 = vpop.f32.mrb[4].mxu1  ;;  %v1215_v32 = vpop.f32.mrb[5].mxu0 }
 0x100   :  { %v1216_v33 = vadd.f32 %v1215_v32, %v1214_v30  ;;  %v1279_v34 = vpop.f32.mrb[5].mxu1  ;;  %v1217_v35 = vpop.f32.mrb[6].mxu0 }
 0x101   :  { %v1280_v36 = vadd.f32 %v1279_v34, %v1278_v31  ;;  %v1281_v37 = vpop.f32.mrb[6].mxu1  ;;  %v1218_v38 = vpop.f32.mrb[7].mxu0 }
 0x102   :  { %v1219_v39 = vadd.f32 %v1218_v38, %v1217_v35  ;;  %v1282_v40 = vpop.f32.mrb[7].mxu1 }
 0x103   :  { %v1283_v41 = vadd.f32 %v1282_v40, %v1281_v37  ;;  %v1749_v42 = vadd.f32 %v1280_v36, %v1216_v33 }
 0x105   :  { %v1751_v43 = vadd.f32 %v1283_v41, %v1219_v39 }
 0x106   :  { %v1220_v44 = vpop.f32.mrb[8].mxu0 }
 0x107   :  { %v1284_v45 = vpop.f32.mrb[8].mxu1  ;;  %v1221_v46 = vpop.f32.mrb[9].mxu0 }
 0x108   :  { %v1222_v47 = vadd.f32 %v1221_v46, %v1220_v44  ;;  %v1285_v48 = vpop.f32.mrb[9].mxu1  ;;  %v1223_v49 = vpop.f32.mrb[10].mxu0 }
 0x109   :  { %v1286_v50 = vadd.f32 %v1285_v48, %v1284_v45  ;;  %v1287_v51 = vpop.f32.mrb[10].mxu1  ;;  %v1224_v52 = vpop.f32.mrb[11].mxu0 }
 0x10a   :  { %v1225_v53 = vadd.f32 %v1224_v52, %v1223_v49  ;;  %v1288_v54 = vpop.f32.mrb[11].mxu1 }
 0x10b   :  { %v1289_v55 = vadd.f32 %v1288_v54, %v1287_v51  ;;  %v1753_v56 = vadd.f32 %v1286_v50, %v1222_v47 }
 0x10d   :  { %v1755_v57 = vadd.f32 %v1289_v55, %v1225_v53 }
 0x10e   :  { %v1226_v58 = vpop.f32.mrb[12].mxu0 }
 0x10f   :  { %v1290_v59 = vpop.f32.mrb[12].mxu1  ;;  %v1227_v60 = vpop.f32.mrb[13].mxu0 }
 0x110   :  { %v1228_v61 = vadd.f32 %v1227_v60, %v1226_v58  ;;  %v1291_v62 = vpop.f32.mrb[13].mxu1  ;;  %v1229_v63 = vpop.f32.mrb[14].mxu0 }
 0x111   :  { %v1292_v0 = vadd.f32 %v1291_v62, %v1290_v59  ;;  %v1293_v1 = vpop.f32.mrb[14].mxu1  ;;  %v1230_v2 = vpop.f32.mrb[15].mxu0 }
 0x112   :  { %v1231_v3 = vadd.f32 %v1230_v2, %v1229_v63  ;;  %v1294_v4 = vpop.f32.mrb[15].mxu1 }
 0x113   :  { %v1295_v5 = vadd.f32 %v1294_v4, %v1293_v1  ;;  %v1757_v6 = vadd.f32 %v1292_v0, %v1228_v61 }
 0x115   :  { %v1759_v7 = vadd.f32 %v1295_v5, %v1231_v3 }
 0x116   :  { %v1232_v8 = vpop.f32.mrb[16].mxu0 }
 0x117   :  { %v1296_v9 = vpop.f32.mrb[16].mxu1  ;;  %v1233_v10 = vpop.f32.mrb[17].mxu0 }
 0x118   :  { %v1234_v11 = vadd.f32 %v1233_v10, %v1232_v8  ;;  %v1297_v12 = vpop.f32.mrb[17].mxu1  ;;  %v1235_v13 = vpop.f32.mrb[18].mxu0 }
 0x119   :  { %v1298_v14 = vadd.f32 %v1297_v12, %v1296_v9  ;;  %v1299_v15 = vpop.f32.mrb[18].mxu1  ;;  %v1236_v16 = vpop.f32.mrb[19].mxu0  ;;  %v1772_v9 = vld [vmem:[%s1849_s2] ss:$0 sm:$0xff] }
 0x11a   :  { %v1237_v17 = vadd.f32 %v1236_v16, %v1235_v13  ;;  %v1300_v18 = vpop.f32.mrb[19].mxu1  ;;  %v1778_v13 = vld [vmem:[%s1850_s3] ss:$0 sm:$0xff] }
 0x11b   :  { %v1301_v19 = vadd.f32 %v1300_v18, %v1299_v15  ;;  %v758_v20 = vadd.f32 %v1298_v14, %v1234_v11 }
 0x11d   :  { %v1761_v21 = vadd.f32 %v1301_v19, %v1237_v17 }
 0x11e   :  { %v1238_v22 = vpop.f32.mrb[20].mxu0 }
 0x11f   :  { %v1302_v23 = vpop.f32.mrb[20].mxu1  ;;  %v1239_v24 = vpop.f32.mrb[21].mxu0 }
 0x120   :  { %v1240_v25 = vadd.f32 %v1239_v24, %v1238_v22  ;;  %v1303_v26 = vpop.f32.mrb[21].mxu1  ;;  %v1241_v27 = vpop.f32.mrb[22].mxu0 }
 0x121   :  { %v1304_v30 = vadd.f32 %v1303_v26, %v1302_v23  ;;  %v1305_v31 = vpop.f32.mrb[22].mxu1  ;;  %v1242_v32 = vpop.f32.mrb[23].mxu0 }
 0x122   :  { %v1243_v33 = vadd.f32 %v1242_v32, %v1241_v27  ;;  %v1306_v34 = vpop.f32.mrb[23].mxu1 }
 0x123   :  { %v1307_v35 = vadd.f32 %v1306_v34, %v1305_v31  ;;  %v766_v36 = vadd.f32 %v1304_v30, %v1240_v25 }
 0x125   :  { %v769_v37 = vadd.f32 %v1307_v35, %v1243_v33 }
 0x126   :  { %v1244_v38 = vpop.f32.mrb[24].mxu0 }
 0x127   :  { %v1308_v39 = vpop.f32.mrb[24].mxu1  ;;  %v1245_v40 = vpop.f32.mrb[25].mxu0 }
 0x128   :  { %v1246_v41 = vadd.f32 %v1245_v40, %v1244_v38  ;;  %v1309_v44 = vpop.f32.mrb[25].mxu1  ;;  %v1247_v45 = vpop.f32.mrb[26].mxu0 }
 0x129   :  { %v1310_v46 = vadd.f32 %v1309_v44, %v1308_v39  ;;  %v1311_v47 = vpop.f32.mrb[26].mxu1  ;;  %v1248_v48 = vpop.f32.mrb[27].mxu0 }
 0x12a   :  { %v1249_v49 = vadd.f32 %v1248_v48, %v1247_v45  ;;  %v1312_v50 = vpop.f32.mrb[27].mxu1 }
 0x12b   :  { %v1313_v51 = vadd.f32 %v1312_v50, %v1311_v47  ;;  %v1763_v52 = vadd.f32 %v1310_v46, %v1246_v41 }
 0x12d   :  { %v1765_v53 = vadd.f32 %v1313_v51, %v1249_v49 }
 0x12e   :  { %v1250_v54 = vpop.f32.mrb[28].mxu0 }
 0x12f   :  { %v1314_v55 = vpop.f32.mrb[28].mxu1  ;;  %v1251_v58 = vpop.f32.mrb[29].mxu0 }
 0x130   :  { %v1252_v59 = vadd.f32 %v1251_v58, %v1250_v54  ;;  %v1315_v60 = vpop.f32.mrb[29].mxu1  ;;  %v1253_v61 = vpop.f32.mrb[30].mxu0 }
 0x131   :  { %v1316_v62 = vadd.f32 %v1315_v60, %v1314_v55  ;;  %v1317_v63 = vpop.f32.mrb[30].mxu1  ;;  %v1254_v0 = vpop.f32.mrb[31].mxu0 }
 0x132   :  { %v1255_v1 = vadd.f32 %v1254_v0, %v1253_v61  ;;  %v1318_v2 = vpop.f32.mrb[31].mxu1 }
 0x133   :  { %v1319_v3 = vadd.f32 %v1318_v2, %v1317_v63  ;;  %v782_v4 = vadd.f32 %v1316_v62, %v1252_v59 }
 0x135   :  { %v1767_v5 = vadd.f32 %v1319_v3, %v1255_v1 }
 0x136   :  { %v1354_v8 = vpop.f32.mrb[32].mxu0 }
 0x137   :  { %v831_v10 = vadd.f32 %v1354_v8, %v1749_v42  ;;  %v1362_v11 = vpop.f32.mrb[32].mxu1  ;;  %v822_v12 = vpop.f32.mrb[33].mxu0 }
 0x138   :  { %v863_v14 = vadd.f32 %v1362_v11, %v766_v36  ;;  %v823_v15 = vadd.f32 %v822_v12, %v1745_v28  ;;  %v854_v16 = vpop.f32.mrb[33].mxu1  ;;  %v1355_v17 = vpop.f32.mrb[34].mxu0 }
 0x139   :  { %v894_v18 = vmul.f32 %v1772_v9, %v831_v10  ;;  %v855_v19 = vadd.f32 %v854_v16, %v758_v20  ;;  %v834_v22 = vadd.f32 %v1355_v17, %v1751_v43  ;;  %v1363_v23 = vpop.f32.mrb[34].mxu1  ;;  %v825_v24 = vpop.f32.mrb[35].mxu0 }
 0x13a   :  { %v902_v42 = vmul.f32 %v1772_v9, %v863_v14  ;;  %v892_v25 = vmul.f32 %v1772_v9, %v823_v15  ;;  %v866_v26 = vadd.f32 %v1363_v23, %v769_v37  ;;  %v826_v27 = vadd.f32 %v825_v24, %v1747_v29  ;;  %v857_v30 = vpop.f32.mrb[35].mxu1 }
 0x13b   :  { %v917_v31 = vadd.f32 %v1778_v13, %v894_v18  ;;  %v900_v28 = vmul.f32 %v1772_v9, %v855_v19  ;;  %v895_v32 = vmul.f32 %v1772_v9, %v834_v22  ;;  %v858_v20 = vadd.f32 %v857_v30, %v1761_v21 }
 0x13c   :  { %v925_v43 = vadd.f32 %v1778_v13, %v902_v42  ;;  %v915_v33 = vadd.f32 %v1778_v13, %v892_v25  ;;  %v903_v34 = vmul.f32 %v1772_v9, %v866_v26  ;;  %v893_v35 = vmul.f32 %v1772_v9, %v826_v27 }
 0x13d   :  { %v933_v36 = vmax.f32 %v917_v31, 0.0  ;;  %v923_v29 = vadd.f32 %v1778_v13, %v900_v28  ;;  %v918_v37 = vadd.f32 %v1778_v13, %v895_v32  ;;  %v901_v38 = vmul.f32 %v1772_v9, %v858_v20 }
 0x13e   :  { %v941_v39 = vmax.f32 %v925_v43, 0.0  ;;  %v931_v40 = vmax.f32 %v915_v33, 0.0  ;;  %v926_v41 = vadd.f32 %v1778_v13, %v903_v34  ;;  %v916_v21 = vadd.f32 %v1778_v13, %v893_v35  ;;  %v1358_v44 = vpop.f32.mrb[36].mxu0 }
 0x13f   :  { %v939_v45 = vmax.f32 %v923_v29, 0.0  ;;  %v934_v46 = vmax.f32 %v918_v37, 0.0  ;;  %v924_v47 = vadd.f32 %v1778_v13, %v901_v38  ;;  %v847_v48 = vadd.f32 %v1358_v44, %v1757_v6  ;;  %v1366_v49 = vpop.f32.mrb[36].mxu1  ;;  %v838_v50 = vpop.f32.mrb[37].mxu0 }
 0x140   :  { %v942_v51 = vmax.f32 %v926_v41, 0.0  ;;  %v932_v54 = vmax.f32 %v916_v21, 0.0  ;;  %v879_v55 = vadd.f32 %v1366_v49, %v782_v4  ;;  %v839_v58 = vadd.f32 %v838_v50, %v1753_v56  ;;  %v870_v59 = vpop.f32.mrb[37].mxu1  ;;  %v1359_v60 = vpop.f32.mrb[38].mxu0 }
 0x141   :  { %v1153_v61 = vpack.c.bf16 %v934_v46, %v933_v36  ;;  %v940_v62 = vmax.f32 %v924_v47, 0.0  ;;  %v898_v63 = vmul.f32 %v1772_v9, %v847_v48  ;;  %v871_v0 = vadd.f32 %v870_v59, %v1763_v52  ;;  %v1367_v1 = vpop.f32.mrb[38].mxu1  ;;  %v841_v2 = vpop.f32.mrb[39].mxu0 }
 0x142   :  { %v1173_v3 = vpack.c.bf16 %v942_v51, %v941_v39  ;;  %v1148_v8 = vpack.c.bf16 %v932_v54, %v931_v40  ;;  %v906_v6 = vmul.f32 %v1772_v9, %v879_v55  ;;  %v896_v10 = vmul.f32 %v1772_v9, %v839_v58  ;;  %v873_v11 = vpop.f32.mrb[39].mxu1 }
 0x143   :  { %1185 = vst [vmem:[%s1851_s4 + $0x8] sm:$0xff] %v1153_v61   ;;  %v1168_v56 = vpack.c.bf16 %v940_v62, %v939_v45  ;;  %v904_v4 = vmul.f32 %v1772_v9, %v871_v0  ;;  %v850_v12 = vadd.f32 %v1359_v60, %v1759_v7  ;;  %v882_v52 = vadd.f32 %v1367_v1, %v1767_v5 }
 0x144   :  { %1189 = vst [vmem:[%s1851_s4 + $0x28] sm:$0xff] %v1173_v3   ;;  %1149 = vst [vmem:[%s1851_s4] sm:$0xff] %v1148_v8   ;;  %v842_v14 = vadd.f32 %v841_v2, %v1755_v57  ;;  %v921_v15 = vadd.f32 %v1778_v13, %v898_v63  ;;  %v874_v16 = vadd.f32 %v873_v11, %v1765_v53 }
 0x145   :  { %1188 = vst [vmem:[%s1851_s4 + $0x20] sm:$0xff] %v1168_v56   ;;  %v899_v7 = vmul.f32 %v1772_v9, %v850_v12  ;;  %v929_v17 = vadd.f32 %v1778_v13, %v906_v6  ;;  %v919_v18 = vadd.f32 %v1778_v13, %v896_v10  ;;  %v907_v19 = vmul.f32 %v1772_v9, %v882_v52 }
 0x146   :  { %v897_v5 = vmul.f32 %v1772_v9, %v842_v14  ;;  %v927_v57 = vadd.f32 %v1778_v13, %v904_v4  ;;  %v905_v23 = vmul.f32 %v1772_v9, %v874_v16  ;;  %v937_v25 = vmax.f32 %v921_v15, 0.0 }
 0x147   :  { %v922_v22 = vadd.f32 %v1778_v13, %v899_v7  ;;  %v930_v24 = vadd.f32 %v1778_v13, %v907_v19  ;;  %v945_v27 = vmax.f32 %v929_v17, 0.0  ;;  %v935_v30 = vmax.f32 %v919_v18, 0.0 }
 0x148   :  { %v920_v42 = vadd.f32 %v1778_v13, %v897_v5  ;;  %v928_v26 = vadd.f32 %v1778_v13, %v905_v23  ;;  %v943_v32 = vmax.f32 %v927_v57, 0.0 }
 0x149   :  { %v938_v53 = vmax.f32 %v922_v22, 0.0  ;;  %v946_v31 = vmax.f32 %v930_v24, 0.0 }
 0x14a   :  { %v936_v28 = vmax.f32 %v920_v42, 0.0  ;;  %v944_v43 = vmax.f32 %v928_v26, 0.0 }
 0x14b   :  { %v1163_v20 = vpack.c.bf16 %v938_v53, %v937_v25  ;;  %v1183_v33 = vpack.c.bf16 %v946_v31, %v945_v27 }
 0x14c   :  { %v1158_v34 = vpack.c.bf16 %v936_v28, %v935_v30  ;;  %v1178_v9 = vpack.c.bf16 %v944_v43, %v943_v32 }
 0x14d   :  { %1187 = vst [vmem:[%s1851_s4 + $0x18] sm:$0xff] %v1163_v20   ;;  %1191 = vst [vmem:[%s1851_s4 + $0x38] sm:$0xff] %v1183_v33  }
 0x14e   :  { %1186 = vst [vmem:[%s1851_s4 + $0x10] sm:$0xff] %v1158_v34   ;;  %1190 = vst [vmem:[%s1851_s4 + $0x30] sm:$0xff] %v1178_v9  }

// kernel: forward.14
= control target key start
LH: loop header
LB: loop body
LE: loop exit
PB: predicated region body
PF: predicated region fallthrough
CT: control target
= control target key end

     0   :  { %s2330_s1 = inlined_call_operand.vmem [shape: bf16[1152,256], index: 1, kind: input, shape index: {}]   ;;  %s2331_s0 = inlined_call_operand.vmem [shape: bf16[32,1152], index: 0, kind: input, shape index: {}]   ;;  %s2332_s2 = inlined_call_operand.vmem [shape: f32[1,256], index: 2, kind: input, shape index: {}]   ;;  %s2333_s3 = inlined_call_operand.vmem [shape: f32[1,256], index: 3, kind: input, shape index: {}]   ;;  %s2334_s4 = inlined_call_operand.vmem [shape: bf16[32,256], index: 4, kind: output, shape index: {}]  }
   0x1   :  { %v1558_v0 = vld [vmem:[%s2330_s1 + $0x4] ss:$8 sps:$4 sm:$0xff]   ;;  %v1562_v2 = vld [vmem:[%s2330_s1] ss:$8 sps:$4 sm:$0xff]   ;;  %v1564_v4 = vld [vmem:[%s2330_s1 + $0x14] ss:$8 sps:$4 sm:$0xff]  }
   0x2   :  { %v1560_v1 = vld [vmem:[%s2330_s1 + $0x204] ss:$8 sps:$4 sm:$0xff]   ;;  %994 = vmatprep.subr.bf16.mxu1 %v1558_v0  ;;  %v1563_v3 = vld [vmem:[%s2330_s1 + $0x200] ss:$8 sps:$4 sm:$0xff]   ;;  %v1566_v5 = vld [vmem:[%s2330_s1 + $0x214] ss:$8 sps:$4 sm:$0xff]  }
   0x3   :  { %1100 = vmatprep.subr.bf16.mxu0 %v1560_v1  ;;  %995 = vmatpush1.bf16.msra.mxu1 %v1562_v2  ;;  %v1568_v6 = vld [vmem:[%s2330_s1 + $0x10] ss:$8 sps:$4 sm:$0xff]   ;;  %v1570_v8 = vld [vmem:[%s2330_s1 + $0x24] ss:$8 sps:$4 sm:$0xff]   ;;  %v1574_v10 = vld [vmem:[%s2330_s1 + $0x20] ss:$8 sps:$4 sm:$0xff]  }
   0x4   :  { %1101 = vmatpush1.bf16.msra.mxu0 %v1563_v3  ;;  %996 = vmatprep.subr.bf16.mxu1 %v1564_v4  ;;  %v1569_v7 = vld [vmem:[%s2330_s1 + $0x210] ss:$8 sps:$4 sm:$0xff]   ;;  %v1572_v9 = vld [vmem:[%s2330_s1 + $0x224] ss:$8 sps:$4 sm:$0xff]   ;;  %v1575_v11 = vld [vmem:[%s2330_s1 + $0x220] ss:$8 sps:$4 sm:$0xff]  }
   0x5   :  { %1102 = vmatprep.subr.bf16.mxu0 %v1566_v5  ;;  %v1576_v12 = vld [vmem:[%s2330_s1 + $0x34] ss:$8 sps:$4 sm:$0xff]   ;;  %v1580_v14 = vld [vmem:[%s2330_s1 + $0x30] ss:$8 sps:$4 sm:$0xff]   ;;  %v1582_v16 = vld [vmem:[%s2330_s1 + $0x44] ss:$8 sps:$4 sm:$0xff]  }
   0x6   :  { %v1578_v13 = vld [vmem:[%s2330_s1 + $0x234] ss:$8 sps:$4 sm:$0xff]   ;;  %v1581_v15 = vld [vmem:[%s2330_s1 + $0x230] ss:$8 sps:$4 sm:$0xff]   ;;  %v1584_v17 = vld [vmem:[%s2330_s1 + $0x244] ss:$8 sps:$4 sm:$0xff]  }
   0x7   :  { %997 = vmatpush1.bf16.msra.mxu1 %v1568_v6  ;;  %v1586_v18 = vld [vmem:[%s2330_s1 + $0x40] ss:$8 sps:$4 sm:$0xff]   ;;  %v1588_v20 = vld [vmem:[%s2330_s1 + $0x54] ss:$8 sps:$4 sm:$0xff]   ;;  %v1592_v22 = vld [vmem:[%s2330_s1 + $0x50] ss:$8 sps:$4 sm:$0xff]  }
   0x8   :  { %1103 = vmatpush1.bf16.msra.mxu0 %v1569_v7  ;;  %998 = vmatprep.subr.bf16.mxu1 %v1570_v8  ;;  %v1587_v19 = vld [vmem:[%s2330_s1 + $0x240] ss:$8 sps:$4 sm:$0xff]   ;;  %v1590_v21 = vld [vmem:[%s2330_s1 + $0x254] ss:$8 sps:$4 sm:$0xff]   ;;  %v1593_v23 = vld [vmem:[%s2330_s1 + $0x250] ss:$8 sps:$4 sm:$0xff]  }
   0x9   :  { %1104 = vmatprep.subr.bf16.mxu0 %v1572_v9  ;;  %v1594_v24 = vld [vmem:[%s2330_s1 + $0x64] ss:$8 sps:$4 sm:$0xff]   ;;  %v1598_v26 = vld [vmem:[%s2330_s1 + $0x60] ss:$8 sps:$4 sm:$0xff]   ;;  %v1600_v28 = vld [vmem:[%s2330_s1 + $0x74] ss:$8 sps:$4 sm:$0xff]  }
   0xa   :  { %v1596_v25 = vld [vmem:[%s2330_s1 + $0x264] ss:$8 sps:$4 sm:$0xff]   ;;  %v1599_v27 = vld [vmem:[%s2330_s1 + $0x260] ss:$8 sps:$4 sm:$0xff]   ;;  %v1602_v29 = vld [vmem:[%s2330_s1 + $0x274] ss:$8 sps:$4 sm:$0xff]  }
   0xb   :  { %999 = vmatpush1.bf16.msra.mxu1 %v1574_v10  ;;  %v1604_v30 = vld [vmem:[%s2330_s1 + $0x70] ss:$8 sps:$4 sm:$0xff]   ;;  %v1606_v32 = vld [vmem:[%s2330_s1 + $0x84] ss:$8 sps:$4 sm:$0xff]   ;;  %v1610_v34 = vld [vmem:[%s2330_s1 + $0x80] ss:$8 sps:$4 sm:$0xff]  }
   0xc   :  { %1105 = vmatpush1.bf16.msra.mxu0 %v1575_v11  ;;  %1000 = vmatprep.subr.bf16.mxu1 %v1576_v12  ;;  %v1605_v31 = vld [vmem:[%s2330_s1 + $0x270] ss:$8 sps:$4 sm:$0xff]   ;;  %v1608_v33 = vld [vmem:[%s2330_s1 + $0x284] ss:$8 sps:$4 sm:$0xff]   ;;  %v1611_v35 = vld [vmem:[%s2330_s1 + $0x280] ss:$8 sps:$4 sm:$0xff]  }
   0xd   :  { %1106 = vmatprep.subr.bf16.mxu0 %v1578_v13  ;;  %v1612_v36 = vld [vmem:[%s2330_s1 + $0x94] ss:$8 sps:$4 sm:$0xff]   ;;  %v1616_v38 = vld [vmem:[%s2330_s1 + $0x90] ss:$8 sps:$4 sm:$0xff]   ;;  %v1618_v40 = vld [vmem:[%s2330_s1 + $0xa4] ss:$8 sps:$4 sm:$0xff]  }
   0xe   :  { %v1614_v37 = vld [vmem:[%s2330_s1 + $0x294] ss:$8 sps:$4 sm:$0xff]   ;;  %v1617_v39 = vld [vmem:[%s2330_s1 + $0x290] ss:$8 sps:$4 sm:$0xff]   ;;  %v1620_v41 = vld [vmem:[%s2330_s1 + $0x2a4] ss:$8 sps:$4 sm:$0xff]  }
   0xf   :  { %1001 = vmatpush1.bf16.msra.mxu1 %v1580_v14  ;;  %v1622_v42 = vld [vmem:[%s2330_s1 + $0xa0] ss:$8 sps:$4 sm:$0xff]   ;;  %v1624_v44 = vld [vmem:[%s2330_s1 + $0xb4] ss:$8 sps:$4 sm:$0xff]   ;;  %v1628_v46 = vld [vmem:[%s2330_s1 + $0xb0] ss:$8 sps:$4 sm:$0xff]  }
  0x10   :  { %1107 = vmatpush1.bf16.msra.mxu0 %v1581_v15  ;;  %1002 = vmatprep.subr.bf16.mxu1 %v1582_v16  ;;  %v1623_v43 = vld [vmem:[%s2330_s1 + $0x2a0] ss:$8 sps:$4 sm:$0xff]   ;;  %v1626_v45 = vld [vmem:[%s2330_s1 + $0x2b4] ss:$8 sps:$4 sm:$0xff]   ;;  %v1629_v47 = vld [vmem:[%s2330_s1 + $0x2b0] ss:$8 sps:$4 sm:$0xff]  }
  0x11   :  { %1108 = vmatprep.subr.bf16.mxu0 %v1584_v17  ;;  %v1656_v48 = vld [vmem:[%s2331_s0 + $0x4] ss:$36 sps:$4 sm:$0xff]   ;;  %v1662_v51 = vld [vmem:[%s2331_s0 + $0x14] ss:$36 sps:$4 sm:$0xff]  }
  0x12   :  { %v1630_v49 = vld [vmem:[%s2330_s1 + $0xc4] ss:$8 sps:$4 sm:$0xff]   ;;  %1026 = vmatprep.mubr.bf16.mxu1 %v1656_v48  ;;  %v1634_v52 = vld [vmem:[%s2330_s1 + $0xc0] ss:$8 sps:$4 sm:$0xff]   ;;  %v1636_v54 = vld [vmem:[%s2330_s1 + $0xd4] ss:$8 sps:$4 sm:$0xff]   ;;  %1132 = vmatprep.mubr.bf16.mxu0 %v1662_v51 }
  0x13   :  { %1003 = vmatpush1.bf16.msra.mxu1 %v1586_v18  ;;  %v1632_v50 = vld [vmem:[%s2330_s1 + $0x2c4] ss:$8 sps:$4 sm:$0xff]   ;;  %v1635_v53 = vld [vmem:[%s2330_s1 + $0x2c0] ss:$8 sps:$4 sm:$0xff]   ;;  %v1638_v55 = vld [vmem:[%s2330_s1 + $0x2d4] ss:$8 sps:$4 sm:$0xff]  }
  0x14   :  { %1109 = vmatpush1.bf16.msra.mxu0 %v1587_v19  ;;  %1004 = vmatprep.subr.bf16.mxu1 %v1588_v20  ;;  %v1640_v56 = vld [vmem:[%s2330_s1 + $0xd0] ss:$8 sps:$4 sm:$0xff]   ;;  %v1642_v58 = vld [vmem:[%s2330_s1 + $0xe4] ss:$8 sps:$4 sm:$0xff]   ;;  %v1646_v60 = vld [vmem:[%s2330_s1 + $0xe0] ss:$8 sps:$4 sm:$0xff]  }
  0x15   :  { %1110 = vmatprep.subr.bf16.mxu0 %v1590_v21  ;;  %v1641_v57 = vld [vmem:[%s2330_s1 + $0x2d0] ss:$8 sps:$4 sm:$0xff]   ;;  %v1644_v59 = vld [vmem:[%s2330_s1 + $0x2e4] ss:$8 sps:$4 sm:$0xff]   ;;  %v1647_v61 = vld [vmem:[%s2330_s1 + $0x2e0] ss:$8 sps:$4 sm:$0xff]  }
  0x16   :  { %v1648_v62 = vld [vmem:[%s2330_s1 + $0xf4] ss:$8 sps:$4 sm:$0xff]   ;;  %v1652_v0 = vld [vmem:[%s2330_s1 + $0xf0] ss:$8 sps:$4 sm:$0xff]   ;;  %v1659_v2 = vld [vmem:[%s2330_s1 + $0x104] ss:$8 sps:$4 sm:$0xff]  }
  0x17   :  { %1005 = vmatpush1.bf16.msra.mxu1 %v1592_v22  ;;  %v1650_v63 = vld [vmem:[%s2330_s1 + $0x2f4] ss:$8 sps:$4 sm:$0xff]   ;;  %v1653_v1 = vld [vmem:[%s2330_s1 + $0x2f0] ss:$8 sps:$4 sm:$0xff]   ;;  %v1665_v3 = vld [vmem:[%s2330_s1 + $0x304] ss:$8 sps:$4 sm:$0xff]  }
  0x18   :  { %1111 = vmatpush1.bf16.msra.mxu0 %v1593_v23  ;;  %1006 = vmatprep.subr.bf16.mxu1 %v1594_v24  ;;  %v1654_v4 = vld [vmem:[%s2331_s0] ss:$36 sps:$4 sm:$0xff]   ;;  %v1660_v6 = vld [vmem:[%s2331_s0 + $0x10] ss:$36 sps:$4 sm:$0xff]  }
  0x19   :  { %1112 = vmatprep.subr.bf16.mxu0 %v1596_v25  ;;  %v1657_v5 = vld [vmem:[%s2330_s1 + $0x100] ss:$8 sps:$4 sm:$0xff]   ;;  %v1668_v8 = vld [vmem:[%s2330_s1 + $0x114] ss:$8 sps:$4 sm:$0xff]   ;;  %v1666_v10 = vld [vmem:[%s2330_s1 + $0x110] ss:$8 sps:$4 sm:$0xff]  }
  0x1a   :  { %v1663_v7 = vld [vmem:[%s2330_s1 + $0x300] ss:$8 sps:$4 sm:$0xff]   ;;  %v1671_v9 = vld [vmem:[%s2330_s1 + $0x314] ss:$8 sps:$4 sm:$0xff]   ;;  %v1669_v11 = vld [vmem:[%s2330_s1 + $0x310] ss:$8 sps:$4 sm:$0xff]  }
  0x1b   :  { %1007 = vmatpush1.bf16.msra.mxu1 %v1598_v26  ;;  %v1674_v12 = vld [vmem:[%s2330_s1 + $0x124] ss:$8 sps:$4 sm:$0xff]   ;;  %v1672_v14 = vld [vmem:[%s2330_s1 + $0x120] ss:$8 sps:$4 sm:$0xff]   ;;  %v1680_v16 = vld [vmem:[%s2330_s1 + $0x134] ss:$8 sps:$4 sm:$0xff]  }
  0x1c   :  { %1113 = vmatpush1.bf16.msra.mxu0 %v1599_v27  ;;  %1008 = vmatprep.subr.bf16.mxu1 %v1600_v28  ;;  %v1677_v13 = vld [vmem:[%s2330_s1 + $0x324] ss:$8 sps:$4 sm:$0xff]   ;;  %v1675_v15 = vld [vmem:[%s2330_s1 + $0x320] ss:$8 sps:$4 sm:$0xff]   ;;  %v1683_v17 = vld [vmem:[%s2330_s1 + $0x334] ss:$8 sps:$4 sm:$0xff]  }
  0x1d   :  { %1114 = vmatprep.subr.bf16.mxu0 %v1602_v29  ;;  %v1678_v18 = vld [vmem:[%s2330_s1 + $0x130] ss:$8 sps:$4 sm:$0xff]   ;;  %v1686_v20 = vld [vmem:[%s2330_s1 + $0x144] ss:$8 sps:$4 sm:$0xff]   ;;  %v1684_v22 = vld [vmem:[%s2330_s1 + $0x140] ss:$8 sps:$4 sm:$0xff]  }
  0x1e   :  { %v1681_v19 = vld [vmem:[%s2330_s1 + $0x330] ss:$8 sps:$4 sm:$0xff]   ;;  %v1689_v21 = vld [vmem:[%s2330_s1 + $0x344] ss:$8 sps:$4 sm:$0xff]   ;;  %v1687_v23 = vld [vmem:[%s2330_s1 + $0x340] ss:$8 sps:$4 sm:$0xff]  }
  0x1f   :  { %1009 = vmatpush1.bf16.msra.mxu1 %v1604_v30  ;;  %v1692_v24 = vld [vmem:[%s2330_s1 + $0x154] ss:$8 sps:$4 sm:$0xff]   ;;  %v1690_v26 = vld [vmem:[%s2330_s1 + $0x150] ss:$8 sps:$4 sm:$0xff]   ;;  %v1698_v28 = vld [vmem:[%s2330_s1 + $0x164] ss:$8 sps:$4 sm:$0xff]  }
  0x20   :  { %1115 = vmatpush1.bf16.msra.mxu0 %v1605_v31  ;;  %1010 = vmatprep.subr.bf16.mxu1 %v1606_v32  ;;  %v1695_v25 = vld [vmem:[%s2330_s1 + $0x354] ss:$8 sps:$4 sm:$0xff]   ;;  %v1693_v27 = vld [vmem:[%s2330_s1 + $0x350] ss:$8 sps:$4 sm:$0xff]   ;;  %v1748_v31 = vld [vmem:[%s2331_s0 + $0x48] ss:$36 sps:$4 sm:$0xff]  }
  0x21   :  { %1116 = vmatprep.subr.bf16.mxu0 %v1608_v33  ;;  %v1744_v29 = vld [vmem:[%s2331_s0 + $0x4c] ss:$36 sps:$4 sm:$0xff]   ;;  %v1746_v30 = vld [vmem:[%s2331_s0 + $0x5c] ss:$36 sps:$4 sm:$0xff]  }
  0x22   :  { %v1701_v32 = vld [vmem:[%s2330_s1 + $0x364] ss:$8 sps:$4 sm:$0xff]   ;;  %v1752_v33 = vld [vmem:[%s2331_s0 + $0x58] ss:$36 sps:$4 sm:$0xff]  }
  0x23   :  { %1011 = vmatpush1.bf16.msra.mxu1 %v1610_v34  ;;  %v1696_v34 = vld [vmem:[%s2330_s1 + $0x160] ss:$8 sps:$4 sm:$0xff]   ;;  %v1714_v48 = vld [vmem:[%s2330_s1 + $0x190] ss:$8 sps:$4 sm:$0xff]   ;;  %v1725_v51 = vld [vmem:[%s2330_s1 + $0x3a4] ss:$8 sps:$4 sm:$0xff]  }
  0x24   :  { %1117 = vmatpush1.bf16.msra.mxu0 %v1611_v35  ;;  %1012 = vmatprep.subr.bf16.mxu1 %v1612_v36  ;;  %v1699_v35 = vld [vmem:[%s2330_s1 + $0x360] ss:$8 sps:$4 sm:$0xff]   ;;  %v1704_v36 = vld [vmem:[%s2330_s1 + $0x174] ss:$8 sps:$4 sm:$0xff]  }
  0x25   :  { %1118 = vmatprep.subr.bf16.mxu0 %v1614_v37  ;;  %v1707_v37 = vld [vmem:[%s2330_s1 + $0x374] ss:$8 sps:$4 sm:$0xff]  }
  0x27   :  { %1013 = vmatpush1.bf16.msra.mxu1 %v1616_v38  ;;  %v1702_v38 = vld [vmem:[%s2330_s1 + $0x170] ss:$8 sps:$4 sm:$0xff]  }
  0x28   :  { %1119 = vmatpush1.bf16.msra.mxu0 %v1617_v39  ;;  %1014 = vmatprep.subr.bf16.mxu1 %v1618_v40  ;;  %v1705_v39 = vld [vmem:[%s2330_s1 + $0x370] ss:$8 sps:$4 sm:$0xff]   ;;  %v1710_v40 = vld [vmem:[%s2330_s1 + $0x184] ss:$8 sps:$4 sm:$0xff]  }
  0x29   :  { %1120 = vmatprep.subr.bf16.mxu0 %v1620_v41  ;;  %v1764_v41 = vld [vmem:[%s2331_s0 + $0xc] ss:$36 sps:$4 sm:$0xff]  }
  0x2b   :  { %1015 = vmatpush1.bf16.msra.mxu1 %v1622_v42  ;;  %v1713_v42 = vld [vmem:[%s2330_s1 + $0x384] ss:$8 sps:$4 sm:$0xff]  }
  0x2c   :  { %1121 = vmatpush1.bf16.msra.mxu0 %v1623_v43  ;;  %1016 = vmatprep.subr.bf16.mxu1 %v1624_v44  ;;  %v1767_v43 = vld [vmem:[%s2331_s0 + $0x1c] ss:$36 sps:$4 sm:$0xff]  }
  0x2d   :  { %1122 = vmatprep.subr.bf16.mxu0 %v1626_v45  ;;  %v1708_v44 = vld [vmem:[%s2330_s1 + $0x180] ss:$8 sps:$4 sm:$0xff]  }
  0x2e   :  { %v1711_v45 = vld [vmem:[%s2330_s1 + $0x380] ss:$8 sps:$4 sm:$0xff]  }
  0x2f   :  { %1017 = vmatpush1.bf16.msra.mxu1 %v1628_v46  ;;  %v1716_v46 = vld [vmem:[%s2330_s1 + $0x194] ss:$8 sps:$4 sm:$0xff]  }
  0x30   :  { %1123 = vmatpush1.bf16.msra.mxu0 %v1629_v47  ;;  %1018 = vmatprep.subr.bf16.mxu1 %v1630_v49  ;;  %v1719_v47 = vld [vmem:[%s2330_s1 + $0x394] ss:$8 sps:$4 sm:$0xff]   ;;  %v1717_v49 = vld [vmem:[%s2330_s1 + $0x390] ss:$8 sps:$4 sm:$0xff]  }
  0x31   :  { %1124 = vmatprep.subr.bf16.mxu0 %v1632_v50  ;;  %v1722_v50 = vld [vmem:[%s2330_s1 + $0x1a4] ss:$8 sps:$4 sm:$0xff]  }
  0x33   :  { %1019 = vmatpush1.bf16.msra.mxu1 %v1634_v52  ;;  %v1720_v52 = vld [vmem:[%s2330_s1 + $0x1a0] ss:$8 sps:$4 sm:$0xff]  }
  0x34   :  { %1125 = vmatpush1.bf16.msra.mxu0 %v1635_v53  ;;  %1020 = vmatprep.subr.bf16.mxu1 %v1636_v54  ;;  %v1723_v53 = vld [vmem:[%s2330_s1 + $0x3a0] ss:$8 sps:$4 sm:$0xff]   ;;  %v1728_v54 = vld [vmem:[%s2330_s1 + $0x1b4] ss:$8 sps:$4 sm:$0xff]  }
  0x35   :  { %1126 = vmatprep.subr.bf16.mxu0 %v1638_v55  ;;  %v1731_v55 = vld [vmem:[%s2330_s1 + $0x3b4] ss:$8 sps:$4 sm:$0xff]  }
  0x37   :  { %1021 = vmatpush1.bf16.msra.mxu1 %v1640_v56  ;;  %v1726_v56 = vld [vmem:[%s2330_s1 + $0x1b0] ss:$8 sps:$4 sm:$0xff]  }
  0x38   :  { %1127 = vmatpush1.bf16.msra.mxu0 %v1641_v57  ;;  %1022 = vmatprep.subr.bf16.mxu1 %v1642_v58  ;;  %v1729_v57 = vld [vmem:[%s2330_s1 + $0x3b0] ss:$8 sps:$4 sm:$0xff]   ;;  %v1734_v58 = vld [vmem:[%s2330_s1 + $0x1c4] ss:$8 sps:$4 sm:$0xff]  }
  0x39   :  { %1128 = vmatprep.subr.bf16.mxu0 %v1644_v59  ;;  %v1737_v59 = vld [vmem:[%s2330_s1 + $0x3c4] ss:$8 sps:$4 sm:$0xff]  }
  0x3b   :  { %1023 = vmatpush1.bf16.msra.mxu1 %v1646_v60  ;;  %v1732_v60 = vld [vmem:[%s2330_s1 + $0x1c0] ss:$8 sps:$4 sm:$0xff]  }
  0x3c   :  { %1129 = vmatpush1.bf16.msra.mxu0 %v1647_v61  ;;  %1024 = vmatprep.subr.bf16.mxu1 %v1648_v62  ;;  %v1735_v61 = vld [vmem:[%s2330_s1 + $0x3c0] ss:$8 sps:$4 sm:$0xff]   ;;  %v1740_v62 = vld [vmem:[%s2330_s1 + $0x1d4] ss:$8 sps:$4 sm:$0xff]  }
  0x3d   :  { %1130 = vmatprep.subr.bf16.mxu0 %v1650_v63  ;;  %v1743_v63 = vld [vmem:[%s2330_s1 + $0x3d4] ss:$8 sps:$4 sm:$0xff]  }
  0x3f   :  { %1025 = vmatpush1.bf16.msra.mxu1 %v1652_v0  ;;  %v1738_v0 = vld [vmem:[%s2330_s1 + $0x1d0] ss:$8 sps:$4 sm:$0xff]  }
  0x40   :  { %1131 = vmatpush1.bf16.msra.mxu0 %v1653_v1  ;;  %1047 = vmatprep.subr.bf16.mxu1 %v1659_v2  ;;  %v1741_v1 = vld [vmem:[%s2330_s1 + $0x3d0] ss:$8 sps:$4 sm:$0xff]   ;;  %v1751_v2 = vld [vmem:[%s2330_s1 + $0x1e4] ss:$8 sps:$4 sm:$0xff]  }
  0x41   :  { %1153 = vmatprep.subr.bf16.mxu0 %v1665_v3  ;;  %v1755_v3 = vld [vmem:[%s2330_s1 + $0x3e4] ss:$8 sps:$4 sm:$0xff]  }
  0x42   :  { %1027 = vmatmul.mubr.bf16.vlgmr.msra.gmra.mrb[0].mxu1 %v1654_v4  ;;  %v1749_v4 = vld [vmem:[%s2330_s1 + $0x1e0] ss:$8 sps:$4 sm:$0xff]  }
  0x43   :  { %1133 = vmatmul.mubr.bf16.vlgmr.msra.gmra.mrb[0].mxu0 %v1660_v6  ;;  %1048 = vmatpush1.bf16.msra.mxu1 %v1657_v5  ;;  %v1753_v5 = vld [vmem:[%s2330_s1 + $0x3e0] ss:$8 sps:$4 sm:$0xff]   ;;  %v1758_v6 = vld [vmem:[%s2330_s1 + $0x1f4] ss:$8 sps:$4 sm:$0xff]  }
  0x44   :  { %1154 = vmatpush1.bf16.msra.mxu0 %v1663_v7  ;;  %1049 = vmatprep.subr.bf16.mxu1 %v1668_v8  ;;  %v1761_v7 = vld [vmem:[%s2330_s1 + $0x3f4] ss:$8 sps:$4 sm:$0xff]   ;;  %v1756_v8 = vld [vmem:[%s2330_s1 + $0x1f0] ss:$8 sps:$4 sm:$0xff]  }
  0x45   :  { %1155 = vmatprep.subr.bf16.mxu0 %v1671_v9  ;;  %1036 = vmatprep.mubr.bf16.mxu1 %v1744_v29  ;;  %v1759_v9 = vld [vmem:[%s2330_s1 + $0x3f0] ss:$8 sps:$4 sm:$0xff]   ;;  %v1794_v29 = vld [vmem:[%s2330_s1 + $0x464] ss:$8 sps:$4 sm:$0xff]  }
  0x46   :  { %1142 = vmatprep.mubr.bf16.mxu0 %v1746_v30  ;;  %v1792_v30 = vld [vmem:[%s2330_s1 + $0x460] ss:$8 sps:$4 sm:$0xff]  }
  0x47   :  { %1050 = vmatpush1.bf16.msra.mxu1 %v1666_v10  ;;  %v1770_v10 = vld [vmem:[%s2330_s1 + $0x404] ss:$8 sps:$4 sm:$0xff]  }
  0x48   :  { %1156 = vmatpush1.bf16.msra.mxu0 %v1669_v11  ;;  %1051 = vmatprep.subr.bf16.mxu1 %v1674_v12  ;;  %v1762_v11 = vld [vmem:[%s2331_s0 + $0x8] ss:$36 sps:$4 sm:$0xff]   ;;  %v1765_v12 = vld [vmem:[%s2331_s0 + $0x18] ss:$36 sps:$4 sm:$0xff]  }
  0x49   :  { %1157 = vmatprep.subr.bf16.mxu0 %v1677_v13  ;;  %v1768_v13 = vld [vmem:[%s2330_s1 + $0x400] ss:$8 sps:$4 sm:$0xff]  }
  0x4a   :  { %1037 = vmatmul.mubr.bf16.gmra.mrb[4].mxu1 %v1748_v31  ;;  %v1797_v31 = vld [vmem:[%s2330_s1 + $0x474] ss:$8 sps:$4 sm:$0xff]  }
  0x4b   :  { %1052 = vmatpush1.bf16.msra.mxu1 %v1672_v14  ;;  %1143 = vmatmul.mubr.bf16.gmra.mrb[4].mxu0 %v1752_v33  ;;  %v1773_v14 = vld [vmem:[%s2330_s1 + $0x414] ss:$8 sps:$4 sm:$0xff]   ;;  %v1798_v33 = vld [vmem:[%s2331_s0 + $0x20] ss:$36 sps:$4 sm:$0xff]  }
  0x4c   :  { %1158 = vmatpush1.bf16.msra.mxu0 %v1675_v15  ;;  %1053 = vmatprep.subr.bf16.mxu1 %v1680_v16  ;;  %v1774_v15 = vld [vmem:[%s2331_s0 + $0x54] ss:$36 sps:$4 sm:$0xff]   ;;  %v1776_v16 = vld [vmem:[%s2331_s0 + $0x64] ss:$36 sps:$4 sm:$0xff]  }
  0x4d   :  { %1159 = vmatprep.subr.bf16.mxu0 %v1683_v17  ;;  %1079 = vmatprep.mubr.bf16.mxu1 %v1764_v41  ;;  %v1771_v17 = vld [vmem:[%s2330_s1 + $0x410] ss:$8 sps:$4 sm:$0xff]  }
  0x4e   :  { %1185 = vmatprep.mubr.bf16.mxu0 %v1767_v43 }
  0x4f   :  { %1054 = vmatpush1.bf16.msra.mxu1 %v1678_v18  ;;  %v1782_v18 = vld [vmem:[%s2330_s1 + $0x424] ss:$8 sps:$4 sm:$0xff]  }
  0x50   :  { %1160 = vmatpush1.bf16.msra.mxu0 %v1681_v19  ;;  %1055 = vmatprep.subr.bf16.mxu1 %v1686_v20  ;;  %v1778_v19 = vld [vmem:[%s2331_s0 + $0x50] ss:$36 sps:$4 sm:$0xff]   ;;  %v1779_v20 = vld [vmem:[%s2331_s0 + $0x60] ss:$36 sps:$4 sm:$0xff]  }
  0x51   :  { %1161 = vmatprep.subr.bf16.mxu0 %v1689_v21  ;;  %v1780_v21 = vld [vmem:[%s2330_s1 + $0x420] ss:$8 sps:$4 sm:$0xff]  }
  0x53   :  { %1056 = vmatpush1.bf16.msra.mxu1 %v1684_v22  ;;  %v1785_v22 = vld [vmem:[%s2330_s1 + $0x434] ss:$8 sps:$4 sm:$0xff]  }
  0x54   :  { %1162 = vmatpush1.bf16.msra.mxu0 %v1687_v23  ;;  %1057 = vmatprep.subr.bf16.mxu1 %v1692_v24  ;;  %v1783_v23 = vld [vmem:[%s2330_s1 + $0x430] ss:$8 sps:$4 sm:$0xff]   ;;  %v1788_v24 = vld [vmem:[%s2330_s1 + $0x444] ss:$8 sps:$4 sm:$0xff]  }
  0x55   :  { %1163 = vmatprep.subr.bf16.mxu0 %v1695_v25  ;;  %v1800_v25 = vmov 0  }
  0x57   :  { %1058 = vmatpush1.bf16.msra.mxu1 %v1690_v26  ;;  %v1786_v26 = vld [vmem:[%s2330_s1 + $0x440] ss:$8 sps:$4 sm:$0xff]  }
  0x58   :  { %1164 = vmatpush1.bf16.msra.mxu0 %v1693_v27  ;;  %1059 = vmatprep.subr.bf16.mxu1 %v1698_v28  ;;  %v1791_v27 = vld [vmem:[%s2330_s1 + $0x454] ss:$8 sps:$4 sm:$0xff]   ;;  %v1789_v28 = vld [vmem:[%s2330_s1 + $0x450] ss:$8 sps:$4 sm:$0xff]  }
  0x59   :  { %1165 = vmatprep.subr.bf16.mxu0 %v1701_v32  ;;  %v1795_v32 = vld [vmem:[%s2330_s1 + $0x470] ss:$8 sps:$4 sm:$0xff]  }
  0x5b   :  { %1060 = vmatpush1.bf16.msra.mxu1 %v1696_v34  ;;  %v1799_v34 = vld [vmem:[%s2331_s0 + $0x68] ss:$36 sps:$4 sm:$0xff]  }
  0x5c   :  { %1166 = vmatpush1.bf16.msra.mxu0 %v1699_v35  ;;  %1061 = vmatprep.subr.bf16.mxu1 %v1704_v36 }
  0x5d   :  { %1167 = vmatprep.subr.bf16.mxu0 %v1707_v37 }
  0x5f   :  { %1062 = vmatpush1.bf16.msra.mxu1 %v1702_v38 }
  0x60   :  { %1168 = vmatpush1.bf16.msra.mxu0 %v1705_v39  ;;  %1063 = vmatprep.subr.bf16.mxu1 %v1710_v40 }
  0x61   :  { %1169 = vmatprep.subr.bf16.mxu0 %v1713_v42 }
  0x63   :  { %1064 = vmatpush1.bf16.msra.mxu1 %v1708_v44 }
  0x64   :  { %1170 = vmatpush1.bf16.msra.mxu0 %v1711_v45  ;;  %1065 = vmatprep.subr.bf16.mxu1 %v1716_v46 }
  0x65   :  { %1171 = vmatprep.subr.bf16.mxu0 %v1719_v47 }
  0x67   :  { %1066 = vmatpush1.bf16.msra.mxu1 %v1714_v48 }
  0x68   :  { %1172 = vmatpush1.bf16.msra.mxu0 %v1717_v49  ;;  %1067 = vmatprep.subr.bf16.mxu1 %v1722_v50 }
  0x69   :  { %1173 = vmatprep.subr.bf16.mxu0 %v1725_v51  ;;  %v1261_v51 = vlaneseq }
  0x6b   :  { %1068 = vmatpush1.bf16.msra.mxu1 %v1720_v52  ;;  %v1262_v52 = vshrl.u32 %v1261_v51, 7 }
  0x6c   :  { %1174 = vmatpush1.bf16.msra.mxu0 %v1723_v53  ;;  %1069 = vmatprep.subr.bf16.mxu1 %v1728_v54  ;;  %v1259_v54 = vld [vmem:[%s2332_s2] sm:$0x3] }
  0x6d   :  { %1175 = vmatprep.subr.bf16.mxu0 %v1731_v55  ;;  %v1263_v53 = vsub.s32 0, %v1262_v52  ;;  %v1267_v55 = vsub.s32 1, %v1262_v52 }
  0x6f   :  { %1070 = vmatpush1.bf16.msra.mxu1 %v1726_v56  ;;  %v1279_v56 = vld [vmem:[%s2333_s3] sm:$0x3] }
  0x70   :  { %1176 = vmatpush1.bf16.msra.mxu0 %v1729_v57  ;;  %1071 = vmatprep.subr.bf16.mxu1 %v1734_v58  ;;  %v1264_v57 = vrot.slane %v1259_v54, %v1263_v53 }
  0x71   :  { %1177 = vmatprep.subr.bf16.mxu0 %v1737_v59 }
  0x73   :  { %1072 = vmatpush1.bf16.msra.mxu1 %v1732_v60  ;;  %v1268_v60 = vrot.slane %v1259_v54, %v1267_v55 }
  0x74   :  { %1178 = vmatpush1.bf16.msra.mxu0 %v1735_v61  ;;  %1073 = vmatprep.subr.bf16.mxu1 %v1740_v62  ;;  %v1284_v62 = vrot.slane %v1279_v56, %v1263_v53 }
  0x75   :  { %1179 = vmatprep.subr.bf16.mxu0 %v1743_v63 }
  0x77   :  { %1074 = vmatpush1.bf16.msra.mxu1 %v1738_v0 }
  0x78   :  { %1180 = vmatpush1.bf16.msra.mxu0 %v1741_v1  ;;  %1075 = vmatprep.subr.bf16.mxu1 %v1751_v2 }
  0x79   :  { %1181 = vmatprep.subr.bf16.mxu0 %v1755_v3  ;;  %v1288_v3 = vrot.slane %v1279_v56, %v1267_v55 }
  0x7b   :  { %1076 = vmatpush1.bf16.msra.mxu1 %v1749_v4 }
  0x7c   :  { %1182 = vmatpush1.bf16.msra.mxu0 %v1753_v5  ;;  %1077 = vmatprep.subr.bf16.mxu1 %v1758_v6 }
  0x7d   :  { %1183 = vmatprep.subr.bf16.mxu0 %v1761_v7 }
  0x7f   :  { %1078 = vmatpush1.bf16.msra.mxu1 %v1756_v8 }
  0x80   :  { %1184 = vmatpush1.bf16.msra.mxu0 %v1759_v9  ;;  %1509 = vmatprep.subr.bf16.mxu1 %v1770_v10 }
  0x81   :  { %1206 = vmatprep.subr.bf16.mxu0 %v1770_v10 }
  0x82   :  { %1080 = vmatmul.mubr.bf16.vlgmr.msra.gmra.mrb[0].mxu1 %v1762_v11 }
  0x83   :  { %1186 = vmatmul.mubr.bf16.vlgmr.msra.gmra.mrb[0].mxu0 %v1765_v12  ;;  %1517 = vmatpush1.bf16.msra.mxu1 %v1768_v13 }
  0x84   :  { %1207 = vmatpush1.bf16.msra.mxu0 %v1768_v13  ;;  %1510 = vmatprep.subr.bf16.mxu1 %v1773_v14 }
  0x85   :  { %1208 = vmatprep.subr.bf16.mxu0 %v1773_v14  ;;  %1089 = vmatprep.mubr.bf16.mxu1 %v1774_v15 }
  0x86   :  { %1195 = vmatprep.mubr.bf16.mxu0 %v1776_v16 }
  0x87   :  { %1518 = vmatpush1.bf16.msra.mxu1 %v1771_v17 }
  0x88   :  { %1209 = vmatpush1.bf16.msra.mxu0 %v1771_v17  ;;  %1511 = vmatprep.subr.bf16.mxu1 %v1782_v18 }
  0x89   :  { %1210 = vmatprep.subr.bf16.mxu0 %v1782_v18 }
  0x8a   :  { %1090 = vmatmul.mubr.bf16.gmra.mrb[4].mxu1 %v1778_v19 }
  0x8b   :  { %1196 = vmatmul.mubr.bf16.gmra.mrb[4].mxu0 %v1779_v20  ;;  %1519 = vmatpush1.bf16.msra.mxu1 %v1780_v21 }
  0x8c   :  { %1211 = vmatpush1.bf16.msra.mxu0 %v1780_v21  ;;  %1512 = vmatprep.subr.bf16.mxu1 %v1785_v22 }
  0x8d   :  { %1212 = vmatprep.subr.bf16.mxu0 %v1785_v22  ;;  %1238 = vmatprep.mubr.bf16.mxu0 %v1800_v25 }
  0x8e   :  { %1248 = vmatprep.mubr.bf16.mxu1 %v1800_v25 }
  0x8f   :  { %1520 = vmatpush1.bf16.msra.mxu1 %v1783_v23 }
  0x90   :  { %1213 = vmatpush1.bf16.msra.mxu0 %v1783_v23  ;;  %1513 = vmatprep.subr.bf16.mxu1 %v1788_v24 }
  0x91   :  { %1214 = vmatprep.subr.bf16.mxu0 %v1788_v24 }
  0x93   :  { %1521 = vmatpush1.bf16.msra.mxu1 %v1786_v26 }
  0x94   :  { %1215 = vmatpush1.bf16.msra.mxu0 %v1786_v26  ;;  %1514 = vmatprep.subr.bf16.mxu1 %v1791_v27 }
  0x95   :  { %1216 = vmatprep.subr.bf16.mxu0 %v1791_v27 }
  0x97   :  { %1522 = vmatpush1.bf16.msra.mxu1 %v1789_v28 }
  0x98   :  { %1217 = vmatpush1.bf16.msra.mxu0 %v1789_v28  ;;  %1515 = vmatprep.subr.bf16.mxu1 %v1794_v29 }
  0x99   :  { %1218 = vmatprep.subr.bf16.mxu0 %v1794_v29 }
  0x9b   :  { %1523 = vmatpush1.bf16.msra.mxu1 %v1792_v30 }
  0x9c   :  { %1219 = vmatpush1.bf16.msra.mxu0 %v1792_v30  ;;  %1516 = vmatprep.subr.bf16.mxu1 %v1797_v31 }
  0x9d   :  { %1220 = vmatprep.subr.bf16.mxu0 %v1797_v31 }
  0x9f   :  { %1524 = vmatpush1.bf16.msra.mxu1 %v1795_v32 }
  0xa0   :  { %1221 = vmatpush1.bf16.msra.mxu0 %v1795_v32 }
  0xa2   :  { %1249 = vmatmul.mubr.bf16.vlgmr.msra.gmra.mrb[8].mxu1 %v1799_v34 }
  0xa3   :  { %1239 = vmatmul.mubr.bf16.vlgmr.msra.gmra.mrb[0].mxu0 %v1798_v33 }
 0x155   :  { %v1081_v35 = vpop.f32.mrb[0].mxu1 }
 0x156   :  { %v1083_v36 = vpop.f32.mrb[1].mxu1 }
 0x157   :  { %v1085_v37 = vpop.f32.mrb[2].mxu1 }
 0x158   :  { %v1087_v38 = vpop.f32.mrb[3].mxu1 }
 0x15d   :  { %v1091_v39 = vpop.f32.mrb[4].mxu1 }
 0x15e   :  { %v1197_v40 = vpop.f32.mrb[4].mxu0  ;;  %v1093_v42 = vpop.f32.mrb[5].mxu1 }
 0x15f   :  { %v1529_v41 = vadd.f32 %v1197_v40, %v1091_v39  ;;  %v1199_v43 = vpop.f32.mrb[5].mxu0  ;;  %v1095_v45 = vpop.f32.mrb[6].mxu1 }
 0x160   :  { %v1531_v44 = vadd.f32 %v1199_v43, %v1093_v42  ;;  %v1201_v46 = vpop.f32.mrb[6].mxu0  ;;  %v1097_v48 = vpop.f32.mrb[7].mxu1 }
 0x161   :  { %v1533_v47 = vadd.f32 %v1201_v46, %v1095_v45  ;;  %v1203_v49 = vpop.f32.mrb[7].mxu0 }
 0x162   :  { %v1535_v50 = vadd.f32 %v1203_v49, %v1097_v48 }
 0x175   :  { %v1250_v59 = vpop.f32.mrb[8].mxu1 }
 0x176   :  { %v1240_v58 = vpop.f32.mrb[0].mxu0  ;;  %v1530_v63 = vadd.f32 %v1529_v41, %v1250_v59  ;;  %v1252_v1 = vpop.f32.mrb[9].mxu1 }
 0x177   :  { %v1525_v61 = vadd.f32 %v1240_v58, %v1081_v35  ;;  %v1242_v0 = vpop.f32.mrb[1].mxu0  ;;  %v1532_v4 = vadd.f32 %v1531_v44, %v1252_v1  ;;  %v1254_v6 = vpop.f32.mrb[10].mxu1 }
 0x178   :  { %v1526_v2 = vadd.f32 %v1242_v0, %v1083_v36  ;;  %v1244_v5 = vpop.f32.mrb[2].mxu0  ;;  %v1275_v8 = vmul.f32 %v1530_v63, %v1264_v57  ;;  %v1534_v10 = vadd.f32 %v1533_v47, %v1254_v6  ;;  %v1256_v12 = vpop.f32.mrb[11].mxu1 }
 0x179   :  { %v1271_v7 = vmul.f32 %v1525_v61, %v1264_v57  ;;  %v1527_v9 = vadd.f32 %v1244_v5, %v1085_v37  ;;  %v1246_v11 = vpop.f32.mrb[3].mxu0  ;;  %v1276_v14 = vmul.f32 %v1532_v4, %v1268_v60  ;;  %v1536_v16 = vadd.f32 %v1535_v50, %v1256_v12 }
 0x17a   :  { %v1272_v13 = vmul.f32 %v1526_v2, %v1268_v60  ;;  %v1528_v15 = vadd.f32 %v1246_v11, %v1087_v38  ;;  %v1295_v18 = vadd.f32 %v1284_v62, %v1275_v8  ;;  %v1277_v20 = vmul.f32 %v1534_v10, %v1264_v57 }
 0x17b   :  { %v1291_v17 = vadd.f32 %v1284_v62, %v1271_v7  ;;  %v1273_v19 = vmul.f32 %v1527_v9, %v1264_v57  ;;  %v1296_v22 = vadd.f32 %v1288_v3, %v1276_v14  ;;  %v1278_v24 = vmul.f32 %v1536_v16, %v1268_v60 }
 0x17c   :  { %v1292_v21 = vadd.f32 %v1288_v3, %v1272_v13  ;;  %v1274_v23 = vmul.f32 %v1528_v15, %v1268_v60  ;;  %v1303_v26 = vmax.f32 %v1295_v18, 0.0  ;;  %v1297_v28 = vadd.f32 %v1284_v62, %v1277_v20 }
 0x17d   :  { %v1299_v25 = vmax.f32 %v1291_v17, 0.0  ;;  %v1293_v27 = vadd.f32 %v1284_v62, %v1273_v19  ;;  %v1304_v30 = vmax.f32 %v1296_v22, 0.0  ;;  %v1298_v32 = vadd.f32 %v1288_v3, %v1278_v24 }
 0x17e   :  { %v1300_v29 = vmax.f32 %v1292_v21, 0.0  ;;  %v1294_v31 = vadd.f32 %v1288_v3, %v1274_v23  ;;  %v1305_v34 = vmax.f32 %v1297_v28, 0.0 }
 0x17f   :  { %v1301_v33 = vmax.f32 %v1293_v27, 0.0  ;;  %v1507_v36 = vpack.c.bf16 %v1304_v30, %v1303_v26  ;;  %v1306_v38 = vmax.f32 %v1298_v32, 0.0 }
 0x180   :  { %v1505_v35 = vpack.c.bf16 %v1300_v29, %v1299_v25  ;;  %v1302_v37 = vmax.f32 %v1294_v31, 0.0 }
 0x181   :  { %1333 = vst [vmem:[%s2334_s4 + $0x10] sm:$0xff] %v1507_v36  ;;  %v1508_v40 = vpack.c.bf16 %v1306_v38, %v1305_v34 }
 0x182   :  { %1331 = vst [vmem:[%s2334_s4] sm:$0xff] %v1505_v35  ;;  %v1506_v39 = vpack.c.bf16 %v1302_v37, %v1301_v33 }
 0x183   :  { %1334 = vst [vmem:[%s2334_s4 + $0x18] sm:$0xff] %v1508_v40 }
 0x184   :  { %1332 = vst [vmem:[%s2334_s4 + $0x8] sm:$0xff] %v1506_v39 }

// kernel: forward.15
= control target key start
LH: loop header
LB: loop body
LE: loop exit
PB: predicated region body
PF: predicated region fallthrough
CT: control target
= control target key end

     0   :  { %12 = vsyncpa [#allocation4], 0  ;;  %s8012_s24 = smov 0   ;;  %s9602_s0 = inlined_call_operand.vmem [shape: bf16[2,4096], index: 0, kind: input, shape index: {}]   ;;  %s9603_s1 = inlined_call_operand.vmem [shape: bf16[4096,1024], index: 1, kind: input, shape index: {}]   ;;  %s9604_s2 = inlined_call_operand.vmem [shape: f32[1,1024], index: 2, kind: input, shape index: {}]   ;;  %s9605_s3 = inlined_call_operand.vmem [shape: bf16[1024,512], index: 3, kind: input, shape index: {}]   ;;  %s9606_s4 = inlined_call_operand.vmem [shape: f32[1,512], index: 4, kind: input, shape index: {}]   ;;  %s9607_s5 = inlined_call_operand.vmem [shape: bf16[512,10], index: 5, kind: input, shape index: {}]   ;;  %s9608_s6 = inlined_call_operand.vmem [shape: f32[1,10], index: 6, kind: input, shape index: {}]   ;;  %s9609_s7 = inlined_call_operand.hbm [shape: f32[2,10], index: 7, kind: output, shape index: {}]  }
   0x1 LB: > { %s8018_s25 = sadd.s32 4294967295, %s7966_s24   ;;  %p6562_p0 = scmp.ge.s32.totalorder %s7966_s24, 1  ;;  %s7966_s24 = sphi %s8012_s24, %s18_s24  }
   0x2   : > { %p245_p1 = scmp.lt.s32.totalorder %s7966_s24, 5 }
   0x4   : > { %p246_p2 = pnand %p6562_p0, %p245_p1 }
   0x5   : > { %s6563_s26 = sshll.u32 (!%p246_p2), %s8018_s25, 3  ;;  %s6564_s27 = sshll.u32 (!%p246_p2), %s8018_s25, 7 }
   0x6   : > { %249 = sbr.rel (%p246_p2) target bundleno = 1432 (0x598), region = 48  ;;  %p278_p3 = scmp.lt.s32.totalorder (!%p246_p2), %s6563_s26, 31 }
   0x7   : > { %p283_p4 = scmp.lt.s32.totalorder (!%p246_p2), %s6564_s27, 511  ;;  %p6567_p5 = scmp.ne.s32.totalorder (!%p246_p2), %s8018_s25, 0 }
   0xd   : > { %s9611_s26 = smov (!%p278_p3, %s6563_s26), 31  ;;  %s9613_s27 = smov (!%p283_p4, %s6564_s27), 511 }
   0xe   : > { %s280_s30 = scalar_lea.vmem %s9602_s0, %s9611_s26  ;;  %s7374_s8 = sshll.u32 %s9613_s27, 5  ;;  %v7968_v0 = vmov (!%p6567_p5), 0.0  }
   0xf   : > { %s8033_s11 = scalar_lea.vmem %s9603_s1, %s7374_s8  ;;  %293 = sbr.rel (%p6567_p5) target bundleno = 22 (0x16), region = 52  ;;  %294 = vst [vmem:[#allocation2] sm:$0xff] (!%p6567_p5), %v7968_v0  ;;  %295 = vst [vmem:[#allocation2 + $0x8] sm:$0xff] (!%p6567_p5), %v7968_v0 }
  0x16 PF: > { %v299_v1 = vld [vmem:[%s8033_s11] sm:$0xff]  ;;  %v300_v3 = vld [vmem:[%s8033_s11 + $0x8] sm:$0xff]  ;;  %v7969_v33 = vmov 1966171168   ;;  %v816_v35 = vlaneseq  ;;  %p7080_p6 = scmp.ne.s32.totalorder %s8018_s25, 3 }
  0x17   : > { %v303_v2 = vld [vmem:[%s8033_s11 + $0x20] sm:$0xff]  ;;  %v304_v5 = vld [vmem:[%s8033_s11 + $0x28] sm:$0xff]  ;;  %v814_v34 = vunpack.c.l.s4 %v7969_v33  ;;  %vm6502_vm0 = vcmask (!%p7080_p6), 74752  }
  0x18   : > { %v6569_v4 = vcombine.high %v299_v1, %v303_v2  ;;  %v6568_v6 = vcombine.low %v299_v1, %v303_v2  ;;  %v307_v7 = vld [vmem:[%s8033_s11 + $0x40] sm:$0xff]  ;;  %v6571_v9 = vcombine.high %v300_v3, %v304_v5  ;;  %v6570_v10 = vcombine.low %v300_v3, %v304_v5  ;;  %v308_v12 = vld [vmem:[%s8033_s11 + $0x48] sm:$0xff] }
  0x19   : > { %v311_v8 = vld [vmem:[%s8033_s11 + $0x60] sm:$0xff]  ;;  %v312_v13 = vld [vmem:[%s8033_s11 + $0x68] sm:$0xff]  ;;  %v815_v44 = vunpack.c.0.s8 %v814_v34  ;;  %v8058_v45 = vshrl.u32 %v816_v35, 7 }
  0x1a   : > { %v6577_v11 = vcombine.high %v307_v7, %v311_v8  ;;  %v315_v14 = vld [vmem:[%s8033_s11 + $0x80] sm:$0xff]  ;;  %3429 = vmatprep.subr.bf16.mxu0 %v6569_v4  ;;  %v6579_v15 = vcombine.high %v308_v12, %v312_v13  ;;  %v316_v17 = vld [vmem:[%s8033_s11 + $0x88] sm:$0xff]  ;;  %3593 = vmatprep.subr.bf16.mxu1 %v6571_v9  ;;  %v6576_v19 = vcombine.low %v307_v7, %v311_v8 }
  0x1b   : > { %v319_v16 = vld [vmem:[%s8033_s11 + $0xa0] sm:$0xff]  ;;  %v320_v18 = vld [vmem:[%s8033_s11 + $0xa8] sm:$0xff]  ;;  %3430 = vmatpush1.bf16.msra.mxu0 %v6568_v6  ;;  %3594 = vmatpush1.bf16.msra.mxu1 %v6570_v10  ;;  %v6578_v20 = vcombine.low %v308_v12, %v312_v13  ;;  %v8065_v54 = vsub.s32 %v815_v44, %v8058_v45 }
  0x1c   : > { %3431 = vmatprep.subr.bf16.mxu0 %v6577_v11  ;;  %v6585_v21 = vcombine.high %v315_v14, %v319_v16  ;;  %3595 = vmatprep.subr.bf16.mxu1 %v6579_v15  ;;  %v6587_v22 = vcombine.high %v316_v17, %v320_v18  ;;  %v323_v23 = vld [vmem:[%s8033_s11 + $0xc0] sm:$0xff]  ;;  %v324_v25 = vld [vmem:[%s8033_s11 + $0xc8] sm:$0xff]  ;;  %v6584_v27 = vcombine.low %v315_v14, %v319_v16 }
  0x1d   : > { %v327_v24 = vld [vmem:[%s8033_s11 + $0xe0] sm:$0xff]  ;;  %v328_v26 = vld [vmem:[%s8033_s11 + $0xe8] sm:$0xff]  ;;  %v6586_v28 = vcombine.low %v316_v17, %v320_v18 }
  0x1e   : > { %v6593_v29 = vcombine.high %v323_v23, %v327_v24  ;;  %v6595_v30 = vcombine.high %v324_v25, %v328_v26  ;;  %v331_v31 = vld [vmem:[%s8033_s11 + $0x100] sm:$0xff]  ;;  %v332_v36 = vld [vmem:[%s8033_s11 + $0x108] sm:$0xff]  ;;  %v6592_v38 = vcombine.low %v323_v23, %v327_v24  ;;  %v6594_v39 = vcombine.low %v324_v25, %v328_v26 }
  0x1f   : > { %3432 = vmatpush1.bf16.msra.mxu0 %v6576_v19  ;;  %3596 = vmatpush1.bf16.msra.mxu1 %v6578_v20  ;;  %v335_v32 = vld [vmem:[%s8033_s11 + $0x120] sm:$0xff]  ;;  %v336_v37 = vld [vmem:[%s8033_s11 + $0x128] sm:$0xff] }
  0x20   : > { %3433 = vmatprep.subr.bf16.mxu0 %v6585_v21  ;;  %3597 = vmatprep.subr.bf16.mxu1 %v6587_v22  ;;  %v6601_v40 = vcombine.high %v331_v31, %v335_v32  ;;  %v6603_v41 = vcombine.high %v332_v36, %v336_v37  ;;  %v339_v42 = vld [vmem:[%s8033_s11 + $0x140] sm:$0xff]  ;;  %v340_v46 = vld [vmem:[%s8033_s11 + $0x148] sm:$0xff]  ;;  %v6600_v48 = vcombine.low %v331_v31, %v335_v32 }
  0x21   : > { %v343_v43 = vld [vmem:[%s8033_s11 + $0x160] sm:$0xff]  ;;  %v344_v47 = vld [vmem:[%s8033_s11 + $0x168] sm:$0xff]  ;;  %v6602_v49 = vcombine.low %v332_v36, %v336_v37 }
  0x22   : > { %v6609_v50 = vcombine.high %v339_v42, %v343_v43  ;;  %v6611_v51 = vcombine.high %v340_v46, %v344_v47  ;;  %v347_v52 = vld [vmem:[%s8033_s11 + $0x180] sm:$0xff]  ;;  %v348_v55 = vld [vmem:[%s8033_s11 + $0x188] sm:$0xff]  ;;  %v6608_v57 = vcombine.low %v339_v42, %v343_v43  ;;  %v6610_v58 = vcombine.low %v340_v46, %v344_v47 }
  0x23   : > { %3434 = vmatpush1.bf16.msra.mxu0 %v6584_v27  ;;  %3598 = vmatpush1.bf16.msra.mxu1 %v6586_v28  ;;  %v351_v53 = vld [vmem:[%s8033_s11 + $0x1a0] sm:$0xff]  ;;  %v352_v56 = vld [vmem:[%s8033_s11 + $0x1a8] sm:$0xff] }
  0x24   : > { %3435 = vmatprep.subr.bf16.mxu0 %v6593_v29  ;;  %3599 = vmatprep.subr.bf16.mxu1 %v6595_v30  ;;  %v6617_v59 = vcombine.high %v347_v52, %v351_v53  ;;  %v8074_v60 = vld [vmem:[%s280_s30] sm:$0xff]  ;;  %v6619_v61 = vcombine.high %v348_v55, %v352_v56  ;;  %v356_v1 = vld [vmem:[%s8033_s11 + $0x1c8] sm:$0xff]  ;;  %v6616_v3 = vcombine.low %v347_v52, %v351_v53 }
  0x25   : > { %v355_v62 = vld [vmem:[%s8033_s11 + $0x1c0] sm:$0xff]  ;;  %v8080_v0 = vrot.slane %v8074_v60, %v8065_v54  ;;  %v360_v2 = vld [vmem:[%s8033_s11 + $0x1e8] sm:$0xff]  ;;  %v6618_v5 = vcombine.low %v348_v55, %v352_v56 }
  0x26   : > { %v359_v63 = vld [vmem:[%s8033_s11 + $0x1e0] sm:$0xff]  ;;  %v6627_v7 = vcombine.high %v356_v1, %v360_v2  ;;  %v364_v11 = vld [vmem:[%s8033_s11 + $0x208] sm:$0xff]  ;;  %v6626_v14 = vcombine.low %v356_v1, %v360_v2 }
  0x27   : > { %3436 = vmatpush1.bf16.msra.mxu0 %v6592_v38  ;;  %3600 = vmatpush1.bf16.msra.mxu1 %v6594_v39  ;;  %v827_v4 = vcombine.high %v8080_v0, %v8080_v0  ;;  %v6625_v6 = vcombine.high %v355_v62, %v359_v63  ;;  %v363_v8 = vld [vmem:[%s8033_s11 + $0x200] sm:$0xff]  ;;  %v368_v12 = vld [vmem:[%s8033_s11 + $0x228] sm:$0xff]  ;;  %v6624_v13 = vcombine.low %v355_v62, %v359_v63 }
  0x28   : > { %3437 = vmatprep.subr.bf16.mxu0 %v6601_v40  ;;  %3601 = vmatprep.subr.bf16.mxu1 %v6603_v41  ;;  %v367_v9 = vld [vmem:[%s8033_s11 + $0x220] sm:$0xff]  ;;  %v6635_v16 = vcombine.high %v364_v11, %v368_v12  ;;  %v372_v19 = vld [vmem:[%s8033_s11 + $0x248] sm:$0xff]  ;;  %v6634_v22 = vcombine.low %v364_v11, %v368_v12 }
  0x29   : > { %v8089_v10 = vrot.slane %v827_v4, %v8065_v54  ;;  %v6633_v15 = vcombine.high %v363_v8, %v367_v9  ;;  %v371_v17 = vld [vmem:[%s8033_s11 + $0x240] sm:$0xff]  ;;  %v376_v20 = vld [vmem:[%s8033_s11 + $0x268] sm:$0xff]  ;;  %v6632_v21 = vcombine.low %v363_v8, %v367_v9 }
  0x2a   : > { %v375_v18 = vld [vmem:[%s8033_s11 + $0x260] sm:$0xff]  ;;  %v6643_v24 = vcombine.high %v372_v19, %v376_v20  ;;  %v380_v27 = vld [vmem:[%s8033_s11 + $0x288] sm:$0xff]  ;;  %v6642_v30 = vcombine.low %v372_v19, %v376_v20  ;;  %v812_v19 = vcombine.high %v8074_v60, %v8074_v60 }
  0x2b   : > { %3438 = vmatpush1.bf16.msra.mxu0 %v6600_v48  ;;  %3602 = vmatpush1.bf16.msra.mxu1 %v6602_v49  ;;  %v6641_v23 = vcombine.high %v371_v17, %v375_v18  ;;  %v379_v25 = vld [vmem:[%s8033_s11 + $0x280] sm:$0xff]  ;;  %v384_v28 = vld [vmem:[%s8033_s11 + $0x2a8] sm:$0xff]  ;;  %v6640_v29 = vcombine.low %v371_v17, %v375_v18 }
  0x2c   : > { %3439 = vmatprep.subr.bf16.mxu0 %v6609_v50  ;;  %3603 = vmatprep.subr.bf16.mxu1 %v6611_v51  ;;  %v383_v26 = vld [vmem:[%s8033_s11 + $0x2a0] sm:$0xff]  ;;  %v6651_v32 = vcombine.high %v380_v27, %v384_v28  ;;  %v388_v35 = vld [vmem:[%s8033_s11 + $0x2c8] sm:$0xff]  ;;  %v6650_v38 = vcombine.low %v380_v27, %v384_v28 }
  0x2d   : > { %3461 = vmatprep.mubr.bf16.mxu0 %v8089_v10  ;;  %3625 = vmatprep.mubr.bf16.mxu1 %v8089_v10  ;;  %v6649_v31 = vcombine.high %v379_v25, %v383_v26  ;;  %v387_v33 = vld [vmem:[%s8033_s11 + $0x2c0] sm:$0xff]  ;;  %v392_v36 = vld [vmem:[%s8033_s11 + $0x2e8] sm:$0xff]  ;;  %v6648_v37 = vcombine.low %v379_v25, %v383_v26  ;;  %v826_v25 = vrot.slane %v812_v19, %v8065_v54 }
  0x2e   : > { %v391_v34 = vld [vmem:[%s8033_s11 + $0x2e0] sm:$0xff]  ;;  %v6659_v40 = vcombine.high %v388_v35, %v392_v36  ;;  %v396_v43 = vld [vmem:[%s8033_s11 + $0x308] sm:$0xff]  ;;  %v6658_v47 = vcombine.low %v388_v35, %v392_v36  ;;  %v8134_v26 = vrot.slane %v8080_v0, %v8065_v54  ;;  %v8142_v0 = vcombine.high %v8089_v10, %v8089_v10 }
  0x2f   : > { %3440 = vmatpush1.bf16.msra.mxu0 %v6608_v57  ;;  %3604 = vmatpush1.bf16.msra.mxu1 %v6610_v58  ;;  %v6657_v39 = vcombine.high %v387_v33, %v391_v34  ;;  %v395_v41 = vld [vmem:[%s8033_s11 + $0x300] sm:$0xff]  ;;  %v400_v44 = vld [vmem:[%s8033_s11 + $0x328] sm:$0xff]  ;;  %v6656_v46 = vcombine.low %v387_v33, %v391_v34  ;;  %v8148_v36 = vrot.slane %v826_v25, %v8065_v54 }
  0x30   : > { %3441 = vmatprep.subr.bf16.mxu0 %v6617_v59  ;;  %3605 = vmatprep.subr.bf16.mxu1 %v6619_v61  ;;  %v399_v42 = vld [vmem:[%s8033_s11 + $0x320] sm:$0xff]  ;;  %v6667_v49 = vcombine.high %v396_v43, %v400_v44  ;;  %v404_v52 = vld [vmem:[%s8033_s11 + $0x348] sm:$0xff]  ;;  %v6666_v56 = vcombine.low %v396_v43, %v400_v44 }
  0x31   : > { %v6665_v48 = vcombine.high %v395_v41, %v399_v42  ;;  %v403_v50 = vld [vmem:[%s8033_s11 + $0x340] sm:$0xff]  ;;  %v408_v53 = vld [vmem:[%s8033_s11 + $0x368] sm:$0xff]  ;;  %v6664_v55 = vcombine.low %v395_v41, %v399_v42 }
  0x32   : > { %v407_v51 = vld [vmem:[%s8033_s11 + $0x360] sm:$0xff]  ;;  %v6675_v58 = vcombine.high %v404_v52, %v408_v53  ;;  %v412_v62 = vld [vmem:[%s8033_s11 + $0x388] sm:$0xff]  ;;  %v6674_v2 = vcombine.low %v404_v52, %v408_v53 }
  0x33   : > { %3442 = vmatpush1.bf16.msra.mxu0 %v6616_v3  ;;  %3606 = vmatpush1.bf16.msra.mxu1 %v6618_v5  ;;  %v6673_v57 = vcombine.high %v403_v50, %v407_v51  ;;  %v411_v59 = vld [vmem:[%s8033_s11 + $0x380] sm:$0xff]  ;;  %v416_v63 = vld [vmem:[%s8033_s11 + $0x3a8] sm:$0xff]  ;;  %v6672_v1 = vcombine.low %v403_v50, %v407_v51 }
  0x34   : > { %3443 = vmatprep.subr.bf16.mxu0 %v6625_v6  ;;  %3607 = vmatprep.subr.bf16.mxu1 %v6627_v7  ;;  %v415_v61 = vld [vmem:[%s8033_s11 + $0x3a0] sm:$0xff]  ;;  %v6683_v4 = vcombine.high %v412_v62, %v416_v63  ;;  %v420_v7 = vld [vmem:[%s8033_s11 + $0x3c8] sm:$0xff]  ;;  %v6682_v11 = vcombine.low %v412_v62, %v416_v63 }
  0x35   : > { %v6681_v3 = vcombine.high %v411_v59, %v415_v61  ;;  %v419_v5 = vld [vmem:[%s8033_s11 + $0x3c0] sm:$0xff]  ;;  %v424_v8 = vld [vmem:[%s8033_s11 + $0x3e8] sm:$0xff]  ;;  %v6680_v9 = vcombine.low %v411_v59, %v415_v61 }
  0x36   : > { %v423_v6 = vld [vmem:[%s8033_s11 + $0x3e0] sm:$0xff]  ;;  %v432_v17 = vld [vmem:[%s8033_s11 + $0x428] sm:$0xff]  ;;  %v6690_v20 = vcombine.low %v420_v7, %v424_v8 }
  0x37   : > { %3444 = vmatpush1.bf16.msra.mxu0 %v6624_v13  ;;  %3608 = vmatpush1.bf16.msra.mxu1 %v6626_v14  ;;  %v6689_v12 = vcombine.high %v419_v5, %v423_v6  ;;  %v6691_v13 = vcombine.high %v420_v7, %v424_v8  ;;  %v427_v14 = vld [vmem:[%s8033_s11 + $0x400] sm:$0xff]  ;;  %v6688_v18 = vcombine.low %v419_v5, %v423_v6  ;;  %v436_v27 = vld [vmem:[%s8033_s11 + $0x448] sm:$0xff] }
  0x38   : > { %3445 = vmatprep.subr.bf16.mxu0 %v6633_v15  ;;  %3609 = vmatprep.subr.bf16.mxu1 %v6635_v16  ;;  %v431_v15 = vld [vmem:[%s8033_s11 + $0x420] sm:$0xff]  ;;  %v428_v16 = vld [vmem:[%s8033_s11 + $0x408] sm:$0xff] }
  0x39   : > { %v440_v28 = vld [vmem:[%s8033_s11 + $0x468] sm:$0xff]  ;;  %v6696_v60 = vcombine.low %v427_v14, %v431_v15  ;;  %v443_v33 = vld [vmem:[%s8033_s11 + $0x480] sm:$0xff] }
  0x3a   : > { %v447_v34 = vld [vmem:[%s8033_s11 + $0x4a0] sm:$0xff]  ;;  %v452_v44 = vld [vmem:[%s8033_s11 + $0x4c8] sm:$0xff] }
  0x3b   : > { %3446 = vmatpush1.bf16.msra.mxu0 %v6632_v21  ;;  %3610 = vmatpush1.bf16.msra.mxu1 %v6634_v22  ;;  %v6697_v21 = vcombine.high %v427_v14, %v431_v15  ;;  %v6699_v22 = vcombine.high %v428_v16, %v432_v17  ;;  %v6713_v41 = vcombine.high %v443_v33, %v447_v34  ;;  %v455_v43 = vld [vmem:[%s8033_s11 + $0x4e0] sm:$0xff]  ;;  %v460_v53 = vld [vmem:[%s8033_s11 + $0x508] sm:$0xff] }
  0x3c   : > { %3447 = vmatprep.subr.bf16.mxu0 %v6641_v23  ;;  %3611 = vmatprep.subr.bf16.mxu1 %v6643_v24  ;;  %v435_v23 = vld [vmem:[%s8033_s11 + $0x440] sm:$0xff]  ;;  %v468_v63 = vld [vmem:[%s8033_s11 + $0x548] sm:$0xff] }
  0x3d   : > { %v439_v24 = vld [vmem:[%s8033_s11 + $0x460] sm:$0xff]  ;;  %v476_v8 = vld [vmem:[%s8033_s11 + $0x588] sm:$0xff] }
  0x3e   : > { %v459_v51 = vld [vmem:[%s8033_s11 + $0x500] sm:$0xff] }
  0x3f   : > { %3448 = vmatpush1.bf16.msra.mxu0 %v6640_v29  ;;  %3612 = vmatpush1.bf16.msra.mxu1 %v6642_v30  ;;  %v828_v29 = vcombine.high %v826_v25, %v826_v25  ;;  %v6698_v30 = vcombine.low %v428_v16, %v432_v17  ;;  %v463_v52 = vld [vmem:[%s8033_s11 + $0x520] sm:$0xff]  ;;  %v484_v17 = vld [vmem:[%s8033_s11 + $0x5c8] sm:$0xff] }
  0x40   : > { %3449 = vmatprep.subr.bf16.mxu0 %v6649_v31  ;;  %3613 = vmatprep.subr.bf16.mxu1 %v6651_v32  ;;  %v6705_v31 = vcombine.high %v435_v23, %v439_v24  ;;  %v6707_v32 = vcombine.high %v436_v27, %v440_v28  ;;  %v467_v61 = vld [vmem:[%s8033_s11 + $0x540] sm:$0xff]  ;;  %v492_v25 = vld [vmem:[%s8033_s11 + $0x608] sm:$0xff] }
  0x41   : > { %v8145_v35 = vrot.slane %v828_v29, %v8065_v54  ;;  %v451_v54 = vld [vmem:[%s8033_s11 + $0x4c0] sm:$0xff] }
  0x42   : > { %v471_v62 = vld [vmem:[%s8033_s11 + $0x560] sm:$0xff] }
  0x43   : > { %3450 = vmatpush1.bf16.msra.mxu0 %v6648_v37  ;;  %3614 = vmatpush1.bf16.msra.mxu1 %v6650_v38  ;;  %v444_v37 = vld [vmem:[%s8033_s11 + $0x488] sm:$0xff]  ;;  %v475_v6 = vld [vmem:[%s8033_s11 + $0x580] sm:$0xff] }
  0x44   : > { %3451 = vmatprep.subr.bf16.mxu0 %v6657_v39  ;;  %3615 = vmatprep.subr.bf16.mxu1 %v6659_v40  ;;  %v448_v38 = vld [vmem:[%s8033_s11 + $0x4a8] sm:$0xff]  ;;  %v6704_v39 = vcombine.low %v435_v23, %v439_v24  ;;  %v6706_v40 = vcombine.low %v436_v27, %v440_v28  ;;  %v479_v7 = vld [vmem:[%s8033_s11 + $0x5a0] sm:$0xff] }
  0x45   : > { %v6715_v42 = vcombine.high %v444_v37, %v448_v38  ;;  %v483_v15 = vld [vmem:[%s8033_s11 + $0x5c0] sm:$0xff]  ;;  %v6744_v19 = vcombine.low %v475_v6, %v479_v7  ;;  %v496_v27 = vld [vmem:[%s8033_s11 + $0x628] sm:$0xff] }
  0x46   : > { %v487_v16 = vld [vmem:[%s8033_s11 + $0x5e0] sm:$0xff] }
  0x47   : > { %3452 = vmatpush1.bf16.msra.mxu0 %v6656_v46  ;;  %3616 = vmatpush1.bf16.msra.mxu1 %v6658_v47  ;;  %v456_v46 = vld [vmem:[%s8033_s11 + $0x4e8] sm:$0xff]  ;;  %v6712_v47 = vcombine.low %v443_v33, %v447_v34  ;;  %v491_v23 = vld [vmem:[%s8033_s11 + $0x600] sm:$0xff]  ;;  %v6752_v28 = vcombine.low %v483_v15, %v487_v16 }
  0x48   : > { %3453 = vmatprep.subr.bf16.mxu0 %v6665_v48  ;;  %3617 = vmatprep.subr.bf16.mxu1 %v6667_v49  ;;  %v6714_v48 = vcombine.low %v444_v37, %v448_v38  ;;  %v6721_v49 = vcombine.high %v451_v54, %v455_v43  ;;  %v6723_v50 = vcombine.high %v452_v44, %v456_v46  ;;  %v495_v24 = vld [vmem:[%s8033_s11 + $0x620] sm:$0xff]  ;;  %v500_v33 = vld [vmem:[%s8033_s11 + $0x648] sm:$0xff] }
  0x49   : > { %v6761_v29 = vcombine.high %v491_v23, %v495_v24  ;;  %v504_v34 = vld [vmem:[%s8033_s11 + $0x668] sm:$0xff]  ;;  %v6760_v37 = vcombine.low %v491_v23, %v495_v24  ;;  %v6762_v38 = vcombine.low %v492_v25, %v496_v27 }
  0x4a   : > { %v548_v23 = vld [vmem:[%s8033_s11 + $0x7c8] sm:$0xff] }
  0x4b   : > { %3454 = vmatpush1.bf16.msra.mxu0 %v6664_v55  ;;  %3618 = vmatpush1.bf16.msra.mxu1 %v6666_v56  ;;  %v464_v55 = vld [vmem:[%s8033_s11 + $0x528] sm:$0xff]  ;;  %v6720_v56 = vcombine.low %v451_v54, %v455_v43 }
  0x4c   : > { %3455 = vmatprep.subr.bf16.mxu0 %v6673_v57  ;;  %3619 = vmatprep.subr.bf16.mxu1 %v6675_v58  ;;  %v6722_v57 = vcombine.low %v452_v44, %v456_v46  ;;  %v6729_v58 = vcombine.high %v459_v51, %v463_v52  ;;  %v6731_v59 = vcombine.high %v460_v53, %v464_v55  ;;  %v508_v54 = vld [vmem:[%s8033_s11 + $0x688] sm:$0xff] }
  0x4d   : > { %v512_v43 = vld [vmem:[%s8033_s11 + $0x6a8] sm:$0xff]  ;;  %v6770_v46 = vcombine.low %v500_v33, %v504_v34 }
  0x4e   : > { %v552_v24 = vld [vmem:[%s8033_s11 + $0x7e8] sm:$0xff] }
  0x4f   : > { %3456 = vmatpush1.bf16.msra.mxu0 %v6672_v1  ;;  %3620 = vmatpush1.bf16.msra.mxu1 %v6674_v2  ;;  %v472_v1 = vld [vmem:[%s8033_s11 + $0x568] sm:$0xff]  ;;  %v6728_v2 = vcombine.low %v459_v51, %v463_v52 }
  0x50   : > { %3457 = vmatprep.subr.bf16.mxu0 %v6681_v3  ;;  %3621 = vmatprep.subr.bf16.mxu1 %v6683_v4  ;;  %v6730_v3 = vcombine.low %v460_v53, %v464_v55  ;;  %v6737_v4 = vcombine.high %v467_v61, %v471_v62  ;;  %v6739_v5 = vcombine.high %v468_v63, %v472_v1  ;;  %v516_v51 = vld [vmem:[%s8033_s11 + $0x6c8] sm:$0xff] }
  0x51   : > { %v520_v52 = vld [vmem:[%s8033_s11 + $0x6e8] sm:$0xff]  ;;  %v6778_v55 = vcombine.low %v508_v54, %v512_v43 }
  0x53   : > { %3458 = vmatpush1.bf16.msra.mxu0 %v6680_v9  ;;  %3622 = vmatpush1.bf16.msra.mxu1 %v6682_v11  ;;  %v480_v9 = vld [vmem:[%s8033_s11 + $0x5a8] sm:$0xff]  ;;  %v6736_v11 = vcombine.low %v467_v61, %v471_v62 }
  0x54   : > { %3459 = vmatprep.subr.bf16.mxu0 %v6689_v12  ;;  %3623 = vmatprep.subr.bf16.mxu1 %v6691_v13  ;;  %v6738_v12 = vcombine.low %v468_v63, %v472_v1  ;;  %v6745_v13 = vcombine.high %v475_v6, %v479_v7  ;;  %v6747_v14 = vcombine.high %v476_v8, %v480_v9  ;;  %v524_v61 = vld [vmem:[%s8033_s11 + $0x708] sm:$0xff] }
  0x55   : > { %v528_v62 = vld [vmem:[%s8033_s11 + $0x728] sm:$0xff]  ;;  %v6786_v1 = vcombine.low %v516_v51, %v520_v52 }
  0x56   : > { %v532_v6 = vld [vmem:[%s8033_s11 + $0x748] sm:$0xff] }
  0x57   : > { %3460 = vmatpush1.bf16.msra.mxu0 %v6688_v18  ;;  %3624 = vmatpush1.bf16.msra.mxu1 %v6690_v20  ;;  %v488_v18 = vld [vmem:[%s8033_s11 + $0x5e8] sm:$0xff]  ;;  %v6746_v20 = vcombine.low %v476_v8, %v480_v9  ;;  %v6794_v9 = vcombine.low %v524_v61, %v528_v62 }
  0x58   : > { %3470 = vmatprep.subr.bf16.mxu0 %v6697_v21  ;;  %3634 = vmatprep.subr.bf16.mxu1 %v6699_v22  ;;  %v6753_v21 = vcombine.high %v483_v15, %v487_v16  ;;  %v6755_v22 = vcombine.high %v484_v17, %v488_v18  ;;  %v536_v7 = vld [vmem:[%s8033_s11 + $0x768] sm:$0xff] }
  0x59   : > { %v540_v15 = vld [vmem:[%s8033_s11 + $0x788] sm:$0xff] }
  0x5a   : > { %3462 = vmatmul.mubr.bf16.vlgmr.msra.gmra.mrb[0].mxu0 %v8134_v26  ;;  %3626 = vmatmul.mubr.bf16.vlgmr.msra.gmra.mrb[0].mxu1 %v8134_v26  ;;  %v544_v16 = vld [vmem:[%s8033_s11 + $0x7a8] sm:$0xff] }
  0x5b   : > { %3471 = vmatpush1.bf16.msra.mxu0 %v6696_v60  ;;  %3635 = vmatpush1.bf16.msra.mxu1 %v6698_v30  ;;  %v6754_v60 = vcombine.low %v484_v17, %v488_v18  ;;  %v6763_v30 = vcombine.high %v492_v25, %v496_v27  ;;  %v6802_v18 = vcombine.low %v532_v6, %v536_v7 }
  0x5c   : > { %3472 = vmatprep.subr.bf16.mxu0 %v6705_v31  ;;  %3636 = vmatprep.subr.bf16.mxu1 %v6707_v32  ;;  %v499_v31 = vld [vmem:[%s8033_s11 + $0x640] sm:$0xff]  ;;  %v6810_v27 = vcombine.low %v540_v15, %v544_v16 }
  0x5d   : > { %3502 = vmatprep.mubr.bf16.mxu0 %v8142_v0  ;;  %3666 = vmatprep.mubr.bf16.mxu1 %v8142_v0  ;;  %v503_v32 = vld [vmem:[%s8033_s11 + $0x660] sm:$0xff] }
  0x5e   : > { %v6768_v44 = vcombine.low %v499_v31, %v503_v32 }
  0x5f   : > { %3473 = vmatpush1.bf16.msra.mxu0 %v6704_v39  ;;  %3637 = vmatpush1.bf16.msra.mxu1 %v6706_v40  ;;  %v6769_v39 = vcombine.high %v499_v31, %v503_v32  ;;  %v6771_v40 = vcombine.high %v500_v33, %v504_v34  ;;  %v556_v31 = vld [vmem:[%s8033_s11 + $0x808] sm:$0xff]  ;;  %v6818_v34 = vcombine.low %v548_v23, %v552_v24 }
  0x60   : > { %3474 = vmatprep.subr.bf16.mxu0 %v6713_v41  ;;  %3638 = vmatprep.subr.bf16.mxu1 %v6715_v42  ;;  %v507_v41 = vld [vmem:[%s8033_s11 + $0x680] sm:$0xff]  ;;  %v560_v32 = vld [vmem:[%s8033_s11 + $0x828] sm:$0xff] }
  0x61   : > { %v511_v42 = vld [vmem:[%s8033_s11 + $0x6a0] sm:$0xff] }
  0x62   : > { %v6776_v53 = vcombine.low %v507_v41, %v511_v42 }
  0x63   : > { %3475 = vmatpush1.bf16.msra.mxu0 %v6712_v47  ;;  %3639 = vmatpush1.bf16.msra.mxu1 %v6714_v48  ;;  %v6777_v47 = vcombine.high %v507_v41, %v511_v42  ;;  %v6779_v48 = vcombine.high %v508_v54, %v512_v43  ;;  %v8216_v41 = vcombine.high %v8134_v26, %v8134_v26  ;;  %v564_v42 = vld [vmem:[%s8033_s11 + $0x848] sm:$0xff] }
  0x64   : > { %3476 = vmatprep.subr.bf16.mxu0 %v6721_v49  ;;  %3640 = vmatprep.subr.bf16.mxu1 %v6723_v50  ;;  %v515_v49 = vld [vmem:[%s8033_s11 + $0x6c0] sm:$0xff]  ;;  %v568_v54 = vld [vmem:[%s8033_s11 + $0x868] sm:$0xff] }
  0x65   : > { %v519_v50 = vld [vmem:[%s8033_s11 + $0x6e0] sm:$0xff] }
  0x66   : > { %v6784_v63 = vcombine.low %v515_v49, %v519_v50 }
  0x67   : > { %3477 = vmatpush1.bf16.msra.mxu0 %v6720_v56  ;;  %3641 = vmatpush1.bf16.msra.mxu1 %v6722_v57  ;;  %v6785_v56 = vcombine.high %v515_v49, %v519_v50  ;;  %v6787_v57 = vcombine.high %v516_v51, %v520_v52  ;;  %v575_v49 = vld [vmem:[%s8033_s11 + $0x8a0] sm:$0xff]  ;;  %v572_v50 = vld [vmem:[%s8033_s11 + $0x888] sm:$0xff] }
  0x68   : > { %3478 = vmatprep.subr.bf16.mxu0 %v6729_v58  ;;  %3642 = vmatprep.subr.bf16.mxu1 %v6731_v59  ;;  %v523_v58 = vld [vmem:[%s8033_s11 + $0x700] sm:$0xff]  ;;  %v576_v51 = vld [vmem:[%s8033_s11 + $0x8a8] sm:$0xff] }
  0x69   : > { %v527_v59 = vld [vmem:[%s8033_s11 + $0x720] sm:$0xff] }
  0x6a   : > { %v6792_v8 = vcombine.low %v523_v58, %v527_v59 }
  0x6b   : > { %3479 = vmatpush1.bf16.msra.mxu0 %v6728_v2  ;;  %3643 = vmatpush1.bf16.msra.mxu1 %v6730_v3  ;;  %v6793_v2 = vcombine.high %v523_v58, %v527_v59  ;;  %v6795_v3 = vcombine.high %v524_v61, %v528_v62  ;;  %v583_v58 = vld [vmem:[%s8033_s11 + $0x8e0] sm:$0xff]  ;;  %v580_v59 = vld [vmem:[%s8033_s11 + $0x8c8] sm:$0xff] }
  0x6c   : > { %3480 = vmatprep.subr.bf16.mxu0 %v6737_v4  ;;  %3644 = vmatprep.subr.bf16.mxu1 %v6739_v5  ;;  %v531_v4 = vld [vmem:[%s8033_s11 + $0x740] sm:$0xff]  ;;  %v584_v61 = vld [vmem:[%s8033_s11 + $0x8e8] sm:$0xff] }
  0x6d   : > { %v535_v5 = vld [vmem:[%s8033_s11 + $0x760] sm:$0xff] }
  0x6e   : > { %v6800_v17 = vcombine.low %v531_v4, %v535_v5 }
  0x6f   : > { %3481 = vmatpush1.bf16.msra.mxu0 %v6736_v11  ;;  %3645 = vmatpush1.bf16.msra.mxu1 %v6738_v12  ;;  %v6801_v11 = vcombine.high %v531_v4, %v535_v5  ;;  %v6803_v12 = vcombine.high %v532_v6, %v536_v7  ;;  %v591_v4 = vld [vmem:[%s8033_s11 + $0x920] sm:$0xff]  ;;  %v588_v5 = vld [vmem:[%s8033_s11 + $0x908] sm:$0xff] }
  0x70   : > { %3482 = vmatprep.subr.bf16.mxu0 %v6745_v13  ;;  %3646 = vmatprep.subr.bf16.mxu1 %v6747_v14  ;;  %v539_v13 = vld [vmem:[%s8033_s11 + $0x780] sm:$0xff]  ;;  %v592_v6 = vld [vmem:[%s8033_s11 + $0x928] sm:$0xff] }
  0x71   : > { %v543_v14 = vld [vmem:[%s8033_s11 + $0x7a0] sm:$0xff] }
  0x72   : > { %v6808_v25 = vcombine.low %v539_v13, %v543_v14 }
  0x73   : > { %3483 = vmatpush1.bf16.msra.mxu0 %v6744_v19  ;;  %3647 = vmatpush1.bf16.msra.mxu1 %v6746_v20  ;;  %v6809_v19 = vcombine.high %v539_v13, %v543_v14  ;;  %v6811_v20 = vcombine.high %v540_v15, %v544_v16  ;;  %v599_v13 = vld [vmem:[%s8033_s11 + $0x960] sm:$0xff]  ;;  %v596_v14 = vld [vmem:[%s8033_s11 + $0x948] sm:$0xff] }
  0x74   : > { %3484 = vmatprep.subr.bf16.mxu0 %v6753_v21  ;;  %3648 = vmatprep.subr.bf16.mxu1 %v6755_v22  ;;  %v547_v21 = vld [vmem:[%s8033_s11 + $0x7c0] sm:$0xff]  ;;  %v600_v15 = vld [vmem:[%s8033_s11 + $0x968] sm:$0xff] }
  0x75   : > { %v551_v22 = vld [vmem:[%s8033_s11 + $0x7e0] sm:$0xff] }
  0x76   : > { %v6816_v33 = vcombine.low %v547_v21, %v551_v22 }
  0x77   : > { %3485 = vmatpush1.bf16.msra.mxu0 %v6752_v28  ;;  %3649 = vmatpush1.bf16.msra.mxu1 %v6754_v60  ;;  %v6817_v28 = vcombine.high %v547_v21, %v551_v22  ;;  %v6819_v60 = vcombine.high %v548_v23, %v552_v24  ;;  %v607_v21 = vld [vmem:[%s8033_s11 + $0x9a0] sm:$0xff]  ;;  %v604_v22 = vld [vmem:[%s8033_s11 + $0x988] sm:$0xff] }
  0x78   : > { %3486 = vmatprep.subr.bf16.mxu0 %v6761_v29  ;;  %3650 = vmatprep.subr.bf16.mxu1 %v6763_v30  ;;  %v555_v29 = vld [vmem:[%s8033_s11 + $0x800] sm:$0xff]  ;;  %v608_v23 = vld [vmem:[%s8033_s11 + $0x9a8] sm:$0xff] }
  0x79   : > { %v559_v30 = vld [vmem:[%s8033_s11 + $0x820] sm:$0xff] }
  0x7a   : > { %v6824_v43 = vcombine.low %v555_v29, %v559_v30 }
  0x7b   : > { %3487 = vmatpush1.bf16.msra.mxu0 %v6760_v37  ;;  %3651 = vmatpush1.bf16.msra.mxu1 %v6762_v38  ;;  %v6825_v37 = vcombine.high %v555_v29, %v559_v30  ;;  %v6827_v38 = vcombine.high %v556_v31, %v560_v32  ;;  %v615_v29 = vld [vmem:[%s8033_s11 + $0x9e0] sm:$0xff]  ;;  %v612_v30 = vld [vmem:[%s8033_s11 + $0x9c8] sm:$0xff] }
  0x7c   : > { %3488 = vmatprep.subr.bf16.mxu0 %v6769_v39  ;;  %3652 = vmatprep.subr.bf16.mxu1 %v6771_v40  ;;  %v563_v39 = vld [vmem:[%s8033_s11 + $0x840] sm:$0xff] }
  0x7d   : > { %v567_v40 = vld [vmem:[%s8033_s11 + $0x860] sm:$0xff] }
  0x7e   : > { %v6832_v52 = vcombine.low %v563_v39, %v567_v40 }
  0x7f   : > { %3489 = vmatpush1.bf16.msra.mxu0 %v6768_v44  ;;  %3653 = vmatpush1.bf16.msra.mxu1 %v6770_v46  ;;  %v6826_v44 = vcombine.low %v556_v31, %v560_v32  ;;  %v6833_v46 = vcombine.high %v563_v39, %v567_v40  ;;  %v616_v31 = vld [vmem:[%s8033_s11 + $0x9e8] sm:$0xff]  ;;  %v623_v39 = vld [vmem:[%s8033_s11 + $0xa20] sm:$0xff] }
  0x80   : > { %3490 = vmatprep.subr.bf16.mxu0 %v6777_v47  ;;  %3654 = vmatprep.subr.bf16.mxu1 %v6779_v48  ;;  %v6835_v47 = vcombine.high %v564_v42, %v568_v54  ;;  %v571_v48 = vld [vmem:[%s8033_s11 + $0x880] sm:$0xff]  ;;  %v620_v40 = vld [vmem:[%s8033_s11 + $0xa08] sm:$0xff] }
  0x81   : > { %v6840_v62 = vcombine.low %v571_v48, %v575_v49 }
  0x83   : > { %3491 = vmatpush1.bf16.msra.mxu0 %v6776_v53  ;;  %3655 = vmatpush1.bf16.msra.mxu1 %v6778_v55  ;;  %v6834_v53 = vcombine.low %v564_v42, %v568_v54  ;;  %v6841_v55 = vcombine.high %v571_v48, %v575_v49  ;;  %v624_v42 = vld [vmem:[%s8033_s11 + $0xa28] sm:$0xff]  ;;  %v631_v48 = vld [vmem:[%s8033_s11 + $0xa60] sm:$0xff] }
  0x84   : > { %3492 = vmatprep.subr.bf16.mxu0 %v6785_v56  ;;  %3656 = vmatprep.subr.bf16.mxu1 %v6787_v57  ;;  %v6843_v56 = vcombine.high %v572_v50, %v576_v51  ;;  %v579_v57 = vld [vmem:[%s8033_s11 + $0x8c0] sm:$0xff]  ;;  %v628_v49 = vld [vmem:[%s8033_s11 + $0xa48] sm:$0xff] }
  0x85   : > { %v6848_v7 = vcombine.low %v579_v57, %v583_v58 }
  0x87   : > { %3493 = vmatpush1.bf16.msra.mxu0 %v6784_v63  ;;  %3657 = vmatpush1.bf16.msra.mxu1 %v6786_v1  ;;  %v6842_v63 = vcombine.low %v572_v50, %v576_v51  ;;  %v6849_v1 = vcombine.high %v579_v57, %v583_v58  ;;  %v632_v50 = vld [vmem:[%s8033_s11 + $0xa68] sm:$0xff]  ;;  %v639_v57 = vld [vmem:[%s8033_s11 + $0xaa0] sm:$0xff] }
  0x88   : > { %3494 = vmatprep.subr.bf16.mxu0 %v6793_v2  ;;  %3658 = vmatprep.subr.bf16.mxu1 %v6795_v3  ;;  %v6851_v2 = vcombine.high %v580_v59, %v584_v61  ;;  %v587_v3 = vld [vmem:[%s8033_s11 + $0x900] sm:$0xff]  ;;  %v636_v58 = vld [vmem:[%s8033_s11 + $0xa88] sm:$0xff] }
  0x89   : > { %v6856_v16 = vcombine.low %v587_v3, %v591_v4 }
  0x8b   : > { %3495 = vmatpush1.bf16.msra.mxu0 %v6792_v8  ;;  %3659 = vmatpush1.bf16.msra.mxu1 %v6794_v9  ;;  %v6850_v8 = vcombine.low %v580_v59, %v584_v61  ;;  %v6857_v9 = vcombine.high %v587_v3, %v591_v4  ;;  %v640_v59 = vld [vmem:[%s8033_s11 + $0xaa8] sm:$0xff]  ;;  %v647_v3 = vld [vmem:[%s8033_s11 + $0xae0] sm:$0xff] }
  0x8c   : > { %3496 = vmatprep.subr.bf16.mxu0 %v6801_v11  ;;  %3660 = vmatprep.subr.bf16.mxu1 %v6803_v12  ;;  %v6859_v11 = vcombine.high %v588_v5, %v592_v6  ;;  %v595_v12 = vld [vmem:[%s8033_s11 + $0x940] sm:$0xff]  ;;  %v644_v4 = vld [vmem:[%s8033_s11 + $0xac8] sm:$0xff] }
  0x8d   : > { %v6864_v24 = vcombine.low %v595_v12, %v599_v13 }
  0x8f   : > { %3497 = vmatpush1.bf16.msra.mxu0 %v6800_v17  ;;  %3661 = vmatpush1.bf16.msra.mxu1 %v6802_v18  ;;  %v6858_v17 = vcombine.low %v588_v5, %v592_v6  ;;  %v6865_v18 = vcombine.high %v595_v12, %v599_v13  ;;  %v648_v5 = vld [vmem:[%s8033_s11 + $0xae8] sm:$0xff]  ;;  %v655_v12 = vld [vmem:[%s8033_s11 + $0xb20] sm:$0xff] }
  0x90   : > { %3498 = vmatprep.subr.bf16.mxu0 %v6809_v19  ;;  %3662 = vmatprep.subr.bf16.mxu1 %v6811_v20  ;;  %v6867_v19 = vcombine.high %v596_v14, %v600_v15  ;;  %v603_v20 = vld [vmem:[%s8033_s11 + $0x980] sm:$0xff]  ;;  %v652_v13 = vld [vmem:[%s8033_s11 + $0xb08] sm:$0xff] }
  0x91   : > { %v6872_v32 = vcombine.low %v603_v20, %v607_v21 }
  0x93   : > { %3499 = vmatpush1.bf16.msra.mxu0 %v6808_v25  ;;  %3663 = vmatpush1.bf16.msra.mxu1 %v6810_v27  ;;  %v6866_v25 = vcombine.low %v596_v14, %v600_v15  ;;  %v6873_v27 = vcombine.high %v603_v20, %v607_v21  ;;  %v656_v14 = vld [vmem:[%s8033_s11 + $0xb28] sm:$0xff]  ;;  %v663_v20 = vld [vmem:[%s8033_s11 + $0xb60] sm:$0xff] }
  0x94   : > { %3500 = vmatprep.subr.bf16.mxu0 %v6817_v28  ;;  %3664 = vmatprep.subr.bf16.mxu1 %v6819_v60  ;;  %v6875_v28 = vcombine.high %v604_v22, %v608_v23  ;;  %v611_v60 = vld [vmem:[%s8033_s11 + $0x9c0] sm:$0xff]  ;;  %v660_v21 = vld [vmem:[%s8033_s11 + $0xb48] sm:$0xff] }
  0x95   : > { %v6880_v54 = vcombine.low %v611_v60, %v615_v29 }
  0x97   : > { %3501 = vmatpush1.bf16.msra.mxu0 %v6816_v33  ;;  %3665 = vmatpush1.bf16.msra.mxu1 %v6818_v34  ;;  %v6874_v33 = vcombine.low %v604_v22, %v608_v23  ;;  %v6881_v34 = vcombine.high %v611_v60, %v615_v29  ;;  %v664_v22 = vld [vmem:[%s8033_s11 + $0xb68] sm:$0xff]  ;;  %v671_v60 = vld [vmem:[%s8033_s11 + $0xba0] sm:$0xff] }
  0x98   : > { %3511 = vmatprep.subr.bf16.mxu0 %v6825_v37  ;;  %3675 = vmatprep.subr.bf16.mxu1 %v6827_v38  ;;  %v6883_v37 = vcombine.high %v612_v30, %v616_v31  ;;  %v619_v38 = vld [vmem:[%s8033_s11 + $0xa00] sm:$0xff]  ;;  %v668_v29 = vld [vmem:[%s8033_s11 + $0xb88] sm:$0xff] }
  0x99   : > { %v6888_v51 = vcombine.low %v619_v38, %v623_v39 }
  0x9a   : > { %3503 = vmatmul.mubr.bf16.vlgmr.msra.gmra.mrb[0].mxu0 %v8216_v41  ;;  %3667 = vmatmul.mubr.bf16.vlgmr.msra.gmra.mrb[0].mxu1 %v8216_v41 }
  0x9b   : > { %3512 = vmatpush1.bf16.msra.mxu0 %v6824_v43  ;;  %3676 = vmatpush1.bf16.msra.mxu1 %v6826_v44  ;;  %v6882_v43 = vcombine.low %v612_v30, %v616_v31  ;;  %v6889_v44 = vcombine.high %v619_v38, %v623_v39  ;;  %v672_v30 = vld [vmem:[%s8033_s11 + $0xba8] sm:$0xff]  ;;  %v679_v38 = vld [vmem:[%s8033_s11 + $0xbe0] sm:$0xff] }
  0x9c   : > { %3513 = vmatprep.subr.bf16.mxu0 %v6833_v46  ;;  %3677 = vmatprep.subr.bf16.mxu1 %v6835_v47  ;;  %v6891_v46 = vcombine.high %v620_v40, %v624_v42  ;;  %v627_v47 = vld [vmem:[%s8033_s11 + $0xa40] sm:$0xff]  ;;  %v676_v39 = vld [vmem:[%s8033_s11 + $0xbc8] sm:$0xff] }
  0x9d   : > { %3543 = vmatprep.mubr.bf16.mxu0 %v8145_v35  ;;  %3707 = vmatprep.mubr.bf16.mxu1 %v8145_v35  ;;  %v6896_v61 = vcombine.low %v627_v47, %v631_v48 }
  0x9f   : > { %3514 = vmatpush1.bf16.msra.mxu0 %v6832_v52  ;;  %3678 = vmatpush1.bf16.msra.mxu1 %v6834_v53  ;;  %v6890_v52 = vcombine.low %v620_v40, %v624_v42  ;;  %v6897_v53 = vcombine.high %v627_v47, %v631_v48  ;;  %v680_v40 = vld [vmem:[%s8033_s11 + $0xbe8] sm:$0xff]  ;;  %v687_v47 = vld [vmem:[%s8033_s11 + $0xc20] sm:$0xff] }
  0xa0   : > { %3515 = vmatprep.subr.bf16.mxu0 %v6841_v55  ;;  %3679 = vmatprep.subr.bf16.mxu1 %v6843_v56  ;;  %v6899_v55 = vcombine.high %v628_v49, %v632_v50  ;;  %v635_v56 = vld [vmem:[%s8033_s11 + $0xa80] sm:$0xff]  ;;  %v684_v48 = vld [vmem:[%s8033_s11 + $0xc08] sm:$0xff] }
  0xa1   : > { %v6904_v6 = vcombine.low %v635_v56, %v639_v57 }
  0xa3   : > { %3516 = vmatpush1.bf16.msra.mxu0 %v6840_v62  ;;  %3680 = vmatpush1.bf16.msra.mxu1 %v6842_v63  ;;  %v6898_v62 = vcombine.low %v628_v49, %v632_v50  ;;  %v6905_v63 = vcombine.high %v635_v56, %v639_v57  ;;  %v688_v49 = vld [vmem:[%s8033_s11 + $0xc28] sm:$0xff]  ;;  %v695_v56 = vld [vmem:[%s8033_s11 + $0xc60] sm:$0xff] }
  0xa4   : > { %3517 = vmatprep.subr.bf16.mxu0 %v6849_v1  ;;  %3681 = vmatprep.subr.bf16.mxu1 %v6851_v2  ;;  %v6907_v1 = vcombine.high %v636_v58, %v640_v59  ;;  %v643_v2 = vld [vmem:[%s8033_s11 + $0xac0] sm:$0xff]  ;;  %v692_v57 = vld [vmem:[%s8033_s11 + $0xc48] sm:$0xff] }
  0xa5   : > { %v6912_v15 = vcombine.low %v643_v2, %v647_v3 }
  0xa7   : > { %3518 = vmatpush1.bf16.msra.mxu0 %v6848_v7  ;;  %3682 = vmatpush1.bf16.msra.mxu1 %v6850_v8  ;;  %v6906_v7 = vcombine.low %v636_v58, %v640_v59  ;;  %v6913_v8 = vcombine.high %v643_v2, %v647_v3  ;;  %v696_v58 = vld [vmem:[%s8033_s11 + $0xc68] sm:$0xff]  ;;  %v703_v2 = vld [vmem:[%s8033_s11 + $0xca0] sm:$0xff]  ;;  %v8292_v3 = vcombine.high %v8145_v35, %v8145_v35 }
  0xa8   : > { %3519 = vmatprep.subr.bf16.mxu0 %v6857_v9  ;;  %3683 = vmatprep.subr.bf16.mxu1 %v6859_v11  ;;  %v6915_v9 = vcombine.high %v644_v4, %v648_v5  ;;  %v651_v11 = vld [vmem:[%s8033_s11 + $0xb00] sm:$0xff] }
  0xa9   : > { %v6920_v23 = vcombine.low %v651_v11, %v655_v12 }
  0xab   : > { %3520 = vmatpush1.bf16.msra.mxu0 %v6856_v16  ;;  %3684 = vmatpush1.bf16.msra.mxu1 %v6858_v17  ;;  %v6914_v16 = vcombine.low %v644_v4, %v648_v5  ;;  %v6921_v17 = vcombine.high %v651_v11, %v655_v12  ;;  %v700_v4 = vld [vmem:[%s8033_s11 + $0xc88] sm:$0xff]  ;;  %v707_v11 = vld [vmem:[%s8033_s11 + $0xcc0] sm:$0xff] }
  0xac   : > { %3521 = vmatprep.subr.bf16.mxu0 %v6865_v18  ;;  %3685 = vmatprep.subr.bf16.mxu1 %v6867_v19  ;;  %v6923_v18 = vcombine.high %v652_v13, %v656_v14  ;;  %v659_v19 = vld [vmem:[%s8033_s11 + $0xb40] sm:$0xff]  ;;  %v704_v5 = vld [vmem:[%s8033_s11 + $0xca8] sm:$0xff] }
  0xad   : > { %v6928_v31 = vcombine.low %v659_v19, %v663_v20  ;;  %v711_v12 = vld [vmem:[%s8033_s11 + $0xce0] sm:$0xff] }
  0xaf   : > { %3522 = vmatpush1.bf16.msra.mxu0 %v6864_v24  ;;  %3686 = vmatpush1.bf16.msra.mxu1 %v6866_v25  ;;  %v6922_v24 = vcombine.low %v652_v13, %v656_v14  ;;  %v6929_v25 = vcombine.high %v659_v19, %v663_v20  ;;  %v708_v13 = vld [vmem:[%s8033_s11 + $0xcc8] sm:$0xff]  ;;  %v715_v19 = vld [vmem:[%s8033_s11 + $0xd00] sm:$0xff] }
  0xb0   : > { %3523 = vmatprep.subr.bf16.mxu0 %v6873_v27  ;;  %3687 = vmatprep.subr.bf16.mxu1 %v6875_v28  ;;  %v6931_v27 = vcombine.high %v660_v21, %v664_v22  ;;  %v667_v28 = vld [vmem:[%s8033_s11 + $0xb80] sm:$0xff]  ;;  %v712_v14 = vld [vmem:[%s8033_s11 + $0xce8] sm:$0xff] }
  0xb1   : > { %v6936_v42 = vcombine.low %v667_v28, %v671_v60  ;;  %v719_v20 = vld [vmem:[%s8033_s11 + $0xd20] sm:$0xff] }
  0xb3   : > { %3524 = vmatpush1.bf16.msra.mxu0 %v6872_v32  ;;  %3688 = vmatpush1.bf16.msra.mxu1 %v6874_v33  ;;  %v6930_v32 = vcombine.low %v660_v21, %v664_v22  ;;  %v6937_v33 = vcombine.high %v667_v28, %v671_v60  ;;  %v716_v21 = vld [vmem:[%s8033_s11 + $0xd08] sm:$0xff]  ;;  %v723_v28 = vld [vmem:[%s8033_s11 + $0xd40] sm:$0xff] }
  0xb4   : > { %3525 = vmatprep.subr.bf16.mxu0 %v6881_v34  ;;  %3689 = vmatprep.subr.bf16.mxu1 %v6883_v37  ;;  %v6939_v34 = vcombine.high %v668_v29, %v672_v30  ;;  %v675_v37 = vld [vmem:[%s8033_s11 + $0xbc0] sm:$0xff]  ;;  %v720_v22 = vld [vmem:[%s8033_s11 + $0xd28] sm:$0xff] }
  0xb5   : > { %v6944_v50 = vcombine.low %v675_v37, %v679_v38  ;;  %v727_v60 = vld [vmem:[%s8033_s11 + $0xd60] sm:$0xff] }
  0xb7   : > { %3526 = vmatpush1.bf16.msra.mxu0 %v6880_v54  ;;  %3690 = vmatpush1.bf16.msra.mxu1 %v6882_v43  ;;  %v6938_v54 = vcombine.low %v668_v29, %v672_v30  ;;  %v6945_v43 = vcombine.high %v675_v37, %v679_v38  ;;  %v724_v29 = vld [vmem:[%s8033_s11 + $0xd48] sm:$0xff]  ;;  %v731_v37 = vld [vmem:[%s8033_s11 + $0xd80] sm:$0xff] }
  0xb8   : > { %3527 = vmatprep.subr.bf16.mxu0 %v6889_v44  ;;  %3691 = vmatprep.subr.bf16.mxu1 %v6891_v46  ;;  %v6947_v44 = vcombine.high %v676_v39, %v680_v40  ;;  %v683_v46 = vld [vmem:[%s8033_s11 + $0xc00] sm:$0xff]  ;;  %v728_v30 = vld [vmem:[%s8033_s11 + $0xd68] sm:$0xff] }
  0xb9   : > { %v6952_v59 = vcombine.low %v683_v46, %v687_v47  ;;  %v735_v38 = vld [vmem:[%s8033_s11 + $0xda0] sm:$0xff] }
  0xbb   : > { %3528 = vmatpush1.bf16.msra.mxu0 %v6888_v51  ;;  %3692 = vmatpush1.bf16.msra.mxu1 %v6890_v52  ;;  %v6946_v51 = vcombine.low %v676_v39, %v680_v40  ;;  %v6953_v52 = vcombine.high %v683_v46, %v687_v47  ;;  %v732_v39 = vld [vmem:[%s8033_s11 + $0xd88] sm:$0xff]  ;;  %v739_v46 = vld [vmem:[%s8033_s11 + $0xdc0] sm:$0xff] }
  0xbc   : > { %3529 = vmatprep.subr.bf16.mxu0 %v6897_v53  ;;  %3693 = vmatprep.subr.bf16.mxu1 %v6899_v55  ;;  %v6955_v53 = vcombine.high %v684_v48, %v688_v49  ;;  %v691_v55 = vld [vmem:[%s8033_s11 + $0xc40] sm:$0xff]  ;;  %v736_v40 = vld [vmem:[%s8033_s11 + $0xda8] sm:$0xff] }
  0xbd   : > { %v743_v47 = vld [vmem:[%s8033_s11 + $0xde0] sm:$0xff] }
  0xbf   : > { %3530 = vmatpush1.bf16.msra.mxu0 %v6896_v61  ;;  %3694 = vmatpush1.bf16.msra.mxu1 %v6898_v62  ;;  %v6954_v61 = vcombine.low %v684_v48, %v688_v49  ;;  %v6961_v62 = vcombine.high %v691_v55, %v695_v56  ;;  %v740_v48 = vld [vmem:[%s8033_s11 + $0xdc8] sm:$0xff] }
  0xc0   : > { %3531 = vmatprep.subr.bf16.mxu0 %v6905_v63  ;;  %3695 = vmatprep.subr.bf16.mxu1 %v6907_v1  ;;  %v6963_v63 = vcombine.high %v692_v57, %v696_v58  ;;  %v699_v1 = vld [vmem:[%s8033_s11 + $0xc80] sm:$0xff]  ;;  %v744_v49 = vld [vmem:[%s8033_s11 + $0xde8] sm:$0xff] }
  0xc3   : > { %3532 = vmatpush1.bf16.msra.mxu0 %v6904_v6  ;;  %3696 = vmatpush1.bf16.msra.mxu1 %v6906_v7  ;;  %v6960_v6 = vcombine.low %v691_v55, %v695_v56  ;;  %v6962_v7 = vcombine.low %v692_v57, %v696_v58  ;;  %v747_v55 = vld [vmem:[%s8033_s11 + $0xe00] sm:$0xff]  ;;  %v748_v57 = vld [vmem:[%s8033_s11 + $0xe08] sm:$0xff] }
  0xc4   : > { %3533 = vmatprep.subr.bf16.mxu0 %v6913_v8  ;;  %3697 = vmatprep.subr.bf16.mxu1 %v6915_v9  ;;  %v6969_v8 = vcombine.high %v699_v1, %v703_v2  ;;  %v6971_v9 = vcombine.high %v700_v4, %v704_v5  ;;  %v751_v56 = vld [vmem:[%s8033_s11 + $0xe20] sm:$0xff]  ;;  %v752_v58 = vld [vmem:[%s8033_s11 + $0xe28] sm:$0xff] }
  0xc7   : > { %3534 = vmatpush1.bf16.msra.mxu0 %v6912_v15  ;;  %3698 = vmatpush1.bf16.msra.mxu1 %v6914_v16  ;;  %v6968_v15 = vcombine.low %v699_v1, %v703_v2  ;;  %v6970_v16 = vcombine.low %v700_v4, %v704_v5  ;;  %v755_v1 = vld [vmem:[%s8033_s11 + $0xe40] sm:$0xff]  ;;  %v756_v4 = vld [vmem:[%s8033_s11 + $0xe48] sm:$0xff] }
  0xc8   : > { %3535 = vmatprep.subr.bf16.mxu0 %v6921_v17  ;;  %3699 = vmatprep.subr.bf16.mxu1 %v6923_v18  ;;  %v6977_v17 = vcombine.high %v707_v11, %v711_v12  ;;  %v6979_v18 = vcombine.high %v708_v13, %v712_v14  ;;  %v759_v2 = vld [vmem:[%s8033_s11 + $0xe60] sm:$0xff]  ;;  %v760_v5 = vld [vmem:[%s8033_s11 + $0xe68] sm:$0xff] }
  0xcb   : > { %3536 = vmatpush1.bf16.msra.mxu0 %v6920_v23  ;;  %3700 = vmatpush1.bf16.msra.mxu1 %v6922_v24  ;;  %v6976_v23 = vcombine.low %v707_v11, %v711_v12  ;;  %v6978_v24 = vcombine.low %v708_v13, %v712_v14  ;;  %v763_v11 = vld [vmem:[%s8033_s11 + $0xe80] sm:$0xff]  ;;  %v764_v13 = vld [vmem:[%s8033_s11 + $0xe88] sm:$0xff] }
  0xcc   : > { %3537 = vmatprep.subr.bf16.mxu0 %v6929_v25  ;;  %3701 = vmatprep.subr.bf16.mxu1 %v6931_v27  ;;  %v6985_v25 = vcombine.high %v715_v19, %v719_v20  ;;  %v6987_v27 = vcombine.high %v716_v21, %v720_v22  ;;  %v767_v12 = vld [vmem:[%s8033_s11 + $0xea0] sm:$0xff]  ;;  %v768_v14 = vld [vmem:[%s8033_s11 + $0xea8] sm:$0xff] }
  0xcf   : > { %3538 = vmatpush1.bf16.msra.mxu0 %v6928_v31  ;;  %3702 = vmatpush1.bf16.msra.mxu1 %v6930_v32  ;;  %v6984_v31 = vcombine.low %v715_v19, %v719_v20  ;;  %v6986_v32 = vcombine.low %v716_v21, %v720_v22  ;;  %v771_v19 = vld [vmem:[%s8033_s11 + $0xec0] sm:$0xff]  ;;  %v772_v21 = vld [vmem:[%s8033_s11 + $0xec8] sm:$0xff] }
  0xd0   : > { %3539 = vmatprep.subr.bf16.mxu0 %v6937_v33  ;;  %3703 = vmatprep.subr.bf16.mxu1 %v6939_v34  ;;  %v6993_v33 = vcombine.high %v723_v28, %v727_v60  ;;  %v6995_v34 = vcombine.high %v724_v29, %v728_v30  ;;  %v775_v20 = vld [vmem:[%s8033_s11 + $0xee0] sm:$0xff]  ;;  %v776_v22 = vld [vmem:[%s8033_s11 + $0xee8] sm:$0xff] }
  0xd3   : > { %3540 = vmatpush1.bf16.msra.mxu0 %v6936_v42  ;;  %3704 = vmatpush1.bf16.msra.mxu1 %v6938_v54  ;;  %v6992_v42 = vcombine.low %v723_v28, %v727_v60  ;;  %v6994_v54 = vcombine.low %v724_v29, %v728_v30  ;;  %v779_v28 = vld [vmem:[%s8033_s11 + $0xf00] sm:$0xff]  ;;  %v780_v29 = vld [vmem:[%s8033_s11 + $0xf08] sm:$0xff] }
  0xd4   : > { %3541 = vmatprep.subr.bf16.mxu0 %v6945_v43  ;;  %3705 = vmatprep.subr.bf16.mxu1 %v6947_v44  ;;  %v7001_v43 = vcombine.high %v731_v37, %v735_v38  ;;  %v7003_v44 = vcombine.high %v732_v39, %v736_v40  ;;  %v783_v60 = vld [vmem:[%s8033_s11 + $0xf20] sm:$0xff]  ;;  %v784_v30 = vld [vmem:[%s8033_s11 + $0xf28] sm:$0xff] }
  0xd7   : > { %3542 = vmatpush1.bf16.msra.mxu0 %v6944_v50  ;;  %3706 = vmatpush1.bf16.msra.mxu1 %v6946_v51  ;;  %v7000_v50 = vcombine.low %v731_v37, %v735_v38  ;;  %v7002_v51 = vcombine.low %v732_v39, %v736_v40  ;;  %v787_v37 = vld [vmem:[%s8033_s11 + $0xf40] sm:$0xff]  ;;  %v788_v39 = vld [vmem:[%s8033_s11 + $0xf48] sm:$0xff] }
  0xd8   : > { %3552 = vmatprep.subr.bf16.mxu0 %v6953_v52  ;;  %3716 = vmatprep.subr.bf16.mxu1 %v6955_v53  ;;  %v7009_v52 = vcombine.high %v739_v46, %v743_v47  ;;  %v7011_v53 = vcombine.high %v740_v48, %v744_v49  ;;  %v791_v38 = vld [vmem:[%s8033_s11 + $0xf60] sm:$0xff]  ;;  %v792_v40 = vld [vmem:[%s8033_s11 + $0xf68] sm:$0xff] }
  0xda   : > { %3544 = vmatmul.mubr.bf16.vlgmr.msra.gmra.mrb[0].mxu0 %v8148_v36  ;;  %3708 = vmatmul.mubr.bf16.vlgmr.msra.gmra.mrb[0].mxu1 %v8148_v36 }
  0xdb   : > { %3553 = vmatpush1.bf16.msra.mxu0 %v6952_v59  ;;  %3717 = vmatpush1.bf16.msra.mxu1 %v6954_v61  ;;  %v7008_v59 = vcombine.low %v739_v46, %v743_v47  ;;  %v7010_v61 = vcombine.low %v740_v48, %v744_v49  ;;  %v795_v46 = vld [vmem:[%s8033_s11 + $0xf80] sm:$0xff]  ;;  %v796_v48 = vld [vmem:[%s8033_s11 + $0xf88] sm:$0xff] }
  0xdc   : > { %3554 = vmatprep.subr.bf16.mxu0 %v6961_v62  ;;  %3718 = vmatprep.subr.bf16.mxu1 %v6963_v63  ;;  %v7017_v62 = vcombine.high %v747_v55, %v751_v56  ;;  %v7019_v63 = vcombine.high %v748_v57, %v752_v58  ;;  %v799_v47 = vld [vmem:[%s8033_s11 + $0xfa0] sm:$0xff]  ;;  %v800_v49 = vld [vmem:[%s8033_s11 + $0xfa8] sm:$0xff] }
  0xdd   : > { %3584 = vmatprep.mubr.bf16.mxu0 %v8292_v3  ;;  %3748 = vmatprep.mubr.bf16.mxu1 %v8292_v3 }
  0xdf   : > { %3555 = vmatpush1.bf16.msra.mxu0 %v6960_v6  ;;  %3719 = vmatpush1.bf16.msra.mxu1 %v6962_v7  ;;  %v7016_v6 = vcombine.low %v747_v55, %v751_v56  ;;  %v7018_v7 = vcombine.low %v748_v57, %v752_v58  ;;  %v803_v55 = vld [vmem:[%s8033_s11 + $0xfc0] sm:$0xff]  ;;  %v804_v57 = vld [vmem:[%s8033_s11 + $0xfc8] sm:$0xff] }
  0xe0   : > { %3556 = vmatprep.subr.bf16.mxu0 %v6969_v8  ;;  %3720 = vmatprep.subr.bf16.mxu1 %v6971_v9  ;;  %v7025_v8 = vcombine.high %v755_v1, %v759_v2  ;;  %v7027_v9 = vcombine.high %v756_v4, %v760_v5  ;;  %v807_v56 = vld [vmem:[%s8033_s11 + $0xfe0] sm:$0xff]  ;;  %v808_v58 = vld [vmem:[%s8033_s11 + $0xfe8] sm:$0xff] }
  0xe3   : > { %3557 = vmatpush1.bf16.msra.mxu0 %v6968_v15  ;;  %3721 = vmatpush1.bf16.msra.mxu1 %v6970_v16  ;;  %v7024_v15 = vcombine.low %v755_v1, %v759_v2  ;;  %v7026_v16 = vcombine.low %v756_v4, %v760_v5  ;;  %v301_v1 = vld [vmem:[%s8033_s11 + $0x10] sm:$0xff]  ;;  %v302_v4 = vld [vmem:[%s8033_s11 + $0x18] sm:$0xff] }
  0xe4   : > { %3558 = vmatprep.subr.bf16.mxu0 %v6977_v17  ;;  %3722 = vmatprep.subr.bf16.mxu1 %v6979_v18  ;;  %v7033_v17 = vcombine.high %v763_v11, %v767_v12  ;;  %v7035_v18 = vcombine.high %v764_v13, %v768_v14  ;;  %v305_v2 = vld [vmem:[%s8033_s11 + $0x30] sm:$0xff]  ;;  %v306_v5 = vld [vmem:[%s8033_s11 + $0x38] sm:$0xff] }
  0xe7   : > { %3559 = vmatpush1.bf16.msra.mxu0 %v6976_v23  ;;  %3723 = vmatpush1.bf16.msra.mxu1 %v6978_v24  ;;  %v7032_v23 = vcombine.low %v763_v11, %v767_v12  ;;  %v7034_v24 = vcombine.low %v764_v13, %v768_v14  ;;  %v309_v11 = vld [vmem:[%s8033_s11 + $0x50] sm:$0xff]  ;;  %v8360_v13 = vcombine.high %v8148_v36, %v8148_v36  ;;  %v310_v14 = vld [vmem:[%s8033_s11 + $0x58] sm:$0xff] }
  0xe8   : > { %3560 = vmatprep.subr.bf16.mxu0 %v6985_v25  ;;  %3724 = vmatprep.subr.bf16.mxu1 %v6987_v27  ;;  %v7041_v25 = vcombine.high %v771_v19, %v775_v20  ;;  %v7043_v27 = vcombine.high %v772_v21, %v776_v22  ;;  %v313_v12 = vld [vmem:[%s8033_s11 + $0x70] sm:$0xff] }
  0xeb   : > { %3561 = vmatpush1.bf16.msra.mxu0 %v6984_v31  ;;  %3725 = vmatpush1.bf16.msra.mxu1 %v6986_v32  ;;  %v7040_v31 = vcombine.low %v771_v19, %v775_v20  ;;  %v7042_v32 = vcombine.low %v772_v21, %v776_v22  ;;  %v317_v20 = vld [vmem:[%s8033_s11 + $0x90] sm:$0xff]  ;;  %v318_v22 = vld [vmem:[%s8033_s11 + $0x98] sm:$0xff] }
  0xec   : > { %3562 = vmatprep.subr.bf16.mxu0 %v6993_v33  ;;  %3726 = vmatprep.subr.bf16.mxu1 %v6995_v34  ;;  %v7049_v33 = vcombine.high %v779_v28, %v783_v60  ;;  %v7051_v34 = vcombine.high %v780_v29, %v784_v30  ;;  %v321_v21 = vld [vmem:[%s8033_s11 + $0xb0] sm:$0xff] }
  0xef   : > { %3563 = vmatpush1.bf16.msra.mxu0 %v6992_v42  ;;  %3727 = vmatpush1.bf16.msra.mxu1 %v6994_v54  ;;  %v7048_v42 = vcombine.low %v779_v28, %v783_v60  ;;  %v7050_v54 = vcombine.low %v780_v29, %v784_v30  ;;  %v325_v60 = vld [vmem:[%s8033_s11 + $0xd0] sm:$0xff]  ;;  %v326_v30 = vld [vmem:[%s8033_s11 + $0xd8] sm:$0xff] }
  0xf0   : > { %3564 = vmatprep.subr.bf16.mxu0 %v7001_v43  ;;  %3728 = vmatprep.subr.bf16.mxu1 %v7003_v44  ;;  %v7057_v43 = vcombine.high %v787_v37, %v791_v38  ;;  %v7059_v44 = vcombine.high %v788_v39, %v792_v40  ;;  %v329_v29 = vld [vmem:[%s8033_s11 + $0xf0] sm:$0xff] }
  0xf3   : > { %3565 = vmatpush1.bf16.msra.mxu0 %v7000_v50  ;;  %3729 = vmatpush1.bf16.msra.mxu1 %v7002_v51  ;;  %v7056_v50 = vcombine.low %v787_v37, %v791_v38  ;;  %v7058_v51 = vcombine.low %v788_v39, %v792_v40  ;;  %v333_v38 = vld [vmem:[%s8033_s11 + $0x110] sm:$0xff]  ;;  %v334_v40 = vld [vmem:[%s8033_s11 + $0x118] sm:$0xff] }
  0xf4   : > { %3566 = vmatprep.subr.bf16.mxu0 %v7009_v52  ;;  %3730 = vmatprep.subr.bf16.mxu1 %v7011_v53  ;;  %v7065_v52 = vcombine.high %v795_v46, %v799_v47  ;;  %v7067_v53 = vcombine.high %v796_v48, %v800_v49  ;;  %v337_v39 = vld [vmem:[%s8033_s11 + $0x130] sm:$0xff] }
  0xf7   : > { %3567 = vmatpush1.bf16.msra.mxu0 %v7008_v59  ;;  %3731 = vmatpush1.bf16.msra.mxu1 %v7010_v61  ;;  %v7064_v59 = vcombine.low %v795_v46, %v799_v47  ;;  %v7066_v61 = vcombine.low %v796_v48, %v800_v49  ;;  %v341_v46 = vld [vmem:[%s8033_s11 + $0x150] sm:$0xff]  ;;  %v342_v48 = vld [vmem:[%s8033_s11 + $0x158] sm:$0xff] }
  0xf8   : > { %3568 = vmatprep.subr.bf16.mxu0 %v7017_v62  ;;  %3732 = vmatprep.subr.bf16.mxu1 %v7019_v63  ;;  %v7073_v62 = vcombine.high %v803_v55, %v807_v56  ;;  %v7075_v63 = vcombine.high %v804_v57, %v808_v58  ;;  %v345_v47 = vld [vmem:[%s8033_s11 + $0x170] sm:$0xff]  ;;  %v346_v49 = vld [vmem:[%s8033_s11 + $0x178] sm:$0xff] }
  0xfb   : > { %3569 = vmatpush1.bf16.msra.mxu0 %v7016_v6  ;;  %3733 = vmatpush1.bf16.msra.mxu1 %v7018_v7  ;;  %v7072_v6 = vcombine.low %v803_v55, %v807_v56  ;;  %v7074_v7 = vcombine.low %v804_v57, %v808_v58  ;;  %v349_v55 = vld [vmem:[%s8033_s11 + $0x190] sm:$0xff]  ;;  %v350_v57 = vld [vmem:[%s8033_s11 + $0x198] sm:$0xff] }
  0xfc   : > { %3570 = vmatprep.subr.bf16.mxu0 %v7025_v8  ;;  %3734 = vmatprep.subr.bf16.mxu1 %v7027_v9  ;;  %v6573_v8 = vcombine.high %v301_v1, %v305_v2  ;;  %v6575_v9 = vcombine.high %v302_v4, %v306_v5  ;;  %v353_v56 = vld [vmem:[%s8033_s11 + $0x1b0] sm:$0xff]  ;;  %v354_v58 = vld [vmem:[%s8033_s11 + $0x1b8] sm:$0xff] }
  0xff   : > { %3571 = vmatpush1.bf16.msra.mxu0 %v7024_v15  ;;  %3735 = vmatpush1.bf16.msra.mxu1 %v7026_v16  ;;  %v314_v15 = vld [vmem:[%s8033_s11 + $0x78] sm:$0xff]  ;;  %v6572_v16 = vcombine.low %v301_v1, %v305_v2  ;;  %v357_v1 = vld [vmem:[%s8033_s11 + $0x1d0] sm:$0xff] }
 0x100   : > { %3572 = vmatprep.subr.bf16.mxu0 %v7033_v17  ;;  %3736 = vmatprep.subr.bf16.mxu1 %v7035_v18  ;;  %v6574_v17 = vcombine.low %v302_v4, %v306_v5  ;;  %v6581_v18 = vcombine.high %v309_v11, %v313_v12  ;;  %v6583_v19 = vcombine.high %v310_v14, %v314_v15  ;;  %v361_v2 = vld [vmem:[%s8033_s11 + $0x1f0] sm:$0xff]  ;;  %v358_v4 = vld [vmem:[%s8033_s11 + $0x1d8] sm:$0xff] }
 0x101   : > { %v362_v5 = vld [vmem:[%s8033_s11 + $0x1f8] sm:$0xff] }
 0x103   : > { %3573 = vmatpush1.bf16.msra.mxu0 %v7032_v23  ;;  %3737 = vmatpush1.bf16.msra.mxu1 %v7034_v24  ;;  %v322_v23 = vld [vmem:[%s8033_s11 + $0xb8] sm:$0xff]  ;;  %v6580_v24 = vcombine.low %v309_v11, %v313_v12  ;;  %v365_v11 = vld [vmem:[%s8033_s11 + $0x210] sm:$0xff] }
 0x104   : > { %3574 = vmatprep.subr.bf16.mxu0 %v7041_v25  ;;  %3738 = vmatprep.subr.bf16.mxu1 %v7043_v27  ;;  %v6582_v25 = vcombine.low %v310_v14, %v314_v15  ;;  %v6589_v27 = vcombine.high %v317_v20, %v321_v21  ;;  %v6591_v28 = vcombine.high %v318_v22, %v322_v23  ;;  %v369_v12 = vld [vmem:[%s8033_s11 + $0x230] sm:$0xff]  ;;  %v366_v14 = vld [vmem:[%s8033_s11 + $0x218] sm:$0xff] }
 0x105   : > { %v370_v15 = vld [vmem:[%s8033_s11 + $0x238] sm:$0xff] }
 0x107   : > { %3575 = vmatpush1.bf16.msra.mxu0 %v7040_v31  ;;  %3739 = vmatpush1.bf16.msra.mxu1 %v7042_v32  ;;  %v330_v31 = vld [vmem:[%s8033_s11 + $0xf8] sm:$0xff]  ;;  %v6588_v32 = vcombine.low %v317_v20, %v321_v21  ;;  %v373_v20 = vld [vmem:[%s8033_s11 + $0x250] sm:$0xff] }
 0x108   : > { %3576 = vmatprep.subr.bf16.mxu0 %v7049_v33  ;;  %3740 = vmatprep.subr.bf16.mxu1 %v7051_v34  ;;  %v6590_v33 = vcombine.low %v318_v22, %v322_v23  ;;  %v6597_v34 = vcombine.high %v325_v60, %v329_v29  ;;  %v6599_v37 = vcombine.high %v326_v30, %v330_v31  ;;  %v377_v21 = vld [vmem:[%s8033_s11 + $0x270] sm:$0xff]  ;;  %v374_v22 = vld [vmem:[%s8033_s11 + $0x258] sm:$0xff] }
 0x109   : > { %v378_v23 = vld [vmem:[%s8033_s11 + $0x278] sm:$0xff] }
 0x10b   : > { %3577 = vmatpush1.bf16.msra.mxu0 %v7048_v42  ;;  %3741 = vmatpush1.bf16.msra.mxu1 %v7050_v54  ;;  %v338_v42 = vld [vmem:[%s8033_s11 + $0x138] sm:$0xff]  ;;  %v6596_v54 = vcombine.low %v325_v60, %v329_v29  ;;  %v381_v60 = vld [vmem:[%s8033_s11 + $0x290] sm:$0xff] }
 0x10c   : > { %3578 = vmatprep.subr.bf16.mxu0 %v7057_v43  ;;  %3742 = vmatprep.subr.bf16.mxu1 %v7059_v44  ;;  %v6605_v43 = vcombine.high %v333_v38, %v337_v39  ;;  %v6607_v44 = vcombine.high %v334_v40, %v338_v42  ;;  %v385_v29 = vld [vmem:[%s8033_s11 + $0x2b0] sm:$0xff] }
 0x10f   : > { %3579 = vmatpush1.bf16.msra.mxu0 %v7056_v50  ;;  %3743 = vmatpush1.bf16.msra.mxu1 %v7058_v51  ;;  %v6604_v50 = vcombine.low %v333_v38, %v337_v39  ;;  %v6606_v51 = vcombine.low %v334_v40, %v338_v42  ;;  %v389_v38 = vld [vmem:[%s8033_s11 + $0x2d0] sm:$0xff]  ;;  %v390_v40 = vld [vmem:[%s8033_s11 + $0x2d8] sm:$0xff] }
 0x110   : > { %3580 = vmatprep.subr.bf16.mxu0 %v7065_v52  ;;  %3744 = vmatprep.subr.bf16.mxu1 %v7067_v53  ;;  %v6613_v52 = vcombine.high %v341_v46, %v345_v47  ;;  %v6615_v53 = vcombine.high %v342_v48, %v346_v49  ;;  %v393_v39 = vld [vmem:[%s8033_s11 + $0x2f0] sm:$0xff]  ;;  %v394_v42 = vld [vmem:[%s8033_s11 + $0x2f8] sm:$0xff] }
 0x113   : > { %3581 = vmatpush1.bf16.msra.mxu0 %v7064_v59  ;;  %3745 = vmatpush1.bf16.msra.mxu1 %v7066_v61  ;;  %v6612_v59 = vcombine.low %v341_v46, %v345_v47  ;;  %v6614_v61 = vcombine.low %v342_v48, %v346_v49  ;;  %v397_v46 = vld [vmem:[%s8033_s11 + $0x310] sm:$0xff]  ;;  %v398_v48 = vld [vmem:[%s8033_s11 + $0x318] sm:$0xff] }
 0x114   : > { %3582 = vmatprep.subr.bf16.mxu0 %v7073_v62  ;;  %3746 = vmatprep.subr.bf16.mxu1 %v7075_v63  ;;  %v6621_v62 = vcombine.high %v349_v55, %v353_v56  ;;  %v6623_v63 = vcombine.high %v350_v57, %v354_v58  ;;  %v401_v47 = vld [vmem:[%s8033_s11 + $0x330] sm:$0xff]  ;;  %v402_v49 = vld [vmem:[%s8033_s11 + $0x338] sm:$0xff] }
 0x117   : > { %3583 = vmatpush1.bf16.msra.mxu0 %v7072_v6  ;;  %3747 = vmatpush1.bf16.msra.mxu1 %v7074_v7  ;;  %v6620_v6 = vcombine.low %v349_v55, %v353_v56  ;;  %v6622_v7 = vcombine.low %v350_v57, %v354_v58  ;;  %v405_v55 = vld [vmem:[%s8033_s11 + $0x350] sm:$0xff]  ;;  %v406_v57 = vld [vmem:[%s8033_s11 + $0x358] sm:$0xff] }
 0x118   : > { %3757 = vmatprep.subr.bf16.mxu0 %v6573_v8  ;;  %3921 = vmatprep.subr.bf16.mxu1 %v6575_v9  ;;  %v6629_v8 = vcombine.high %v357_v1, %v361_v2  ;;  %v6631_v9 = vcombine.high %v358_v4, %v362_v5  ;;  %v409_v56 = vld [vmem:[%s8033_s11 + $0x370] sm:$0xff]  ;;  %v410_v58 = vld [vmem:[%s8033_s11 + $0x378] sm:$0xff] }
 0x11a   : > { %3585 = vmatmul.mubr.bf16.vlgmr.msra.gmra.mrb[0].mxu0 %v8360_v13  ;;  %3749 = vmatmul.mubr.bf16.vlgmr.msra.gmra.mrb[0].mxu1 %v8360_v13 }
 0x11b   : > { %3758 = vmatpush1.bf16.msra.mxu0 %v6572_v16  ;;  %3922 = vmatpush1.bf16.msra.mxu1 %v6574_v17  ;;  %v6628_v16 = vcombine.low %v357_v1, %v361_v2  ;;  %v6630_v17 = vcombine.low %v358_v4, %v362_v5  ;;  %v413_v1 = vld [vmem:[%s8033_s11 + $0x390] sm:$0xff]  ;;  %v414_v4 = vld [vmem:[%s8033_s11 + $0x398] sm:$0xff] }
 0x11c   : > { %3759 = vmatprep.subr.bf16.mxu0 %v6581_v18  ;;  %3923 = vmatprep.subr.bf16.mxu1 %v6583_v19  ;;  %v6637_v18 = vcombine.high %v365_v11, %v369_v12  ;;  %v6639_v19 = vcombine.high %v366_v14, %v370_v15  ;;  %v417_v2 = vld [vmem:[%s8033_s11 + $0x3b0] sm:$0xff]  ;;  %v418_v5 = vld [vmem:[%s8033_s11 + $0x3b8] sm:$0xff] }
 0x11d   : > { %3789 = vmatprep.mubr.bf16.mxu0 %v8089_v10  ;;  %3953 = vmatprep.mubr.bf16.mxu1 %v8089_v10  ;;  %v6598_v10 = vcombine.low %v326_v30, %v330_v31  ;;  %v382_v30 = vld [vmem:[%s8033_s11 + $0x298] sm:$0xff] }
 0x11e   : > { %v386_v31 = vld [vmem:[%s8033_s11 + $0x2b8] sm:$0xff] }
 0x11f   : > { %3760 = vmatpush1.bf16.msra.mxu0 %v6580_v24  ;;  %3924 = vmatpush1.bf16.msra.mxu1 %v6582_v25  ;;  %v6636_v24 = vcombine.low %v365_v11, %v369_v12  ;;  %v6638_v25 = vcombine.low %v366_v14, %v370_v15  ;;  %v421_v11 = vld [vmem:[%s8033_s11 + $0x3d0] sm:$0xff]  ;;  %v422_v14 = vld [vmem:[%s8033_s11 + $0x3d8] sm:$0xff] }
 0x120   : > { %3761 = vmatprep.subr.bf16.mxu0 %v6589_v27  ;;  %3925 = vmatprep.subr.bf16.mxu1 %v6591_v28  ;;  %v6645_v27 = vcombine.high %v373_v20, %v377_v21  ;;  %v6647_v28 = vcombine.high %v374_v22, %v378_v23  ;;  %v425_v12 = vld [vmem:[%s8033_s11 + $0x3f0] sm:$0xff]  ;;  %v426_v15 = vld [vmem:[%s8033_s11 + $0x3f8] sm:$0xff] }
 0x123   : > { %3762 = vmatpush1.bf16.msra.mxu0 %v6588_v32  ;;  %3926 = vmatpush1.bf16.msra.mxu1 %v6590_v33  ;;  %v6644_v32 = vcombine.low %v373_v20, %v377_v21  ;;  %v6646_v33 = vcombine.low %v374_v22, %v378_v23  ;;  %v429_v20 = vld [vmem:[%s8033_s11 + $0x410] sm:$0xff]  ;;  %v430_v22 = vld [vmem:[%s8033_s11 + $0x418] sm:$0xff] }
 0x124   : > { %3763 = vmatprep.subr.bf16.mxu0 %v6597_v34  ;;  %3927 = vmatprep.subr.bf16.mxu1 %v6599_v37  ;;  %v6653_v34 = vcombine.high %v381_v60, %v385_v29  ;;  %v6655_v37 = vcombine.high %v382_v30, %v386_v31  ;;  %v433_v21 = vld [vmem:[%s8033_s11 + $0x430] sm:$0xff]  ;;  %v434_v23 = vld [vmem:[%s8033_s11 + $0x438] sm:$0xff] }
 0x127   : > { %3764 = vmatpush1.bf16.msra.mxu0 %v6596_v54  ;;  %3928 = vmatpush1.bf16.msra.mxu1 %v6598_v10  ;;  %v6652_v54 = vcombine.low %v381_v60, %v385_v29  ;;  %v6654_v10 = vcombine.low %v382_v30, %v386_v31  ;;  %v437_v60 = vld [vmem:[%s8033_s11 + $0x450] sm:$0xff]  ;;  %v438_v30 = vld [vmem:[%s8033_s11 + $0x458] sm:$0xff] }
 0x128   : > { %3765 = vmatprep.subr.bf16.mxu0 %v6605_v43  ;;  %3929 = vmatprep.subr.bf16.mxu1 %v6607_v44  ;;  %v6661_v43 = vcombine.high %v389_v38, %v393_v39  ;;  %v6663_v44 = vcombine.high %v390_v40, %v394_v42  ;;  %v441_v29 = vld [vmem:[%s8033_s11 + $0x470] sm:$0xff]  ;;  %v442_v31 = vld [vmem:[%s8033_s11 + $0x478] sm:$0xff] }
 0x12b   : > { %3766 = vmatpush1.bf16.msra.mxu0 %v6604_v50  ;;  %3930 = vmatpush1.bf16.msra.mxu1 %v6606_v51  ;;  %v6660_v50 = vcombine.low %v389_v38, %v393_v39  ;;  %v6662_v51 = vcombine.low %v390_v40, %v394_v42  ;;  %v445_v38 = vld [vmem:[%s8033_s11 + $0x490] sm:$0xff]  ;;  %v446_v40 = vld [vmem:[%s8033_s11 + $0x498] sm:$0xff] }
 0x12c   : > { %3767 = vmatprep.subr.bf16.mxu0 %v6613_v52  ;;  %3931 = vmatprep.subr.bf16.mxu1 %v6615_v53  ;;  %v6669_v52 = vcombine.high %v397_v46, %v401_v47  ;;  %v6671_v53 = vcombine.high %v398_v48, %v402_v49  ;;  %v449_v39 = vld [vmem:[%s8033_s11 + $0x4b0] sm:$0xff]  ;;  %v450_v42 = vld [vmem:[%s8033_s11 + $0x4b8] sm:$0xff] }
 0x12f   : > { %3768 = vmatpush1.bf16.msra.mxu0 %v6612_v59  ;;  %3932 = vmatpush1.bf16.msra.mxu1 %v6614_v61  ;;  %v6668_v59 = vcombine.low %v397_v46, %v401_v47  ;;  %v6670_v61 = vcombine.low %v398_v48, %v402_v49  ;;  %v453_v46 = vld [vmem:[%s8033_s11 + $0x4d0] sm:$0xff]  ;;  %v454_v48 = vld [vmem:[%s8033_s11 + $0x4d8] sm:$0xff] }
 0x130   : > { %3769 = vmatprep.subr.bf16.mxu0 %v6621_v62  ;;  %3933 = vmatprep.subr.bf16.mxu1 %v6623_v63  ;;  %v6677_v62 = vcombine.high %v405_v55, %v409_v56  ;;  %v6679_v63 = vcombine.high %v406_v57, %v410_v58  ;;  %v457_v47 = vld [vmem:[%s8033_s11 + $0x4f0] sm:$0xff]  ;;  %v458_v49 = vld [vmem:[%s8033_s11 + $0x4f8] sm:$0xff] }
 0x133   : > { %3770 = vmatpush1.bf16.msra.mxu0 %v6620_v6  ;;  %3934 = vmatpush1.bf16.msra.mxu1 %v6622_v7  ;;  %v6676_v6 = vcombine.low %v405_v55, %v409_v56  ;;  %v6678_v7 = vcombine.low %v406_v57, %v410_v58  ;;  %v465_v55 = vld [vmem:[%s8033_s11 + $0x530] sm:$0xff]  ;;  %v462_v56 = vld [vmem:[%s8033_s11 + $0x518] sm:$0xff]  ;;  %v6724_v58 = vcombine.low %v453_v46, %v457_v47 }
 0x134   : > { %3771 = vmatprep.subr.bf16.mxu0 %v6629_v8  ;;  %3935 = vmatprep.subr.bf16.mxu1 %v6631_v9  ;;  %v6685_v8 = vcombine.high %v413_v1, %v417_v2  ;;  %v6687_v9 = vcombine.high %v414_v4, %v418_v5  ;;  %v466_v57 = vld [vmem:[%s8033_s11 + $0x538] sm:$0xff] }
 0x137   : > { %3772 = vmatpush1.bf16.msra.mxu0 %v6628_v16  ;;  %3936 = vmatpush1.bf16.msra.mxu1 %v6630_v17  ;;  %v6684_v16 = vcombine.low %v413_v1, %v417_v2  ;;  %v6686_v17 = vcombine.low %v414_v4, %v418_v5  ;;  %v470_v1 = vld [vmem:[%s8033_s11 + $0x558] sm:$0xff]  ;;  %v6734_v5 = vcombine.low %v462_v56, %v466_v57 }
 0x138   : > { %3773 = vmatprep.subr.bf16.mxu0 %v6637_v18  ;;  %3937 = vmatprep.subr.bf16.mxu1 %v6639_v19  ;;  %v6693_v18 = vcombine.high %v421_v11, %v425_v12  ;;  %v6695_v19 = vcombine.high %v422_v14, %v426_v15  ;;  %v474_v2 = vld [vmem:[%s8033_s11 + $0x578] sm:$0xff] }
 0x13b   : > { %3774 = vmatpush1.bf16.msra.mxu0 %v6636_v24  ;;  %3938 = vmatpush1.bf16.msra.mxu1 %v6638_v25  ;;  %v6692_v24 = vcombine.low %v421_v11, %v425_v12  ;;  %v6694_v25 = vcombine.low %v422_v14, %v426_v15  ;;  %v478_v11 = vld [vmem:[%s8033_s11 + $0x598] sm:$0xff]  ;;  %v6742_v15 = vcombine.low %v470_v1, %v474_v2 }
 0x13c   : > { %3775 = vmatprep.subr.bf16.mxu0 %v6645_v27  ;;  %3939 = vmatprep.subr.bf16.mxu1 %v6647_v28  ;;  %v6701_v27 = vcombine.high %v429_v20, %v433_v21  ;;  %v6703_v28 = vcombine.high %v430_v22, %v434_v23  ;;  %v482_v12 = vld [vmem:[%s8033_s11 + $0x5b8] sm:$0xff] }
 0x13f   : > { %3776 = vmatpush1.bf16.msra.mxu0 %v6644_v32  ;;  %3940 = vmatpush1.bf16.msra.mxu1 %v6646_v33  ;;  %v6700_v32 = vcombine.low %v429_v20, %v433_v21  ;;  %v6702_v33 = vcombine.low %v430_v22, %v434_v23  ;;  %v486_v20 = vld [vmem:[%s8033_s11 + $0x5d8] sm:$0xff]  ;;  %v6750_v23 = vcombine.low %v478_v11, %v482_v12 }
 0x140   : > { %3777 = vmatprep.subr.bf16.mxu0 %v6653_v34  ;;  %3941 = vmatprep.subr.bf16.mxu1 %v6655_v37  ;;  %v6709_v34 = vcombine.high %v437_v60, %v441_v29  ;;  %v6711_v37 = vcombine.high %v438_v30, %v442_v31  ;;  %v490_v21 = vld [vmem:[%s8033_s11 + $0x5f8] sm:$0xff] }
 0x143   : > { %3778 = vmatpush1.bf16.msra.mxu0 %v6652_v54  ;;  %3942 = vmatpush1.bf16.msra.mxu1 %v6654_v10  ;;  %v6708_v54 = vcombine.low %v437_v60, %v441_v29  ;;  %v6710_v10 = vcombine.low %v438_v30, %v442_v31  ;;  %v494_v60 = vld [vmem:[%s8033_s11 + $0x618] sm:$0xff]  ;;  %v6758_v31 = vcombine.low %v486_v20, %v490_v21 }
 0x144   : > { %3779 = vmatprep.subr.bf16.mxu0 %v6661_v43  ;;  %3943 = vmatprep.subr.bf16.mxu1 %v6663_v44  ;;  %v6717_v43 = vcombine.high %v445_v38, %v449_v39  ;;  %v6719_v44 = vcombine.high %v446_v40, %v450_v42  ;;  %v498_v29 = vld [vmem:[%s8033_s11 + $0x638] sm:$0xff] }
 0x147   : > { %3780 = vmatpush1.bf16.msra.mxu0 %v6660_v50  ;;  %3944 = vmatpush1.bf16.msra.mxu1 %v6662_v51  ;;  %v6718_v50 = vcombine.low %v446_v40, %v450_v42  ;;  %v6725_v51 = vcombine.high %v453_v46, %v457_v47  ;;  %v6766_v42 = vcombine.low %v494_v60, %v498_v29  ;;  %v510_v46 = vld [vmem:[%s8033_s11 + $0x698] sm:$0xff] }
 0x148   : > { %3781 = vmatprep.subr.bf16.mxu0 %v6669_v52  ;;  %3945 = vmatprep.subr.bf16.mxu1 %v6671_v53  ;;  %v6727_v52 = vcombine.high %v454_v48, %v458_v49  ;;  %v461_v53 = vld [vmem:[%s8033_s11 + $0x510] sm:$0xff]  ;;  %v514_v47 = vld [vmem:[%s8033_s11 + $0x6b8] sm:$0xff] }
 0x149   : > { %v6732_v4 = vcombine.low %v461_v53, %v465_v55 }
 0x14b   : > { %3782 = vmatpush1.bf16.msra.mxu0 %v6668_v59  ;;  %3946 = vmatpush1.bf16.msra.mxu1 %v6670_v61  ;;  %v6733_v59 = vcombine.high %v461_v53, %v465_v55  ;;  %v6735_v61 = vcombine.high %v462_v56, %v466_v57  ;;  %v518_v53 = vld [vmem:[%s8033_s11 + $0x6d8] sm:$0xff]  ;;  %v6782_v57 = vcombine.low %v510_v46, %v514_v47 }
 0x14c   : > { %3783 = vmatprep.subr.bf16.mxu0 %v6677_v62  ;;  %3947 = vmatprep.subr.bf16.mxu1 %v6679_v63  ;;  %v469_v62 = vld [vmem:[%s8033_s11 + $0x550] sm:$0xff]  ;;  %v522_v55 = vld [vmem:[%s8033_s11 + $0x6f8] sm:$0xff] }
 0x14d   : > { %v473_v63 = vld [vmem:[%s8033_s11 + $0x570] sm:$0xff] }
 0x14e   : > { %v6740_v14 = vcombine.low %v469_v62, %v473_v63 }
 0x14f   : > { %3784 = vmatpush1.bf16.msra.mxu0 %v6676_v6  ;;  %3948 = vmatpush1.bf16.msra.mxu1 %v6678_v7  ;;  %v6741_v6 = vcombine.high %v469_v62, %v473_v63  ;;  %v6743_v7 = vcombine.high %v470_v1, %v474_v2  ;;  %v526_v62 = vld [vmem:[%s8033_s11 + $0x718] sm:$0xff]  ;;  %v6790_v2 = vcombine.low %v518_v53, %v522_v55 }
 0x150   : > { %3785 = vmatprep.subr.bf16.mxu0 %v6685_v8  ;;  %3949 = vmatprep.subr.bf16.mxu1 %v6687_v9  ;;  %v477_v8 = vld [vmem:[%s8033_s11 + $0x590] sm:$0xff]  ;;  %v530_v63 = vld [vmem:[%s8033_s11 + $0x738] sm:$0xff] }
 0x151   : > { %v481_v9 = vld [vmem:[%s8033_s11 + $0x5b0] sm:$0xff] }
 0x152   : > { %v6748_v22 = vcombine.low %v477_v8, %v481_v9 }
 0x153   : > { %3786 = vmatpush1.bf16.msra.mxu0 %v6684_v16  ;;  %3950 = vmatpush1.bf16.msra.mxu1 %v6686_v17  ;;  %v6749_v16 = vcombine.high %v477_v8, %v481_v9  ;;  %v6751_v17 = vcombine.high %v478_v11, %v482_v12  ;;  %v534_v8 = vld [vmem:[%s8033_s11 + $0x758] sm:$0xff]  ;;  %v6798_v12 = vcombine.low %v526_v62, %v530_v63 }
 0x154   : > { %3787 = vmatprep.subr.bf16.mxu0 %v6693_v18  ;;  %3951 = vmatprep.subr.bf16.mxu1 %v6695_v19  ;;  %v485_v18 = vld [vmem:[%s8033_s11 + $0x5d0] sm:$0xff]  ;;  %v538_v9 = vld [vmem:[%s8033_s11 + $0x778] sm:$0xff] }
 0x155   : > { %v489_v19 = vld [vmem:[%s8033_s11 + $0x5f0] sm:$0xff] }
 0x156   : > { %v6756_v30 = vcombine.low %v485_v18, %v489_v19 }
 0x157   : > { %3788 = vmatpush1.bf16.msra.mxu0 %v6692_v24  ;;  %3952 = vmatpush1.bf16.msra.mxu1 %v6694_v25  ;;  %v6757_v24 = vcombine.high %v485_v18, %v489_v19  ;;  %v6759_v25 = vcombine.high %v486_v20, %v490_v21  ;;  %v542_v18 = vld [vmem:[%s8033_s11 + $0x798] sm:$0xff]  ;;  %v6806_v21 = vcombine.low %v534_v8, %v538_v9 }
 0x158   : > { %3798 = vmatprep.subr.bf16.mxu0 %v6701_v27  ;;  %3962 = vmatprep.subr.bf16.mxu1 %v6703_v28  ;;  %v493_v27 = vld [vmem:[%s8033_s11 + $0x610] sm:$0xff]  ;;  %v546_v19 = vld [vmem:[%s8033_s11 + $0x7b8] sm:$0xff] }
 0x159   : > { %v497_v28 = vld [vmem:[%s8033_s11 + $0x630] sm:$0xff] }
 0x15a   : > { %3790 = vmatmul.mubr.bf16.vlgmr.msra.gmra.mrb[4].mxu0 %v8134_v26  ;;  %3954 = vmatmul.mubr.bf16.vlgmr.msra.gmra.mrb[4].mxu1 %v8134_v26  ;;  %v6716_v26 = vcombine.low %v445_v38, %v449_v39  ;;  %v502_v38 = vld [vmem:[%s8033_s11 + $0x658] sm:$0xff]  ;;  %v6764_v40 = vcombine.low %v493_v27, %v497_v28 }
 0x15b   : > { %3799 = vmatpush1.bf16.msra.mxu0 %v6700_v32  ;;  %3963 = vmatpush1.bf16.msra.mxu1 %v6702_v33  ;;  %v6765_v32 = vcombine.high %v493_v27, %v497_v28  ;;  %v6767_v33 = vcombine.high %v494_v60, %v498_v29  ;;  %v506_v39 = vld [vmem:[%s8033_s11 + $0x678] sm:$0xff]  ;;  %v6814_v29 = vcombine.low %v542_v18, %v546_v19 }
 0x15c   : > { %3800 = vmatprep.subr.bf16.mxu0 %v6709_v34  ;;  %3964 = vmatprep.subr.bf16.mxu1 %v6711_v37  ;;  %v501_v34 = vld [vmem:[%s8033_s11 + $0x650] sm:$0xff]  ;;  %v550_v27 = vld [vmem:[%s8033_s11 + $0x7d8] sm:$0xff] }
 0x15d   : > { %3830 = vmatprep.mubr.bf16.mxu0 %v8142_v0  ;;  %3994 = vmatprep.mubr.bf16.mxu1 %v8142_v0  ;;  %v6726_v0 = vcombine.low %v454_v48, %v458_v49  ;;  %v505_v37 = vld [vmem:[%s8033_s11 + $0x670] sm:$0xff]  ;;  %v6774_v49 = vcombine.low %v502_v38, %v506_v39  ;;  %v554_v28 = vld [vmem:[%s8033_s11 + $0x7f8] sm:$0xff] }
 0x15e   : > { %v6772_v48 = vcombine.low %v501_v34, %v505_v37 }
 0x15f   : > { %3801 = vmatpush1.bf16.msra.mxu0 %v6708_v54  ;;  %3965 = vmatpush1.bf16.msra.mxu1 %v6710_v10  ;;  %v6773_v54 = vcombine.high %v501_v34, %v505_v37  ;;  %v6775_v10 = vcombine.high %v502_v38, %v506_v39  ;;  %v558_v34 = vld [vmem:[%s8033_s11 + $0x818] sm:$0xff]  ;;  %v6822_v39 = vcombine.low %v550_v27, %v554_v28 }
 0x160   : > { %3802 = vmatprep.subr.bf16.mxu0 %v6717_v43  ;;  %3966 = vmatprep.subr.bf16.mxu1 %v6719_v44  ;;  %v509_v43 = vld [vmem:[%s8033_s11 + $0x690] sm:$0xff]  ;;  %v562_v37 = vld [vmem:[%s8033_s11 + $0x838] sm:$0xff] }
 0x161   : > { %v513_v44 = vld [vmem:[%s8033_s11 + $0x6b0] sm:$0xff] }
 0x162   : > { %v6780_v56 = vcombine.low %v509_v43, %v513_v44 }
 0x163   : > { %3803 = vmatpush1.bf16.msra.mxu0 %v6716_v26  ;;  %3967 = vmatpush1.bf16.msra.mxu1 %v6718_v50  ;;  %v6781_v26 = vcombine.high %v509_v43, %v513_v44  ;;  %v6783_v50 = vcombine.high %v510_v46, %v514_v47  ;;  %v566_v43 = vld [vmem:[%s8033_s11 + $0x858] sm:$0xff]  ;;  %v6830_v47 = vcombine.low %v558_v34, %v562_v37 }
 0x164   : > { %3804 = vmatprep.subr.bf16.mxu0 %v6725_v51  ;;  %3968 = vmatprep.subr.bf16.mxu1 %v6727_v52  ;;  %v517_v51 = vld [vmem:[%s8033_s11 + $0x6d0] sm:$0xff]  ;;  %v570_v44 = vld [vmem:[%s8033_s11 + $0x878] sm:$0xff] }
 0x165   : > { %v521_v52 = vld [vmem:[%s8033_s11 + $0x6f0] sm:$0xff] }
 0x166   : > { %v6788_v1 = vcombine.low %v517_v51, %v521_v52 }
 0x167   : > { %3805 = vmatpush1.bf16.msra.mxu0 %v6724_v58  ;;  %3969 = vmatpush1.bf16.msra.mxu1 %v6726_v0  ;;  %v6789_v58 = vcombine.high %v517_v51, %v521_v52  ;;  %v6791_v0 = vcombine.high %v518_v53, %v522_v55  ;;  %v574_v51 = vld [vmem:[%s8033_s11 + $0x898] sm:$0xff]  ;;  %v6838_v55 = vcombine.low %v566_v43, %v570_v44 }
 0x168   : > { %3806 = vmatprep.subr.bf16.mxu0 %v6733_v59  ;;  %3970 = vmatprep.subr.bf16.mxu1 %v6735_v61  ;;  %v525_v59 = vld [vmem:[%s8033_s11 + $0x710] sm:$0xff]  ;;  %v578_v52 = vld [vmem:[%s8033_s11 + $0x8b8] sm:$0xff] }
 0x169   : > { %v529_v61 = vld [vmem:[%s8033_s11 + $0x730] sm:$0xff] }
 0x16a   : > { %v6796_v11 = vcombine.low %v525_v59, %v529_v61 }
 0x16b   : > { %3807 = vmatpush1.bf16.msra.mxu0 %v6732_v4  ;;  %3971 = vmatpush1.bf16.msra.mxu1 %v6734_v5  ;;  %v6797_v4 = vcombine.high %v525_v59, %v529_v61  ;;  %v6799_v5 = vcombine.high %v526_v62, %v530_v63  ;;  %v582_v59 = vld [vmem:[%s8033_s11 + $0x8d8] sm:$0xff]  ;;  %v6846_v62 = vcombine.low %v574_v51, %v578_v52 }
 0x16c   : > { %3808 = vmatprep.subr.bf16.mxu0 %v6741_v6  ;;  %3972 = vmatprep.subr.bf16.mxu1 %v6743_v7  ;;  %v533_v6 = vld [vmem:[%s8033_s11 + $0x750] sm:$0xff]  ;;  %v586_v61 = vld [vmem:[%s8033_s11 + $0x8f8] sm:$0xff] }
 0x16d   : > { %v537_v7 = vld [vmem:[%s8033_s11 + $0x770] sm:$0xff] }
 0x16e   : > { %v6804_v20 = vcombine.low %v533_v6, %v537_v7 }
 0x16f   : > { %3809 = vmatpush1.bf16.msra.mxu0 %v6740_v14  ;;  %3973 = vmatpush1.bf16.msra.mxu1 %v6742_v15  ;;  %v6805_v14 = vcombine.high %v533_v6, %v537_v7  ;;  %v6807_v15 = vcombine.high %v534_v8, %v538_v9  ;;  %v594_v6 = vld [vmem:[%s8033_s11 + $0x938] sm:$0xff] }
 0x170   : > { %3810 = vmatprep.subr.bf16.mxu0 %v6749_v16  ;;  %3974 = vmatprep.subr.bf16.mxu1 %v6751_v17  ;;  %v541_v16 = vld [vmem:[%s8033_s11 + $0x790] sm:$0xff] }
 0x171   : > { %v545_v17 = vld [vmem:[%s8033_s11 + $0x7b0] sm:$0xff] }
 0x172   : > { %v6812_v60 = vcombine.low %v541_v16, %v545_v17 }
 0x173   : > { %3811 = vmatpush1.bf16.msra.mxu0 %v6748_v22  ;;  %3975 = vmatpush1.bf16.msra.mxu1 %v6750_v23  ;;  %v6813_v22 = vcombine.high %v541_v16, %v545_v17  ;;  %v6815_v23 = vcombine.high %v542_v18, %v546_v19 }
 0x174   : > { %3812 = vmatprep.subr.bf16.mxu0 %v6757_v24  ;;  %3976 = vmatprep.subr.bf16.mxu1 %v6759_v25  ;;  %v549_v24 = vld [vmem:[%s8033_s11 + $0x7d0] sm:$0xff] }
 0x175   : > { %v553_v25 = vld [vmem:[%s8033_s11 + $0x7f0] sm:$0xff] }
 0x176   : > { %v6820_v38 = vcombine.low %v549_v24, %v553_v25 }
 0x177   : > { %3813 = vmatpush1.bf16.msra.mxu0 %v6756_v30  ;;  %3977 = vmatpush1.bf16.msra.mxu1 %v6758_v31  ;;  %v6821_v30 = vcombine.high %v549_v24, %v553_v25  ;;  %v6823_v31 = vcombine.high %v550_v27, %v554_v28 }
 0x178   : > { %3814 = vmatprep.subr.bf16.mxu0 %v6765_v32  ;;  %3978 = vmatprep.subr.bf16.mxu1 %v6767_v33  ;;  %v557_v32 = vld [vmem:[%s8033_s11 + $0x810] sm:$0xff] }
 0x179   : > { %v561_v33 = vld [vmem:[%s8033_s11 + $0x830] sm:$0xff] }
 0x17a   : > { %v6828_v46 = vcombine.low %v557_v32, %v561_v33 }
 0x17b   : > { %3815 = vmatpush1.bf16.msra.mxu0 %v6764_v40  ;;  %3979 = vmatpush1.bf16.msra.mxu1 %v6766_v42  ;;  %v6829_v40 = vcombine.high %v557_v32, %v561_v33  ;;  %v6831_v42 = vcombine.high %v558_v34, %v562_v37 }
 0x17c   : > { %3816 = vmatprep.subr.bf16.mxu0 %v6773_v54  ;;  %3980 = vmatprep.subr.bf16.mxu1 %v6775_v10  ;;  %v565_v54 = vld [vmem:[%s8033_s11 + $0x850] sm:$0xff] }
 0x17d   : > { %v569_v10 = vld [vmem:[%s8033_s11 + $0x870] sm:$0xff] }
 0x17e   : > { %v6836_v53 = vcombine.low %v565_v54, %v569_v10 }
 0x17f   : > { %3817 = vmatpush1.bf16.msra.mxu0 %v6772_v48  ;;  %3981 = vmatpush1.bf16.msra.mxu1 %v6774_v49  ;;  %v6837_v48 = vcombine.high %v565_v54, %v569_v10  ;;  %v6839_v49 = vcombine.high %v566_v43, %v570_v44 }
 0x180   : > { %3818 = vmatprep.subr.bf16.mxu0 %v6781_v26  ;;  %3982 = vmatprep.subr.bf16.mxu1 %v6783_v50  ;;  %v573_v26 = vld [vmem:[%s8033_s11 + $0x890] sm:$0xff] }
 0x181   : > { %v577_v50 = vld [vmem:[%s8033_s11 + $0x8b0] sm:$0xff] }
 0x183   : > { %3819 = vmatpush1.bf16.msra.mxu0 %v6780_v56  ;;  %3983 = vmatpush1.bf16.msra.mxu1 %v6782_v57  ;;  %v6845_v56 = vcombine.high %v573_v26, %v577_v50  ;;  %v6847_v57 = vcombine.high %v574_v51, %v578_v52 }
 0x184   : > { %3820 = vmatprep.subr.bf16.mxu0 %v6789_v58  ;;  %3984 = vmatprep.subr.bf16.mxu1 %v6791_v0  ;;  %v581_v58 = vld [vmem:[%s8033_s11 + $0x8d0] sm:$0xff] }
 0x185   : > { %v585_v0 = vld [vmem:[%s8033_s11 + $0x8f0] sm:$0xff] }
 0x186   : > { %v6853_v63 = vcombine.high %v581_v58, %v585_v0  ;;  %v6852_v7 = vcombine.low %v581_v58, %v585_v0 }
 0x187   : > { %3821 = vmatpush1.bf16.msra.mxu0 %v6788_v1  ;;  %3985 = vmatpush1.bf16.msra.mxu1 %v6790_v2  ;;  %v6855_v1 = vcombine.high %v582_v59, %v586_v61  ;;  %v589_v2 = vld [vmem:[%s8033_s11 + $0x910] sm:$0xff] }
 0x188   : > { %3822 = vmatprep.subr.bf16.mxu0 %v6797_v4  ;;  %3986 = vmatprep.subr.bf16.mxu1 %v6799_v5  ;;  %v593_v4 = vld [vmem:[%s8033_s11 + $0x930] sm:$0xff]  ;;  %v590_v5 = vld [vmem:[%s8033_s11 + $0x918] sm:$0xff] }
 0x189   : > { %v6861_v8 = vcombine.high %v589_v2, %v593_v4  ;;  %v6863_v9 = vcombine.high %v590_v5, %v594_v6  ;;  %v6860_v16 = vcombine.low %v589_v2, %v593_v4  ;;  %v6862_v17 = vcombine.low %v590_v5, %v594_v6 }
 0x18b   : > { %3823 = vmatpush1.bf16.msra.mxu0 %v6796_v11  ;;  %3987 = vmatpush1.bf16.msra.mxu1 %v6798_v12  ;;  %v597_v11 = vld [vmem:[%s8033_s11 + $0x950] sm:$0xff] }
 0x18c   : > { %3824 = vmatprep.subr.bf16.mxu0 %v6805_v14  ;;  %3988 = vmatprep.subr.bf16.mxu1 %v6807_v15  ;;  %v601_v12 = vld [vmem:[%s8033_s11 + $0x970] sm:$0xff]  ;;  %v598_v14 = vld [vmem:[%s8033_s11 + $0x958] sm:$0xff] }
 0x18d   : > { %v602_v15 = vld [vmem:[%s8033_s11 + $0x978] sm:$0xff]  ;;  %v6869_v18 = vcombine.high %v597_v11, %v601_v12  ;;  %v6868_v24 = vcombine.low %v597_v11, %v601_v12 }
 0x18e   : > { %v6871_v19 = vcombine.high %v598_v14, %v602_v15  ;;  %v6870_v25 = vcombine.low %v598_v14, %v602_v15 }
 0x18f   : > { %3825 = vmatpush1.bf16.msra.mxu0 %v6804_v20  ;;  %3989 = vmatpush1.bf16.msra.mxu1 %v6806_v21  ;;  %v605_v20 = vld [vmem:[%s8033_s11 + $0x990] sm:$0xff] }
 0x190   : > { %3826 = vmatprep.subr.bf16.mxu0 %v6813_v22  ;;  %3990 = vmatprep.subr.bf16.mxu1 %v6815_v23  ;;  %v609_v21 = vld [vmem:[%s8033_s11 + $0x9b0] sm:$0xff]  ;;  %v606_v22 = vld [vmem:[%s8033_s11 + $0x998] sm:$0xff] }
 0x191   : > { %v610_v23 = vld [vmem:[%s8033_s11 + $0x9b8] sm:$0xff]  ;;  %v6877_v27 = vcombine.high %v605_v20, %v609_v21  ;;  %v6876_v32 = vcombine.low %v605_v20, %v609_v21 }
 0x192   : > { %v6879_v28 = vcombine.high %v606_v22, %v610_v23  ;;  %v6878_v33 = vcombine.low %v606_v22, %v610_v23 }
 0x193   : > { %3827 = vmatpush1.bf16.msra.mxu0 %v6812_v60  ;;  %3991 = vmatpush1.bf16.msra.mxu1 %v6814_v29  ;;  %v613_v60 = vld [vmem:[%s8033_s11 + $0x9d0] sm:$0xff] }
 0x194   : > { %3828 = vmatprep.subr.bf16.mxu0 %v6821_v30  ;;  %3992 = vmatprep.subr.bf16.mxu1 %v6823_v31  ;;  %v617_v29 = vld [vmem:[%s8033_s11 + $0x9f0] sm:$0xff]  ;;  %v614_v30 = vld [vmem:[%s8033_s11 + $0x9d8] sm:$0xff] }
 0x195   : > { %v618_v31 = vld [vmem:[%s8033_s11 + $0x9f8] sm:$0xff]  ;;  %v6885_v34 = vcombine.high %v613_v60, %v617_v29  ;;  %v6884_v54 = vcombine.low %v613_v60, %v617_v29 }
 0x196   : > { %v6887_v37 = vcombine.high %v614_v30, %v618_v31  ;;  %v6886_v10 = vcombine.low %v614_v30, %v618_v31 }
 0x197   : > { %3829 = vmatpush1.bf16.msra.mxu0 %v6820_v38  ;;  %3993 = vmatpush1.bf16.msra.mxu1 %v6822_v39  ;;  %v621_v38 = vld [vmem:[%s8033_s11 + $0xa10] sm:$0xff] }
 0x198   : > { %3839 = vmatprep.subr.bf16.mxu0 %v6829_v40  ;;  %4003 = vmatprep.subr.bf16.mxu1 %v6831_v42  ;;  %v625_v39 = vld [vmem:[%s8033_s11 + $0xa30] sm:$0xff]  ;;  %v622_v40 = vld [vmem:[%s8033_s11 + $0xa18] sm:$0xff] }
 0x199   : > { %v626_v42 = vld [vmem:[%s8033_s11 + $0xa38] sm:$0xff]  ;;  %v6893_v43 = vcombine.high %v621_v38, %v625_v39 }
 0x19a   : > { %3831 = vmatmul.mubr.bf16.vlgmr.msra.gmra.mrb[4].mxu0 %v8216_v41  ;;  %3995 = vmatmul.mubr.bf16.vlgmr.msra.gmra.mrb[4].mxu1 %v8216_v41  ;;  %v6844_v41 = vcombine.low %v573_v26, %v577_v50  ;;  %v6895_v44 = vcombine.high %v622_v40, %v626_v42  ;;  %v6892_v26 = vcombine.low %v621_v38, %v625_v39 }
 0x19b   : > { %3840 = vmatpush1.bf16.msra.mxu0 %v6828_v46  ;;  %4004 = vmatpush1.bf16.msra.mxu1 %v6830_v47  ;;  %v629_v46 = vld [vmem:[%s8033_s11 + $0xa50] sm:$0xff]  ;;  %v6894_v50 = vcombine.low %v622_v40, %v626_v42 }
 0x19c   : > { %3841 = vmatprep.subr.bf16.mxu0 %v6837_v48  ;;  %4005 = vmatprep.subr.bf16.mxu1 %v6839_v49  ;;  %v633_v47 = vld [vmem:[%s8033_s11 + $0xa70] sm:$0xff]  ;;  %v630_v48 = vld [vmem:[%s8033_s11 + $0xa58] sm:$0xff] }
 0x19d   : > { %3871 = vmatprep.mubr.bf16.mxu0 %v8145_v35  ;;  %4035 = vmatprep.mubr.bf16.mxu1 %v8145_v35  ;;  %v6854_v35 = vcombine.low %v582_v59, %v586_v61  ;;  %v634_v49 = vld [vmem:[%s8033_s11 + $0xa78] sm:$0xff]  ;;  %v6901_v51 = vcombine.high %v629_v46, %v633_v47  ;;  %v6900_v58 = vcombine.low %v629_v46, %v633_v47 }
 0x19e   : > { %v6903_v52 = vcombine.high %v630_v48, %v634_v49  ;;  %v6902_v0 = vcombine.low %v630_v48, %v634_v49 }
 0x19f   : > { %3842 = vmatpush1.bf16.msra.mxu0 %v6836_v53  ;;  %4006 = vmatpush1.bf16.msra.mxu1 %v6838_v55  ;;  %v637_v53 = vld [vmem:[%s8033_s11 + $0xa90] sm:$0xff] }
 0x1a0   : > { %3843 = vmatprep.subr.bf16.mxu0 %v6845_v56  ;;  %4007 = vmatprep.subr.bf16.mxu1 %v6847_v57  ;;  %v641_v55 = vld [vmem:[%s8033_s11 + $0xab0] sm:$0xff]  ;;  %v638_v56 = vld [vmem:[%s8033_s11 + $0xa98] sm:$0xff] }
 0x1a1   : > { %v642_v57 = vld [vmem:[%s8033_s11 + $0xab8] sm:$0xff]  ;;  %v6909_v59 = vcombine.high %v637_v53, %v641_v55  ;;  %v6908_v2 = vcombine.low %v637_v53, %v641_v55 }
 0x1a2   : > { %v6911_v61 = vcombine.high %v638_v56, %v642_v57  ;;  %v6910_v4 = vcombine.low %v638_v56, %v642_v57 }
 0x1a3   : > { %3844 = vmatpush1.bf16.msra.mxu0 %v6844_v41  ;;  %4008 = vmatpush1.bf16.msra.mxu1 %v6846_v62  ;;  %v645_v41 = vld [vmem:[%s8033_s11 + $0xad0] sm:$0xff] }
 0x1a4   : > { %3845 = vmatprep.subr.bf16.mxu0 %v6853_v63  ;;  %4009 = vmatprep.subr.bf16.mxu1 %v6855_v1  ;;  %v649_v62 = vld [vmem:[%s8033_s11 + $0xaf0] sm:$0xff]  ;;  %v646_v63 = vld [vmem:[%s8033_s11 + $0xad8] sm:$0xff] }
 0x1a5   : > { %v650_v1 = vld [vmem:[%s8033_s11 + $0xaf8] sm:$0xff]  ;;  %v6917_v5 = vcombine.high %v645_v41, %v649_v62  ;;  %v6916_v11 = vcombine.low %v645_v41, %v649_v62 }
 0x1a6   : > { %v6919_v6 = vcombine.high %v646_v63, %v650_v1  ;;  %v6918_v12 = vcombine.low %v646_v63, %v650_v1 }
 0x1a7   : > { %3846 = vmatpush1.bf16.msra.mxu0 %v6852_v7  ;;  %4010 = vmatpush1.bf16.msra.mxu1 %v6854_v35  ;;  %v653_v7 = vld [vmem:[%s8033_s11 + $0xb10] sm:$0xff] }
 0x1a8   : > { %3847 = vmatprep.subr.bf16.mxu0 %v6861_v8  ;;  %4011 = vmatprep.subr.bf16.mxu1 %v6863_v9  ;;  %v657_v35 = vld [vmem:[%s8033_s11 + $0xb30] sm:$0xff]  ;;  %v654_v8 = vld [vmem:[%s8033_s11 + $0xb18] sm:$0xff] }
 0x1a9   : > { %v658_v9 = vld [vmem:[%s8033_s11 + $0xb38] sm:$0xff]  ;;  %v6925_v14 = vcombine.high %v653_v7, %v657_v35  ;;  %v6924_v20 = vcombine.low %v653_v7, %v657_v35 }
 0x1aa   : > { %v6927_v15 = vcombine.high %v654_v8, %v658_v9  ;;  %v6926_v21 = vcombine.low %v654_v8, %v658_v9  ;;  %v717_v9 = vld [vmem:[%s8033_s11 + $0xd10] sm:$0xff] }
 0x1ab   : > { %3848 = vmatpush1.bf16.msra.mxu0 %v6860_v16  ;;  %4012 = vmatpush1.bf16.msra.mxu1 %v6862_v17  ;;  %v661_v16 = vld [vmem:[%s8033_s11 + $0xb50] sm:$0xff] }
 0x1ac   : > { %3849 = vmatprep.subr.bf16.mxu0 %v6869_v18  ;;  %4013 = vmatprep.subr.bf16.mxu1 %v6871_v19  ;;  %v665_v17 = vld [vmem:[%s8033_s11 + $0xb70] sm:$0xff]  ;;  %v662_v18 = vld [vmem:[%s8033_s11 + $0xb58] sm:$0xff] }
 0x1ad   : > { %v666_v19 = vld [vmem:[%s8033_s11 + $0xb78] sm:$0xff]  ;;  %v6933_v22 = vcombine.high %v661_v16, %v665_v17  ;;  %v6932_v60 = vcombine.low %v661_v16, %v665_v17 }
 0x1ae   : > { %v6935_v23 = vcombine.high %v662_v18, %v666_v19  ;;  %v6934_v29 = vcombine.low %v662_v18, %v666_v19  ;;  %v7970_v18 = vmov 1983009808  }
 0x1af   : > { %3850 = vmatpush1.bf16.msra.mxu0 %v6868_v24  ;;  %4014 = vmatpush1.bf16.msra.mxu1 %v6870_v25  ;;  %v669_v24 = vld [vmem:[%s8033_s11 + $0xb90] sm:$0xff]  ;;  %v4096_v19 = vunpack.c.l.s4 %v7970_v18  ;;  %v770_v18 = vld [vmem:[%s8033_s11 + $0xeb8] sm:$0xff] }
 0x1b0   : > { %3851 = vmatprep.subr.bf16.mxu0 %v6877_v27  ;;  %4015 = vmatprep.subr.bf16.mxu1 %v6879_v28  ;;  %v673_v25 = vld [vmem:[%s8033_s11 + $0xbb0] sm:$0xff]  ;;  %v670_v27 = vld [vmem:[%s8033_s11 + $0xb98] sm:$0xff] }
 0x1b1   : > { %v674_v28 = vld [vmem:[%s8033_s11 + $0xbb8] sm:$0xff]  ;;  %v6941_v30 = vcombine.high %v669_v24, %v673_v25  ;;  %v6940_v38 = vcombine.low %v669_v24, %v673_v25 }
 0x1b2   : > { %v6943_v31 = vcombine.high %v670_v27, %v674_v28  ;;  %v6942_v39 = vcombine.low %v670_v27, %v674_v28  ;;  %v4097_v28 = vunpack.c.0.s8 %v4096_v19 }
 0x1b3   : > { %3852 = vmatpush1.bf16.msra.mxu0 %v6876_v32  ;;  %4016 = vmatpush1.bf16.msra.mxu1 %v6878_v33  ;;  %v677_v32 = vld [vmem:[%s8033_s11 + $0xbd0] sm:$0xff] }
 0x1b4   : > { %3853 = vmatprep.subr.bf16.mxu0 %v6885_v34  ;;  %4017 = vmatprep.subr.bf16.mxu1 %v6887_v37  ;;  %v681_v33 = vld [vmem:[%s8033_s11 + $0xbf0] sm:$0xff]  ;;  %v678_v34 = vld [vmem:[%s8033_s11 + $0xbd8] sm:$0xff] }
 0x1b5   : > { %v682_v37 = vld [vmem:[%s8033_s11 + $0xbf8] sm:$0xff]  ;;  %v6949_v40 = vcombine.high %v677_v32, %v681_v33  ;;  %v6948_v46 = vcombine.low %v677_v32, %v681_v33 }
 0x1b6   : > { %v6951_v42 = vcombine.high %v678_v34, %v682_v37  ;;  %v6950_v47 = vcombine.low %v678_v34, %v682_v37  ;;  %v738_v32 = vld [vmem:[%s8033_s11 + $0xdb8] sm:$0xff] }
 0x1b7   : > { %3854 = vmatpush1.bf16.msra.mxu0 %v6884_v54  ;;  %4018 = vmatpush1.bf16.msra.mxu1 %v6886_v10  ;;  %v685_v54 = vld [vmem:[%s8033_s11 + $0xc10] sm:$0xff] }
 0x1b8   : > { %3855 = vmatprep.subr.bf16.mxu0 %v6893_v43  ;;  %4019 = vmatprep.subr.bf16.mxu1 %v6895_v44  ;;  %v689_v10 = vld [vmem:[%s8033_s11 + $0xc30] sm:$0xff]  ;;  %v686_v43 = vld [vmem:[%s8033_s11 + $0xc18] sm:$0xff] }
 0x1b9   : > { %v690_v44 = vld [vmem:[%s8033_s11 + $0xc38] sm:$0xff]  ;;  %v6957_v48 = vcombine.high %v685_v54, %v689_v10  ;;  %v6956_v53 = vcombine.low %v685_v54, %v689_v10  ;;  %v745_v54 = vld [vmem:[%s8033_s11 + $0xdf0] sm:$0xff] }
 0x1ba   : > { %v6959_v49 = vcombine.high %v686_v43, %v690_v44  ;;  %v6958_v55 = vcombine.low %v686_v43, %v690_v44  ;;  %v742_v44 = vld [vmem:[%s8033_s11 + $0xdd8] sm:$0xff] }
 0x1bb   : > { %3856 = vmatpush1.bf16.msra.mxu0 %v6892_v26  ;;  %4020 = vmatpush1.bf16.msra.mxu1 %v6894_v50  ;;  %v693_v26 = vld [vmem:[%s8033_s11 + $0xc50] sm:$0xff] }
 0x1bc   : > { %3857 = vmatprep.subr.bf16.mxu0 %v6901_v51  ;;  %4021 = vmatprep.subr.bf16.mxu1 %v6903_v52  ;;  %v697_v50 = vld [vmem:[%s8033_s11 + $0xc70] sm:$0xff]  ;;  %v694_v51 = vld [vmem:[%s8033_s11 + $0xc58] sm:$0xff] }
 0x1bd   : > { %v698_v52 = vld [vmem:[%s8033_s11 + $0xc78] sm:$0xff]  ;;  %v6965_v56 = vcombine.high %v693_v26, %v697_v50  ;;  %v6964_v41 = vcombine.low %v693_v26, %v697_v50 }
 0x1be   : > { %v6967_v57 = vcombine.high %v694_v51, %v698_v52  ;;  %v6966_v62 = vcombine.low %v694_v51, %v698_v52 }
 0x1bf   : > { %3858 = vmatpush1.bf16.msra.mxu0 %v6900_v58  ;;  %4022 = vmatpush1.bf16.msra.mxu1 %v6902_v0  ;;  %v701_v58 = vld [vmem:[%s8033_s11 + $0xc90] sm:$0xff] }
 0x1c0   : > { %3859 = vmatprep.subr.bf16.mxu0 %v6909_v59  ;;  %4023 = vmatprep.subr.bf16.mxu1 %v6911_v61  ;;  %v705_v0 = vld [vmem:[%s8033_s11 + $0xcb0] sm:$0xff]  ;;  %v702_v59 = vld [vmem:[%s8033_s11 + $0xc98] sm:$0xff] }
 0x1c1   : > { %v706_v61 = vld [vmem:[%s8033_s11 + $0xcb8] sm:$0xff]  ;;  %v6973_v63 = vcombine.high %v701_v58, %v705_v0 }
 0x1c2   : > { %v6975_v1 = vcombine.high %v702_v59, %v706_v61  ;;  %v6974_v7 = vcombine.low %v702_v59, %v706_v61  ;;  %v753_v59 = vld [vmem:[%s8033_s11 + $0xe30] sm:$0xff] }
 0x1c3   : > { %3860 = vmatpush1.bf16.msra.mxu0 %v6908_v2  ;;  %4024 = vmatpush1.bf16.msra.mxu1 %v6910_v4  ;;  %v709_v2 = vld [vmem:[%s8033_s11 + $0xcd0] sm:$0xff] }
 0x1c4   : > { %3861 = vmatprep.subr.bf16.mxu0 %v6917_v5  ;;  %4025 = vmatprep.subr.bf16.mxu1 %v6919_v6  ;;  %v713_v4 = vld [vmem:[%s8033_s11 + $0xcf0] sm:$0xff]  ;;  %v710_v5 = vld [vmem:[%s8033_s11 + $0xcd8] sm:$0xff] }
 0x1c5   : > { %v714_v6 = vld [vmem:[%s8033_s11 + $0xcf8] sm:$0xff]  ;;  %v6981_v35 = vcombine.high %v709_v2, %v713_v4 }
 0x1c6   : > { %v6983_v8 = vcombine.high %v710_v5, %v714_v6 }
 0x1c7   : > { %3862 = vmatpush1.bf16.msra.mxu0 %v6916_v11  ;;  %4026 = vmatpush1.bf16.msra.mxu1 %v6918_v12  ;;  %v721_v11 = vld [vmem:[%s8033_s11 + $0xd30] sm:$0xff]  ;;  %v718_v12 = vld [vmem:[%s8033_s11 + $0xd18] sm:$0xff] }
 0x1c8   : > { %3863 = vmatprep.subr.bf16.mxu0 %v6925_v14  ;;  %4027 = vmatprep.subr.bf16.mxu1 %v6927_v15  ;;  %v722_v14 = vld [vmem:[%s8033_s11 + $0xd38] sm:$0xff]  ;;  %v6980_v15 = vcombine.low %v709_v2, %v713_v4  ;;  %v6989_v16 = vcombine.high %v717_v9, %v721_v11  ;;  %v6988_v24 = vcombine.low %v717_v9, %v721_v11 }
 0x1c9   : > { %v6991_v17 = vcombine.high %v718_v12, %v722_v14  ;;  %v6990_v25 = vcombine.low %v718_v12, %v722_v14  ;;  %v762_v9 = vld [vmem:[%s8033_s11 + $0xe78] sm:$0xff] }
 0x1cb   : > { %3864 = vmatpush1.bf16.msra.mxu0 %v6924_v20  ;;  %4028 = vmatpush1.bf16.msra.mxu1 %v6926_v21  ;;  %v725_v20 = vld [vmem:[%s8033_s11 + $0xd50] sm:$0xff] }
 0x1cc   : > { %3865 = vmatprep.subr.bf16.mxu0 %v6933_v22  ;;  %4029 = vmatprep.subr.bf16.mxu1 %v6935_v23  ;;  %v729_v21 = vld [vmem:[%s8033_s11 + $0xd70] sm:$0xff]  ;;  %v726_v22 = vld [vmem:[%s8033_s11 + $0xd58] sm:$0xff] }
 0x1cd   : > { %v730_v23 = vld [vmem:[%s8033_s11 + $0xd78] sm:$0xff]  ;;  %v6997_v27 = vcombine.high %v725_v20, %v729_v21  ;;  %v6996_v33 = vcombine.low %v725_v20, %v729_v21 }
 0x1ce   : > { %v6998_v34 = vcombine.low %v726_v22, %v730_v23 }
 0x1cf   : > { %3866 = vmatpush1.bf16.msra.mxu0 %v6932_v60  ;;  %4030 = vmatpush1.bf16.msra.mxu1 %v6934_v29  ;;  %v6999_v60 = vcombine.high %v726_v22, %v730_v23  ;;  %v733_v29 = vld [vmem:[%s8033_s11 + $0xd90] sm:$0xff] }
 0x1d0   : > { %3867 = vmatprep.subr.bf16.mxu0 %v6941_v30  ;;  %4031 = vmatprep.subr.bf16.mxu1 %v6943_v31  ;;  %v737_v30 = vld [vmem:[%s8033_s11 + $0xdb0] sm:$0xff]  ;;  %v734_v31 = vld [vmem:[%s8033_s11 + $0xd98] sm:$0xff] }
 0x1d1   : > { %v7005_v37 = vcombine.high %v733_v29, %v737_v30  ;;  %v7004_v26 = vcombine.low %v733_v29, %v737_v30  ;;  %v773_v23 = vld [vmem:[%s8033_s11 + $0xed0] sm:$0xff] }
 0x1d3   : > { %3868 = vmatpush1.bf16.msra.mxu0 %v6940_v38  ;;  %4032 = vmatpush1.bf16.msra.mxu1 %v6942_v39  ;;  %v8593_v39 = vsub.s32 %v4097_v28, %v8058_v45 }
 0x1d4   : > { %3869 = vmatprep.subr.bf16.mxu0 %v6949_v40  ;;  %4033 = vmatprep.subr.bf16.mxu1 %v6951_v42  ;;  %v7007_v40 = vcombine.high %v734_v31, %v738_v32  ;;  %v741_v42 = vld [vmem:[%s8033_s11 + $0xdd0] sm:$0xff] }
 0x1d7   : > { %3870 = vmatpush1.bf16.msra.mxu0 %v6948_v46  ;;  %4034 = vmatpush1.bf16.msra.mxu1 %v6950_v47  ;;  %v746_v46 = vld [vmem:[%s8033_s11 + $0xdf8] sm:$0xff] }
 0x1d8   : > { %3880 = vmatprep.subr.bf16.mxu0 %v6957_v48  ;;  %4044 = vmatprep.subr.bf16.mxu1 %v6959_v49  ;;  %v7014_v4 = vcombine.low %v742_v44, %v746_v46 }
 0x1da   : > { %3872 = vmatmul.mubr.bf16.vlgmr.msra.gmra.mrb[4].mxu0 %v8148_v36  ;;  %4036 = vmatmul.mubr.bf16.vlgmr.msra.gmra.mrb[4].mxu1 %v8148_v36  ;;  %v6972_v36 = vcombine.low %v701_v58, %v705_v0  ;;  %v7015_v58 = vcombine.high %v742_v44, %v746_v46  ;;  %v749_v0 = vld [vmem:[%s8033_s11 + $0xe10] sm:$0xff]  ;;  %v794_v44 = vld [vmem:[%s8033_s11 + $0xf78] sm:$0xff] }
 0x1db   : > { %3881 = vmatpush1.bf16.msra.mxu0 %v6956_v53  ;;  %4045 = vmatpush1.bf16.msra.mxu1 %v6958_v55  ;;  %v7006_v53 = vcombine.low %v734_v31, %v738_v32  ;;  %v7013_v55 = vcombine.high %v741_v42, %v745_v54  ;;  %v7020_v11 = vcombine.low %v749_v0, %v753_v59  ;;  %v781_v31 = vld [vmem:[%s8033_s11 + $0xf10] sm:$0xff] }
 0x1dc   : > { %3882 = vmatprep.subr.bf16.mxu0 %v6965_v56  ;;  %4046 = vmatprep.subr.bf16.mxu1 %v6967_v57  ;;  %v785_v32 = vld [vmem:[%s8033_s11 + $0xf30] sm:$0xff] }
 0x1dd   : > { %3912 = vmatprep.mubr.bf16.mxu0 %v8292_v3  ;;  %4076 = vmatprep.mubr.bf16.mxu1 %v8292_v3  ;;  %v6982_v3 = vcombine.low %v710_v5, %v714_v6  ;;  %v7021_v5 = vcombine.high %v749_v0, %v753_v59  ;;  %v7052_v46 = vcombine.low %v781_v31, %v785_v32  ;;  %v809_v0 = vld [vmem:[%s8033_s11 + $0xff0] sm:$0xff]  ;;  %v806_v59 = vld [vmem:[%s8033_s11 + $0xfd8] sm:$0xff] }
 0x1df   : > { %3883 = vmatpush1.bf16.msra.mxu0 %v6964_v41  ;;  %4047 = vmatpush1.bf16.msra.mxu1 %v6966_v62  ;;  %v750_v41 = vld [vmem:[%s8033_s11 + $0xe18] sm:$0xff] }
 0x1e0   : > { %3884 = vmatprep.subr.bf16.mxu0 %v6973_v63  ;;  %4048 = vmatprep.subr.bf16.mxu1 %v6975_v1  ;;  %v754_v62 = vld [vmem:[%s8033_s11 + $0xe38] sm:$0xff]  ;;  %v296_v63 = vld [vmem:[#allocation2] sm:$0xff]  ;;  %v7012_v1 = vcombine.low %v741_v42, %v745_v54  ;;  %v789_v54 = vld [vmem:[%s8033_s11 + $0xf50] sm:$0xff] }
 0x1e1   : > { %v7023_v6 = vcombine.high %v750_v41, %v754_v62  ;;  %v7022_v12 = vcombine.low %v750_v41, %v754_v62 }
 0x1e3   : > { %3885 = vmatpush1.bf16.msra.mxu0 %v6972_v36  ;;  %4049 = vmatpush1.bf16.msra.mxu1 %v6974_v7  ;;  %v757_v36 = vld [vmem:[%s8033_s11 + $0xe50] sm:$0xff] }
 0x1e4   : > { %3886 = vmatprep.subr.bf16.mxu0 %v6981_v35  ;;  %4050 = vmatprep.subr.bf16.mxu1 %v6983_v8  ;;  %v761_v7 = vld [vmem:[%s8033_s11 + $0xe70] sm:$0xff]  ;;  %v758_v8 = vld [vmem:[%s8033_s11 + $0xe58] sm:$0xff] }
 0x1e5   : > { %v7029_v14 = vcombine.high %v757_v36, %v761_v7  ;;  %v7028_v19 = vcombine.low %v757_v36, %v761_v7  ;;  %v7030_v20 = vcombine.low %v758_v8, %v762_v9 }
 0x1e7   : > { %3887 = vmatpush1.bf16.msra.mxu0 %v6980_v15  ;;  %4051 = vmatpush1.bf16.msra.mxu1 %v6982_v3  ;;  %v7031_v15 = vcombine.high %v758_v8, %v762_v9  ;;  %v765_v3 = vld [vmem:[%s8033_s11 + $0xe90] sm:$0xff] }
 0x1e8   : > { %3888 = vmatprep.subr.bf16.mxu0 %v6989_v16  ;;  %4052 = vmatprep.subr.bf16.mxu1 %v6991_v17  ;;  %v769_v16 = vld [vmem:[%s8033_s11 + $0xeb0] sm:$0xff]  ;;  %v766_v17 = vld [vmem:[%s8033_s11 + $0xe98] sm:$0xff] }
 0x1e9   : > { %v7037_v21 = vcombine.high %v765_v3, %v769_v16  ;;  %v7039_v22 = vcombine.high %v766_v17, %v770_v18  ;;  %v7036_v28 = vcombine.low %v765_v3, %v769_v16  ;;  %v297_v16 = vld [vmem:[#allocation2 + $0x8] sm:$0xff] }
 0x1eb   : > { %3889 = vmatpush1.bf16.msra.mxu0 %v6988_v24  ;;  %4053 = vmatpush1.bf16.msra.mxu1 %v6990_v25  ;;  %v777_v24 = vld [vmem:[%s8033_s11 + $0xef0] sm:$0xff]  ;;  %v774_v25 = vld [vmem:[%s8033_s11 + $0xed8] sm:$0xff] }
 0x1ec   : > { %3890 = vmatprep.subr.bf16.mxu0 %v6997_v27  ;;  %4054 = vmatprep.subr.bf16.mxu1 %v6999_v60  ;;  %v778_v27 = vld [vmem:[%s8033_s11 + $0xef8] sm:$0xff]  ;;  %v7038_v60 = vcombine.low %v766_v17, %v770_v18  ;;  %v7045_v29 = vcombine.high %v773_v23, %v777_v24 }
 0x1ed   : > { %v3586_v38 = vpop.f32.mrb[0].mxu0  ;;  %v3750_v10 = vpop.f32.mrb[0].mxu1  ;;  %v7047_v30 = vcombine.high %v774_v25, %v778_v27 }
 0x1ee   : > { %v3588_v43 = vpop.f32.mrb[1].mxu0  ;;  %v3752_v48 = vpop.f32.mrb[1].mxu1 }
 0x1ef   : > { %v4093_v47 = vcombine.low %v3586_v38, %v3588_v43  ;;  %v3590_v49 = vpop.f32.mrb[2].mxu0  ;;  %3891 = vmatpush1.bf16.msra.mxu0 %v6996_v33  ;;  %v4094_v50 = vcombine.low %v3750_v10, %v3752_v48  ;;  %v3754_v51 = vpop.f32.mrb[2].mxu1  ;;  %4055 = vmatpush1.bf16.msra.mxu1 %v6998_v34  ;;  %v782_v33 = vld [vmem:[%s8033_s11 + $0xf18] sm:$0xff]  ;;  %v7046_v38 = vcombine.low %v774_v25, %v778_v27  ;;  %v793_v10 = vld [vmem:[%s8033_s11 + $0xf70] sm:$0xff] }
 0x1f0   : > { %v3591_v52 = vpop.f32.mrb[3].mxu0  ;;  %3892 = vmatprep.subr.bf16.mxu0 %v7005_v37  ;;  %v3755_v57 = vpop.f32.mrb[3].mxu1  ;;  %4056 = vmatprep.subr.bf16.mxu1 %v7007_v40  ;;  %v786_v34 = vld [vmem:[%s8033_s11 + $0xf38] sm:$0xff]  ;;  %v7044_v37 = vcombine.low %v773_v23, %v777_v24  ;;  %v7053_v40 = vcombine.high %v781_v31, %v785_v32  ;;  %v7061_v48 = vcombine.high %v789_v54, %v793_v10  ;;  %v7524_v24 = vld [vmem:[%s9605_s3 + $0x20] ss:$16 sps:$4 sm:$0xff] (!%p7080_p6)  }
 0x1f1   : > { %v4101_v56 = vrot.slane %v4093_v47, %v8593_v39  ;;  %v4108_v61 = vrot.slane %v4094_v50, %v8593_v39  ;;  %v7055_v42 = vcombine.high %v782_v33, %v786_v34  ;;  %v790_v43 = vld [vmem:[%s8033_s11 + $0xf58] sm:$0xff]  ;;  %v7054_v47 = vcombine.low %v782_v33, %v786_v34  ;;  %v801_v50 = vld [vmem:[%s8033_s11 + $0xfb0] sm:$0xff] }
 0x1f2   : > { %v7063_v49 = vcombine.high %v790_v43, %v794_v44  ;;  %v798_v51 = vld [vmem:[%s8033_s11 + $0xf98] sm:$0xff]  ;;  %v7526_v27 = vld [vmem:[%s9605_s3 + $0x44] ss:$16 sps:$4 sm:$0xff] (!%p7080_p6)   ;;  %v7536_v32 = vld [vmem:[%s9605_s3 + $0x60] ss:$16 sps:$4 sm:$0xff] (!%p7080_p6)  }
 0x1f3   : > { %3893 = vmatpush1.bf16.msra.mxu0 %v7004_v26  ;;  %v4109_v2 = vcombine.low %v4101_v56, %v4108_v61  ;;  %4057 = vmatpush1.bf16.msra.mxu1 %v7006_v53  ;;  %v797_v26 = vld [vmem:[%s8033_s11 + $0xf90] sm:$0xff]  ;;  %v802_v52 = vld [vmem:[%s8033_s11 + $0xfb8] sm:$0xff]  ;;  %v7060_v53 = vcombine.low %v789_v54, %v793_v10 }
 0x1f4   : > { %3894 = vmatprep.subr.bf16.mxu0 %v7013_v55  ;;  %4058 = vmatprep.subr.bf16.mxu1 %v7015_v58  ;;  %v7062_v55 = vcombine.low %v790_v43, %v794_v44  ;;  %v7069_v56 = vcombine.high %v797_v26, %v801_v50  ;;  %v7071_v57 = vcombine.high %v798_v51, %v802_v52  ;;  %v805_v58 = vld [vmem:[%s8033_s11 + $0xfd0] sm:$0xff]  ;;  %v810_v61 = vld [vmem:[%s8033_s11 + $0xff8] sm:$0xff] }
 0x1f5   : > { %v4129_v35 = vadd.f32 %v4109_v2, %v296_v63  ;;  %v7068_v41 = vcombine.low %v797_v26, %v801_v50  ;;  %v7070_v62 = vcombine.low %v798_v51, %v802_v52  ;;  %v7077_v63 = vcombine.high %v805_v58, %v809_v0  ;;  %v7522_v23 = vld [vmem:[%s9605_s3 + $0x2c] ss:$16 sps:$4 sm:$0xff] (!%p7080_p6)   ;;  %v7525_v25 = vld [vmem:[%s9605_s3 + $0x28] ss:$16 sps:$4 sm:$0xff] (!%p7080_p6)   ;;  %v7538_v34 = vld [vmem:[%s9605_s3 + $0x84] ss:$16 sps:$4 sm:$0xff] (!%p7080_p6)  }
 0x1f6   : > { %v7076_v2 = vcombine.low %v805_v58, %v809_v0  ;;  %v7534_v31 = vld [vmem:[%s9605_s3 + $0x6c] ss:$16 sps:$4 sm:$0xff] (!%p7080_p6)   ;;  %v7537_v33 = vld [vmem:[%s9605_s3 + $0x68] ss:$16 sps:$4 sm:$0xff] (!%p7080_p6)   ;;  %v7548_v10 = vld [vmem:[%s9605_s3 + $0xa0] ss:$16 sps:$4 sm:$0xff] (!%p7080_p6)  }
 0x1f7   : > { %3895 = vmatpush1.bf16.msra.mxu0 %v7012_v1  ;;  %4131 = vst [vmem:[#allocation2] sm:$0xff] %v4129_v35  ;;  %4059 = vmatpush1.bf16.msra.mxu1 %v7014_v4  ;;  %v7079_v1 = vcombine.high %v806_v59, %v810_v61  ;;  %v7078_v4 = vcombine.low %v806_v59, %v810_v61  ;;  %v7546_v54 = vld [vmem:[%s9605_s3 + $0xac] ss:$16 sps:$4 sm:$0xff] (!%p7080_p6)   ;;  %v7549_v43 = vld [vmem:[%s9605_s3 + $0xa8] ss:$16 sps:$4 sm:$0xff] (!%p7080_p6)  }
 0x1f8   : > { %3896 = vmatprep.subr.bf16.mxu0 %v7021_v5  ;;  %4060 = vmatprep.subr.bf16.mxu1 %v7023_v6  ;;  %v7550_v44 = vld [vmem:[%s9605_s3 + $0xc4] ss:$16 sps:$4 sm:$0xff] (!%p7080_p6)   ;;  %v7558_v26 = vld [vmem:[%s9605_s3 + $0xec] ss:$16 sps:$4 sm:$0xff] (!%p7080_p6)   ;;  %v7560_v50 = vld [vmem:[%s9605_s3 + $0xe0] ss:$16 sps:$4 sm:$0xff] (!%p7080_p6)  }
 0x1f9   : > { %v7561_v51 = vld [vmem:[%s9605_s3 + $0xe8] ss:$16 sps:$4 sm:$0xff] (!%p7080_p6)   ;;  %v7562_v52 = vld [vmem:[%s9605_s3 + $0x104] ss:$16 sps:$4 sm:$0xff] (!%p7080_p6)   ;;  %v7570_v58 = vld [vmem:[%s9605_s3 + $0x12c] ss:$16 sps:$4 sm:$0xff] (!%p7080_p6)  }
 0x1fa   : > { %v7572_v0 = vld [vmem:[%s9605_s3 + $0x120] ss:$16 sps:$4 sm:$0xff] (!%p7080_p6)   ;;  %v7573_v59 = vld [vmem:[%s9605_s3 + $0x128] ss:$16 sps:$4 sm:$0xff] (!%p7080_p6)   ;;  %v7574_v61 = vld [vmem:[%s9605_s3 + $0x144] ss:$16 sps:$4 sm:$0xff] (!%p7080_p6)  }
 0x1fb   : > { %3897 = vmatpush1.bf16.msra.mxu0 %v7020_v11  ;;  %4061 = vmatpush1.bf16.msra.mxu1 %v7022_v12 }
 0x1fc   : > { %3898 = vmatprep.subr.bf16.mxu0 %v7029_v14  ;;  %4062 = vmatprep.subr.bf16.mxu1 %v7031_v15 }
 0x1ff   : > { %3899 = vmatpush1.bf16.msra.mxu0 %v7028_v19  ;;  %4063 = vmatpush1.bf16.msra.mxu1 %v7030_v20  ;;  %v7516_v19 = vld [vmem:[%s9605_s3 + $0xc] ss:$16 sps:$4 sm:$0xff] (!%p7080_p6)   ;;  %v7518_v20 = vld [vmem:[%s9605_s3] ss:$16 sps:$4 sm:$0xff] (!%p7080_p6)  }
 0x200   : > { %3900 = vmatprep.subr.bf16.mxu0 %v7037_v21  ;;  %4064 = vmatprep.subr.bf16.mxu1 %v7039_v22  ;;  %v7519_v21 = vld [vmem:[%s9605_s3 + $0x8] ss:$16 sps:$4 sm:$0xff] (!%p7080_p6)   ;;  %v7520_v22 = vld [vmem:[%s9605_s3 + $0x24] ss:$16 sps:$4 sm:$0xff] (!%p7080_p6)  }
 0x203   : > { %3901 = vmatpush1.bf16.msra.mxu0 %v7036_v28  ;;  %4065 = vmatpush1.bf16.msra.mxu1 %v7038_v60  ;;  %v7528_v28 = vld [vmem:[%s9605_s3 + $0x4c] ss:$16 sps:$4 sm:$0xff] (!%p7080_p6)   ;;  %v7530_v60 = vld [vmem:[%s9605_s3 + $0x40] ss:$16 sps:$4 sm:$0xff] (!%p7080_p6)  }
 0x204   : > { %3902 = vmatprep.subr.bf16.mxu0 %v7045_v29  ;;  %4066 = vmatprep.subr.bf16.mxu1 %v7047_v30  ;;  %v7531_v29 = vld [vmem:[%s9605_s3 + $0x48] ss:$16 sps:$4 sm:$0xff] (!%p7080_p6)   ;;  %v7532_v30 = vld [vmem:[%s9605_s3 + $0x64] ss:$16 sps:$4 sm:$0xff] (!%p7080_p6)  }
 0x207   : > { %3903 = vmatpush1.bf16.msra.mxu0 %v7044_v37  ;;  %4067 = vmatpush1.bf16.msra.mxu1 %v7046_v38  ;;  %v7540_v37 = vld [vmem:[%s9605_s3 + $0x8c] ss:$16 sps:$4 sm:$0xff] (!%p7080_p6)   ;;  %v7542_v38 = vld [vmem:[%s9605_s3 + $0x80] ss:$16 sps:$4 sm:$0xff] (!%p7080_p6)  }
 0x208   : > { %3904 = vmatprep.subr.bf16.mxu0 %v7053_v40  ;;  %4068 = vmatprep.subr.bf16.mxu1 %v7055_v42  ;;  %v7543_v40 = vld [vmem:[%s9605_s3 + $0x88] ss:$16 sps:$4 sm:$0xff] (!%p7080_p6)   ;;  %v7544_v42 = vld [vmem:[%s9605_s3 + $0xa4] ss:$16 sps:$4 sm:$0xff] (!%p7080_p6)  }
 0x20b   : > { %3905 = vmatpush1.bf16.msra.mxu0 %v7052_v46  ;;  %4069 = vmatpush1.bf16.msra.mxu1 %v7054_v47  ;;  %v7552_v46 = vld [vmem:[%s9605_s3 + $0xcc] ss:$16 sps:$4 sm:$0xff] (!%p7080_p6)   ;;  %v7554_v47 = vld [vmem:[%s9605_s3 + $0xc0] ss:$16 sps:$4 sm:$0xff] (!%p7080_p6)  }
 0x20c   : > { %3906 = vmatprep.subr.bf16.mxu0 %v7061_v48  ;;  %4070 = vmatprep.subr.bf16.mxu1 %v7063_v49  ;;  %v7555_v48 = vld [vmem:[%s9605_s3 + $0xc8] ss:$16 sps:$4 sm:$0xff] (!%p7080_p6)   ;;  %v7556_v49 = vld [vmem:[%s9605_s3 + $0xe4] ss:$16 sps:$4 sm:$0xff] (!%p7080_p6)  }
 0x20f   : > { %3907 = vmatpush1.bf16.msra.mxu0 %v7060_v53  ;;  %4071 = vmatpush1.bf16.msra.mxu1 %v7062_v55  ;;  %v7564_v53 = vld [vmem:[%s9605_s3 + $0x10c] ss:$16 sps:$4 sm:$0xff] (!%p7080_p6)   ;;  %v7566_v55 = vld [vmem:[%s9605_s3 + $0x100] ss:$16 sps:$4 sm:$0xff] (!%p7080_p6)  }
 0x210   : > { %3908 = vmatprep.subr.bf16.mxu0 %v7069_v56  ;;  %4072 = vmatprep.subr.bf16.mxu1 %v7071_v57  ;;  %v7567_v56 = vld [vmem:[%s9605_s3 + $0x108] ss:$16 sps:$4 sm:$0xff] (!%p7080_p6)   ;;  %v7568_v57 = vld [vmem:[%s9605_s3 + $0x124] ss:$16 sps:$4 sm:$0xff] (!%p7080_p6)  }
 0x213   : > { %3909 = vmatpush1.bf16.msra.mxu0 %v7068_v41  ;;  %4073 = vmatpush1.bf16.msra.mxu1 %v7070_v62  ;;  %v7576_v41 = vld [vmem:[%s9605_s3 + $0x14c] ss:$16 sps:$4 sm:$0xff] (!%p7080_p6)   ;;  %v7578_v62 = vld [vmem:[%s9605_s3 + $0x140] ss:$16 sps:$4 sm:$0xff] (!%p7080_p6)  }
 0x214   : > { %3910 = vmatprep.subr.bf16.mxu0 %v7077_v63  ;;  %4074 = vmatprep.subr.bf16.mxu1 %v7079_v1  ;;  %v7579_v63 = vld [vmem:[%s9605_s3 + $0x148] ss:$16 sps:$4 sm:$0xff] (!%p7080_p6)   ;;  %v4143_v1 = vsub.s32 (!%p7080_p6), 0, %v8058_v45 }
 0x217   : > { %3911 = vmatpush1.bf16.msra.mxu0 %v7076_v2  ;;  %4075 = vmatpush1.bf16.msra.mxu1 %v7078_v4  ;;  %v7580_v2 = vld [vmem:[%s9605_s3 + $0x164] ss:$16 sps:$4 sm:$0xff] (!%p7080_p6)   ;;  %v4147_v4 = vsub.s32 (!%p7080_p6), 1, %v8058_v45 }
 0x218   : > { %5987 = vmatprep.subr.bf16.mxu1 (!%p7080_p6), %v7516_v19 }
 0x21a   : > { %3913 = vmatmul.mubr.bf16.vlgmr.msra.gmra.mrb[4].mxu0 %v8360_v13  ;;  %4077 = vmatmul.mubr.bf16.vlgmr.msra.gmra.mrb[4].mxu1 %v8360_v13  ;;  %v7514_v13 = vld [vmem:[%s9605_s3 + $0x4] ss:$16 sps:$4 sm:$0xff] (!%p7080_p6)  }
 0x21b   : > { %5823 = vmatprep.subr.bf16.mxu0 (!%p7080_p6), %v7514_v13  ;;  %5988 = vmatpush1.bf16.msra.mxu1 (!%p7080_p6), %v7519_v21  ;;  %v7591_v13 = vld [vmem:[%s9605_s3 + $0x188] ss:$16 sps:$4 sm:$0xff] (!%p7080_p6)   ;;  %v7594_v21 = vld [vmem:[%s9605_s3 + $0x1ac] ss:$16 sps:$4 sm:$0xff] (!%p7080_p6)  }
 0x21c   : > { %5824 = vmatpush1.bf16.msra.mxu0 (!%p7080_p6), %v7518_v20  ;;  %5989 = vmatprep.subr.bf16.mxu1 (!%p7080_p6), %v7522_v23  ;;  %v7592_v20 = vld [vmem:[%s9605_s3 + $0x1a4] ss:$16 sps:$4 sm:$0xff] (!%p7080_p6)  }
 0x21d   : > { %5825 = vmatprep.subr.bf16.mxu0 (!%p7080_p6), %v7520_v22  ;;  %v4137_v23 = vld [vmem:[#allocation2] sm:$0xff] (!%p7080_p6) }
 0x21f   : > { %5990 = vmatpush1.bf16.msra.mxu1 (!%p7080_p6), %v7525_v25  ;;  %v7596_v25 = vld [vmem:[%s9605_s3 + $0x1a0] ss:$16 sps:$4 sm:$0xff] (!%p7080_p6)  }
 0x220   : > { %5826 = vmatpush1.bf16.msra.mxu0 (!%p7080_p6), %v7524_v24  ;;  %5991 = vmatprep.subr.bf16.mxu1 (!%p7080_p6), %v7528_v28  ;;  %v7598_v28 = vld [vmem:[%s9605_s3 + $0x1c4] ss:$16 sps:$4 sm:$0xff] (!%p7080_p6)  }
 0x221   : > { %5827 = vmatprep.subr.bf16.mxu0 (!%p7080_p6), %v7526_v27  ;;  %v7597_v27 = vld [vmem:[%s9605_s3 + $0x1a8] ss:$16 sps:$4 sm:$0xff] (!%p7080_p6)  }
 0x223   : > { %5992 = vmatpush1.bf16.msra.mxu1 (!%p7080_p6), %v7531_v29 }
 0x224   : > { %5828 = vmatpush1.bf16.msra.mxu0 (!%p7080_p6), %v7530_v60  ;;  %5993 = vmatprep.subr.bf16.mxu1 (!%p7080_p6), %v7534_v31  ;;  %v7600_v60 = vld [vmem:[%s9605_s3 + $0x1cc] ss:$16 sps:$4 sm:$0xff] (!%p7080_p6)   ;;  %v7602_v31 = vld [vmem:[%s9605_s3 + $0x1c0] ss:$16 sps:$4 sm:$0xff] (!%p7080_p6)  }
 0x225   : > { %5829 = vmatprep.subr.bf16.mxu0 (!%p7080_p6), %v7532_v30 }
 0x227   : > { %5994 = vmatpush1.bf16.msra.mxu1 (!%p7080_p6), %v7537_v33  ;;  %v7604_v33 = vld [vmem:[%s9605_s3 + $0x1e4] ss:$16 sps:$4 sm:$0xff] (!%p7080_p6)  }
 0x228   : > { %5830 = vmatpush1.bf16.msra.mxu0 (!%p7080_p6), %v7536_v32  ;;  %5995 = vmatprep.subr.bf16.mxu1 (!%p7080_p6), %v7540_v37  ;;  %v7603_v32 = vld [vmem:[%s9605_s3 + $0x1c8] ss:$16 sps:$4 sm:$0xff] (!%p7080_p6)  }
 0x229   : > { %5831 = vmatprep.subr.bf16.mxu0 (!%p7080_p6), %v7538_v34  ;;  %v7606_v34 = vld [vmem:[%s9605_s3 + $0x1ec] ss:$16 sps:$4 sm:$0xff] (!%p7080_p6)  }
 0x22b   : > { %5996 = vmatpush1.bf16.msra.mxu1 (!%p7080_p6), %v7543_v40 }
 0x22c   : > { %5832 = vmatpush1.bf16.msra.mxu0 (!%p7080_p6), %v7542_v38  ;;  %5997 = vmatprep.subr.bf16.mxu1 (!%p7080_p6), %v7546_v54  ;;  %v7608_v54 = vld [vmem:[%s9605_s3 + $0x1e0] ss:$16 sps:$4 sm:$0xff] (!%p7080_p6)  }
 0x22d   : > { %5833 = vmatprep.subr.bf16.mxu0 (!%p7080_p6), %v7544_v42 }
 0x22f   : > { %5998 = vmatpush1.bf16.msra.mxu1 (!%p7080_p6), %v7549_v43 }
 0x230   : > { %5834 = vmatpush1.bf16.msra.mxu0 (!%p7080_p6), %v7548_v10  ;;  %5999 = vmatprep.subr.bf16.mxu1 (!%p7080_p6), %v7552_v46  ;;  %v7609_v10 = vld [vmem:[%s9605_s3 + $0x1e8] ss:$16 sps:$4 sm:$0xff] (!%p7080_p6)   ;;  %v7615_v46 = vld [vmem:[%s9605_s3 + $0x20c] ss:$16 sps:$4 sm:$0xff] (!%p7080_p6)  }
 0x231   : > { %5835 = vmatprep.subr.bf16.mxu0 (!%p7080_p6), %v7550_v44  ;;  %v7612_v44 = vld [vmem:[%s9605_s3 + $0x204] ss:$16 sps:$4 sm:$0xff] (!%p7080_p6)  }
 0x233   : > { %6000 = vmatpush1.bf16.msra.mxu1 (!%p7080_p6), %v7555_v48 }
 0x234   : > { %5836 = vmatpush1.bf16.msra.mxu0 (!%p7080_p6), %v7554_v47  ;;  %6001 = vmatprep.subr.bf16.mxu1 (!%p7080_p6), %v7558_v26  ;;  %v7613_v26 = vld [vmem:[%s9605_s3 + $0x208] ss:$16 sps:$4 sm:$0xff] (!%p7080_p6)  }
 0x235   : > { %5837 = vmatprep.subr.bf16.mxu0 (!%p7080_p6), %v7556_v49  ;;  %v7610_v49 = vld [vmem:[%s9605_s3 + $0x200] ss:$16 sps:$4 sm:$0xff] (!%p7080_p6)  }
 0x237   : > { %6002 = vmatpush1.bf16.msra.mxu1 (!%p7080_p6), %v7561_v51  ;;  %v7621_v51 = vld [vmem:[%s9605_s3 + $0x22c] ss:$16 sps:$4 sm:$0xff] (!%p7080_p6)  }
 0x238   : > { %5838 = vmatpush1.bf16.msra.mxu0 (!%p7080_p6), %v7560_v50  ;;  %6003 = vmatprep.subr.bf16.mxu1 (!%p7080_p6), %v7564_v53  ;;  %v7618_v50 = vld [vmem:[%s9605_s3 + $0x224] ss:$16 sps:$4 sm:$0xff] (!%p7080_p6)   ;;  %v7616_v53 = vld [vmem:[%s9605_s3 + $0x220] ss:$16 sps:$4 sm:$0xff] (!%p7080_p6)  }
 0x239   : > { %5839 = vmatprep.subr.bf16.mxu0 (!%p7080_p6), %v7562_v52 }
 0x23b   : > { %6004 = vmatpush1.bf16.msra.mxu1 (!%p7080_p6), %v7567_v56  ;;  %v7624_v56 = vld [vmem:[%s9605_s3 + $0x244] ss:$16 sps:$4 sm:$0xff] (!%p7080_p6)  }
 0x23c   : > { %5840 = vmatpush1.bf16.msra.mxu0 (!%p7080_p6), %v7566_v55  ;;  %6005 = vmatprep.subr.bf16.mxu1 (!%p7080_p6), %v7570_v58  ;;  %v7619_v55 = vld [vmem:[%s9605_s3 + $0x228] ss:$16 sps:$4 sm:$0xff] (!%p7080_p6)   ;;  %v7622_v58 = vld [vmem:[%s9605_s3 + $0x240] ss:$16 sps:$4 sm:$0xff] (!%p7080_p6)  }
 0x23d   : > { %5841 = vmatprep.subr.bf16.mxu0 (!%p7080_p6), %v7568_v57  ;;  %v7627_v57 = vld [vmem:[%s9605_s3 + $0x24c] ss:$16 sps:$4 sm:$0xff] (!%p7080_p6)  }
 0x23f   : > { %6006 = vmatpush1.bf16.msra.mxu1 (!%p7080_p6), %v7573_v59  ;;  %v7630_v59 = vld [vmem:[%s9605_s3 + $0x264] ss:$16 sps:$4 sm:$0xff] (!%p7080_p6)  }
 0x240   : > { %5842 = vmatpush1.bf16.msra.mxu0 (!%p7080_p6), %v7572_v0  ;;  %6007 = vmatprep.subr.bf16.mxu1 (!%p7080_p6), %v7576_v41  ;;  %v7625_v0 = vld [vmem:[%s9605_s3 + $0x248] ss:$16 sps:$4 sm:$0xff] (!%p7080_p6)   ;;  %v7628_v41 = vld [vmem:[%s9605_s3 + $0x260] ss:$16 sps:$4 sm:$0xff] (!%p7080_p6)  }
 0x241   : > { %5843 = vmatprep.subr.bf16.mxu0 (!%p7080_p6), %v7574_v61  ;;  %v7633_v61 = vld [vmem:[%s9605_s3 + $0x26c] ss:$16 sps:$4 sm:$0xff] (!%p7080_p6)  }
 0x243   : > { %6008 = vmatpush1.bf16.msra.mxu1 (!%p7080_p6), %v7579_v63  ;;  %v7636_v63 = vld [vmem:[%s9605_s3 + $0x284] ss:$16 sps:$4 sm:$0xff] (!%p7080_p6)  }
 0x244   : > { %5844 = vmatpush1.bf16.msra.mxu0 (!%p7080_p6), %v7578_v62  ;;  %v7631_v62 = vld [vmem:[%s9605_s3 + $0x268] ss:$16 sps:$4 sm:$0xff] (!%p7080_p6)  }
 0x245   : > { %5845 = vmatprep.subr.bf16.mxu0 (!%p7080_p6), %v7580_v2  ;;  %v7639_v2 = vld [vmem:[%s9605_s3 + $0x28c] ss:$16 sps:$4 sm:$0xff] (!%p7080_p6)  }
 0x2ed   : > { %v3914_v5 = vpop.f32.mrb[4].mxu0  ;;  %v4078_v6 = vpop.f32.mrb[4].mxu1 }
 0x2ee   : > { %v3916_v36 = vpop.f32.mrb[5].mxu0  ;;  %v4080_v35 = vpop.f32.mrb[5].mxu1 }
 0x2ef   : > { %v4110_v7 = vcombine.low %v3914_v5, %v3916_v36  ;;  %v3918_v8 = vpop.f32.mrb[6].mxu0  ;;  %v4111_v9 = vcombine.low %v4078_v6, %v4080_v35  ;;  %v4082_v11 = vpop.f32.mrb[6].mxu1  ;;  %v4151_v5 = vsub.s32 (!%p7080_p6), 2, %v8058_v45  ;;  %v7582_v6 = vld [vmem:[%s9605_s3 + $0x16c] ss:$16 sps:$4 sm:$0xff] (!%p7080_p6)   ;;  %v4155_v36 = vsub.s32 (!%p7080_p6), 3, %v8058_v45 }
 0x2f0   : > { %v3919_v12 = vpop.f32.mrb[7].mxu0  ;;  %v4083_v15 = vpop.f32.mrb[7].mxu1  ;;  %v7584_v35 = vld [vmem:[%s9605_s3 + $0x160] ss:$16 sps:$4 sm:$0xff] (!%p7080_p6)   ;;  %v7585_v8 = vld [vmem:[%s9605_s3 + $0x168] ss:$16 sps:$4 sm:$0xff] (!%p7080_p6)   ;;  %6009 = vmatprep.subr.bf16.mxu1 (!%p7080_p6), %v7582_v6 }
 0x2f1   : > { %v4118_v14 = vrot.slane %v4110_v7, %v8593_v39  ;;  %v4125_v3 = vrot.slane %v4111_v9, %v8593_v39  ;;  %4136 = sbr.rel (%p7080_p6) target bundleno = 1407 (0x57f), region = 56  ;;  %v8783_v7 = vld [vmem:[%s9604_s2] sm:$0xff] (!%p7080_p6)  ;;  %v7588_v15 = vld [vmem:[%s9605_s3 + $0x18c] ss:$16 sps:$4 sm:$0xff] (!%p7080_p6)   ;;  %5846 = vmatpush1.bf16.msra.mxu0 (!%p7080_p6), %v7584_v35  ;;  %6010 = vmatpush1.bf16.msra.mxu1 (!%p7080_p6), %v7585_v8  ;;  %v7637_v35 = vld [vmem:[%s9605_s3 + $0x288] ss:$16 sps:$4 sm:$0xff] (!%p7080_p6)  }
 0x2f2   : > { %v4144_v9 = vrot.slane (!%p7080_p6), %v8783_v7, %v4143_v1  ;;  %v4148_v11 = vrot.slane (!%p7080_p6), %v8783_v7, %v4147_v4  ;;  %v4152_v12 = vrot.slane (!%p7080_p6), %v8783_v7, %v4151_v5  ;;  %6011 = vmatprep.subr.bf16.mxu1 (!%p7080_p6), %v7588_v15  ;;  %v7634_v6 = vld [vmem:[%s9605_s3 + $0x280] ss:$16 sps:$4 sm:$0xff] (!%p7080_p6)   ;;  %v7642_v8 = vld [vmem:[%s9605_s3 + $0x2a4] ss:$16 sps:$4 sm:$0xff] (!%p7080_p6)   ;;  %v7651_v15 = vld [vmem:[%s9605_s3 + $0x2cc] ss:$16 sps:$4 sm:$0xff] (!%p7080_p6)  }
 0x2f3   : > { %v4126_v17 = vcombine.low %v4118_v14, %v4125_v3  ;;  %v7586_v14 = vld [vmem:[%s9605_s3 + $0x184] ss:$16 sps:$4 sm:$0xff] (!%p7080_p6)   ;;  %v4156_v3 = vrot.slane (!%p7080_p6), %v8783_v7, %v4155_v36 }
 0x2f4   : > { %5847 = vmatprep.subr.bf16.mxu0 (!%p7080_p6), %v7586_v14  ;;  %v7648_v14 = vld [vmem:[%s9605_s3 + $0x2c4] ss:$16 sps:$4 sm:$0xff] (!%p7080_p6)  }
 0x2f5   : > { %v4130_v18 = vadd.f32 %v4126_v17, %v297_v16  ;;  %v4173_v16 = vcombine.low (!%p7080_p6), %v4144_v9, %v4148_v11  ;;  %v4174_v17 = vcombine.low (!%p7080_p6), %v4152_v12, %v4156_v3  ;;  %6012 = vmatpush1.bf16.msra.mxu1 (!%p7080_p6), %v7591_v13  ;;  %v7645_v9 = vld [vmem:[%s9605_s3 + $0x2ac] ss:$16 sps:$4 sm:$0xff] (!%p7080_p6)   ;;  %v7640_v11 = vld [vmem:[%s9605_s3 + $0x2a0] ss:$16 sps:$4 sm:$0xff] (!%p7080_p6)   ;;  %v7643_v12 = vld [vmem:[%s9605_s3 + $0x2a8] ss:$16 sps:$4 sm:$0xff] (!%p7080_p6)  }
 0x2f6   : > { %6013 = vmatprep.subr.bf16.mxu1 (!%p7080_p6), %v7594_v21  ;;  %v7646_v3 = vld [vmem:[%s9605_s3 + $0x2c0] ss:$16 sps:$4 sm:$0xff] (!%p7080_p6)   ;;  %v7663_v21 = vld [vmem:[%s9605_s3 + $0x30c] ss:$16 sps:$4 sm:$0xff] (!%p7080_p6)  }
 0x2f7   : > { %4132 = vst [vmem:[#allocation2 + $0x8] sm:$0xff] %v4130_v18  ;;  %v7590_v18 = vld [vmem:[%s9605_s3 + $0x180] ss:$16 sps:$4 sm:$0xff] (!%p7080_p6)   ;;  %v4181_v19 = vrot.slane (!%p7080_p6), %v4173_v16, %v8593_v39  ;;  %v4188_v22 = vrot.slane (!%p7080_p6), %v4174_v17, %v8593_v39  ;;  %v7649_v16 = vld [vmem:[%s9605_s3 + $0x2c8] ss:$16 sps:$4 sm:$0xff] (!%p7080_p6)  }
 0x2f8   : > { %5848 = vmatpush1.bf16.msra.mxu0 %v7590_v18  ;;  %v7654_v17 = vld [vmem:[%s9605_s3 + $0x2e4] ss:$16 sps:$4 sm:$0xff]   ;;  %v7657_v18 = vld [vmem:[%s9605_s3 + $0x2ec] ss:$16 sps:$4 sm:$0xff]   ;;  %v7652_v13 = vld [vmem:[%s9605_s3 + $0x2e0] ss:$16 sps:$4 sm:$0xff]  }
 0x2f9   : > { %v4189_v24 = vcombine.low %v4181_v19, %v4188_v22  ;;  %5849 = vmatprep.subr.bf16.mxu0 %v7592_v20  ;;  %6014 = vmatpush1.bf16.msra.mxu1 %v7597_v27  ;;  %v7655_v19 = vld [vmem:[%s9605_s3 + $0x2e8] ss:$16 sps:$4 sm:$0xff]   ;;  %v7660_v20 = vld [vmem:[%s9605_s3 + $0x304] ss:$16 sps:$4 sm:$0xff]   ;;  %v7658_v22 = vld [vmem:[%s9605_s3 + $0x300] ss:$16 sps:$4 sm:$0xff]  }
 0x2fa   : > { %6015 = vmatprep.subr.bf16.mxu1 %v7600_v60  ;;  %v7664_v27 = vld [vmem:[%s9605_s3 + $0x320] ss:$16 sps:$4 sm:$0xff]   ;;  %v7672_v60 = vld [vmem:[%s9605_s3 + $0x344] ss:$16 sps:$4 sm:$0xff]  }
 0x2fb   : > { %v4209_v29 = vadd.f32 %v4189_v24, %v4137_v23  ;;  %v7661_v23 = vld [vmem:[%s9605_s3 + $0x308] ss:$16 sps:$4 sm:$0xff]   ;;  %v7666_v24 = vld [vmem:[%s9605_s3 + $0x324] ss:$16 sps:$4 sm:$0xff]  }
 0x2fc   : > { %5850 = vmatpush1.bf16.msra.mxu0 %v7596_v25  ;;  %v7669_v25 = vld [vmem:[%s9605_s3 + $0x32c] ss:$16 sps:$4 sm:$0xff]  }
 0x2fd   : > { %v4211_v30 = vmax.f32 %v4209_v29, 0.0  ;;  %5851 = vmatprep.subr.bf16.mxu0 %v7598_v28  ;;  %6016 = vmatpush1.bf16.msra.mxu1 %v7603_v32  ;;  %v7667_v28 = vld [vmem:[%s9605_s3 + $0x328] ss:$16 sps:$4 sm:$0xff]   ;;  %v7675_v29 = vld [vmem:[%s9605_s3 + $0x34c] ss:$16 sps:$4 sm:$0xff]  }
 0x2fe   : > { %6017 = vmatprep.subr.bf16.mxu1 %v7606_v34  ;;  %v7678_v32 = vld [vmem:[%s9605_s3 + $0x364] ss:$16 sps:$4 sm:$0xff]   ;;  %v4159_v34 = vsub.s32 4, %v8058_v45 }
 0x2ff   : > { %v4222_v37 = vrot.slane %v4211_v30, %v8593_v39  ;;  %v4215_v38 = vcombine.high %v4211_v30, %v4211_v30  ;;  %v7670_v30 = vld [vmem:[%s9605_s3 + $0x340] ss:$16 sps:$4 sm:$0xff]  }
 0x300   : > { %5852 = vmatpush1.bf16.msra.mxu0 %v7602_v31  ;;  %v7673_v31 = vld [vmem:[%s9605_s3 + $0x348] ss:$16 sps:$4 sm:$0xff]  }
 0x301   : > { %v4230_v40 = vcombine.high %v4222_v37, %v4222_v37  ;;  %v8849_v42 = vrot.slane %v4215_v38, %v8593_v39  ;;  %5853 = vmatprep.subr.bf16.mxu0 %v7604_v33  ;;  %v4257_v48 = vpack.c.bf16 %v4222_v37, %v4222_v37  ;;  %6018 = vmatpush1.bf16.msra.mxu1 %v7609_v10  ;;  %v7681_v33 = vld [vmem:[%s9605_s3 + $0x36c] ss:$16 sps:$4 sm:$0xff]   ;;  %v4163_v37 = vsub.s32 5, %v8058_v45  ;;  %v7676_v38 = vld [vmem:[%s9605_s3 + $0x360] ss:$16 sps:$4 sm:$0xff]  }
 0x302   : > { %6028 = vmatprep.subr.bf16.mxu1 %v7615_v46  ;;  %v7684_v10 = vld [vmem:[%s9605_s3 + $0x384] ss:$16 sps:$4 sm:$0xff]   ;;  %v7682_v46 = vld [vmem:[%s9605_s3 + $0x380] ss:$16 sps:$4 sm:$0xff]  }
 0x303   : > { %v4258_v43 = vpack.c.bf16 %v4230_v40, %v4230_v40  ;;  %v4231_v47 = vcombine.high %v8849_v42, %v8849_v42  ;;  %v7679_v40 = vld [vmem:[%s9605_s3 + $0x368] ss:$16 sps:$4 sm:$0xff]  }
 0x304   : > { %5854 = vmatpush1.bf16.msra.mxu0 %v7608_v54  ;;  %v4167_v54 = vsub.s32 6, %v8058_v45 }
 0x305   : > { %5855 = vmatprep.mubr.bf16.mxu0 %v4258_v43  ;;  %6019 = vmatprep.mubr.bf16.mxu1 %v4258_v43  ;;  %v4260_v52 = vpack.c.bf16 %v4231_v47, %v4231_v47  ;;  %v7687_v43 = vld [vmem:[%s9605_s3 + $0x38c] ss:$16 sps:$4 sm:$0xff]   ;;  %v7685_v47 = vld [vmem:[%s9605_s3 + $0x388] ss:$16 sps:$4 sm:$0xff]  }
 0x306   : > { %5864 = vmatprep.subr.bf16.mxu0 %v7612_v44  ;;  %6020 = vmatmul.mubr.bf16.vlgmr.msra.gmra.mrb[0].mxu1 %v4257_v48  ;;  %v4171_v44 = vsub.s32 7, %v8058_v45 }
 0x307   : > { %5856 = vmatmul.mubr.bf16.vlgmr.msra.gmra.mrb[0].mxu0 %v4257_v48  ;;  %6029 = vmatpush1.bf16.msra.mxu1 %v7613_v26  ;;  %v4160_v48 = vrot.slane %v8783_v7, %v4159_v34  ;;  %v7693_v26 = vld [vmem:[%s9605_s3 + $0x3ac] ss:$16 sps:$4 sm:$0xff]   ;;  %v7738_v34 = vld [vmem:[%s9605_s3 + $0x4a4] ss:$16 sps:$4 sm:$0xff]  }
 0x308   : > { %5865 = vmatpush1.bf16.msra.mxu0 %v7610_v49  ;;  %6030 = vmatprep.subr.bf16.mxu1 %v7621_v51  ;;  %v7690_v49 = vld [vmem:[%s9605_s3 + $0x3a4] ss:$16 sps:$4 sm:$0xff]   ;;  %v4168_v51 = vrot.slane %v8783_v7, %v4167_v54 }
 0x309   : > { %5866 = vmatprep.subr.bf16.mxu0 %v7618_v50  ;;  %5896 = vmatprep.mubr.bf16.mxu0 %v4260_v52  ;;  %v4164_v50 = vrot.slane %v8783_v7, %v4163_v37  ;;  %v7741_v37 = vld [vmem:[%s9605_s3 + $0x4ac] ss:$16 sps:$4 sm:$0xff]   ;;  %v7744_v54 = vld [vmem:[%s9605_s3 + $0x4c4] ss:$16 sps:$4 sm:$0xff]  }
 0x30a   : > { %6060 = vmatprep.mubr.bf16.mxu1 %v4260_v52  ;;  %v4172_v52 = vrot.slane %v8783_v7, %v4171_v44  ;;  %v7699_v7 = vld [vmem:[%s9605_s3 + $0x3cc] ss:$16 sps:$4 sm:$0xff]   ;;  %v7745_v44 = vld [vmem:[%s9605_s3 + $0x4c8] ss:$16 sps:$4 sm:$0xff]  }
 0x30b   : > { %6031 = vmatpush1.bf16.msra.mxu1 %v7619_v55  ;;  %v7691_v55 = vld [vmem:[%s9605_s3 + $0x3a8] ss:$16 sps:$4 sm:$0xff]  }
 0x30c   : > { %5867 = vmatpush1.bf16.msra.mxu0 %v7616_v53  ;;  %6032 = vmatprep.subr.bf16.mxu1 %v7627_v57  ;;  %v7688_v53 = vld [vmem:[%s9605_s3 + $0x3a0] ss:$16 sps:$4 sm:$0xff]   ;;  %v4190_v57 = vcombine.low %v4160_v48, %v4164_v50  ;;  %v7759_v50 = vld [vmem:[%s9605_s3 + $0x50c] ss:$16 sps:$4 sm:$0xff]  }
 0x30d   : > { %5868 = vmatprep.subr.bf16.mxu0 %v7624_v56  ;;  %v7696_v56 = vld [vmem:[%s9605_s3 + $0x3c4] ss:$16 sps:$4 sm:$0xff]   ;;  %v7748_v48 = vld [vmem:[%s9605_s3 + $0x4e0] ss:$16 sps:$4 sm:$0xff]  }
 0x30f   : > { %6033 = vmatpush1.bf16.msra.mxu1 %v7625_v0  ;;  %v7694_v0 = vld [vmem:[%s9605_s3 + $0x3c0] ss:$16 sps:$4 sm:$0xff]  }
 0x310   : > { %5869 = vmatpush1.bf16.msra.mxu0 %v7622_v58  ;;  %6034 = vmatprep.subr.bf16.mxu1 %v7633_v61  ;;  %v4191_v58 = vcombine.low %v4168_v51, %v4172_v52  ;;  %v7702_v61 = vld [vmem:[%s9605_s3 + $0x3e4] ss:$16 sps:$4 sm:$0xff]   ;;  %v7754_v51 = vld [vmem:[%s9605_s3 + $0x500] ss:$16 sps:$4 sm:$0xff]   ;;  %v7757_v52 = vld [vmem:[%s9605_s3 + $0x508] ss:$16 sps:$4 sm:$0xff]  }
 0x311   : > { %5870 = vmatprep.subr.bf16.mxu0 %v7630_v59  ;;  %v7697_v59 = vld [vmem:[%s9605_s3 + $0x3c8] ss:$16 sps:$4 sm:$0xff]  }
 0x313   : > { %6035 = vmatpush1.bf16.msra.mxu1 %v7631_v62  ;;  %v4198_v62 = vrot.slane %v4190_v57, %v8593_v39  ;;  %v7768_v57 = vld [vmem:[%s9605_s3 + $0x544] ss:$16 sps:$4 sm:$0xff]  }
 0x314   : > { %5871 = vmatpush1.bf16.msra.mxu0 %v7628_v41  ;;  %6036 = vmatprep.subr.bf16.mxu1 %v7639_v2  ;;  %v7705_v41 = vld [vmem:[%s9605_s3 + $0x3ec] ss:$16 sps:$4 sm:$0xff]   ;;  %v7700_v2 = vld [vmem:[%s9605_s3 + $0x3e0] ss:$16 sps:$4 sm:$0xff]  }
 0x315   : > { %5872 = vmatprep.subr.bf16.mxu0 %v7636_v63  ;;  %v4205_v63 = vrot.slane %v4191_v58, %v8593_v39  ;;  %v7771_v58 = vld [vmem:[%s9605_s3 + $0x54c] ss:$16 sps:$4 sm:$0xff]  }
 0x317   : > { %6037 = vmatpush1.bf16.msra.mxu1 %v7637_v35  ;;  %v7708_v35 = vld [vmem:[%s9605_s3 + $0x404] ss:$16 sps:$4 sm:$0xff]  }
 0x318   : > { %5873 = vmatpush1.bf16.msra.mxu0 %v7634_v6  ;;  %6038 = vmatprep.subr.bf16.mxu1 %v7645_v9  ;;  %v7703_v6 = vld [vmem:[%s9605_s3 + $0x3e8] ss:$16 sps:$4 sm:$0xff]   ;;  %v4206_v9 = vcombine.low %v4198_v62, %v4205_v63  ;;  %v7772_v62 = vld [vmem:[%s9605_s3 + $0x560] ss:$16 sps:$4 sm:$0xff]  }
 0x319   : > { %5874 = vmatprep.subr.bf16.mxu0 %v7642_v8  ;;  %v7711_v8 = vld [vmem:[%s9605_s3 + $0x40c] ss:$16 sps:$4 sm:$0xff]   ;;  %v7775_v63 = vld [vmem:[%s9605_s3 + $0x568] ss:$16 sps:$4 sm:$0xff]  }
 0x31b   : > { %6039 = vmatpush1.bf16.msra.mxu1 %v7643_v12  ;;  %v4259_v12 = vpack.c.bf16 %v8849_v42, %v8849_v42  ;;  %v7712_v42 = vld [vmem:[%s9605_s3 + $0x420] ss:$16 sps:$4 sm:$0xff]  }
 0x31c   : > { %5875 = vmatpush1.bf16.msra.mxu0 %v7640_v11  ;;  %6040 = vmatprep.subr.bf16.mxu1 %v7651_v15  ;;  %v7706_v11 = vld [vmem:[%s9605_s3 + $0x400] ss:$16 sps:$4 sm:$0xff]   ;;  %v7714_v15 = vld [vmem:[%s9605_s3 + $0x424] ss:$16 sps:$4 sm:$0xff]  }
 0x31d   : > { %5876 = vmatprep.subr.bf16.mxu0 %v7648_v14  ;;  %v7709_v14 = vld [vmem:[%s9605_s3 + $0x408] ss:$16 sps:$4 sm:$0xff]  }
 0x31f   : > { %6041 = vmatpush1.bf16.msra.mxu1 %v7649_v16  ;;  %v7717_v16 = vld [vmem:[%s9605_s3 + $0x42c] ss:$16 sps:$4 sm:$0xff]  }
 0x320   : > { %5877 = vmatpush1.bf16.msra.mxu0 %v7646_v3  ;;  %6042 = vmatprep.subr.bf16.mxu1 %v7657_v18  ;;  %v4138_v3 = vld [vmem:[#allocation2 + $0x8] sm:$0xff] }
 0x321   : > { %5878 = vmatprep.subr.bf16.mxu0 %v7654_v17  ;;  %v4210_v17 = vadd.f32 %v4206_v9, %v4138_v3  ;;  %v7786_v9 = vld [vmem:[%s9605_s3 + $0x5a4] ss:$16 sps:$4 sm:$0xff]   ;;  %v7795_v3 = vld [vmem:[%s9605_s3 + $0x5cc] ss:$16 sps:$4 sm:$0xff]  }
 0x323   : > { %6043 = vmatpush1.bf16.msra.mxu1 %v7655_v19  ;;  %v9084_v18 = vmax.f32 %v4210_v17, 0.0  ;;  %v7720_v19 = vld [vmem:[%s9605_s3 + $0x444] ss:$16 sps:$4 sm:$0xff]  }
 0x324   : > { %5879 = vmatpush1.bf16.msra.mxu0 %v7652_v13  ;;  %6044 = vmatprep.subr.bf16.mxu1 %v7663_v21  ;;  %v7715_v13 = vld [vmem:[%s9605_s3 + $0x428] ss:$16 sps:$4 sm:$0xff]  }
 0x325   : > { %5880 = vmatprep.subr.bf16.mxu0 %v7660_v20  ;;  %v7723_v20 = vld [vmem:[%s9605_s3 + $0x44c] ss:$16 sps:$4 sm:$0xff]   ;;  %v9097_v21 = vrot.slane %v9084_v18, %v8593_v39  ;;  %v4232_v17 = vcombine.high %v9084_v18, %v9084_v18  ;;  %v7796_v18 = vld [vmem:[%s9605_s3 + $0x5e0] ss:$16 sps:$4 sm:$0xff]  }
 0x327   : > { %6045 = vmatpush1.bf16.msra.mxu1 %v7661_v23  ;;  %v4247_v23 = vcombine.high %v9097_v21, %v9097_v21 }
 0x328   : > { %5881 = vmatpush1.bf16.msra.mxu0 %v7658_v22  ;;  %6046 = vmatprep.subr.bf16.mxu1 %v7669_v25  ;;  %v7718_v22 = vld [vmem:[%s9605_s3 + $0x440] ss:$16 sps:$4 sm:$0xff]   ;;  %v7726_v25 = vld [vmem:[%s9605_s3 + $0x464] ss:$16 sps:$4 sm:$0xff]  }
 0x329   : > { %5882 = vmatprep.subr.bf16.mxu0 %v7666_v24  ;;  %v7721_v24 = vld [vmem:[%s9605_s3 + $0x448] ss:$16 sps:$4 sm:$0xff]  }
 0x32b   : > { %6047 = vmatpush1.bf16.msra.mxu1 %v7667_v28  ;;  %v4262_v28 = vpack.c.bf16 %v4247_v23, %v4247_v23  ;;  %v7804_v23 = vld [vmem:[%s9605_s3 + $0x604] ss:$16 sps:$4 sm:$0xff]  }
 0x32c   : > { %5883 = vmatpush1.bf16.msra.mxu0 %v7664_v27  ;;  %6048 = vmatprep.subr.bf16.mxu1 %v7675_v29  ;;  %v7729_v27 = vld [vmem:[%s9605_s3 + $0x46c] ss:$16 sps:$4 sm:$0xff]   ;;  %v7727_v29 = vld [vmem:[%s9605_s3 + $0x468] ss:$16 sps:$4 sm:$0xff]  }
 0x32d   : > { %5884 = vmatprep.subr.bf16.mxu0 %v7672_v60  ;;  %v7724_v60 = vld [vmem:[%s9605_s3 + $0x460] ss:$16 sps:$4 sm:$0xff]  }
 0x32f   : > { %6049 = vmatpush1.bf16.msra.mxu1 %v7673_v31  ;;  %v7735_v31 = vld [vmem:[%s9605_s3 + $0x48c] ss:$16 sps:$4 sm:$0xff]  }
 0x330   : > { %5885 = vmatpush1.bf16.msra.mxu0 %v7670_v30  ;;  %6050 = vmatprep.subr.bf16.mxu1 %v7681_v33  ;;  %v7732_v30 = vld [vmem:[%s9605_s3 + $0x484] ss:$16 sps:$4 sm:$0xff]   ;;  %v7733_v33 = vld [vmem:[%s9605_s3 + $0x488] ss:$16 sps:$4 sm:$0xff]  }
 0x331   : > { %5886 = vmatprep.subr.bf16.mxu0 %v7678_v32  ;;  %v7730_v32 = vld [vmem:[%s9605_s3 + $0x480] ss:$16 sps:$4 sm:$0xff]  }
 0x333   : > { %6051 = vmatpush1.bf16.msra.mxu1 %v7679_v40  ;;  %v7739_v40 = vld [vmem:[%s9605_s3 + $0x4a8] ss:$16 sps:$4 sm:$0xff]  }
 0x334   : > { %5887 = vmatpush1.bf16.msra.mxu0 %v7676_v38  ;;  %6052 = vmatprep.subr.bf16.mxu1 %v7687_v43  ;;  %v7736_v38 = vld [vmem:[%s9605_s3 + $0x4a0] ss:$16 sps:$4 sm:$0xff]  }
 0x335   : > { %5888 = vmatprep.subr.bf16.mxu0 %v7684_v10  ;;  %v7747_v10 = vld [vmem:[%s9605_s3 + $0x4cc] ss:$16 sps:$4 sm:$0xff]   ;;  %v7742_v43 = vld [vmem:[%s9605_s3 + $0x4c0] ss:$16 sps:$4 sm:$0xff]  }
 0x337   : > { %6053 = vmatpush1.bf16.msra.mxu1 %v7685_v47  ;;  %v7753_v47 = vld [vmem:[%s9605_s3 + $0x4ec] ss:$16 sps:$4 sm:$0xff]  }
 0x338   : > { %5889 = vmatpush1.bf16.msra.mxu0 %v7682_v46  ;;  %6054 = vmatprep.subr.bf16.mxu1 %v7693_v26  ;;  %v7750_v46 = vld [vmem:[%s9605_s3 + $0x4e4] ss:$16 sps:$4 sm:$0xff]  }
 0x339   : > { %5890 = vmatprep.subr.bf16.mxu0 %v7690_v49  ;;  %v7751_v49 = vld [vmem:[%s9605_s3 + $0x4e8] ss:$16 sps:$4 sm:$0xff]   ;;  %v7756_v26 = vld [vmem:[%s9605_s3 + $0x504] ss:$16 sps:$4 sm:$0xff]  }
 0x33b   : > { %6055 = vmatpush1.bf16.msra.mxu1 %v7691_v55  ;;  %v7765_v55 = vld [vmem:[%s9605_s3 + $0x52c] ss:$16 sps:$4 sm:$0xff]  }
 0x33c   : > { %5891 = vmatpush1.bf16.msra.mxu0 %v7688_v53  ;;  %6056 = vmatprep.subr.bf16.mxu1 %v7699_v7  ;;  %v7762_v53 = vld [vmem:[%s9605_s3 + $0x524] ss:$16 sps:$4 sm:$0xff]   ;;  %v7763_v7 = vld [vmem:[%s9605_s3 + $0x528] ss:$16 sps:$4 sm:$0xff]  }
 0x33d   : > { %5892 = vmatprep.subr.bf16.mxu0 %v7696_v56  ;;  %v7760_v56 = vld [vmem:[%s9605_s3 + $0x520] ss:$16 sps:$4 sm:$0xff]  }
 0x33f   : > { %6057 = vmatpush1.bf16.msra.mxu1 %v7697_v59  ;;  %v7769_v59 = vld [vmem:[%s9605_s3 + $0x548] ss:$16 sps:$4 sm:$0xff]  }
 0x340   : > { %5893 = vmatpush1.bf16.msra.mxu0 %v7694_v0  ;;  %6058 = vmatprep.subr.bf16.mxu1 %v7705_v41  ;;  %v7766_v0 = vld [vmem:[%s9605_s3 + $0x540] ss:$16 sps:$4 sm:$0xff]   ;;  %v7777_v41 = vld [vmem:[%s9605_s3 + $0x56c] ss:$16 sps:$4 sm:$0xff]  }
 0x341   : > { %5894 = vmatprep.subr.bf16.mxu0 %v7702_v61  ;;  %v7774_v61 = vld [vmem:[%s9605_s3 + $0x564] ss:$16 sps:$4 sm:$0xff]  }
 0x343   : > { %6059 = vmatpush1.bf16.msra.mxu1 %v7703_v6  ;;  %v7783_v6 = vld [vmem:[%s9605_s3 + $0x58c] ss:$16 sps:$4 sm:$0xff]  }
 0x344   : > { %5895 = vmatpush1.bf16.msra.mxu0 %v7700_v2  ;;  %6069 = vmatprep.subr.bf16.mxu1 %v7711_v8  ;;  %v7780_v2 = vld [vmem:[%s9605_s3 + $0x584] ss:$16 sps:$4 sm:$0xff]   ;;  %v7781_v8 = vld [vmem:[%s9605_s3 + $0x588] ss:$16 sps:$4 sm:$0xff]  }
 0x345   : > { %5905 = vmatprep.subr.bf16.mxu0 %v7708_v35  ;;  %v7778_v35 = vld [vmem:[%s9605_s3 + $0x580] ss:$16 sps:$4 sm:$0xff]  }
 0x346   : > { %6061 = vmatmul.mubr.bf16.vlgmr.msra.gmra.mrb[0].mxu1 %v4259_v12 }
 0x347   : > { %5897 = vmatmul.mubr.bf16.vlgmr.msra.gmra.mrb[0].mxu0 %v4259_v12  ;;  %6070 = vmatpush1.bf16.msra.mxu1 %v7709_v14  ;;  %v7784_v12 = vld [vmem:[%s9605_s3 + $0x5a0] ss:$16 sps:$4 sm:$0xff]   ;;  %v7787_v14 = vld [vmem:[%s9605_s3 + $0x5a8] ss:$16 sps:$4 sm:$0xff]  }
 0x348   : > { %5906 = vmatpush1.bf16.msra.mxu0 %v7706_v11  ;;  %6071 = vmatprep.subr.bf16.mxu1 %v7717_v16  ;;  %v7789_v11 = vld [vmem:[%s9605_s3 + $0x5ac] ss:$16 sps:$4 sm:$0xff]   ;;  %v7790_v16 = vld [vmem:[%s9605_s3 + $0x5c0] ss:$16 sps:$4 sm:$0xff]  }
 0x349   : > { %5907 = vmatprep.subr.bf16.mxu0 %v7714_v15  ;;  %5937 = vmatprep.mubr.bf16.mxu0 %v4262_v28  ;;  %v7792_v15 = vld [vmem:[%s9605_s3 + $0x5c4] ss:$16 sps:$4 sm:$0xff]  }
 0x34a   : > { %6101 = vmatprep.mubr.bf16.mxu1 %v4262_v28  ;;  %v4261_v28 = vpack.c.bf16 %v9097_v21, %v9097_v21  ;;  %v7811_v21 = vld [vmem:[%s9605_s3 + $0x628] ss:$16 sps:$4 sm:$0xff]  }
 0x34b   : > { %6072 = vmatpush1.bf16.msra.mxu1 %v7715_v13  ;;  %v7798_v13 = vld [vmem:[%s9605_s3 + $0x5e4] ss:$16 sps:$4 sm:$0xff]  }
 0x34c   : > { %5908 = vmatpush1.bf16.msra.mxu0 %v7712_v42  ;;  %6073 = vmatprep.subr.bf16.mxu1 %v7723_v20  ;;  %v7793_v42 = vld [vmem:[%s9605_s3 + $0x5c8] ss:$16 sps:$4 sm:$0xff]   ;;  %v9263_v20 = vrot.slane %v4232_v17, %v8593_v39  ;;  %v7802_v39 = vld [vmem:[%s9605_s3 + $0x600] ss:$16 sps:$4 sm:$0xff]   ;;  %v7879_v17 = vld [vmem:[%s9605_s3 + $0x78c] ss:$16 sps:$4 sm:$0xff]  }
 0x34d   : > { %5909 = vmatprep.subr.bf16.mxu0 %v7720_v19  ;;  %v7801_v19 = vld [vmem:[%s9605_s3 + $0x5ec] ss:$16 sps:$4 sm:$0xff]  }
 0x34f   : > { %6074 = vmatpush1.bf16.msra.mxu1 %v7721_v24  ;;  %v7807_v24 = vld [vmem:[%s9605_s3 + $0x60c] ss:$16 sps:$4 sm:$0xff]  }
 0x350   : > { %5910 = vmatpush1.bf16.msra.mxu0 %v7718_v22  ;;  %6075 = vmatprep.subr.bf16.mxu1 %v7729_v27  ;;  %v7799_v22 = vld [vmem:[%s9605_s3 + $0x5e8] ss:$16 sps:$4 sm:$0xff]  }
 0x351   : > { %5911 = vmatprep.subr.bf16.mxu0 %v7726_v25  ;;  %v4248_v25 = vcombine.high %v9263_v20, %v9263_v20  ;;  %v7805_v27 = vld [vmem:[%s9605_s3 + $0x608] ss:$16 sps:$4 sm:$0xff]  }
 0x353   : > { %6076 = vmatpush1.bf16.msra.mxu1 %v7727_v29  ;;  %v7813_v29 = vld [vmem:[%s9605_s3 + $0x62c] ss:$16 sps:$4 sm:$0xff]  }
 0x354   : > { %5912 = vmatpush1.bf16.msra.mxu0 %v7724_v60  ;;  %6077 = vmatprep.subr.bf16.mxu1 %v7735_v31  ;;  %v7810_v60 = vld [vmem:[%s9605_s3 + $0x624] ss:$16 sps:$4 sm:$0xff]   ;;  %v4264_v31 = vpack.c.bf16 %v4248_v25, %v4248_v25  ;;  %v7886_v25 = vld [vmem:[%s9605_s3 + $0x7c0] ss:$16 sps:$4 sm:$0xff]  }
 0x355   : > { %5913 = vmatprep.subr.bf16.mxu0 %v7732_v30  ;;  %v7808_v30 = vld [vmem:[%s9605_s3 + $0x620] ss:$16 sps:$4 sm:$0xff]  }
 0x357   : > { %6078 = vmatpush1.bf16.msra.mxu1 %v7733_v33  ;;  %v7819_v33 = vld [vmem:[%s9605_s3 + $0x64c] ss:$16 sps:$4 sm:$0xff]  }
 0x358   : > { %5914 = vmatpush1.bf16.msra.mxu0 %v7730_v32  ;;  %6079 = vmatprep.subr.bf16.mxu1 %v7741_v37  ;;  %v7816_v32 = vld [vmem:[%s9605_s3 + $0x644] ss:$16 sps:$4 sm:$0xff]   ;;  %v7817_v37 = vld [vmem:[%s9605_s3 + $0x648] ss:$16 sps:$4 sm:$0xff]  }
 0x359   : > { %5915 = vmatprep.subr.bf16.mxu0 %v7738_v34  ;;  %v7814_v34 = vld [vmem:[%s9605_s3 + $0x640] ss:$16 sps:$4 sm:$0xff]  }
 0x35b   : > { %6080 = vmatpush1.bf16.msra.mxu1 %v7739_v40  ;;  %v7825_v40 = vld [vmem:[%s9605_s3 + $0x66c] ss:$16 sps:$4 sm:$0xff]  }
 0x35c   : > { %5916 = vmatpush1.bf16.msra.mxu0 %v7736_v38  ;;  %6081 = vmatprep.subr.bf16.mxu1 %v7747_v10  ;;  %v7822_v38 = vld [vmem:[%s9605_s3 + $0x664] ss:$16 sps:$4 sm:$0xff]   ;;  %v7823_v10 = vld [vmem:[%s9605_s3 + $0x668] ss:$16 sps:$4 sm:$0xff]  }
 0x35d   : > { %5917 = vmatprep.subr.bf16.mxu0 %v7744_v54  ;;  %v7820_v54 = vld [vmem:[%s9605_s3 + $0x660] ss:$16 sps:$4 sm:$0xff]  }
 0x35f   : > { %6082 = vmatpush1.bf16.msra.mxu1 %v7745_v44  ;;  %v7831_v44 = vld [vmem:[%s9605_s3 + $0x68c] ss:$16 sps:$4 sm:$0xff]  }
 0x360   : > { %5918 = vmatpush1.bf16.msra.mxu0 %v7742_v43  ;;  %6083 = vmatprep.subr.bf16.mxu1 %v7753_v47  ;;  %v7828_v43 = vld [vmem:[%s9605_s3 + $0x684] ss:$16 sps:$4 sm:$0xff]   ;;  %v7829_v47 = vld [vmem:[%s9605_s3 + $0x688] ss:$16 sps:$4 sm:$0xff]  }
 0x361   : > { %5919 = vmatprep.subr.bf16.mxu0 %v7750_v46  ;;  %v7826_v46 = vld [vmem:[%s9605_s3 + $0x680] ss:$16 sps:$4 sm:$0xff]  }
 0x363   : > { %6084 = vmatpush1.bf16.msra.mxu1 %v7751_v49  ;;  %v7837_v49 = vld [vmem:[%s9605_s3 + $0x6ac] ss:$16 sps:$4 sm:$0xff]  }
 0x364   : > { %5920 = vmatpush1.bf16.msra.mxu0 %v7748_v48  ;;  %6085 = vmatprep.subr.bf16.mxu1 %v7759_v50  ;;  %v7834_v48 = vld [vmem:[%s9605_s3 + $0x6a4] ss:$16 sps:$4 sm:$0xff]   ;;  %v7835_v50 = vld [vmem:[%s9605_s3 + $0x6a8] ss:$16 sps:$4 sm:$0xff]  }
 0x365   : > { %5921 = vmatprep.subr.bf16.mxu0 %v7756_v26  ;;  %v7832_v26 = vld [vmem:[%s9605_s3 + $0x6a0] ss:$16 sps:$4 sm:$0xff]  }
 0x367   : > { %6086 = vmatpush1.bf16.msra.mxu1 %v7757_v52  ;;  %v7843_v52 = vld [vmem:[%s9605_s3 + $0x6cc] ss:$16 sps:$4 sm:$0xff]  }
 0x368   : > { %5922 = vmatpush1.bf16.msra.mxu0 %v7754_v51  ;;  %6087 = vmatprep.subr.bf16.mxu1 %v7765_v55  ;;  %v7840_v51 = vld [vmem:[%s9605_s3 + $0x6c4] ss:$16 sps:$4 sm:$0xff]   ;;  %v7841_v55 = vld [vmem:[%s9605_s3 + $0x6c8] ss:$16 sps:$4 sm:$0xff]  }
 0x369   : > { %5923 = vmatprep.subr.bf16.mxu0 %v7762_v53  ;;  %v7838_v53 = vld [vmem:[%s9605_s3 + $0x6c0] ss:$16 sps:$4 sm:$0xff]  }
 0x36b   : > { %6088 = vmatpush1.bf16.msra.mxu1 %v7763_v7  ;;  %v7849_v7 = vld [vmem:[%s9605_s3 + $0x6ec] ss:$16 sps:$4 sm:$0xff]  }
 0x36c   : > { %5924 = vmatpush1.bf16.msra.mxu0 %v7760_v56  ;;  %6089 = vmatprep.subr.bf16.mxu1 %v7771_v58  ;;  %v7846_v56 = vld [vmem:[%s9605_s3 + $0x6e4] ss:$16 sps:$4 sm:$0xff]   ;;  %v7847_v58 = vld [vmem:[%s9605_s3 + $0x6e8] ss:$16 sps:$4 sm:$0xff]  }
 0x36d   : > { %5925 = vmatprep.subr.bf16.mxu0 %v7768_v57  ;;  %v7844_v57 = vld [vmem:[%s9605_s3 + $0x6e0] ss:$16 sps:$4 sm:$0xff]  }
 0x36f   : > { %6090 = vmatpush1.bf16.msra.mxu1 %v7769_v59  ;;  %v7855_v59 = vld [vmem:[%s9605_s3 + $0x70c] ss:$16 sps:$4 sm:$0xff]  }
 0x370   : > { %5926 = vmatpush1.bf16.msra.mxu0 %v7766_v0  ;;  %6091 = vmatprep.subr.bf16.mxu1 %v7777_v41  ;;  %v7852_v0 = vld [vmem:[%s9605_s3 + $0x704] ss:$16 sps:$4 sm:$0xff]   ;;  %v7853_v41 = vld [vmem:[%s9605_s3 + $0x708] ss:$16 sps:$4 sm:$0xff]  }
 0x371   : > { %5927 = vmatprep.subr.bf16.mxu0 %v7774_v61  ;;  %v7850_v61 = vld [vmem:[%s9605_s3 + $0x700] ss:$16 sps:$4 sm:$0xff]  }
 0x373   : > { %6092 = vmatpush1.bf16.msra.mxu1 %v7775_v63  ;;  %v7861_v63 = vld [vmem:[%s9605_s3 + $0x72c] ss:$16 sps:$4 sm:$0xff]  }
 0x374   : > { %5928 = vmatpush1.bf16.msra.mxu0 %v7772_v62  ;;  %6093 = vmatprep.subr.bf16.mxu1 %v7783_v6  ;;  %v7858_v62 = vld [vmem:[%s9605_s3 + $0x724] ss:$16 sps:$4 sm:$0xff]   ;;  %v7859_v6 = vld [vmem:[%s9605_s3 + $0x728] ss:$16 sps:$4 sm:$0xff]  }
 0x375   : > { %5929 = vmatprep.subr.bf16.mxu0 %v7780_v2  ;;  %v7856_v2 = vld [vmem:[%s9605_s3 + $0x720] ss:$16 sps:$4 sm:$0xff]  }
 0x377   : > { %6094 = vmatpush1.bf16.msra.mxu1 %v7781_v8  ;;  %v7867_v8 = vld [vmem:[%s9605_s3 + $0x74c] ss:$16 sps:$4 sm:$0xff]  }
 0x378   : > { %5930 = vmatpush1.bf16.msra.mxu0 %v7778_v35  ;;  %6095 = vmatprep.subr.bf16.mxu1 %v7789_v11  ;;  %v7864_v35 = vld [vmem:[%s9605_s3 + $0x744] ss:$16 sps:$4 sm:$0xff]   ;;  %v7865_v11 = vld [vmem:[%s9605_s3 + $0x748] ss:$16 sps:$4 sm:$0xff]  }
 0x379   : > { %5931 = vmatprep.subr.bf16.mxu0 %v7786_v9  ;;  %v7862_v9 = vld [vmem:[%s9605_s3 + $0x740] ss:$16 sps:$4 sm:$0xff]  }
 0x37b   : > { %6096 = vmatpush1.bf16.msra.mxu1 %v7787_v14  ;;  %v7873_v14 = vld [vmem:[%s9605_s3 + $0x76c] ss:$16 sps:$4 sm:$0xff]  }
 0x37c   : > { %5932 = vmatpush1.bf16.msra.mxu0 %v7784_v12  ;;  %6097 = vmatprep.subr.bf16.mxu1 %v7795_v3  ;;  %v7870_v12 = vld [vmem:[%s9605_s3 + $0x764] ss:$16 sps:$4 sm:$0xff]   ;;  %v7871_v3 = vld [vmem:[%s9605_s3 + $0x768] ss:$16 sps:$4 sm:$0xff]  }
 0x37d   : > { %5933 = vmatprep.subr.bf16.mxu0 %v7792_v15  ;;  %v7868_v15 = vld [vmem:[%s9605_s3 + $0x760] ss:$16 sps:$4 sm:$0xff]  }
 0x37f   : > { %6098 = vmatpush1.bf16.msra.mxu1 %v7793_v42  ;;  %v7874_v42 = vld [vmem:[%s9605_s3 + $0x780] ss:$16 sps:$4 sm:$0xff]  }
 0x380   : > { %5934 = vmatpush1.bf16.msra.mxu0 %v7790_v16  ;;  %6099 = vmatprep.subr.bf16.mxu1 %v7801_v19  ;;  %v7876_v16 = vld [vmem:[%s9605_s3 + $0x784] ss:$16 sps:$4 sm:$0xff]  }
 0x381   : > { %5935 = vmatprep.subr.bf16.mxu0 %v7798_v13  ;;  %v7877_v13 = vld [vmem:[%s9605_s3 + $0x788] ss:$16 sps:$4 sm:$0xff]   ;;  %v7882_v19 = vld [vmem:[%s9605_s3 + $0x7a4] ss:$16 sps:$4 sm:$0xff]  }
 0x383   : > { %6100 = vmatpush1.bf16.msra.mxu1 %v7799_v22  ;;  %v7880_v22 = vld [vmem:[%s9605_s3 + $0x7a0] ss:$16 sps:$4 sm:$0xff]  }
 0x384   : > { %5936 = vmatpush1.bf16.msra.mxu0 %v7796_v18  ;;  %6110 = vmatprep.subr.bf16.mxu1 %v7807_v24  ;;  %v7885_v18 = vld [vmem:[%s9605_s3 + $0x7ac] ss:$16 sps:$4 sm:$0xff]   ;;  %v7888_v24 = vld [vmem:[%s9605_s3 + $0x7c4] ss:$16 sps:$4 sm:$0xff]  }
 0x385   : > { %5946 = vmatprep.subr.bf16.mxu0 %v7804_v23  ;;  %v7883_v23 = vld [vmem:[%s9605_s3 + $0x7a8] ss:$16 sps:$4 sm:$0xff]  }
 0x386   : > { %6102 = vmatmul.mubr.bf16.vlgmr.msra.gmra.mrb[0].mxu1 %v4261_v28 }
 0x387   : > { %5938 = vmatmul.mubr.bf16.vlgmr.msra.gmra.mrb[0].mxu0 %v4261_v28  ;;  %6111 = vmatpush1.bf16.msra.mxu1 %v7805_v27  ;;  %v7889_v27 = vld [vmem:[%s9605_s3 + $0x7c8] ss:$16 sps:$4 sm:$0xff]   ;;  %v7894_v28 = vld [vmem:[%s9605_s3 + $0x7e4] ss:$16 sps:$4 sm:$0xff]  }
 0x388   : > { %5947 = vmatpush1.bf16.msra.mxu0 %v7802_v39  ;;  %6112 = vmatprep.subr.bf16.mxu1 %v7813_v29  ;;  %v7891_v39 = vld [vmem:[%s9605_s3 + $0x7cc] ss:$16 sps:$4 sm:$0xff]   ;;  %v7892_v29 = vld [vmem:[%s9605_s3 + $0x7e0] ss:$16 sps:$4 sm:$0xff]  }
 0x389   : > { %5948 = vmatprep.subr.bf16.mxu0 %v7810_v60  ;;  %5978 = vmatprep.mubr.bf16.mxu0 %v4264_v31  ;;  %v7897_v60 = vld [vmem:[%s9605_s3 + $0x7ec] ss:$16 sps:$4 sm:$0xff]  }
 0x38a   : > { %6142 = vmatprep.mubr.bf16.mxu1 %v4264_v31  ;;  %v7899_v31 = vld [vmem:[%s9607_s5 + $0xc0] sm:$0xff]  }
 0x38b   : > { %6113 = vmatpush1.bf16.msra.mxu1 %v7811_v21  ;;  %v7898_v21 = vld [vmem:[%s9607_s5 + $0x40] sm:$0xff]  }
 0x38c   : > { %5949 = vmatpush1.bf16.msra.mxu0 %v7808_v30  ;;  %6114 = vmatprep.subr.bf16.mxu1 %v7819_v33  ;;  %v7895_v30 = vld [vmem:[%s9605_s3 + $0x7e8] ss:$16 sps:$4 sm:$0xff]   ;;  %v7900_v33 = vld [vmem:[%s9607_s5] sm:$0xff]  }
 0x38d   : > { %5950 = vmatprep.subr.bf16.mxu0 %v7816_v32  ;;  %v4263_v32 = vpack.c.bf16 %v9263_v20, %v9263_v20  ;;  %v7903_v20 = vld [vmem:[%s9607_s5 + $0xc8] sm:$0xff]  }
 0x38f   : > { %6115 = vmatpush1.bf16.msra.mxu1 %v7817_v37  ;;  %v7902_v37 = vld [vmem:[%s9607_s5 + $0x48] sm:$0xff]  }
 0x390   : > { %5951 = vmatpush1.bf16.msra.mxu0 %v7814_v34  ;;  %6116 = vmatprep.subr.bf16.mxu1 %v7825_v40  ;;  %v7901_v34 = vld [vmem:[%s9607_s5 + $0x80] sm:$0xff]   ;;  %v7905_v40 = vld [vmem:[%s9607_s5 + $0x88] sm:$0xff]  }
 0x391   : > { %5952 = vmatprep.subr.bf16.mxu0 %v7822_v38  ;;  %v7904_v38 = vld [vmem:[%s9607_s5 + $0x8] sm:$0xff]  }
 0x393   : > { %6117 = vmatpush1.bf16.msra.mxu1 %v7823_v10  ;;  %v7907_v10 = vld [vmem:[%s9607_s5 + $0xd0] sm:$0xff]  }
 0x394   : > { %5953 = vmatpush1.bf16.msra.mxu0 %v7820_v54  ;;  %6118 = vmatprep.subr.bf16.mxu1 %v7831_v44  ;;  %v7906_v54 = vld [vmem:[%s9607_s5 + $0x50] sm:$0xff]  }
 0x395   : > { %5954 = vmatprep.subr.bf16.mxu0 %v7828_v43  ;;  %v7908_v43 = vld [vmem:[%s9607_s5 + $0x10] sm:$0xff]  }
 0x396   : > { %v7909_v44 = vld [vmem:[%s9607_s5 + $0x90] sm:$0xff]  }
 0x397   : > { %6119 = vmatpush1.bf16.msra.mxu1 %v7829_v47  ;;  %v7911_v47 = vld [vmem:[%s9607_s5 + $0xd8] sm:$0xff]  }
 0x398   : > { %5955 = vmatpush1.bf16.msra.mxu0 %v7826_v46  ;;  %6120 = vmatprep.subr.bf16.mxu1 %v7837_v49  ;;  %v7910_v46 = vld [vmem:[%s9607_s5 + $0x58] sm:$0xff]  }
 0x399   : > { %5956 = vmatprep.subr.bf16.mxu0 %v7834_v48  ;;  %v7912_v48 = vld [vmem:[%s9607_s5 + $0x18] sm:$0xff]  }
 0x39a   : > { %v7913_v49 = vld [vmem:[%s9607_s5 + $0x98] sm:$0xff]  }
 0x39b   : > { %6121 = vmatpush1.bf16.msra.mxu1 %v7835_v50  ;;  %v7915_v50 = vld [vmem:[%s9607_s5 + $0xe0] sm:$0xff]  }
 0x39c   : > { %5957 = vmatpush1.bf16.msra.mxu0 %v7832_v26  ;;  %6122 = vmatprep.subr.bf16.mxu1 %v7843_v52  ;;  %v7914_v26 = vld [vmem:[%s9607_s5 + $0x60] sm:$0xff]  }
 0x39d   : > { %5958 = vmatprep.subr.bf16.mxu0 %v7840_v51  ;;  %v7916_v51 = vld [vmem:[%s9607_s5 + $0x20] sm:$0xff]  }
 0x39e   : > { %v7917_v52 = vld [vmem:[%s9607_s5 + $0xa0] sm:$0xff]  }
 0x39f   : > { %6123 = vmatpush1.bf16.msra.mxu1 %v7841_v55  ;;  %v7919_v55 = vld [vmem:[%s9607_s5 + $0xe8] sm:$0xff]  }
 0x3a0   : > { %5959 = vmatpush1.bf16.msra.mxu0 %v7838_v53  ;;  %6124 = vmatprep.subr.bf16.mxu1 %v7849_v7  ;;  %v7918_v53 = vld [vmem:[%s9607_s5 + $0x68] sm:$0xff]  }
 0x3a1   : > { %5960 = vmatprep.subr.bf16.mxu0 %v7846_v56  ;;  %v7920_v56 = vld [vmem:[%s9607_s5 + $0x28] sm:$0xff]  }
 0x3a2   : > { %v7921_v7 = vld [vmem:[%s9607_s5 + $0xa8] sm:$0xff]  }
 0x3a3   : > { %6125 = vmatpush1.bf16.msra.mxu1 %v7847_v58  ;;  %v7923_v58 = vld [vmem:[%s9607_s5 + $0xf0] sm:$0xff]  }
 0x3a4   : > { %5961 = vmatpush1.bf16.msra.mxu0 %v7844_v57  ;;  %6126 = vmatprep.subr.bf16.mxu1 %v7855_v59  ;;  %v7922_v57 = vld [vmem:[%s9607_s5 + $0x70] sm:$0xff]  }
 0x3a5   : > { %5962 = vmatprep.subr.bf16.mxu0 %v7852_v0  ;;  %v7924_v0 = vld [vmem:[%s9607_s5 + $0x30] sm:$0xff]  }
 0x3a6   : > { %v7925_v59 = vld [vmem:[%s9607_s5 + $0xb0] sm:$0xff]  }
 0x3a7   : > { %6127 = vmatpush1.bf16.msra.mxu1 %v7853_v41  ;;  %v7927_v41 = vld [vmem:[%s9607_s5 + $0xf8] sm:$0xff]  }
 0x3a8   : > { %5963 = vmatpush1.bf16.msra.mxu0 %v7850_v61  ;;  %6128 = vmatprep.subr.bf16.mxu1 %v7861_v63  ;;  %v7926_v61 = vld [vmem:[%s9607_s5 + $0x78] sm:$0xff]  }
 0x3a9   : > { %5964 = vmatprep.subr.bf16.mxu0 %v7858_v62  ;;  %v7928_v62 = vld [vmem:[%s9607_s5 + $0x38] sm:$0xff]  }
 0x3aa   : > { %v7929_v63 = vld [vmem:[%s9607_s5 + $0xb8] sm:$0xff]  }
 0x3ab   : > { %6129 = vmatpush1.bf16.msra.mxu1 %v7859_v6 }
 0x3ac   : > { %5965 = vmatpush1.bf16.msra.mxu0 %v7856_v2  ;;  %6130 = vmatprep.subr.bf16.mxu1 %v7867_v8  ;;  %v4521_v2 = vld [vmem:[%s9606_s4] sm:$0xf] }
 0x3ad   : > { %5966 = vmatprep.subr.bf16.mxu0 %v7864_v35  ;;  %v4526_v6 = vrot.slane %v4521_v2, %v4143_v1  ;;  %v4534_v35 = vrot.slane %v4521_v2, %v4151_v5  ;;  %v4530_v8 = vrot.slane %v4521_v2, %v4147_v4 }
 0x3af   : > { %6131 = vmatpush1.bf16.msra.mxu1 %v7865_v11 }
 0x3b0   : > { %5967 = vmatpush1.bf16.msra.mxu0 %v7862_v9  ;;  %6132 = vmatprep.subr.bf16.mxu1 %v7873_v14  ;;  %v4538_v9 = vrot.slane %v4521_v2, %v4155_v36 }
 0x3b1   : > { %5968 = vmatprep.subr.bf16.mxu0 %v7870_v12 }
 0x3b3   : > { %6133 = vmatpush1.bf16.msra.mxu1 %v7871_v3 }
 0x3b4   : > { %5969 = vmatpush1.bf16.msra.mxu0 %v7868_v15  ;;  %6134 = vmatprep.subr.bf16.mxu1 %v7879_v17 }
 0x3b5   : > { %5970 = vmatprep.subr.bf16.mxu0 %v7876_v16 }
 0x3b7   : > { %6135 = vmatpush1.bf16.msra.mxu1 %v7877_v13 }
 0x3b8   : > { %5971 = vmatpush1.bf16.msra.mxu0 %v7874_v42  ;;  %6136 = vmatprep.subr.bf16.mxu1 %v7885_v18 }
 0x3b9   : > { %5972 = vmatprep.subr.bf16.mxu0 %v7882_v19 }
 0x3bb   : > { %6137 = vmatpush1.bf16.msra.mxu1 %v7883_v23 }
 0x3bc   : > { %5973 = vmatpush1.bf16.msra.mxu0 %v7880_v22  ;;  %6138 = vmatprep.subr.bf16.mxu1 %v7891_v39 }
 0x3bd   : > { %5974 = vmatprep.subr.bf16.mxu0 %v7888_v24 }
 0x3bf   : > { %6139 = vmatpush1.bf16.msra.mxu1 %v7889_v27 }
 0x3c0   : > { %5975 = vmatpush1.bf16.msra.mxu0 %v7886_v25  ;;  %6140 = vmatprep.subr.bf16.mxu1 %v7897_v60 }
 0x3c1   : > { %5976 = vmatprep.subr.bf16.mxu0 %v7894_v28  ;;  %v7337_v28 = vld [vmem:[%s9608_s6] ss:$0 sm:$0xff] }
 0x3c3   : > { %6141 = vmatpush1.bf16.msra.mxu1 %v7895_v30 }
 0x3c4   : > { %5977 = vmatpush1.bf16.msra.mxu0 %v7892_v29  ;;  %7397 = vmatprep.subr.bf16.mxu1 %v7899_v31 }
 0x3c5   : > { %7375 = vmatprep.subr.bf16.mxu0 %v7898_v21 }
 0x3c6   : > { %6143 = vmatmul.mubr.bf16.vlgmr.msra.gmra.mrb[0].mxu1 %v4263_v32 }
 0x3c7   : > { %5979 = vmatmul.mubr.bf16.vlgmr.msra.gmra.mrb[0].mxu0 %v4263_v32  ;;  %7398 = vmatpush3.bf16.msra.mxu1 %v7901_v34 }
 0x3c8   : > { %7376 = vmatpush3.bf16.msra.mxu0 %v7900_v33  ;;  %7399 = vmatprep.subr.bf16.mxu1 %v7903_v20 }
 0x3c9   : > { %7377 = vmatprep.subr.bf16.mxu0 %v7902_v37 }
 0x3cb   : > { %7400 = vmatpush3.bf16.msra.mxu1 %v7905_v40 }
 0x3cc   : > { %7378 = vmatpush3.bf16.msra.mxu0 %v7904_v38  ;;  %7401 = vmatprep.subr.bf16.mxu1 %v7907_v10 }
 0x3cd   : > { %7379 = vmatprep.subr.bf16.mxu0 %v7906_v54 }
 0x3cf   : > { %7402 = vmatpush3.bf16.msra.mxu1 %v7909_v44 }
 0x3d0   : > { %7380 = vmatpush3.bf16.msra.mxu0 %v7908_v43  ;;  %7403 = vmatprep.subr.bf16.mxu1 %v7911_v47 }
 0x3d1   : > { %7381 = vmatprep.subr.bf16.mxu0 %v7910_v46 }
 0x3d3   : > { %7404 = vmatpush3.bf16.msra.mxu1 %v7913_v49 }
 0x3d4   : > { %7382 = vmatpush3.bf16.msra.mxu0 %v7912_v48  ;;  %7405 = vmatprep.subr.bf16.mxu1 %v7915_v50 }
 0x3d5   : > { %7383 = vmatprep.subr.bf16.mxu0 %v7914_v26 }
 0x3d7   : > { %7406 = vmatpush3.bf16.msra.mxu1 %v7917_v52 }
 0x3d8   : > { %7384 = vmatpush3.bf16.msra.mxu0 %v7916_v51  ;;  %7407 = vmatprep.subr.bf16.mxu1 %v7919_v55 }
 0x3d9   : > { %7385 = vmatprep.subr.bf16.mxu0 %v7918_v53 }
 0x3db   : > { %7408 = vmatpush3.bf16.msra.mxu1 %v7921_v7 }
 0x3dc   : > { %7386 = vmatpush3.bf16.msra.mxu0 %v7920_v56  ;;  %7409 = vmatprep.subr.bf16.mxu1 %v7923_v58 }
 0x3dd   : > { %7387 = vmatprep.subr.bf16.mxu0 %v7922_v57 }
 0x3df   : > { %7410 = vmatpush3.bf16.msra.mxu1 %v7925_v59 }
 0x3e0   : > { %7388 = vmatpush3.bf16.msra.mxu0 %v7924_v0  ;;  %7411 = vmatprep.subr.bf16.mxu1 %v7927_v41 }
 0x3e1   : > { %7389 = vmatprep.subr.bf16.mxu0 %v7926_v61 }
 0x3e3   : > { %7412 = vmatpush3.bf16.msra.mxu1 %v7929_v63 }
 0x3e4   : > { %7390 = vmatpush3.bf16.msra.mxu0 %v7928_v62 }
 0x499   : > { %v6144_v12 = vpop.f32.mrb[0].mxu1 }
 0x49a   : > { %v5980_v11 = vpop.f32.mrb[0].mxu0  ;;  %v7469_v15 = vadd.f32 %v6144_v12, %v4534_v35  ;;  %v6146_v16 = vpop.f32.mrb[1].mxu1 }
 0x49b   : > { %v7467_v14 = vadd.f32 %v5980_v11, %v4526_v6  ;;  %v5982_v3 = vpop.f32.mrb[1].mxu0  ;;  %v7470_v42 = vadd.f32 %v6146_v16, %v4538_v9  ;;  %v6148_v19 = vpop.f32.mrb[2].mxu1 }
 0x49c   : > { %v7468_v17 = vadd.f32 %v5982_v3, %v4530_v8  ;;  %v5984_v13 = vpop.f32.mrb[2].mxu0  ;;  %v6153_v18 = vmax.f32 %v7469_v15, 0.0  ;;  %v6149_v5 = vpop.f32.mrb[3].mxu1 }
 0x49d   : > { %v6151_v1 = vmax.f32 %v7467_v14, 0.0  ;;  %v5985_v22 = vpop.f32.mrb[3].mxu0  ;;  %v6154_v24 = vmax.f32 %v7470_v42, 0.0 }
 0x49e   : > { %v6152_v23 = vmax.f32 %v7468_v17, 0.0  ;;  %v6157_v36 = vpack.c.bf16 %v6153_v18, %v6153_v18 }
 0x49f   : > { %v6158_v39 = vpack.c.bf16 %v6154_v24, %v6154_v24  ;;  %v6155_v45 = vpack.c.bf16 %v6151_v1, %v6151_v1 }
 0x4a0   : > { %v6156_v4 = vpack.c.bf16 %v6152_v23, %v6152_v23 }
 0x4a1   : > { %6494 = vmatprep.mubr.bf16.mxu1 %v6158_v39 }
 0x4a2   : > { %6454 = vmatprep.mubr.bf16.mxu0 %v6156_v4  ;;  %6495 = vmatmul.mubr.bf16.vlgmr.msra.gmra.mrb[4].mxu1 %v6157_v36 }
 0x4a3   : > { %6455 = vmatmul.mubr.bf16.vlgmr.msra.gmra.mrb[4].mxu0 %v6155_v45 }
 0x575   : > { %v7413_v27 = vpop.f32.mrb[4].mxu1 }
 0x576   : > { %v7391_v25 = vpop.f32.mrb[4].mxu0  ;;  %v7414_v29 = vpop.f32.mrb[5].mxu1 }
 0x577   : > { %v7392_v60 = vpop.f32.mrb[5].mxu0  ;;  %v7415_v21 = vadd.f32 %v7414_v29, %v7413_v27  ;;  %v7416_v32 = vpop.f32.mrb[6].mxu1 }
 0x578   : > { %v7393_v30 = vadd.f32 %v7392_v60, %v7391_v25  ;;  %v7394_v31 = vpop.f32.mrb[6].mxu0  ;;  %v7417_v34 = vpop.f32.mrb[7].mxu1 }
 0x579   : > { %v7395_v33 = vpop.f32.mrb[7].mxu0 }
 0x57a   : > { %v6457_v37 = vadd.f32 %v7393_v30, %v7337_v28 }
 0x57c   : > { %v6497_v20 = vadd.f32 %v7415_v21, %v6457_v37 }
 0x57e   : > { %6503 = vst.msk [vmem:[#allocation3] sm:$0x3] %vm6502_vm0, %v6497_v20 }
 0x57f PF: > { %p7499_p7 = scmp.eq.s32.totalorder %s8018_s25, 3  ;;  %s7971_s8 = smov [#allocation3]  }
 0x580   : > { %s6511_s9 = sshll.u32 %s7971_s8, 4  ;;  %s6512_s9 = int_to_ptr.vmem [resolvable:$true] %s6511_s9 }
 0x581   : > { %s7930_s10 = scalar_lea.vmem %s6512_s9, 32  ;;  %p7937_p11 = scmp.lt.s32.totalorder %s6512_s9, %s6512_s9 }
 0x582   : > { %p7931_p8 = scmp.ne.s32.totalorder %s6512_s9, %s7930_s10  ;;  %p7938_p12 = scmp.lt.s32.totalorder %s7930_s10, %s7930_s10 }
 0x584   : > { %p7932_p9 = pnand %p7931_p8, %p7499_p7  ;;  %p7939_p13 = por %p7938_p12, %p7937_p11 }
 0x586   : > { %p7933_p10 = pneg %p7932_p9 }
 0x588   : > { %p7940_p0 = pnand %p7939_p13, %p7933_p10 }
 0x58a   : > { %7943 = shalt.err (!%p7940_p0)
}
 0x58b   : > { %s7944_s13 = scalar_lea.hbm %s9609_s7, 32 }
 0x58c   : > { %p7945_p1 = scmp.ne.s32.totalorder %s9609_s7, %s7944_s13  ;;  %p7950_p4 = scmp.lt.u32.totalorder %s7944_s13, %s9609_s7 }
 0x58e   : > { %p7946_p2 = pnand %p7945_p1, %p7499_p7 }
 0x590   : > { %p7947_p3 = pneg %p7946_p2 }
 0x592   : > { %p7952_p5 = pnand %p7950_p4, %p7947_p3 }
 0x594   : > { %7955 = shalt.err (!%p7952_p5)
}
 0x595   : > { %7496 = dma.vmem_to_hbm [thread:$0]  (%p7499_p7), %s6512_s9, 32, %s9609_s7, [#allocation4]  }
 0x596   : > { %7961 = dma.done.wait (%p7499_p7), [#allocation4], 32  }
 0x597   : > { %7963 = vsyncadd (%p7499_p7), [#allocation4], 4294967264 }
 0x598 PF: > { %s18_s24 = sadd.s32 1, %s7966_s24  }
 0x599   : > { %p15_p6 = scmp.ge.s32.totalorder %s18_s24, 6  }
 0x59b   :  { %17 = sbr.rel (!%p15_p6) target bundleno = 1 (0x1), region = 86 }
 0x5a2   :  { %6524 = vsyncpa [#allocation4], 1 }
 0x5a3   :  { %6526 = vsyncpa [#allocation4 + $0x1], 1 }

</bundles_post_ra>
